<compile_context>
chip_gen: v7x
topology: tpu7x:2x2x1
jax: 0.10.0
libtpu: 0.0.40
codegen_flags: <defaults>
</compile_context>

<pallas_src>
import functools

import jax
import jax.numpy as jnp
from jax.experimental import pallas as pl
from jax.experimental.pallas import tpu as pltpu

C1 = 0.01 ** 2
C2 = 0.03 ** 2

_LANE = 128
_VMEM_BUDGET = 24 * 1024 * 1024        # target per-step working set
_VMEM_LIMIT = 32 * 1024 * 1024         # scoped-VMEM limit (safe on v5e/v6e/v7x)


def _ssim_kernel(x_ref, y_ref, o_ref, *, H, W):
    # x_ref / y_ref / o_ref: (H, W, TB); lanes = TB flattened N*C images.
    x = x_ref[...].astype(jnp.float32)
    y = y_ref[...].astype(jnp.float32)

    def reflect_pad(z):
        # torch.nn.ReflectionPad2d(1): row/col 0 mirrors row/col 1, and
        # row/col -1 mirrors row/col -2 (edge pixel excluded).
        z = jnp.concatenate([z[1:2], z, z[H - 2:H - 1]], axis=0)        # (H+2, W, TB)
        z = jnp.concatenate([z[:, 1:2], z, z[:, W - 2:W - 1]], axis=1)  # (H+2, W+2, TB)
        return z

    xp = reflect_pad(x)
    yp = reflect_pad(y)

    inv9 = jnp.float32(1.0 / 9.0)

    def pool9(zp):
        # Separable 3x3 mean (stride 1, valid on the padded tile):
        # 3-tap sum along W, then 3-tap sum along H.
        c = zp[:, 0:W] + zp[:, 1:W + 1] + zp[:, 2:W + 2]                # (H+2, W, TB)
        return (c[0:H] + c[1:H + 1] + c[2:H + 2]) * inv9                # (H, W, TB)

    mu_x = pool9(xp)
    mu_y = pool9(yp)
    sigma_x = pool9(xp * xp) - mu_x * mu_x
    sigma_y = pool9(yp * yp) - mu_y * mu_y
    sigma_xy = pool9(xp * yp) - mu_x * mu_y
    # xp / yp are dead past this point -> few live block-sized f32 temporaries.

    ssim_n = (2.0 * mu_x * mu_y + C1) * (2.0 * sigma_xy + C2)
    ssim_d = (mu_x * mu_x + mu_y * mu_y + C1) * (sigma_x + sigma_y + C2)

    # EUP approximate reciprocal + one Newton-Raphson refinement.
    r = pl.reciprocal(ssim_d, approx=True)
    r = r * (2.0 - ssim_d * r)

    loss = 0.5 * (1.0 - ssim_n * r)
    o_ref[...] = jnp.clip(loss, 0.0, 1.0).astype(o_ref.dtype)


def _choose_tb(H, W, B, in_itemsize, out_itemsize):
    """Lane-block size: a multiple of 128 sized to a ~24 MiB VMEM working set."""
    bp_min = pl.cdiv(B, _LANE) * _LANE
    per_lane = (
        4 * H * W * in_itemsize          # 2 inputs x 2 pipeline buffers
        + 2 * H * W * out_itemsize       # output x 2 pipeline buffers
        + 12 * (H + 2) * (W + 2) * 4     # live f32 intermediates inside the kernel
    )
    tb = (_VMEM_BUDGET // per_lane) // _LANE * _LANE
    tb = max(_LANE, min(tb, 1024, bp_min))
    return int(tb)


def ssim_loss(x, y):
    """x, y: (N, C, H, W) arrays -> (N, C, H, W) per-pixel SSIM loss map."""
    assert x.shape == y.shape
    N, Cc, H, W = x.shape
    assert H >= 2 and W >= 2, "ReflectionPad2d(1) needs H, W >= 2"
    B = N * Cc

    # Lane-dense layout: (H, W, B); B zero-padded to a multiple of TB.
    xb = jnp.transpose(x.reshape(B, H, W), (1, 2, 0))
    yb = jnp.transpose(y.reshape(B, H, W), (1, 2, 0))

    tb = _choose_tb(H, W, B, x.dtype.itemsize, x.dtype.itemsize)
    Bp = pl.cdiv(B, tb) * tb
    if Bp != B:
        pad = ((0, 0), (0, 0), (0, Bp - B))
        xb = jnp.pad(xb, pad)
        yb = jnp.pad(yb, pad)

    kernel = functools.partial(_ssim_kernel, H=H, W=W)

    # TODO(synk): for very large H*W (e.g. H >= 512) also block H with a halo'd
    # index_map so per-step VMEM stays bounded and the grid has >= 2 steps.
    out = pl.pallas_call(
        kernel,
        out_shape=jax.ShapeDtypeStruct((H, W, Bp), x.dtype),
        grid_spec=pltpu.PrefetchScalarGridSpec(
            num_scalar_prefetch=0,
            grid=(Bp // tb,),
            in_specs=[
                pl.BlockSpec((H, W, tb), lambda b: (0, 0, b)),
                pl.BlockSpec((H, W, tb), lambda b: (0, 0, b)),
            ],
            out_specs=pl.BlockSpec((H, W, tb), lambda b: (0, 0, b)),
        ),
        compiler_params=pltpu.CompilerParams(
            dimension_semantics=("parallel",),
            vmem_limit_bytes=_VMEM_LIMIT,
        ),
    )(xb, yb)

    out = out[:, :, :B]                                     # (H, W, B)
    return jnp.transpose(out, (2, 0, 1)).reshape(N, Cc, H, W)


def _ssim_ref(x, y):
    """Pure-JAX reference (mirrors the PyTorch module)."""
    xp = jnp.pad(x, ((0, 0), (0, 0), (1, 1), (1, 1)), mode="reflect")
    yp = jnp.pad(y, ((0, 0), (0, 0), (1, 1), (1, 1)), mode="reflect")

    def avg3(z):
        H, W = x.shape[2], x.shape[3]
        s = jnp.zeros_like(x)
        for di in range(3):
            for dj in range(3):
                s = s + z[:, :, di:di + H, dj:dj + W]
        return s / 9.0

    mu_x = avg3(xp)
    mu_y = avg3(yp)
    sigma_x = avg3(xp ** 2) - mu_x ** 2
    sigma_y = avg3(yp ** 2) - mu_y ** 2
    sigma_xy = avg3(xp * yp) - mu_x * mu_y
    n = (2 * mu_x * mu_y + C1) * (2 * sigma_xy + C2)
    d = (mu_x ** 2 + mu_y ** 2 + C1) * (sigma_x + sigma_y + C2)
    return jnp.clip((1 - n / d) / 2, 0.0, 1.0)


if __name__ == "__main__":
    key = jax.random.PRNGKey(0)
    kx, ky = jax.random.split(key)
    N, C, H, W = 2, 4, 16, 16
    x = jax.random.uniform(kx, (N, C, H, W), dtype=jnp.float32)
    y = jax.random.uniform(ky, (N, C, H, W), dtype=jnp.float32)

    out = jax.block_until_ready(jax.jit(ssim_loss)(x, y))
    ref = _ssim_ref(x, y)

    assert out.shape == (N, C, H, W)
    assert jnp.max(jnp.abs(out - ref)) < 5e-5
    print("KERNEL_OK")
</pallas_src>

<mosaic_0001>
module attributes {stable_mosaic.version = 11 : i64} {
  func.func @_ssim_kernel(%arg0: i32, %arg1: memref<16x16x128xf32, #tpu.memory_space<vmem>>, %arg2: memref<16x16x128xf32, #tpu.memory_space<vmem>>, %arg3: memref<16x16x128xf32, #tpu.memory_space<vmem>>) attributes {dimension_semantics = [#tpu.dimension_semantics<parallel>], iteration_bounds = array<i64: 1>, scalar_prefetch = 0 : i64, scratch_operands = 0 : i64, tpu.core_type = #tpu.core_type<tc>, window_params = [{transform_indices = @transform_0, window_bounds = array<i64: 16, 16, 128>}, {transform_indices = @transform_1, window_bounds = array<i64: 16, 16, 128>}, {transform_indices = @transform_2, window_bounds = array<i64: 16, 16, 128>}]} {
    %c0 = arith.constant 0 : index
    %c0_0 = arith.constant 0 : index
    %c0_1 = arith.constant 0 : index
    %0 = vector.load %arg1[%c0, %c0_0, %c0_1] : memref<16x16x128xf32, #tpu.memory_space<vmem>>, vector<16x16x128xf32>
    %c0_2 = arith.constant 0 : index
    %c0_3 = arith.constant 0 : index
    %c0_4 = arith.constant 0 : index
    %1 = vector.load %arg2[%c0_2, %c0_3, %c0_4] : memref<16x16x128xf32, #tpu.memory_space<vmem>>, vector<16x16x128xf32>
    %2 = vector.extract_strided_slice %0 {offsets = [1, 0, 0], sizes = [1, 16, 128], strides = [1, 1, 1]} : vector<16x16x128xf32> to vector<1x16x128xf32>
    %3 = vector.extract_strided_slice %0 {offsets = [14, 0, 0], sizes = [1, 16, 128], strides = [1, 1, 1]} : vector<16x16x128xf32> to vector<1x16x128xf32>
    %4 = tpu.concatenate %2, %0, %3 in 0 : vector<1x16x128xf32>, vector<16x16x128xf32>, vector<1x16x128xf32> -> vector<18x16x128xf32>
    %5 = vector.extract_strided_slice %4 {offsets = [0, 1, 0], sizes = [18, 1, 128], strides = [1, 1, 1]} : vector<18x16x128xf32> to vector<18x1x128xf32>
    %6 = vector.extract_strided_slice %4 {offsets = [0, 14, 0], sizes = [18, 1, 128], strides = [1, 1, 1]} : vector<18x16x128xf32> to vector<18x1x128xf32>
    %7 = tpu.concatenate %5, %4, %6 in 1 : vector<18x1x128xf32>, vector<18x16x128xf32>, vector<18x1x128xf32> -> vector<18x18x128xf32>
    %8 = vector.extract_strided_slice %1 {offsets = [1, 0, 0], sizes = [1, 16, 128], strides = [1, 1, 1]} : vector<16x16x128xf32> to vector<1x16x128xf32>
    %9 = vector.extract_strided_slice %1 {offsets = [14, 0, 0], sizes = [1, 16, 128], strides = [1, 1, 1]} : vector<16x16x128xf32> to vector<1x16x128xf32>
    %10 = tpu.concatenate %8, %1, %9 in 0 : vector<1x16x128xf32>, vector<16x16x128xf32>, vector<1x16x128xf32> -> vector<18x16x128xf32>
    %11 = vector.extract_strided_slice %10 {offsets = [0, 1, 0], sizes = [18, 1, 128], strides = [1, 1, 1]} : vector<18x16x128xf32> to vector<18x1x128xf32>
    %12 = vector.extract_strided_slice %10 {offsets = [0, 14, 0], sizes = [18, 1, 128], strides = [1, 1, 1]} : vector<18x16x128xf32> to vector<18x1x128xf32>
    %13 = tpu.concatenate %11, %10, %12 in 1 : vector<18x1x128xf32>, vector<18x16x128xf32>, vector<18x1x128xf32> -> vector<18x18x128xf32>
    %14 = vector.extract_strided_slice %7 {offsets = [0, 0, 0], sizes = [18, 16, 128], strides = [1, 1, 1]} : vector<18x18x128xf32> to vector<18x16x128xf32>
    %15 = vector.extract_strided_slice %7 {offsets = [0, 1, 0], sizes = [18, 16, 128], strides = [1, 1, 1]} : vector<18x18x128xf32> to vector<18x16x128xf32>
    %16 = arith.addf %14, %15 : vector<18x16x128xf32>
    %17 = vector.extract_strided_slice %7 {offsets = [0, 2, 0], sizes = [18, 16, 128], strides = [1, 1, 1]} : vector<18x18x128xf32> to vector<18x16x128xf32>
    %18 = arith.addf %16, %17 : vector<18x16x128xf32>
    %19 = vector.extract_strided_slice %18 {offsets = [0, 0, 0], sizes = [16, 16, 128], strides = [1, 1, 1]} : vector<18x16x128xf32> to vector<16x16x128xf32>
    %20 = vector.extract_strided_slice %18 {offsets = [1, 0, 0], sizes = [16, 16, 128], strides = [1, 1, 1]} : vector<18x16x128xf32> to vector<16x16x128xf32>
    %21 = arith.addf %19, %20 : vector<16x16x128xf32>
    %22 = vector.extract_strided_slice %18 {offsets = [2, 0, 0], sizes = [16, 16, 128], strides = [1, 1, 1]} : vector<18x16x128xf32> to vector<16x16x128xf32>
    %23 = arith.addf %21, %22 : vector<16x16x128xf32>
    %cst = arith.constant 0.111111112 : f32
    %24 = vector.broadcast %cst : f32 to vector<16x16x128xf32>
    %25 = arith.mulf %23, %24 : vector<16x16x128xf32>
    %26 = vector.extract_strided_slice %13 {offsets = [0, 0, 0], sizes = [18, 16, 128], strides = [1, 1, 1]} : vector<18x18x128xf32> to vector<18x16x128xf32>
    %27 = vector.extract_strided_slice %13 {offsets = [0, 1, 0], sizes = [18, 16, 128], strides = [1, 1, 1]} : vector<18x18x128xf32> to vector<18x16x128xf32>
    %28 = arith.addf %26, %27 : vector<18x16x128xf32>
    %29 = vector.extract_strided_slice %13 {offsets = [0, 2, 0], sizes = [18, 16, 128], strides = [1, 1, 1]} : vector<18x18x128xf32> to vector<18x16x128xf32>
    %30 = arith.addf %28, %29 : vector<18x16x128xf32>
    %31 = vector.extract_strided_slice %30 {offsets = [0, 0, 0], sizes = [16, 16, 128], strides = [1, 1, 1]} : vector<18x16x128xf32> to vector<16x16x128xf32>
    %32 = vector.extract_strided_slice %30 {offsets = [1, 0, 0], sizes = [16, 16, 128], strides = [1, 1, 1]} : vector<18x16x128xf32> to vector<16x16x128xf32>
    %33 = arith.addf %31, %32 : vector<16x16x128xf32>
    %34 = vector.extract_strided_slice %30 {offsets = [2, 0, 0], sizes = [16, 16, 128], strides = [1, 1, 1]} : vector<18x16x128xf32> to vector<16x16x128xf32>
    %35 = arith.addf %33, %34 : vector<16x16x128xf32>
    %cst_5 = arith.constant 0.111111112 : f32
    %36 = vector.broadcast %cst_5 : f32 to vector<16x16x128xf32>
    %37 = arith.mulf %35, %36 : vector<16x16x128xf32>
    %38 = arith.mulf %7, %7 : vector<18x18x128xf32>
    %39 = vector.extract_strided_slice %38 {offsets = [0, 0, 0], sizes = [18, 16, 128], strides = [1, 1, 1]} : vector<18x18x128xf32> to vector<18x16x128xf32>
    %40 = vector.extract_strided_slice %38 {offsets = [0, 1, 0], sizes = [18, 16, 128], strides = [1, 1, 1]} : vector<18x18x128xf32> to vector<18x16x128xf32>
    %41 = arith.addf %39, %40 : vector<18x16x128xf32>
    %42 = vector.extract_strided_slice %38 {offsets = [0, 2, 0], sizes = [18, 16, 128], strides = [1, 1, 1]} : vector<18x18x128xf32> to vector<18x16x128xf32>
    %43 = arith.addf %41, %42 : vector<18x16x128xf32>
    %44 = vector.extract_strided_slice %43 {offsets = [0, 0, 0], sizes = [16, 16, 128], strides = [1, 1, 1]} : vector<18x16x128xf32> to vector<16x16x128xf32>
    %45 = vector.extract_strided_slice %43 {offsets = [1, 0, 0], sizes = [16, 16, 128], strides = [1, 1, 1]} : vector<18x16x128xf32> to vector<16x16x128xf32>
    %46 = arith.addf %44, %45 : vector<16x16x128xf32>
    %47 = vector.extract_strided_slice %43 {offsets = [2, 0, 0], sizes = [16, 16, 128], strides = [1, 1, 1]} : vector<18x16x128xf32> to vector<16x16x128xf32>
    %48 = arith.addf %46, %47 : vector<16x16x128xf32>
    %cst_6 = arith.constant 0.111111112 : f32
    %49 = vector.broadcast %cst_6 : f32 to vector<16x16x128xf32>
    %50 = arith.mulf %48, %49 : vector<16x16x128xf32>
    %51 = arith.mulf %25, %25 : vector<16x16x128xf32>
    %52 = arith.subf %50, %51 : vector<16x16x128xf32>
    %53 = arith.mulf %13, %13 : vector<18x18x128xf32>
    %54 = vector.extract_strided_slice %53 {offsets = [0, 0, 0], sizes = [18, 16, 128], strides = [1, 1, 1]} : vector<18x18x128xf32> to vector<18x16x128xf32>
    %55 = vector.extract_strided_slice %53 {offsets = [0, 1, 0], sizes = [18, 16, 128], strides = [1, 1, 1]} : vector<18x18x128xf32> to vector<18x16x128xf32>
    %56 = arith.addf %54, %55 : vector<18x16x128xf32>
    %57 = vector.extract_strided_slice %53 {offsets = [0, 2, 0], sizes = [18, 16, 128], strides = [1, 1, 1]} : vector<18x18x128xf32> to vector<18x16x128xf32>
    %58 = arith.addf %56, %57 : vector<18x16x128xf32>
    %59 = vector.extract_strided_slice %58 {offsets = [0, 0, 0], sizes = [16, 16, 128], strides = [1, 1, 1]} : vector<18x16x128xf32> to vector<16x16x128xf32>
    %60 = vector.extract_strided_slice %58 {offsets = [1, 0, 0], sizes = [16, 16, 128], strides = [1, 1, 1]} : vector<18x16x128xf32> to vector<16x16x128xf32>
    %61 = arith.addf %59, %60 : vector<16x16x128xf32>
    %62 = vector.extract_strided_slice %58 {offsets = [2, 0, 0], sizes = [16, 16, 128], strides = [1, 1, 1]} : vector<18x16x128xf32> to vector<16x16x128xf32>
    %63 = arith.addf %61, %62 : vector<16x16x128xf32>
    %cst_7 = arith.constant 0.111111112 : f32
    %64 = vector.broadcast %cst_7 : f32 to vector<16x16x128xf32>
    %65 = arith.mulf %63, %64 : vector<16x16x128xf32>
    %66 = arith.mulf %37, %37 : vector<16x16x128xf32>
    %67 = arith.subf %65, %66 : vector<16x16x128xf32>
    %68 = arith.mulf %7, %13 : vector<18x18x128xf32>
    %69 = vector.extract_strided_slice %68 {offsets = [0, 0, 0], sizes = [18, 16, 128], strides = [1, 1, 1]} : vector<18x18x128xf32> to vector<18x16x128xf32>
    %70 = vector.extract_strided_slice %68 {offsets = [0, 1, 0], sizes = [18, 16, 128], strides = [1, 1, 1]} : vector<18x18x128xf32> to vector<18x16x128xf32>
    %71 = arith.addf %69, %70 : vector<18x16x128xf32>
    %72 = vector.extract_strided_slice %68 {offsets = [0, 2, 0], sizes = [18, 16, 128], strides = [1, 1, 1]} : vector<18x18x128xf32> to vector<18x16x128xf32>
    %73 = arith.addf %71, %72 : vector<18x16x128xf32>
    %74 = vector.extract_strided_slice %73 {offsets = [0, 0, 0], sizes = [16, 16, 128], strides = [1, 1, 1]} : vector<18x16x128xf32> to vector<16x16x128xf32>
    %75 = vector.extract_strided_slice %73 {offsets = [1, 0, 0], sizes = [16, 16, 128], strides = [1, 1, 1]} : vector<18x16x128xf32> to vector<16x16x128xf32>
    %76 = arith.addf %74, %75 : vector<16x16x128xf32>
    %77 = vector.extract_strided_slice %73 {offsets = [2, 0, 0], sizes = [16, 16, 128], strides = [1, 1, 1]} : vector<18x16x128xf32> to vector<16x16x128xf32>
    %78 = arith.addf %76, %77 : vector<16x16x128xf32>
    %cst_8 = arith.constant 0.111111112 : f32
    %79 = vector.broadcast %cst_8 : f32 to vector<16x16x128xf32>
    %80 = arith.mulf %78, %79 : vector<16x16x128xf32>
    %81 = arith.mulf %25, %37 : vector<16x16x128xf32>
    %82 = arith.subf %80, %81 : vector<16x16x128xf32>
    %cst_9 = arith.constant 2.000000e+00 : f32
    %83 = vector.broadcast %cst_9 : f32 to vector<16x16x128xf32>
    %84 = arith.mulf %83, %25 : vector<16x16x128xf32>
    %85 = arith.mulf %84, %37 : vector<16x16x128xf32>
    %cst_10 = arith.constant 9.99999974E-5 : f32
    %86 = vector.broadcast %cst_10 : f32 to vector<16x16x128xf32>
    %87 = arith.addf %85, %86 : vector<16x16x128xf32>
    %cst_11 = arith.constant 2.000000e+00 : f32
    %88 = vector.broadcast %cst_11 : f32 to vector<16x16x128xf32>
    %89 = arith.mulf %88, %82 : vector<16x16x128xf32>
    %cst_12 = arith.constant 8.99999984E-4 : f32
    %90 = vector.broadcast %cst_12 : f32 to vector<16x16x128xf32>
    %91 = arith.addf %89, %90 : vector<16x16x128xf32>
    %92 = arith.mulf %87, %91 : vector<16x16x128xf32>
    %93 = arith.mulf %25, %25 : vector<16x16x128xf32>
    %94 = arith.mulf %37, %37 : vector<16x16x128xf32>
    %95 = arith.addf %93, %94 : vector<16x16x128xf32>
    %cst_13 = arith.constant 9.99999974E-5 : f32
    %96 = vector.broadcast %cst_13 : f32 to vector<16x16x128xf32>
    %97 = arith.addf %95, %96 : vector<16x16x128xf32>
    %98 = arith.addf %52, %67 : vector<16x16x128xf32>
    %cst_14 = arith.constant 8.99999984E-4 : f32
    %99 = vector.broadcast %cst_14 : f32 to vector<16x16x128xf32>
    %100 = arith.addf %98, %99 : vector<16x16x128xf32>
    %101 = arith.mulf %97, %100 : vector<16x16x128xf32>
    %102 = tpu.reciprocal %101 {approx = true} : vector<16x16x128xf32> -> vector<16x16x128xf32>
    %103 = arith.mulf %101, %102 : vector<16x16x128xf32>
    %cst_15 = arith.constant 2.000000e+00 : f32
    %104 = vector.broadcast %cst_15 : f32 to vector<16x16x128xf32>
    %105 = arith.subf %104, %103 : vector<16x16x128xf32>
    %106 = arith.mulf %102, %105 : vector<16x16x128xf32>
    %107 = arith.mulf %92, %106 : vector<16x16x128xf32>
    %cst_16 = arith.constant 1.000000e+00 : f32
    %108 = vector.broadcast %cst_16 : f32 to vector<16x16x128xf32>
    %109 = arith.subf %108, %107 : vector<16x16x128xf32>
    %cst_17 = arith.constant 5.000000e-01 : f32
    %110 = vector.broadcast %cst_17 : f32 to vector<16x16x128xf32>
    %111 = arith.mulf %110, %109 : vector<16x16x128xf32>
    %cst_18 = arith.constant 0.000000e+00 : f32
    %cst_19 = arith.constant 1.000000e+00 : f32
    %112 = vector.broadcast %cst_18 : f32 to vector<16x16x128xf32>
    %113 = arith.maximumf %112, %111 : vector<16x16x128xf32>
    %114 = vector.broadcast %cst_19 : f32 to vector<16x16x128xf32>
    %115 = arith.minimumf %114, %113 : vector<16x16x128xf32>
    %c0_20 = arith.constant 0 : index
    %c0_21 = arith.constant 0 : index
    %c0_22 = arith.constant 0 : index
    %116 = vector.load %arg3[%c0_20, %c0_21, %c0_22] : memref<16x16x128xf32, #tpu.memory_space<vmem>>, vector<16x16x128xf32>
    tpu.vector_store %arg3[%c0_20, %c0_21, %c0_22], %115 {strides = array<i32>} : memref<16x16x128xf32, #tpu.memory_space<vmem>>, vector<16x16x128xf32>,
    return
  }
  func.func @transform_0(%arg0: i32) -> (i32, i32, i32) {
    %c0_i32 = arith.constant 0 : i32
    %c0_i32_0 = arith.constant 0 : i32
    %c0_i32_1 = arith.constant 0 : i32
    return %c0_i32, %c0_i32_0, %arg0 : i32, i32, i32
  }
  func.func @transform_1(%arg0: i32) -> (i32, i32, i32) {
    %c0_i32 = arith.constant 0 : i32
    %c0_i32_0 = arith.constant 0 : i32
    %c0_i32_1 = arith.constant 0 : i32
    return %c0_i32, %c0_i32_0, %arg0 : i32, i32, i32
  }
  func.func @transform_2(%arg0: i32) -> (i32, i32, i32) {
    %c0_i32 = arith.constant 0 : i32
    %c0_i32_0 = arith.constant 0 : i32
    %c0_i32_1 = arith.constant 0 : i32
    return %c0_i32, %c0_i32_0, %arg0 : i32, i32, i32
  }
}

</mosaic_0001>

<bundles_post_ra>
// kernel: ssim_loss.1
= control target key start
LH: loop header
LB: loop body
LE: loop exit
PB: predicated region body
PF: predicated region fallthrough
CT: control target
= control target key end

     0   :  { %vm139_vm0 = vcmask 1040384   ;;  %vm556_vm1 = vcmask 1046528   ;;  %vm701_vm2 = vcmask 1045504   ;;  %s9009_s0 = inlined_call_operand.vmem [shape: f32[16,16,128], index: 0, kind: input, shape index: {}]   ;;  %s9010_s1 = inlined_call_operand.vmem [shape: f32[16,16,128], index: 1, kind: input, shape index: {}]   ;;  %s9011_s2 = inlined_call_operand.vmem [shape: f32[16,16,128], index: 2, kind: output, shape index: {}]  }
   0x1   :  { %v13_v0 = vld [vmem:[%s9009_s0 + $0x10] sm:$0xff]  ;;  %v11_v1 = vld [vmem:[%s9009_s0] sm:$0xff]  ;;  %v3744_v2 = vld [vmem:[%s9009_s0 + $0x18] sm:$0xff] }
   0x2   :  { %v3749_v3 = vld [vmem:[%s9009_s0 + $0x8] sm:$0xff]  ;;  %v3754_v4 = vld [vmem:[%s9009_s0 + $0x20] sm:$0xff]  ;;  %v3764_v6 = vld [vmem:[%s9009_s0 + $0x30] sm:$0xff]  ;;  %v91_v8 = vrot.slane %v13_v0, 1  ;;  %v140_v9 = vrot.slane %v13_v0, 7  ;;  %v9016_v12 = vrot.slane %v3744_v2, 7 }
   0x3   :  { %v3759_v5 = vld [vmem:[%s9009_s0 + $0x28] sm:$0xff]  ;;  %v3769_v7 = vld [vmem:[%s9009_s0 + $0x40] sm:$0xff]  ;;  %v3774_v10 = vld [vmem:[%s9009_s0 + $0x38] sm:$0xff]  ;;  %v143_v15 = vrot.slane %v11_v1, 7  ;;  %v9015_v16 = vrot.slane %v3749_v3, 7  ;;  %v146_v17 = vrot.slane %v3754_v4, 7 }
   0x4   :  { %v3779_v11 = vld [vmem:[%s9009_s0 + $0x50] sm:$0xff]  ;;  %v3785_v13 = vld [vmem:[%s9009_s0 + $0x48] sm:$0xff]  ;;  %v3790_v14 = vld [vmem:[%s9009_s0 + $0x60] sm:$0xff]  ;;  %v9014_v18 = vrot.slane %v3759_v5, 7  ;;  %v92_v21 = vrot.slane %v11_v1, 1  ;;  %v93_v22 = vrot.slane %v3754_v4, 1  ;;  %v3827_v31 = vsel %vm139_vm0, %v91_v8, %v140_v9 }
   0x5   :  { %v3798_v19 = vld [vmem:[%s9009_s0 + $0x70] sm:$0xff]  ;;  %v3803_v20 = vld [vmem:[%s9009_s0 + $0x80] sm:$0xff]  ;;  %v9018_v29 = vrot.slane %v3764_v6, 7  ;;  %v9013_v30 = vrot.slane %v3774_v10, 7  ;;  %9681 = vst [vmem:[#allocation2_spill] sm:$0xff] %v3827_v31  ;;  %v3832_v32 = vld [vmem:[%s9009_s0 + $0x58] sm:$0xff]  ;;  %v3843_v35 = vsel %vm139_vm0, %v140_v9, %v9016_v12  ;;  %v3862_v42 = vsel %vm139_vm0, %v143_v15, %v9015_v16 }
   0x6   :  { %v3811_v25 = vld [vmem:[%s9009_s0 + $0x90] sm:$0xff]  ;;  %v3816_v26 = vld [vmem:[%s9009_s0 + $0xa0] sm:$0xff]  ;;  %9682 = vst [vmem:[#allocation3_spill] sm:$0xff] %v3843_v35  ;;  %v9017_v36 = vrot.slane %v3769_v7, 7  ;;  %v9012_v37 = vrot.slane %v3785_v13, 7  ;;  %v3850_v38 = vld [vmem:[%s9009_s0 + $0x68] sm:$0xff]  ;;  %v3869_v43 = vsel %vm139_vm0, %v146_v17, %v9014_v18  ;;  %v3885_v49 = vsel %vm139_vm0, %v92_v21, %v143_v15 }
   0x7   :  { %v3821_v27 = vld [vmem:[%s9009_s0 + $0xb0] sm:$0xff]  ;;  %v3837_v33 = vld [vmem:[%s9009_s0 + $0xc0] sm:$0xff]  ;;  %9683 = vst [vmem:[#allocation4_spill] sm:$0xff] %v3862_v42  ;;  %9684 = vst [vmem:[#allocation5_spill] sm:$0xff] %v3869_v43  ;;  %v3903_v53 = vsel %vm139_vm0, %v9018_v29, %v9013_v30  ;;  %v9027_v54 = vrot.slane %v3779_v11, 7  ;;  %v9019_v55 = vrot.slane %v3832_v32, 7 }
   0x8   :  { %v3855_v39 = vld [vmem:[%s9009_s0 + $0xd0] sm:$0xff]  ;;  %v3874_v44 = vld [vmem:[%s9009_s0 + $0x78] sm:$0xff]  ;;  %v3879_v45 = vld [vmem:[%s9009_s0 + $0x88] sm:$0xff]  ;;  %9685 = vst [vmem:[#allocation6_spill] sm:$0xff] %v3885_v49  ;;  %v3928_v60 = vsel %vm139_vm0, %v9017_v36, %v9012_v37  ;;  %v158_v61 = vrot.slane %v3790_v14, 7  ;;  %v9020_v62 = vrot.slane %v3850_v38, 7 }
   0x9   :  { %v3890_v50 = vld [vmem:[%s9009_s0 + $0x98] sm:$0xff]  ;;  %v3895_v51 = vld [vmem:[%s9009_s0 + $0xa8] sm:$0xff]  ;;  %9686 = vst [vmem:[#allocation7_spill] sm:$0xff] %v3903_v53  ;;  %9687 = vst [vmem:[#allocation8_spill] sm:$0xff] %v3928_v60  ;;  %v161_v1 = vrot.slane %v3798_v19, 7  ;;  %v9021_v8 = vrot.slane %v3874_v44, 7  ;;  %v3972_v24 = vsel %vm139_vm0, %v9027_v54, %v9019_v55  ;;  %v3990_v55 = vsel %vm139_vm0, %v93_v22, %v146_v17 }
   0xa   :  { %v3910_v56 = vld [vmem:[%s9009_s0 + $0xb8] sm:$0xff]  ;;  %v3915_v57 = vld [vmem:[%s9009_s0 + $0xc8] sm:$0xff]  ;;  %v3935_v63 = vld [vmem:[%s9009_s0 + $0xe0] sm:$0xff]  ;;  %v164_v9 = vrot.slane %v3803_v20, 7  ;;  %v9024_v15 = vrot.slane %v3879_v45, 7  ;;  %v167_v30 = vrot.slane %v3811_v25, 7  ;;  %v3978_v41 = vsel %vm139_vm0, %v158_v61, %v9020_v62 }
   0xb   :  { %v3920_v58 = vld [vmem:[%s9009_s0 + $0xd8] sm:$0xff]  ;;  %v3940_v0 = vld [vmem:[%s9009_s0 + $0xe8] sm:$0xff]  ;;  %v41_v21 = vld [vmem:[%s9009_s0 + $0xf0] sm:$0xff]  ;;  %v9022_v18 = vrot.slane %v3890_v50, 7  ;;  %v170_v16 = vrot.slane %v3816_v26, 7  ;;  %v9023_v12 = vrot.slane %v3895_v51, 7 }
   0xc   :  { %v3952_v37 = vld [vmem:[%s9009_s0 + $0xf8] sm:$0xff]  ;;  %v173_v59 = vrot.slane %v3821_v27, 7  ;;  %v9025_v52 = vrot.slane %v3910_v56, 7  ;;  %v176_v48 = vrot.slane %v3837_v33, 7  ;;  %v9026_v47 = vrot.slane %v3915_v57, 7  ;;  %9688 = vst [vmem:[#allocation9_spill] sm:$0xff] %v3972_v24 }
   0xd   :  { %v179_v46 = vrot.slane %v3855_v39, 7  ;;  %v182_v40 = vrot.slane %v3935_v63, 7  ;;  %v9030_v34 = vrot.slane %v3940_v0, 7  ;;  %v105_v28 = vrot.slane %v3935_v63, 1  ;;  %9689 = vst [vmem:[#allocation10_spill] sm:$0xff] %v3978_v41  ;;  %9691 = vst [vmem:[#allocation12_spill] sm:$0xff] %v3990_v55 }
   0xe   :  { %v185_v36 = vrot.slane %v41_v21, 7  ;;  %v9034_v23 = vrot.slane %v3952_v37, 7  ;;  %v106_v29 = vrot.slane %v41_v21, 1  ;;  %v3983_v63 = vsel %vm139_vm0, %v161_v1, %v9021_v8 }
   0xf   :  { %9690 = vst [vmem:[#allocation11_spill] sm:$0xff] %v3983_v63  ;;  %v3995_v21 = vsel %vm139_vm0, %v164_v9, %v9024_v15  ;;  %v4000_v62 = vsel %vm139_vm0, %v167_v30, %v9022_v18  ;;  %v4005_v8 = vsel %vm139_vm0, %v170_v16, %v9023_v12  ;;  %v4010_v4 = vsel %vm139_vm0, %v173_v59, %v9025_v52 }
  0x10   :  { %9692 = vst [vmem:[#allocation13_spill] sm:$0xff] %v3995_v21  ;;  %9693 = vst [vmem:[#allocation14_spill] sm:$0xff] %v4000_v62  ;;  %v4015_v17 = vsel %vm139_vm0, %v176_v48, %v9026_v47  ;;  %v9697_v22 = vrot.slane %v3920_v58, 7  ;;  %v4025_v12 = vsel %vm139_vm0, %v182_v40, %v9030_v34  ;;  %v236_v15 = vrot.slane %v3744_v2, 5 }
  0x11   :  { %9694 = vst [vmem:[#allocation15_spill] sm:$0xff] %v4005_v8  ;;  %9695 = vst [vmem:[#allocation16_spill] sm:$0xff] %v4010_v4  ;;  %v4031_v52 = vsel %vm139_vm0, %v185_v36, %v9034_v23  ;;  %v237_v47 = vrot.slane %v3749_v3, 5  ;;  %v238_v54 = vrot.slane %v3759_v5, 5  ;;  %v242_v34 = vrot.slane %v3850_v38, 5 }
  0x12   :  { %9696 = vst [vmem:[#allocation17_spill] sm:$0xff] %v4015_v17  ;;  %v4020_v18 = vsel %vm139_vm0, %v179_v46, %v9697_v22  ;;  %9699 = vst [vmem:[#allocation19_spill] sm:$0xff] %v4025_v12  ;;  %v239_v17 = vrot.slane %v3774_v10, 5  ;;  %v240_v22 = vrot.slane %v3785_v13, 5  ;;  %v243_v12 = vrot.slane %v3874_v44, 5 }
  0x13   :  { %9698 = vst [vmem:[#allocation18_spill] sm:$0xff] %v4020_v18  ;;  %9700 = vst [vmem:[#allocation20_spill] sm:$0xff] %v4031_v52  ;;  %v241_v18 = vrot.slane %v3832_v32, 5  ;;  %v244_v4 = vrot.slane %v3879_v45, 5  ;;  %v245_v8 = vrot.slane %v3890_v50, 5  ;;  %v246_v23 = vrot.slane %v3895_v51, 5 }
  0x14   :  { %v9701_v52 = vrot.slane %v3764_v6, 7  ;;  %v9702_v62 = vrot.slane %v3764_v6, 1  ;;  %v247_v63 = vrot.slane %v3910_v56, 5  ;;  %v248_v41 = vrot.slane %v3915_v57, 5 }
  0x15   :  { %v249_v24 = vrot.slane %v3920_v58, 5  ;;  %v250_v60 = vrot.slane %v3940_v0, 5  ;;  %v251_v53 = vrot.slane %v3952_v37, 5  ;;  %v9704_v43 = vrot.slane %v3769_v7, 7 }
  0x16   :  { %v4048_v21 = vsel %vm139_vm0, %v9702_v62, %v9701_v52  ;;  %v9705_v55 = vrot.slane %v3769_v7, 1  ;;  %v9707_v6 = vrot.slane %v3779_v11, 7  ;;  %v9708_v52 = vrot.slane %v3779_v11, 1 }
  0x17   :  { %9703 = vst [vmem:[#allocation21_spill] sm:$0xff] %v4048_v21  ;;  %v9710_v21 = vrot.slane %v3790_v14, 1  ;;  %v9712_v35 = vrot.slane %v3798_v19, 1  ;;  %v9714_v7 = vrot.slane %v3803_v20, 1  ;;  %v9716_v11 = vrot.slane %v3811_v25, 1 }
  0x18   :  { %v4060_v42 = vsel %vm139_vm0, %v9705_v55, %v9704_v43  ;;  %v4067_v62 = vsel %vm139_vm0, %v9708_v52, %v9707_v6  ;;  %v9718_v14 = vrot.slane %v3816_v26, 1  ;;  %v9720_v19 = vrot.slane %v3821_v27, 1 }
  0x19   :  { %9706 = vst [vmem:[#allocation22_spill] sm:$0xff] %v4060_v42  ;;  %9709 = vst [vmem:[#allocation23_spill] sm:$0xff] %v4067_v62  ;;  %v4072_v49 = vsel %vm139_vm0, %v9710_v21, %v158_v61  ;;  %v4077_v31 = vsel %vm139_vm0, %v9712_v35, %v161_v1  ;;  %v4082_v43 = vsel %vm139_vm0, %v9714_v7, %v164_v9  ;;  %v9722_v20 = vrot.slane %v3837_v33, 1 }
  0x1a   :  { %9711 = vst [vmem:[#allocation24_spill] sm:$0xff] %v4072_v49  ;;  %9713 = vst [vmem:[#allocation25_spill] sm:$0xff] %v4077_v31  ;;  %v4087_v55 = vsel %vm139_vm0, %v9716_v11, %v167_v30  ;;  %v4092_v61 = vsel %vm139_vm0, %v9718_v14, %v170_v16  ;;  %v4097_v35 = vsel %vm139_vm0, %v9720_v19, %v173_v59  ;;  %v9724_v25 = vrot.slane %v3855_v39, 1  ;;  %v4115_v16 = vld [vmem:[%s9010_s1] sm:$0xff] }
  0x1b   :  { %9715 = vst [vmem:[#allocation26_spill] sm:$0xff] %v4082_v43  ;;  %9717 = vst [vmem:[#allocation27_spill] sm:$0xff] %v4087_v55  ;;  %v4102_v1 = vsel %vm139_vm0, %v9722_v20, %v176_v48  ;;  %v4110_v26 = vsel %vm139_vm0, %v105_v28, %v182_v40  ;;  %v4118_v27 = vsel %vm139_vm0, %v106_v29, %v185_v36  ;;  %v9728_v33 = vrot.slane %v3744_v2, 7  ;;  %v4138_v29 = vld [vmem:[%s9010_s1 + $0x8] sm:$0xff]  ;;  %v4143_v2 = vld [vmem:[%s9010_s1 + $0x10] sm:$0xff] }
  0x1c   :  { %9719 = vst [vmem:[#allocation28_spill] sm:$0xff] %v4092_v61  ;;  %9721 = vst [vmem:[#allocation29_spill] sm:$0xff] %v4097_v35  ;;  %v4107_v30 = vsel %vm139_vm0, %v9724_v25, %v179_v46  ;;  %v9730_v39 = vrot.slane %v3749_v3, 7  ;;  %v9732_v28 = vrot.slane %v3759_v5, 7  ;;  %v4148_v3 = vld [vmem:[%s9010_s1 + $0x18] sm:$0xff]  ;;  %v4153_v5 = vld [vmem:[%s9010_s1 + $0x20] sm:$0xff] }
  0x1d   :  { %9723 = vst [vmem:[#allocation30_spill] sm:$0xff] %v4102_v1  ;;  %9725 = vst [vmem:[#allocation31_spill] sm:$0xff] %v4107_v30  ;;  %v4123_v48 = vsel %vm139_vm0, %v9728_v33, %v236_v15  ;;  %v9734_v36 = vrot.slane %v3774_v10, 7  ;;  %v9738_v9 = vrot.slane %v3832_v32, 7  ;;  %v9740_v21 = vrot.slane %v3850_v38, 7  ;;  %v4178_v10 = vld [vmem:[%s9010_s1 + $0x28] sm:$0xff] }
  0x1e   :  { %9726 = vst [vmem:[#allocation32_spill] sm:$0xff] %v4110_v26  ;;  %9727 = vst [vmem:[#allocation33_spill] sm:$0xff] %v4118_v27  ;;  %v4128_v46 = vsel %vm139_vm0, %v9730_v39, %v237_v47  ;;  %v4133_v40 = vsel %vm139_vm0, %v9732_v28, %v238_v54  ;;  %v9736_v54 = vrot.slane %v3785_v13, 7  ;;  %v4183_v13 = vld [vmem:[%s9010_s1 + $0x30] sm:$0xff]  ;;  %v9746_v52 = vrot.slane %v3890_v50, 7  ;;  %v4276_v33 = vld [vmem:[%s9010_s1 + $0xc0] sm:$0xff] }
  0x1f   :  { %9729 = vst [vmem:[#allocation34_spill] sm:$0xff] %v4123_v48  ;;  %9731 = vst [vmem:[#allocation35_spill] sm:$0xff] %v4128_v46  ;;  %v4158_v47 = vsel %vm139_vm0, %v9734_v36, %v239_v17  ;;  %v4168_v15 = vsel %vm139_vm0, %v9738_v9, %v241_v18  ;;  %v4173_v6 = vsel %vm139_vm0, %v9740_v21, %v242_v34  ;;  %v4188_v18 = vld [vmem:[%s9010_s1 + $0x40] sm:$0xff]  ;;  %v4193_v32 = vld [vmem:[%s9010_s1 + $0x50] sm:$0xff]  ;;  %v9742_v34 = vrot.slane %v3874_v44, 7 }
  0x20   :  { %9733 = vst [vmem:[#allocation36_spill] sm:$0xff] %v4133_v40  ;;  %9735 = vst [vmem:[#allocation37_spill] sm:$0xff] %v4158_v47  ;;  %v4163_v59 = vsel %vm139_vm0, %v9736_v54, %v240_v22  ;;  %v9744_v17 = vrot.slane %v3879_v45, 7  ;;  %v4208_v7 = vsel %vm139_vm0, %v9746_v52, %v245_v8  ;;  %v9748_v11 = vrot.slane %v3895_v51, 7  ;;  %v4223_v44 = vld [vmem:[%s9010_s1 + $0x70] sm:$0xff]  ;;  %v4228_v45 = vld [vmem:[%s9010_s1 + $0x80] sm:$0xff] }
  0x21   :  { %9737 = vst [vmem:[#allocation38_spill] sm:$0xff] %v4163_v59  ;;  %9739 = vst [vmem:[#allocation39_spill] sm:$0xff] %v4168_v15  ;;  %v4198_v38 = vsel %vm139_vm0, %v9742_v34, %v243_v12  ;;  %v4218_v12 = vld [vmem:[%s9010_s1 + $0x60] sm:$0xff]  ;;  %v9750_v50 = vrot.slane %v3910_v56, 7  ;;  %v9752_v51 = vrot.slane %v3915_v57, 7  ;;  %v9756_v20 = vrot.slane %v3940_v0, 7 }
  0x22   :  { %9741 = vst [vmem:[#allocation40_spill] sm:$0xff] %v4173_v6  ;;  %9743 = vst [vmem:[#allocation41_spill] sm:$0xff] %v4198_v38  ;;  %v4203_v22 = vsel %vm139_vm0, %v9744_v17, %v244_v4  ;;  %v4213_v14 = vsel %vm139_vm0, %v9748_v11, %v246_v23  ;;  %v9754_v4 = vrot.slane %v3920_v58, 7  ;;  %v4253_v56 = vld [vmem:[%s9010_s1 + $0x90] sm:$0xff]  ;;  %v9758_v57 = vrot.slane %v3952_v37, 7  ;;  %v4290_v54 = vld [vmem:[%s9010_s1 + $0xe0] sm:$0xff] }
  0x23   :  { %9745 = vst [vmem:[#allocation42_spill] sm:$0xff] %v4203_v22  ;;  %9747 = vst [vmem:[#allocation43_spill] sm:$0xff] %v4208_v7  ;;  %v4233_v23 = vsel %vm139_vm0, %v9750_v50, %v247_v63  ;;  %v4238_v8 = vsel %vm139_vm0, %v9752_v51, %v248_v41  ;;  %v4248_v25 = vsel %vm139_vm0, %v9756_v20, %v250_v60  ;;  %v4258_v41 = vld [vmem:[%s9010_s1 + $0xa0] sm:$0xff]  ;;  %v4281_v39 = vld [vmem:[%s9010_s1 + $0xd0] sm:$0xff]  ;;  %v9051_v28 = vrot.slane %v4143_v2, 7 }
  0x24   :  { %9749 = vst [vmem:[#allocation44_spill] sm:$0xff] %v4213_v14  ;;  %9751 = vst [vmem:[#allocation45_spill] sm:$0xff] %v4233_v23  ;;  %v4243_v19 = vsel %vm139_vm0, %v9754_v4, %v249_v24  ;;  %v4263_v24 = vld [vmem:[%s9010_s1 + $0xb0] sm:$0xff]  ;;  %v4268_v58 = vsel %vm139_vm0, %v9758_v57, %v251_v53  ;;  %v9050_v36 = vrot.slane %v4148_v3, 7  ;;  %v9053_v17 = vrot.slane %v4115_v16, 7  ;;  %v4304_v11 = vld [vmem:[%s9010_s1 + $0x38] sm:$0xff] }
  0x25   :  { %9753 = vst [vmem:[#allocation46_spill] sm:$0xff] %v4238_v8  ;;  %9755 = vst [vmem:[#allocation47_spill] sm:$0xff] %v4243_v19  ;;  %v4295_v9 = vld [vmem:[%s9010_s1 + $0xf0] sm:$0xff]  ;;  %v9052_v52 = vrot.slane %v4138_v29, 7  ;;  %v9057_v20 = vrot.slane %v4178_v10, 7  ;;  %v4313_v57 = vld [vmem:[%s9010_s1 + $0x48] sm:$0xff] }
  0x26   :  { %9757 = vst [vmem:[#allocation48_spill] sm:$0xff] %v4248_v25  ;;  %9759 = vst [vmem:[#allocation49_spill] sm:$0xff] %v4268_v58  ;;  %v4318_v34 = vld [vmem:[%s9010_s1 + $0x58] sm:$0xff]  ;;  %v4327_v37 = vld [vmem:[%s9010_s1 + $0x68] sm:$0xff]  ;;  %v4342_v53 = vsel %vm139_vm0, %v9051_v28, %v9050_v36  ;;  %v379_v60 = vrot.slane %v4193_v32, 7  ;;  %v382_v58 = vrot.slane %v4218_v12, 7 }
  0x27   :  { %v4332_v63 = vld [vmem:[%s9010_s1 + $0x78] sm:$0xff]  ;;  %9760 = vst [vmem:[#allocation50_spill] sm:$0xff] %v4342_v53  ;;  %v4347_v51 = vld [vmem:[%s9010_s1 + $0x88] sm:$0xff]  ;;  %v4359_v50 = vsel %vm139_vm0, %v9053_v17, %v9052_v52  ;;  %v9765_v52 = vrot.slane %v4153_v5, 7  ;;  %v388_v27 = vrot.slane %v4228_v45, 7  ;;  %v394_v36 = vrot.slane %v4258_v41, 7 }
  0x28   :  { %v4352_v0 = vld [vmem:[%s9010_s1 + $0x98] sm:$0xff]  ;;  %9762 = vst [vmem:[#allocation52_spill] sm:$0xff] %v4359_v50  ;;  %v4367_v28 = vld [vmem:[%s9010_s1 + $0xa8] sm:$0xff]  ;;  %v397_v30 = vrot.slane %v4263_v24, 7  ;;  %v400_v1 = vrot.slane %v4276_v33, 7  ;;  %v403_v35 = vrot.slane %v4281_v39, 7 }
  0x29   :  { %9761 = vst [vmem:[#allocation51_spill] sm:$0xff] %v4352_v0  ;;  %9763 = vst [vmem:[#allocation53_spill] sm:$0xff] %v4367_v28  ;;  %v4372_v4 = vld [vmem:[%s9010_s1 + $0xb8] sm:$0xff]  ;;  %v4379_v17 = vsel %vm139_vm0, %v9765_v52, %v9057_v20  ;;  %v4387_v50 = vld [vmem:[%s9010_s1 + $0xc8] sm:$0xff]  ;;  %v385_v20 = vrot.slane %v4223_v44, 7  ;;  %v391_v52 = vrot.slane %v4253_v56, 7 }
  0x2a   :  { %9764 = vst [vmem:[#allocation54_spill] sm:$0xff] %v4372_v4  ;;  %9766 = vst [vmem:[#allocation55_spill] sm:$0xff] %v4379_v17  ;;  %v4392_v53 = vld [vmem:[%s9010_s1 + $0xd8] sm:$0xff]  ;;  %v4401_v21 = vld [vmem:[%s9010_s1 + $0xe8] sm:$0xff]  ;;  %v406_v14 = vrot.slane %v4290_v54, 7  ;;  %v409_v61 = vrot.slane %v4295_v9, 7 }
  0x2b   :  { %9767 = vst [vmem:[#allocation56_spill] sm:$0xff] %v4387_v50  ;;  %9768 = vst [vmem:[#allocation57_spill] sm:$0xff] %v4392_v53  ;;  %v4406_v17 = vld [vmem:[%s9010_s1 + $0xf8] sm:$0xff]  ;;  %v9771_v7 = vrot.slane %v4304_v11, 7  ;;  %v9772_v8 = vrot.slane %v4183_v13, 7  ;;  %v9774_v23 = vrot.slane %v4313_v57, 7 }
  0x2c   :  { %9769 = vst [vmem:[#allocation58_spill] sm:$0xff] %v4401_v21  ;;  %9770 = vst [vmem:[#allocation59_spill] sm:$0xff] %v4406_v17  ;;  %v9775_v22 = vrot.slane %v4188_v18, 7  ;;  %v9777_v26 = vrot.slane %v4318_v34, 7  ;;  %v9779_v19 = vrot.slane %v4327_v37, 7  ;;  %v466_v31 = vrot.slane %v4327_v37, 5 }
  0x2d   :  { %v4429_v55 = vsel %vm139_vm0, %v9772_v8, %v9771_v7  ;;  %v9781_v7 = vrot.slane %v4332_v63, 7  ;;  %v469_v6 = vrot.slane %v4352_v0, 5  ;;  %v472_v49 = vrot.slane %v4387_v50, 5 }
  0x2e   :  { %9773 = vst [vmem:[#allocation60_spill] sm:$0xff] %v4429_v55  ;;  %v4436_v25 = vsel %vm139_vm0, %v9775_v22, %v9774_v23  ;;  %v4441_v43 = vsel %vm139_vm0, %v379_v60, %v9777_v26  ;;  %v4446_v38 = vsel %vm139_vm0, %v382_v58, %v9779_v19  ;;  %v9783_v55 = vrot.slane %v4347_v51, 7 }
  0x2f   :  { %9776 = vst [vmem:[#allocation61_spill] sm:$0xff] %v4436_v25  ;;  %9778 = vst [vmem:[#allocation62_spill] sm:$0xff] %v4441_v43  ;;  %v4451_v8 = vsel %vm139_vm0, %v385_v20, %v9781_v7  ;;  %v9785_v23 = vrot.slane %v4352_v0, 7  ;;  %v9787_v43 = vrot.slane %v4367_v28, 7  ;;  %v463_v25 = vrot.slane %v4304_v11, 5 }
  0x30   :  { %9780 = vst [vmem:[#allocation63_spill] sm:$0xff] %v4446_v38  ;;  %9782 = vst [vmem:[#allocation64_spill] sm:$0xff] %v4451_v8  ;;  %v4456_v22 = vsel %vm139_vm0, %v388_v27, %v9783_v55  ;;  %v9789_v38 = vrot.slane %v4372_v4, 7  ;;  %v9791_v8 = vrot.slane %v4387_v50, 7  ;;  %v473_v15 = vrot.slane %v4392_v53, 5 }
  0x31   :  { %9784 = vst [vmem:[#allocation65_spill] sm:$0xff] %v4456_v22  ;;  %v4461_v26 = vsel %vm139_vm0, %v391_v52, %v9785_v23  ;;  %v4466_v19 = vsel %vm139_vm0, %v394_v36, %v9787_v43  ;;  %v9793_v22 = vrot.slane %v4392_v53, 7  ;;  %v9795_v43 = vrot.slane %v4401_v21, 7 }
  0x32   :  { %9786 = vst [vmem:[#allocation66_spill] sm:$0xff] %v4461_v26  ;;  %9788 = vst [vmem:[#allocation67_spill] sm:$0xff] %v4466_v19  ;;  %v4471_v7 = vsel %vm139_vm0, %v397_v30, %v9789_v38  ;;  %v4476_v55 = vsel %vm139_vm0, %v400_v1, %v9791_v8  ;;  %v460_v26 = vrot.slane %v4148_v3, 5  ;;  %v9797_v38 = vrot.slane %v4406_v17, 7 }
  0x33   :  { %9790 = vst [vmem:[#allocation68_spill] sm:$0xff] %v4471_v7  ;;  %9792 = vst [vmem:[#allocation69_spill] sm:$0xff] %v4476_v55  ;;  %v4481_v23 = vsel %vm139_vm0, %v403_v35, %v9793_v22  ;;  %v4487_v19 = vsel %vm139_vm0, %v406_v14, %v9795_v43  ;;  %v461_v8 = vrot.slane %v4138_v29, 5  ;;  %v462_v55 = vrot.slane %v4178_v10, 5 }
  0x34   :  { %9794 = vst [vmem:[#allocation70_spill] sm:$0xff] %v4481_v23  ;;  %9796 = vst [vmem:[#allocation71_spill] sm:$0xff] %v4487_v19  ;;  %v4492_v7 = vsel %vm139_vm0, %v409_v61, %v9797_v38  ;;  %v464_v22 = vrot.slane %v4313_v57, 5  ;;  %v465_v23 = vrot.slane %v4318_v34, 5  ;;  %v467_v43 = vrot.slane %v4332_v63, 5 }
  0x35   :  { %9798 = vst [vmem:[#allocation72_spill] sm:$0xff] %v4492_v7  ;;  %v468_v19 = vrot.slane %v4347_v51, 5  ;;  %v470_v38 = vrot.slane %v4367_v28, 5  ;;  %v471_v7 = vrot.slane %v4372_v4, 5  ;;  %v474_v62 = vrot.slane %v4401_v21, 5 }
  0x36   :  { %v475_v59 = vrot.slane %v4406_v17, 5  ;;  %v9799_v42 = vrot.slane %v4143_v2, 7  ;;  %v9800_v47 = vrot.slane %v4143_v2, 1  ;;  %v9802_v28 = vrot.slane %v4115_v16, 7 }
  0x37   :  { %v9803_v0 = vrot.slane %v4115_v16, 1  ;;  %v9805_v53 = vrot.slane %v4153_v5, 7  ;;  %v9806_v21 = vrot.slane %v4153_v5, 1  ;;  %v9808_v50 = vrot.slane %v4183_v13, 7 }
  0x38   :  { %v4514_v40 = vsel %vm139_vm0, %v9800_v47, %v9799_v42  ;;  %v9809_v2 = vrot.slane %v4183_v13, 1  ;;  %v9811_v47 = vrot.slane %v4188_v18, 7  ;;  %v9812_v16 = vrot.slane %v4188_v18, 1 }
  0x39   :  { %9801 = vst [vmem:[#allocation73_spill] sm:$0xff] %v4514_v40  ;;  %v4521_v4 = vsel %vm139_vm0, %v9803_v0, %v9802_v28  ;;  %v4528_v17 = vsel %vm139_vm0, %v9806_v21, %v9805_v53  ;;  %v9814_v28 = vrot.slane %v4193_v32, 1  ;;  %v9816_v53 = vrot.slane %v4218_v12, 1  ;;  %v9905_v40 = vld [vmem:[#allocation44_spill] sm:$0xff] }
  0x3a   :  { %9804 = vst [vmem:[#allocation74_spill] sm:$0xff] %v4521_v4  ;;  %9807 = vst [vmem:[#allocation75_spill] sm:$0xff] %v4528_v17  ;;  %v4535_v42 = vsel %vm139_vm0, %v9809_v2, %v9808_v50  ;;  %v4542_v0 = vsel %vm139_vm0, %v9812_v16, %v9811_v47  ;;  %v9818_v13 = vrot.slane %v4223_v44, 1  ;;  %v9820_v18 = vrot.slane %v4228_v45, 1  ;;  %v9846_v47 = vld [vmem:[#allocation2_spill] sm:$0xff]  ;;  %v9847_v16 = vld [vmem:[#allocation3_spill] sm:$0xff] }
  0x3b   :  { %9810 = vst [vmem:[#allocation76_spill] sm:$0xff] %v4535_v42  ;;  %9813 = vst [vmem:[#allocation77_spill] sm:$0xff] %v4542_v0  ;;  %v4547_v5 = vsel %vm139_vm0, %v9814_v28, %v379_v60  ;;  %v4552_v21 = vsel %vm139_vm0, %v9816_v53, %v382_v58  ;;  %v9822_v32 = vrot.slane %v4253_v56, 1  ;;  %v9824_v12 = vrot.slane %v4258_v41, 1  ;;  %v9901_v4 = vld [vmem:[#allocation14_spill] sm:$0xff] }
  0x3c   :  { %9815 = vst [vmem:[#allocation78_spill] sm:$0xff] %v4547_v5  ;;  %9817 = vst [vmem:[#allocation79_spill] sm:$0xff] %v4552_v21  ;;  %v4557_v50 = vsel %vm139_vm0, %v9818_v13, %v385_v20  ;;  %v4562_v2 = vsel %vm139_vm0, %v9820_v18, %v388_v27  ;;  %v9826_v44 = vrot.slane %v4263_v24, 1  ;;  %v9828_v45 = vrot.slane %v4276_v33, 1  ;;  %v9857_v18 = vld [vmem:[#allocation4_spill] sm:$0xff] }
  0x3d   :  { %9819 = vst [vmem:[#allocation80_spill] sm:$0xff] %v4557_v50  ;;  %9821 = vst [vmem:[#allocation81_spill] sm:$0xff] %v4562_v2  ;;  %v4567_v60 = vsel %vm139_vm0, %v9822_v32, %v391_v52  ;;  %v4572_v58 = vsel %vm139_vm0, %v9824_v12, %v394_v36  ;;  %v9830_v56 = vrot.slane %v4281_v39, 1  ;;  %v9832_v41 = vrot.slane %v4290_v54, 1  ;;  %v9897_v2 = vld [vmem:[#allocation26_spill] sm:$0xff]  ;;  %v9898_v50 = vld [vmem:[#allocation13_spill] sm:$0xff] }
  0x3e   :  { %9823 = vst [vmem:[#allocation82_spill] sm:$0xff] %v4567_v60  ;;  %9825 = vst [vmem:[#allocation83_spill] sm:$0xff] %v4572_v58  ;;  %v4577_v20 = vsel %vm139_vm0, %v9826_v44, %v397_v30  ;;  %v4582_v27 = vsel %vm139_vm0, %v9828_v45, %v400_v1  ;;  %v9834_v24 = vrot.slane %v4295_v9, 1  ;;  %v9836_v33 = vrot.slane %v4148_v3, 7  ;;  %v9896_v60 = vld [vmem:[#allocation41_spill] sm:$0xff] }
  0x3f   :  { %9827 = vst [vmem:[#allocation84_spill] sm:$0xff] %v4577_v20  ;;  %9829 = vst [vmem:[#allocation85_spill] sm:$0xff] %v4582_v27  ;;  %v4587_v52 = vsel %vm139_vm0, %v9830_v56, %v403_v35  ;;  %v4592_v36 = vsel %vm139_vm0, %v9832_v41, %v406_v14  ;;  %v9838_v39 = vrot.slane %v4138_v29, 7  ;;  %v9840_v54 = vrot.slane %v4178_v10, 7  ;;  %v9867_v41 = vld [vmem:[#allocation56_spill] sm:$0xff] }
  0x40   :  { %9831 = vst [vmem:[#allocation86_spill] sm:$0xff] %v4587_v52  ;;  %9833 = vst [vmem:[#allocation87_spill] sm:$0xff] %v4592_v36  ;;  %v4597_v30 = vsel %vm139_vm0, %v9834_v24, %v409_v61  ;;  %v4602_v1 = vsel %vm139_vm0, %v9836_v33, %v460_v26  ;;  %v9842_v9 = vrot.slane %v4304_v11, 7  ;;  %v9844_v3 = vrot.slane %v4313_v57, 7 }
  0x41   :  { %9835 = vst [vmem:[#allocation88_spill] sm:$0xff] %v4597_v30  ;;  %9837 = vst [vmem:[#allocation89_spill] sm:$0xff] %v4602_v1  ;;  %v4607_v35 = vsel %vm139_vm0, %v9838_v39, %v461_v8  ;;  %v4612_v14 = vsel %vm139_vm0, %v9840_v54, %v462_v55  ;;  %v557_v29 = vrot.slane %v9846_v47, 1  ;;  %v558_v8 = vrot.slane %v9847_v16, 1  ;;  %v9870_v39 = vld [vmem:[#allocation57_spill] sm:$0xff]  ;;  %v9902_v1 = vld [vmem:[#allocation43_spill] sm:$0xff] }
  0x42   :  { %9839 = vst [vmem:[#allocation90_spill] sm:$0xff] %v4607_v35  ;;  %9841 = vst [vmem:[#allocation91_spill] sm:$0xff] %v4612_v14  ;;  %v4617_v61 = vsel %vm139_vm0, %v9842_v9, %v463_v25  ;;  %v4622_v26 = vsel %vm139_vm0, %v9844_v3, %v464_v22  ;;  %v9848_v28 = vrot.slane %v4318_v34, 7  ;;  %v9850_v55 = vrot.slane %v4327_v37, 7  ;;  %v9856_v34 = vld [vmem:[#allocation6_spill] sm:$0xff]  ;;  %v9889_v30 = vld [vmem:[#allocation9_spill] sm:$0xff] }
  0x43   :  { %9843 = vst [vmem:[#allocation92_spill] sm:$0xff] %v4617_v61  ;;  %9845 = vst [vmem:[#allocation93_spill] sm:$0xff] %v4622_v26  ;;  %v9852_v25 = vrot.slane %v4332_v63, 7  ;;  %v560_v22 = vrot.slane %v4123_v48, 1  ;;  %v9854_v53 = vrot.slane %v4347_v51, 7  ;;  %v563_v32 = vrot.slane %v9857_v18, 1 }
  0x44   :  { %v4629_v10 = vsel %vm139_vm0, %v9848_v28, %v465_v23  ;;  %v4634_v11 = vsel %vm139_vm0, %v9850_v55, %v466_v31  ;;  %v562_v23 = vrot.slane %v9856_v34, 1  ;;  %v565_v37 = vrot.slane %v4128_v46, 1  ;;  %v9858_v31 = vld [vmem:[#allocation51_spill] sm:$0xff]  ;;  %v9864_v51 = vld [vmem:[#allocation54_spill] sm:$0xff] }
  0x45   :  { %9849 = vst [vmem:[#allocation94_spill] sm:$0xff] %v4629_v10  ;;  %9851 = vst [vmem:[#allocation95_spill] sm:$0xff] %v4634_v11  ;;  %v4639_v57 = vsel %vm139_vm0, %v9852_v25, %v467_v43  ;;  %v4645_v13 = vsel %vm139_vm0, %v9854_v53, %v468_v19  ;;  %v9859_v12 = vrot.slane %v9858_v31, 7  ;;  %v9861_v43 = vld [vmem:[#allocation53_spill] sm:$0xff]  ;;  %v9865_v56 = vrot.slane %v9864_v51, 7  ;;  %v9873_v9 = vld [vmem:[#allocation58_spill] sm:$0xff] }
  0x46   :  { %9853 = vst [vmem:[#allocation96_spill] sm:$0xff] %v4639_v57  ;;  %9855 = vst [vmem:[#allocation97_spill] sm:$0xff] %v4645_v13  ;;  %v9862_v44 = vrot.slane %v9861_v43, 7  ;;  %v9868_v24 = vrot.slane %v9867_v41, 7  ;;  %v9871_v54 = vrot.slane %v9870_v39, 7  ;;  %v9874_v3 = vrot.slane %v9873_v9, 7 }
  0x47   :  { %v4653_v63 = vsel %vm139_vm0, %v9859_v12, %v469_v6  ;;  %v4663_v19 = vsel %vm139_vm0, %v9865_v56, %v471_v7  ;;  %v9876_v28 = vld [vmem:[#allocation59_spill] sm:$0xff]  ;;  %v4686_v25 = vsel %vm556_vm1, %v557_v29, %v558_v8  ;;  %v9879_v53 = vld [vmem:[#allocation12_spill] sm:$0xff]  ;;  %v4698_v51 = vsel %vm556_vm1, %v563_v32, %v565_v37  ;;  %v9899_v26 = vld [vmem:[#allocation42_spill] sm:$0xff] }
  0x48   :  { %9860 = vst [vmem:[#allocation51_spill] sm:$0xff] %v4653_v63  ;;  %v4658_v45 = vsel %vm139_vm0, %v9862_v44, %v470_v38  ;;  %9866 = vst [vmem:[#allocation54_spill] sm:$0xff] %v4663_v19  ;;  %v4668_v33 = vsel %vm139_vm0, %v9868_v24, %v472_v49  ;;  %v4673_v6 = vsel %vm139_vm0, %v9871_v54, %v473_v15  ;;  %v9877_v55 = vrot.slane %v9876_v28, 7  ;;  %v9880_v15 = vld [vmem:[#allocation5_spill] sm:$0xff]  ;;  %v9881_v43 = vld [vmem:[#allocation36_spill] sm:$0xff] }
  0x49   :  { %9863 = vst [vmem:[#allocation53_spill] sm:$0xff] %v4658_v45  ;;  %9869 = vst [vmem:[#allocation56_spill] sm:$0xff] %v4668_v33  ;;  %v4678_v38 = vsel %vm139_vm0, %v9874_v3, %v474_v62  ;;  %v4689_v49 = vsel %vm556_vm1, %v558_v8, %v560_v22  ;;  %v567_v31 = vrot.slane %v9879_v53, 1  ;;  %v568_v12 = vrot.slane %v9880_v15, 1  ;;  %v9883_v41 = vld [vmem:[#allocation7_spill] sm:$0xff]  ;;  %v9884_v24 = vld [vmem:[#allocation37_spill] sm:$0xff] }
  0x4a   :  { %9872 = vst [vmem:[#allocation57_spill] sm:$0xff] %v4673_v6  ;;  %9875 = vst [vmem:[#allocation58_spill] sm:$0xff] %v4678_v38  ;;  %v4683_v7 = vsel %vm139_vm0, %v9877_v55, %v475_v59  ;;  %v570_v44 = vrot.slane %v9881_v43, 1  ;;  %v4695_v62 = vsel %vm556_vm1, %v562_v23, %v563_v32  ;;  %v9882_v59 = vld [vmem:[#allocation21_spill] sm:$0xff]  ;;  %v573_v29 = vrot.slane %v9883_v41, 1  ;;  %v9885_v8 = vld [vmem:[#allocation22_spill] sm:$0xff] }
  0x4b   :  { %9878 = vst [vmem:[#allocation59_spill] sm:$0xff] %v4683_v7  ;;  %v572_v56 = vrot.slane %v9882_v59, 1  ;;  %v575_v39 = vrot.slane %v9884_v24, 1  ;;  %v577_v22 = vrot.slane %v9885_v8, 1  ;;  %v9886_v54 = vld [vmem:[#allocation8_spill] sm:$0xff]  ;;  %v9887_v3 = vld [vmem:[#allocation38_spill] sm:$0xff]  ;;  %v569_v63 = vsel %vm556_vm1, %v567_v31, %v568_v12 }
  0x4c   :  { %v578_v9 = vrot.slane %v9886_v54, 1  ;;  %v580_v28 = vrot.slane %v9887_v3, 1  ;;  %v9888_v55 = vld [vmem:[#allocation23_spill] sm:$0xff]  ;;  %v583_v23 = vrot.slane %v9889_v30, 1  ;;  %v9891_v32 = vld [vmem:[#allocation24_spill] sm:$0xff]  ;;  %v9892_v6 = vld [vmem:[#allocation10_spill] sm:$0xff]  ;;  %v571_v21 = vsel %vm556_vm1, %v568_v12, %v570_v44 }
  0x4d   :  { %v582_v7 = vrot.slane %v9888_v55, 1  ;;  %v9890_v38 = vld [vmem:[#allocation39_spill] sm:$0xff]  ;;  %v587_v37 = vrot.slane %v9891_v32, 1  ;;  %v588_v52 = vrot.slane %v9892_v6, 1  ;;  %v9893_v33 = vld [vmem:[#allocation40_spill] sm:$0xff]  ;;  %v9894_v19 = vld [vmem:[#allocation25_spill] sm:$0xff]  ;;  %v574_v10 = vsel %vm556_vm1, %v572_v56, %v573_v29 }
  0x4e   :  { %v585_v36 = vrot.slane %v9890_v38, 1  ;;  %v590_v27 = vrot.slane %v9893_v33, 1  ;;  %v592_v20 = vrot.slane %v9894_v19, 1  ;;  %v9895_v45 = vld [vmem:[#allocation11_spill] sm:$0xff]  ;;  %v595_v13 = vrot.slane %v9896_v60, 1  ;;  %v9908_v33 = vld [vmem:[#allocation45_spill] sm:$0xff] }
  0x4f   :  { %v593_v58 = vrot.slane %v9895_v45, 1  ;;  %v597_v57 = vrot.slane %v9897_v2, 1  ;;  %v598_v11 = vrot.slane %v9898_v50, 1  ;;  %v576_v5 = vsel %vm556_vm1, %v573_v29, %v575_v39  ;;  %v9900_v44 = vld [vmem:[#allocation27_spill] sm:$0xff]  ;;  %v9910_v38 = vld [vmem:[#allocation17_spill] sm:$0xff]  ;;  %v9911_v24 = vld [vmem:[#allocation46_spill] sm:$0xff] }
  0x50   :  { %v600_v0 = vrot.slane %v9899_v26, 1  ;;  %v579_v61 = vsel %vm556_vm1, %v577_v22, %v578_v9  ;;  %v581_v42 = vsel %vm556_vm1, %v578_v9, %v580_v28  ;;  %v584_v31 = vsel %vm556_vm1, %v582_v7, %v583_v23  ;;  %v9903_v28 = vld [vmem:[#allocation28_spill] sm:$0xff]  ;;  %v9912_v43 = vld [vmem:[#allocation31_spill] sm:$0xff]  ;;  %v9918_v50 = vld [vmem:[#allocation33_spill] sm:$0xff] }
  0x51   :  { %v586_v14 = vsel %vm556_vm1, %v583_v23, %v585_v36  ;;  %v589_v17 = vsel %vm556_vm1, %v587_v37, %v588_v52  ;;  %v591_v35 = vsel %vm556_vm1, %v588_v52, %v590_v27  ;;  %v594_v12 = vsel %vm556_vm1, %v592_v20, %v593_v58  ;;  %v9904_v23 = vld [vmem:[#allocation15_spill] sm:$0xff]  ;;  %v9906_v52 = vld [vmem:[#allocation29_spill] sm:$0xff]  ;;  %v9907_v26 = vld [vmem:[#allocation16_spill] sm:$0xff] }
  0x52   :  { %v602_v56 = vrot.slane %v9900_v44, 1  ;;  %v596_v29 = vsel %vm556_vm1, %v593_v58, %v595_v13  ;;  %v599_v39 = vsel %vm556_vm1, %v597_v57, %v598_v11  ;;  %v603_v22 = vrot.slane %v9901_v4, 1  ;;  %v9909_v13 = vld [vmem:[#allocation30_spill] sm:$0xff]  ;;  %v9914_v48 = vld [vmem:[#allocation47_spill] sm:$0xff]  ;;  %v9917_v44 = vld [vmem:[#allocation48_spill] sm:$0xff] }
  0x53   :  { %v605_v9 = vrot.slane %v9902_v1, 1  ;;  %v601_v7 = vsel %vm556_vm1, %v598_v11, %v600_v0  ;;  %v607_v36 = vrot.slane %v9903_v28, 1  ;;  %v608_v37 = vrot.slane %v9904_v23, 1  ;;  %v9913_v11 = vld [vmem:[#allocation18_spill] sm:$0xff]  ;;  %v9915_v28 = vld [vmem:[#allocation32_spill] sm:$0xff]  ;;  %v9916_v4 = vld [vmem:[#allocation19_spill] sm:$0xff] }
  0x54   :  { %v610_v27 = vrot.slane %v9905_v40, 1  ;;  %v612_v20 = vrot.slane %v9906_v52, 1  ;;  %v613_v60 = vrot.slane %v9907_v26, 1  ;;  %v615_v58 = vrot.slane %v9908_v33, 1  ;;  %v9919_v2 = vld [vmem:[#allocation20_spill] sm:$0xff]  ;;  %v9920_v45 = vld [vmem:[#allocation49_spill] sm:$0xff] }
  0x55   :  { %v617_v57 = vrot.slane %v9909_v13, 1  ;;  %v618_v3 = vrot.slane %v9910_v38, 1  ;;  %v620_v1 = vrot.slane %v9911_v24, 1  ;;  %v622_v0 = vrot.slane %v9912_v43, 1 }
  0x56   :  { %v623_v46 = vrot.slane %v9913_v11, 1  ;;  %v625_v23 = vrot.slane %v9914_v48, 1  ;;  %v627_v40 = vrot.slane %v9915_v28, 1  ;;  %v628_v52 = vrot.slane %v9916_v4, 1 }
  0x57   :  { %v630_v26 = vrot.slane %v9917_v44, 1  ;;  %v604_v33 = vsel %vm556_vm1, %v602_v56, %v603_v22  ;;  %v606_v13 = vsel %vm556_vm1, %v603_v22, %v605_v9  ;;  %v632_v38 = vrot.slane %v9918_v50, 1 }
  0x58   :  { %v633_v24 = vrot.slane %v9919_v2, 1  ;;  %v609_v43 = vsel %vm556_vm1, %v607_v36, %v608_v37  ;;  %v611_v11 = vsel %vm556_vm1, %v608_v37, %v610_v27  ;;  %v614_v48 = vsel %vm556_vm1, %v612_v20, %v613_v60 }
  0x59   :  { %v635_v28 = vrot.slane %v9920_v45, 1  ;;  %v616_v4 = vsel %vm556_vm1, %v613_v60, %v615_v58  ;;  %v619_v44 = vsel %vm556_vm1, %v617_v57, %v618_v3  ;;  %v621_v56 = vsel %vm556_vm1, %v618_v3, %v620_v1  ;;  %v9934_v57 = vld [vmem:[#allocation15_spill] sm:$0xff] }
  0x5a   :  { %v624_v22 = vsel %vm556_vm1, %v622_v0, %v623_v46  ;;  %v626_v9 = vsel %vm556_vm1, %v623_v46, %v625_v23  ;;  %v629_v2 = vsel %vm556_vm1, %v627_v40, %v628_v52  ;;  %v631_v36 = vsel %vm556_vm1, %v628_v52, %v630_v26 }
  0x5b   :  { %v4767_v37 = vadd.f32 %v4686_v25, %v9846_v47  ;;  %v634_v27 = vsel %vm556_vm1, %v632_v38, %v633_v24  ;;  %v4772_v60 = vadd.f32 %v4689_v49, %v9847_v16  ;;  %v4776_v1 = vadd.f32 %v4695_v62, %v9856_v34 }
  0x5c   :  { %v4780_v46 = vadd.f32 %v4698_v51, %v9857_v18  ;;  %v636_v40 = vsel %vm556_vm1, %v633_v24, %v635_v28  ;;  %v4784_v26 = vadd.f32 %v569_v63, %v9879_v53  ;;  %v4787_v25 = vadd.f32 %v571_v21, %v9880_v15 }
  0x5d   :  { %v4790_v38 = vadd.f32 %v574_v10, %v9882_v59  ;;  %v4793_v49 = vadd.f32 %v576_v5, %v9883_v41  ;;  %v4796_v62 = vadd.f32 %v579_v61, %v9885_v8  ;;  %v4799_v51 = vadd.f32 %v581_v42, %v9886_v54  ;;  %v9922_v61 = vld [vmem:[#allocation11_spill] sm:$0xff]  ;;  %v9924_v42 = vld [vmem:[#allocation26_spill] sm:$0xff] }
  0x5e   :  { %v4802_v24 = vadd.f32 %v584_v31, %v9888_v55  ;;  %v4805_v63 = vadd.f32 %v586_v14, %v9889_v30  ;;  %v4808_v21 = vadd.f32 %v589_v17, %v9891_v32  ;;  %v4811_v10 = vadd.f32 %v591_v35, %v9892_v6  ;;  %v9926_v31 = vld [vmem:[#allocation13_spill] sm:$0xff]  ;;  %v9928_v14 = vld [vmem:[#allocation27_spill] sm:$0xff]  ;;  %v9930_v17 = vld [vmem:[#allocation14_spill] sm:$0xff] }
  0x5f   :  { %v4814_v5 = vadd.f32 %v594_v12, %v9894_v19  ;;  %v4817_v3 = vadd.f32 %v596_v29, %v9922_v61  ;;  %v4820_v28 = vadd.f32 %v599_v39, %v9924_v42  ;;  %v4823_v23 = vadd.f32 %v601_v7, %v9926_v31  ;;  %v9932_v35 = vld [vmem:[#allocation28_spill] sm:$0xff]  ;;  %v9936_v39 = vld [vmem:[#allocation29_spill] sm:$0xff] }
  0x60   :  { %v4826_v52 = vadd.f32 %v604_v33, %v9928_v14  ;;  %v4829_v20 = vadd.f32 %v606_v13, %v9930_v17  ;;  %v4832_v58 = vadd.f32 %v609_v43, %v9932_v35  ;;  %v702_v12 = vrot.slane %v9846_v47, 2  ;;  %v9938_v7 = vld [vmem:[#allocation16_spill] sm:$0xff]  ;;  %v9940_v33 = vld [vmem:[#allocation34_spill] sm:$0xff] }
  0x61   :  { %9921 = vst [vmem:[#allocation98_spill] sm:$0xff] %v4814_v5  ;;  %9923 = vst [vmem:[#allocation99_spill] sm:$0xff] %v4817_v3  ;;  %v703_v29 = vrot.slane %v9847_v16, 2  ;;  %v4837_v0 = vadd.f32 %v611_v11, %v9934_v57  ;;  %v9941_v13 = vld [vmem:[#allocation30_spill] sm:$0xff]  ;;  %v707_v43 = vrot.slane %v9856_v34, 2  ;;  %v708_v47 = vrot.slane %v9857_v18, 2 }
  0x62   :  { %9925 = vst [vmem:[#allocation100_spill] sm:$0xff] %v4820_v28  ;;  %9927 = vst [vmem:[#allocation101_spill] sm:$0xff] %v4823_v23  ;;  %v4840_v28 = vadd.f32 %v614_v48, %v9936_v39  ;;  %v4843_v23 = vadd.f32 %v616_v4, %v9938_v7  ;;  %v9944_v3 = vld [vmem:[#allocation17_spill] sm:$0xff]  ;;  %v4868_v34 = vadd.f32 %v634_v27, %v9918_v50  ;;  %v9955_v18 = vld [vmem:[#allocation20_spill] sm:$0xff] }
  0x63   :  { %9929 = vst [vmem:[#allocation102_spill] sm:$0xff] %v4826_v52  ;;  %9931 = vst [vmem:[#allocation103_spill] sm:$0xff] %v4829_v20  ;;  %v705_v52 = vrot.slane %v9940_v33, 2  ;;  %v4847_v20 = vadd.f32 %v619_v44, %v9941_v13  ;;  %v4853_v11 = vadd.f32 %v621_v56, %v9944_v3  ;;  %v9952_v44 = vld [vmem:[#allocation19_spill] sm:$0xff]  ;;  %v4874_v56 = vsel %vm701_vm2, %v702_v12, %v703_v29  ;;  %v9963_v5 = vld [vmem:[#allocation42_spill] sm:$0xff] }
  0x64   :  { %9933 = vst [vmem:[#allocation104_spill] sm:$0xff] %v4832_v58  ;;  %9935 = vst [vmem:[#allocation105_spill] sm:$0xff] %v4837_v0  ;;  %v9943_v58 = vld [vmem:[#allocation35_spill] sm:$0xff]  ;;  %v718_v12 = vrot.slane %v9883_v41, 2 }
  0x65   :  { %9937 = vst [vmem:[#allocation106_spill] sm:$0xff] %v4840_v28  ;;  %9939 = vst [vmem:[#allocation107_spill] sm:$0xff] %v4843_v23  ;;  %v710_v16 = vrot.slane %v9943_v58, 2  ;;  %v9946_v0 = vld [vmem:[#allocation31_spill] sm:$0xff]  ;;  %v9948_v28 = vld [vmem:[#allocation18_spill] sm:$0xff]  ;;  %v4871_v58 = vadd.f32 %v636_v40, %v9955_v18  ;;  %v717_v40 = vrot.slane %v9882_v59, 2 }
  0x66   :  { %9942 = vst [vmem:[#allocation108_spill] sm:$0xff] %v4847_v20  ;;  %9945 = vst [vmem:[#allocation109_spill] sm:$0xff] %v4853_v11  ;;  %v4856_v48 = vadd.f32 %v624_v22, %v9946_v0  ;;  %v4859_v4 = vadd.f32 %v626_v9, %v9948_v28  ;;  %v9950_v23 = vld [vmem:[#allocation32_spill] sm:$0xff]  ;;  %v4865_v20 = vadd.f32 %v631_v36, %v9952_v44  ;;  %v712_v9 = vrot.slane %v9879_v53, 2  ;;  %v9959_v53 = vld [vmem:[#allocation38_spill] sm:$0xff] }
  0x67   :  { %v4862_v33 = vadd.f32 %v629_v2, %v9950_v23  ;;  %9954 = vst [vmem:[#allocation114_spill] sm:$0xff] %v4868_v34  ;;  %9956 = vst [vmem:[#allocation115_spill] sm:$0xff] %v4871_v58  ;;  %v4877_v22 = vsel %vm701_vm2, %v703_v29, %v705_v52  ;;  %v713_v2 = vrot.slane %v9880_v15, 2  ;;  %v4883_v36 = vsel %vm701_vm2, %v707_v43, %v708_v47  ;;  %v9958_v58 = vld [vmem:[#allocation37_spill] sm:$0xff]  ;;  %v9961_v59 = vld [vmem:[#allocation40_spill] sm:$0xff] }
  0x68   :  { %9947 = vst [vmem:[#allocation110_spill] sm:$0xff] %v4856_v48  ;;  %9949 = vst [vmem:[#allocation111_spill] sm:$0xff] %v4859_v4  ;;  %v4886_v27 = vsel %vm701_vm2, %v708_v47, %v710_v16  ;;  %v720_v34 = vrot.slane %v9958_v58, 2  ;;  %v722_v52 = vrot.slane %v9885_v8, 2  ;;  %v723_v29 = vrot.slane %v9886_v54, 2  ;;  %v9962_v11 = vld [vmem:[#allocation41_spill] sm:$0xff] }
  0x69   :  { %9951 = vst [vmem:[#allocation112_spill] sm:$0xff] %v4862_v33  ;;  %9953 = vst [vmem:[#allocation113_spill] sm:$0xff] %v4865_v20  ;;  %v9957_v33 = vld [vmem:[#allocation36_spill] sm:$0xff]  ;;  %v725_v15 = vrot.slane %v9959_v53, 2  ;;  %v728_v43 = vrot.slane %v9889_v30, 2  ;;  %v9960_v20 = vld [vmem:[#allocation39_spill] sm:$0xff]  ;;  %v714_v54 = vsel %vm701_vm2, %v712_v9, %v713_v2 }
  0x6a   :  { %v715_v4 = vrot.slane %v9957_v33, 2  ;;  %v727_v33 = vrot.slane %v9888_v55, 2  ;;  %v730_v48 = vrot.slane %v9960_v20, 2  ;;  %v732_v47 = vrot.slane %v9891_v32, 2 }
  0x6b   :  { %v733_v16 = vrot.slane %v9892_v6, 2  ;;  %v735_v41 = vrot.slane %v9961_v59, 2  ;;  %v737_v58 = vrot.slane %v9894_v19, 2  ;;  %v738_v8 = vrot.slane %v9922_v61, 2 }
  0x6c   :  { %v740_v53 = vrot.slane %v9962_v11, 2  ;;  %v742_v55 = vrot.slane %v9924_v42, 2  ;;  %v743_v30 = vrot.slane %v9926_v31, 2  ;;  %v716_v20 = vsel %vm701_vm2, %v713_v2, %v715_v4 }
  0x6d   :  { %v719_v32 = vsel %vm701_vm2, %v717_v40, %v718_v12  ;;  %v721_v6 = vsel %vm701_vm2, %v718_v12, %v720_v34  ;;  %v745_v59 = vrot.slane %v9963_v5, 2  ;;  %v724_v19 = vsel %vm701_vm2, %v722_v52, %v723_v29  ;;  %v9964_v52 = vld [vmem:[#allocation43_spill] sm:$0xff] }
  0x6e   :  { %v726_v61 = vsel %vm701_vm2, %v723_v29, %v725_v15  ;;  %v729_v9 = vsel %vm701_vm2, %v727_v33, %v728_v43  ;;  %v731_v11 = vsel %vm701_vm2, %v728_v43, %v730_v48  ;;  %v734_v42 = vsel %vm701_vm2, %v732_v47, %v733_v16  ;;  %v9965_v43 = vld [vmem:[#allocation44_spill] sm:$0xff] }
  0x6f   :  { %v736_v31 = vsel %vm701_vm2, %v733_v16, %v735_v41  ;;  %v739_v4 = vsel %vm701_vm2, %v737_v58, %v738_v8  ;;  %v747_v2 = vrot.slane %v9928_v14, 2  ;;  %v741_v34 = vsel %vm701_vm2, %v738_v8, %v740_v53  ;;  %v9966_v16 = vld [vmem:[#allocation45_spill] sm:$0xff]  ;;  %v9969_v14 = vld [vmem:[#allocation48_spill] sm:$0xff] }
  0x70   :  { %v744_v40 = vsel %vm701_vm2, %v742_v55, %v743_v30  ;;  %v748_v12 = vrot.slane %v9930_v17, 2  ;;  %v750_v15 = vrot.slane %v9964_v52, 2  ;;  %v746_v33 = vsel %vm701_vm2, %v743_v30, %v745_v59  ;;  %v9967_v17 = vld [vmem:[#allocation46_spill] sm:$0xff] }
  0x71   :  { %v752_v48 = vrot.slane %v9932_v35, 2  ;;  %v753_v29 = vrot.slane %v9934_v57, 2  ;;  %v755_v41 = vrot.slane %v9965_v43, 2  ;;  %v757_v58 = vrot.slane %v9936_v39, 2  ;;  %v9968_v35 = vld [vmem:[#allocation47_spill] sm:$0xff] }
  0x72   :  { %v758_v47 = vrot.slane %v9938_v7, 2  ;;  %v760_v53 = vrot.slane %v9966_v16, 2  ;;  %v762_v8 = vrot.slane %v9941_v13, 2  ;;  %v763_v55 = vrot.slane %v9944_v3, 2 }
  0x73   :  { %v765_v52 = vrot.slane %v9967_v17, 2  ;;  %v767_v30 = vrot.slane %v9946_v0, 2  ;;  %v768_v59 = vrot.slane %v9948_v28, 2  ;;  %v770_v57 = vrot.slane %v9968_v35, 2 }
  0x74   :  { %v772_v43 = vrot.slane %v9950_v23, 2  ;;  %v773_v39 = vrot.slane %v9952_v44, 2  ;;  %v775_v7 = vrot.slane %v9969_v14, 2  ;;  %v749_v16 = vsel %vm701_vm2, %v747_v2, %v748_v12 }
  0x75   :  { %v751_v13 = vsel %vm701_vm2, %v748_v12, %v750_v15  ;;  %v777_v3 = vrot.slane %v9918_v50, 2  ;;  %v778_v17 = vrot.slane %v9955_v18, 2  ;;  %v754_v0 = vsel %vm701_vm2, %v752_v48, %v753_v29 }
  0x76   :  { %v756_v28 = vsel %vm701_vm2, %v753_v29, %v755_v41  ;;  %v759_v35 = vsel %vm701_vm2, %v757_v58, %v758_v47  ;;  %v780_v23 = vrot.slane %v9920_v45, 2  ;;  %v761_v44 = vsel %vm701_vm2, %v758_v47, %v760_v53  ;;  %v9983_v47 = vld [vmem:[#allocation111_spill] sm:$0xff]  ;;  %v9984_v53 = vld [vmem:[#allocation112_spill] sm:$0xff] }
  0x77   :  { %v764_v14 = vsel %vm701_vm2, %v762_v8, %v763_v55  ;;  %v766_v2 = vsel %vm701_vm2, %v763_v55, %v765_v52  ;;  %v769_v12 = vsel %vm701_vm2, %v767_v30, %v768_v59  ;;  %v771_v15 = vsel %vm701_vm2, %v768_v59, %v770_v57  ;;  %v9989_v55 = vld [vmem:[#allocation115_spill] sm:$0xff] }
  0x78   :  { %v774_v18 = vsel %vm701_vm2, %v772_v43, %v773_v39  ;;  %v776_v48 = vsel %vm701_vm2, %v773_v39, %v775_v7  ;;  %v4955_v29 = vadd.f32 %v4874_v56, %v4767_v37  ;;  %v779_v41 = vsel %vm701_vm2, %v777_v3, %v778_v17 }
  0x79   :  { %v4960_v58 = vadd.f32 %v4877_v22, %v4772_v60  ;;  %v816_v52 = vadd.f32 %v4883_v36, %v4776_v1  ;;  %v817_v57 = vadd.f32 %v4886_v27, %v4780_v46  ;;  %v781_v43 = vsel %vm701_vm2, %v778_v17, %v780_v23  ;;  %v9970_v17 = vld [vmem:[#allocation98_spill] sm:$0xff]  ;;  %v9977_v36 = vld [vmem:[#allocation105_spill] sm:$0xff] }
  0x7a   :  { %v818_v39 = vadd.f32 %v714_v54, %v4784_v26  ;;  %v819_v7 = vadd.f32 %v716_v20, %v4787_v25  ;;  %v820_v37 = vadd.f32 %v719_v32, %v4790_v38  ;;  %v821_v3 = vadd.f32 %v721_v6, %v4793_v49  ;;  %v9971_v26 = vld [vmem:[#allocation99_spill] sm:$0xff]  ;;  %v9972_v20 = vld [vmem:[#allocation100_spill] sm:$0xff]  ;;  %v9973_v38 = vld [vmem:[#allocation101_spill] sm:$0xff] }
  0x7b   :  { %v822_v56 = vadd.f32 %v724_v19, %v4796_v62  ;;  %v823_v60 = vadd.f32 %v726_v61, %v4799_v51  ;;  %v824_v22 = vadd.f32 %v729_v9, %v4802_v24  ;;  %v825_v1 = vadd.f32 %v731_v11, %v4805_v63  ;;  %v9974_v49 = vld [vmem:[#allocation102_spill] sm:$0xff]  ;;  %v9975_v62 = vld [vmem:[#allocation103_spill] sm:$0xff]  ;;  %v9976_v61 = vld [vmem:[#allocation104_spill] sm:$0xff] }
  0x7c   :  { %v826_v46 = vadd.f32 %v734_v42, %v4808_v21  ;;  %v827_v23 = vadd.f32 %v736_v31, %v4811_v10  ;;  %v828_v54 = vadd.f32 %v739_v4, %v9970_v17  ;;  %v829_v25 = vadd.f32 %v741_v34, %v9971_v26  ;;  %v9978_v11 = vld [vmem:[#allocation106_spill] sm:$0xff]  ;;  %v9979_v42 = vld [vmem:[#allocation107_spill] sm:$0xff]  ;;  %v9980_v31 = vld [vmem:[#allocation108_spill] sm:$0xff] }
  0x7d   :  { %v830_v32 = vadd.f32 %v744_v40, %v9972_v20  ;;  %v831_v6 = vadd.f32 %v746_v33, %v9973_v38  ;;  %v832_v19 = vadd.f32 %v749_v16, %v9974_v49  ;;  %v833_v51 = vadd.f32 %v751_v13, %v9975_v62  ;;  %v9981_v9 = vld [vmem:[#allocation109_spill] sm:$0xff]  ;;  %v9982_v34 = vld [vmem:[#allocation110_spill] sm:$0xff] }
  0x7e   :  { %v834_v24 = vadd.f32 %v754_v0, %v9976_v61  ;;  %v835_v63 = vadd.f32 %v756_v28, %v9977_v36  ;;  %v836_v21 = vadd.f32 %v759_v35, %v9978_v11  ;;  %v837_v10 = vadd.f32 %v761_v44, %v9979_v42  ;;  %v9986_v13 = vld [vmem:[#allocation113_spill] sm:$0xff]  ;;  %v9988_v0 = vld [vmem:[#allocation114_spill] sm:$0xff] }
  0x7f   :  { %v838_v27 = vadd.f32 %v764_v14, %v9980_v31  ;;  %v839_v4 = vadd.f32 %v766_v2, %v9981_v9  ;;  %v840_v40 = vadd.f32 %v769_v12, %v9982_v34  ;;  %v841_v33 = vadd.f32 %v771_v15, %v9983_v47 }
  0x80   :  { %v4992_v16 = vadd.f32 %v774_v18, %v9984_v53  ;;  %v4995_v8 = vadd.f32 %v776_v48, %v9986_v13  ;;  %v844_v28 = vadd.f32 %v779_v41, %v9988_v0  ;;  %v845_v35 = vadd.f32 %v781_v43, %v9989_v55 }
  0x81   :  { %v846_v44 = vadd.f32 %v816_v52, %v4955_v29  ;;  %v847_v14 = vadd.f32 %v817_v57, %v4960_v58  ;;  %v848_v30 = vadd.f32 %v818_v39, %v4955_v29  ;;  %v849_v59 = vadd.f32 %v819_v7, %v4960_v58 }
  0x82   :  { %9985 = vst [vmem:[#allocation98_spill] sm:$0xff] %v4992_v16  ;;  %9987 = vst [vmem:[#allocation99_spill] sm:$0xff] %v4995_v8  ;;  %v850_v2 = vadd.f32 %v820_v37, %v818_v39  ;;  %v851_v12 = vadd.f32 %v821_v3, %v819_v7  ;;  %v852_v15 = vadd.f32 %v822_v56, %v820_v37 }
  0x83   :  { %v853_v18 = vadd.f32 %v823_v60, %v821_v3  ;;  %v854_v17 = vadd.f32 %v824_v22, %v822_v56  ;;  %v855_v26 = vadd.f32 %v825_v1, %v823_v60  ;;  %v856_v48 = vadd.f32 %v826_v46, %v824_v22 }
  0x84   :  { %v857_v20 = vadd.f32 %v827_v23, %v825_v1  ;;  %v858_v38 = vadd.f32 %v828_v54, %v826_v46  ;;  %v859_v41 = vadd.f32 %v829_v25, %v827_v23  ;;  %v860_v49 = vadd.f32 %v830_v32, %v828_v54 }
  0x85   :  { %v861_v43 = vadd.f32 %v831_v6, %v829_v25  ;;  %v862_v62 = vadd.f32 %v832_v19, %v830_v32  ;;  %v863_v52 = vadd.f32 %v833_v51, %v831_v6  ;;  %v864_v61 = vadd.f32 %v834_v24, %v832_v19 }
  0x86   :  { %v865_v57 = vadd.f32 %v835_v63, %v833_v51  ;;  %v866_v36 = vadd.f32 %v836_v21, %v834_v24  ;;  %v867_v11 = vadd.f32 %v837_v10, %v835_v63  ;;  %v868_v42 = vadd.f32 %v838_v27, %v836_v21 }
  0x87   :  { %v869_v31 = vadd.f32 %v839_v4, %v837_v10  ;;  %v870_v9 = vadd.f32 %v840_v40, %v838_v27  ;;  %v871_v34 = vadd.f32 %v841_v33, %v839_v4  ;;  %v872_v47 = vadd.f32 %v4992_v16, %v840_v40 }
  0x88   :  { %v873_v53 = vadd.f32 %v4995_v8, %v841_v33  ;;  %v874_v13 = vadd.f32 %v844_v28, %v4992_v16  ;;  %v875_v0 = vadd.f32 %v845_v35, %v4995_v8  ;;  %v876_v55 = vadd.f32 %v846_v44, %v4955_v29 }
  0x89   :  { %v877_v45 = vadd.f32 %v847_v14, %v4960_v58  ;;  %v878_v50 = vadd.f32 %v846_v44, %v818_v39  ;;  %v879_v5 = vadd.f32 %v847_v14, %v819_v7  ;;  %v880_v16 = vadd.f32 %v848_v30, %v820_v37 }
  0x8a   :  { %v881_v8 = vadd.f32 %v849_v59, %v821_v3  ;;  %v882_v29 = vadd.f32 %v850_v2, %v822_v56  ;;  %v883_v58 = vadd.f32 %v851_v12, %v823_v60  ;;  %v884_v39 = vadd.f32 %v852_v15, %v824_v22 }
  0x8b   :  { %v885_v44 = vadd.f32 %v853_v18, %v825_v1  ;;  %v886_v7 = vadd.f32 %v854_v17, %v826_v46  ;;  %v887_v14 = vadd.f32 %v855_v26, %v827_v23  ;;  %v888_v30 = vadd.f32 %v856_v48, %v828_v54  ;;  %v9990_v23 = vld [vmem:[#allocation98_spill] sm:$0xff]  ;;  %v9991_v48 = vld [vmem:[#allocation99_spill] sm:$0xff] }
  0x8c   :  { %v889_v37 = vadd.f32 %v857_v20, %v829_v25  ;;  %v890_v3 = vadd.f32 %v858_v38, %v830_v32  ;;  %v891_v59 = vadd.f32 %v859_v41, %v831_v6  ;;  %v892_v2 = vadd.f32 %v860_v49, %v832_v19  ;;  %v10011_v49 = vld [vmem:[#allocation6_spill] sm:$0xff] }
  0x8d   :  { %v893_v56 = vadd.f32 %v861_v43, %v833_v51  ;;  %v894_v12 = vadd.f32 %v862_v62, %v834_v24  ;;  %v895_v60 = vadd.f32 %v863_v52, %v835_v63  ;;  %v896_v15 = vadd.f32 %v864_v61, %v836_v21  ;;  %v9996_v21 = vld [vmem:[#allocation2_spill] sm:$0xff] }
  0x8e   :  { %v897_v22 = vadd.f32 %v865_v57, %v837_v10  ;;  %v898_v1 = vadd.f32 %v866_v36, %v838_v27  ;;  %v899_v18 = vadd.f32 %v867_v11, %v839_v4  ;;  %v900_v17 = vadd.f32 %v868_v42, %v840_v40  ;;  %v10016_v57 = vld [vmem:[#allocation4_spill] sm:$0xff] }
  0x8f   :  { %v901_v46 = vadd.f32 %v869_v31, %v841_v33  ;;  %v902_v26 = vadd.f32 %v870_v9, %v9990_v23  ;;  %v903_v54 = vadd.f32 %v871_v34, %v9991_v48  ;;  %v904_v20 = vadd.f32 %v872_v47, %v844_v28  ;;  %v10001_v33 = vld [vmem:[#allocation3_spill] sm:$0xff] }
  0x90   :  { %v905_v25 = vadd.f32 %v873_v53, %v845_v35  ;;  %v906_v32 = vadd.f32 %v874_v13, %v9990_v23  ;;  %v907_v6 = vadd.f32 %v875_v0, %v9991_v48  ;;  %v5013_v19 = vmul.f32 0.11111111, %v876_v55  ;;  %v10006_v35 = vld [vmem:[#allocation34_spill] sm:$0xff]  ;;  %v10021_v9 = vld [vmem:[#allocation35_spill] sm:$0xff]  ;;  %v10026_v0 = vld [vmem:[#allocation12_spill] sm:$0xff] }
  0x91   :  { %v5015_v51 = vmul.f32 0.11111111, %v877_v45  ;;  %v5017_v24 = vmul.f32 0.11111111, %v878_v50  ;;  %v5019_v63 = vmul.f32 0.11111111, %v879_v5  ;;  %v5023_v10 = vmul.f32 %v9996_v21, %v9996_v21 }
  0x92   :  { %9992 = vst [vmem:[#allocation100_spill] sm:$0xff] %v5013_v19  ;;  %v5025_v27 = vmul.f32 0.11111111, %v880_v16  ;;  %v5027_v4 = vmul.f32 0.11111111, %v881_v8  ;;  %v5033_v28 = vmul.f32 %v10001_v33, %v10001_v33  ;;  %v5043_v38 = vmul.f32 %v10006_v35, %v10006_v35  ;;  %v10051_v33 = vld [vmem:[#allocation55_spill] sm:$0xff] }
  0x93   :  { %9993 = vst [vmem:[#allocation101_spill] sm:$0xff] %v5015_v51  ;;  %9994 = vst [vmem:[#allocation102_spill] sm:$0xff] %v5017_v24  ;;  %v5029_v40 = vmul.f32 0.11111111, %v882_v29  ;;  %v5035_v45 = vmul.f32 0.11111111, %v883_v58  ;;  %v5053_v43 = vmul.f32 %v10011_v49, %v10011_v49  ;;  %v5063_v36 = vmul.f32 %v10016_v57, %v10016_v57 }
  0x94   :  { %9995 = vst [vmem:[#allocation103_spill] sm:$0xff] %v5019_v63  ;;  %9997 = vst [vmem:[#allocation104_spill] sm:$0xff] %v5023_v10  ;;  %v5037_v50 = vmul.f32 0.11111111, %v884_v39  ;;  %v5039_v5 = vmul.f32 0.11111111, %v885_v44  ;;  %v5073_v34 = vmul.f32 %v10021_v9, %v10021_v9  ;;  %v5083_v55 = vmul.f32 %v10026_v0, %v10026_v0 }
  0x95   :  { %9998 = vst [vmem:[#allocation105_spill] sm:$0xff] %v5025_v27  ;;  %9999 = vst [vmem:[#allocation106_spill] sm:$0xff] %v5027_v4  ;;  %v5045_v16 = vmul.f32 0.11111111, %v886_v7  ;;  %v5047_v8 = vmul.f32 0.11111111, %v887_v14 }
  0x96   :  { %10000 = vst [vmem:[#allocation107_spill] sm:$0xff] %v5029_v40  ;;  %10002 = vst [vmem:[#allocation108_spill] sm:$0xff] %v5033_v28  ;;  %v5049_v41 = vmul.f32 0.11111111, %v888_v30  ;;  %v5055_v62 = vmul.f32 0.11111111, %v889_v37 }
  0x97   :  { %10003 = vst [vmem:[#allocation109_spill] sm:$0xff] %v5035_v45  ;;  %10004 = vst [vmem:[#allocation110_spill] sm:$0xff] %v5037_v50  ;;  %v5057_v52 = vmul.f32 0.11111111, %v890_v3  ;;  %v5059_v61 = vmul.f32 0.11111111, %v891_v59 }
  0x98   :  { %10005 = vst [vmem:[#allocation111_spill] sm:$0xff] %v5039_v5  ;;  %10007 = vst [vmem:[#allocation112_spill] sm:$0xff] %v5043_v38  ;;  %v5065_v11 = vmul.f32 0.11111111, %v892_v2  ;;  %v5067_v42 = vmul.f32 0.11111111, %v893_v56 }
  0x99   :  { %10008 = vst [vmem:[#allocation113_spill] sm:$0xff] %v5045_v16  ;;  %10009 = vst [vmem:[#allocation114_spill] sm:$0xff] %v5047_v8  ;;  %v5069_v31 = vmul.f32 0.11111111, %v894_v12  ;;  %v5075_v47 = vmul.f32 0.11111111, %v895_v60 }
  0x9a   :  { %10010 = vst [vmem:[#allocation115_spill] sm:$0xff] %v5049_v41  ;;  %10012 = vst [vmem:[#allocation98_spill] sm:$0xff] %v5053_v43  ;;  %v5077_v53 = vmul.f32 0.11111111, %v896_v15  ;;  %v5079_v13 = vmul.f32 0.11111111, %v897_v22 }
  0x9b   :  { %10013 = vst [vmem:[#allocation99_spill] sm:$0xff] %v5055_v62  ;;  %10014 = vst [vmem:[#allocation116_spill] sm:$0xff] %v5057_v52  ;;  %v5085_v29 = vmul.f32 0.11111111, %v898_v1  ;;  %v5087_v58 = vmul.f32 0.11111111, %v899_v18 }
  0x9c   :  { %10015 = vst [vmem:[#allocation117_spill] sm:$0xff] %v5059_v61  ;;  %10017 = vst [vmem:[#allocation118_spill] sm:$0xff] %v5063_v36  ;;  %v10030_v39 = vld [vmem:[#allocation73_spill] sm:$0xff]  ;;  %v10031_v7 = vld [vmem:[#allocation50_spill] sm:$0xff]  ;;  %v5091_v30 = vmul.f32 0.11111111, %v900_v17 }
  0x9d   :  { %10018 = vst [vmem:[#allocation119_spill] sm:$0xff] %v5065_v11  ;;  %10019 = vst [vmem:[#allocation120_spill] sm:$0xff] %v5067_v42  ;;  %v972_v44 = vrot.slane %v10030_v39, 1  ;;  %v973_v14 = vrot.slane %v10031_v7, 1  ;;  %v5093_v37 = vmul.f32 0.11111111, %v901_v46 }
  0x9e   :  { %10020 = vst [vmem:[#allocation121_spill] sm:$0xff] %v5069_v31  ;;  %10022 = vst [vmem:[#allocation122_spill] sm:$0xff] %v5073_v34  ;;  %v10034_v3 = vld [vmem:[#allocation89_spill] sm:$0xff]  ;;  %v5100_v12 = vmul.f32 0.11111111, %v902_v26  ;;  %v10038_v60 = vld [vmem:[#allocation74_spill] sm:$0xff] }
  0x9f   :  { %10023 = vst [vmem:[#allocation123_spill] sm:$0xff] %v5075_v47  ;;  %10024 = vst [vmem:[#allocation124_spill] sm:$0xff] %v5077_v53  ;;  %v975_v59 = vrot.slane %v10034_v3, 1  ;;  %v10035_v2 = vld [vmem:[#allocation5_spill] sm:$0xff]  ;;  %v977_v15 = vrot.slane %v10038_v60, 1  ;;  %v10039_v22 = vld [vmem:[#allocation52_spill] sm:$0xff]  ;;  %v5120_v57 = vsel %vm556_vm1, %v972_v44, %v973_v14 }
  0xa0   :  { %10025 = vst [vmem:[#allocation125_spill] sm:$0xff] %v5079_v13  ;;  %10027 = vst [vmem:[#allocation126_spill] sm:$0xff] %v5083_v55  ;;  %v5098_v56 = vmul.f32 %v10035_v2, %v10035_v2  ;;  %v978_v1 = vrot.slane %v10039_v22, 1  ;;  %v10040_v18 = vld [vmem:[#allocation90_spill] sm:$0xff]  ;;  %v5105_v48 = vmul.f32 0.11111111, %v903_v54 }
  0xa1   :  { %10028 = vst [vmem:[#allocation127_spill] sm:$0xff] %v5085_v29  ;;  %10029 = vst [vmem:[#allocation128_spill] sm:$0xff] %v5087_v58  ;;  %v980_v23 = vrot.slane %v10040_v18, 1  ;;  %v5107_v17 = vmul.f32 0.11111111, %v904_v20  ;;  %v10044_v0 = vld [vmem:[#allocation36_spill] sm:$0xff]  ;;  %v5127_v54 = vsel %vm556_vm1, %v973_v14, %v975_v59 }
  0xa2   :  { %10032 = vst [vmem:[#allocation129_spill] sm:$0xff] %v5091_v30  ;;  %10033 = vst [vmem:[#allocation130_spill] sm:$0xff] %v5093_v37  ;;  %v5109_v46 = vmul.f32 0.11111111, %v905_v25  ;;  %v5113_v9 = vmul.f32 %v10044_v0, %v10044_v0  ;;  %v5115_v2 = vmul.f32 0.11111111, %v906_v32  ;;  %v5133_v32 = vsel %vm556_vm1, %v977_v15, %v978_v1 }
  0xa3   :  { %10036 = vst [vmem:[#allocation131_spill] sm:$0xff] %v5098_v56  ;;  %10037 = vst [vmem:[#allocation132_spill] sm:$0xff] %v5100_v12  ;;  %v5117_v26 = vmul.f32 0.11111111, %v907_v6  ;;  %v10048_v49 = vld [vmem:[#allocation21_spill] sm:$0xff]  ;;  %v10050_v20 = vld [vmem:[#allocation75_spill] sm:$0xff]  ;;  %v5136_v6 = vsel %vm556_vm1, %v978_v1, %v980_v23 }
  0xa4   :  { %10041 = vst [vmem:[#allocation133_spill] sm:$0xff] %v5105_v48  ;;  %10042 = vst [vmem:[#allocation134_spill] sm:$0xff] %v5107_v17  ;;  %v5124_v35 = vmul.f32 %v10048_v49, %v10048_v49  ;;  %v982_v25 = vrot.slane %v10050_v20, 1  ;;  %v983_v21 = vrot.slane %v10051_v33, 1  ;;  %v10052_v0 = vld [vmem:[#allocation91_spill] sm:$0xff]  ;;  %v10053_v44 = vld [vmem:[#allocation76_spill] sm:$0xff] }
  0xa5   :  { %10043 = vst [vmem:[#allocation135_spill] sm:$0xff] %v5109_v46  ;;  %10045 = vst [vmem:[#allocation136_spill] sm:$0xff] %v5113_v9  ;;  %v985_v46 = vrot.slane %v10052_v0, 1  ;;  %v10055_v17 = vld [vmem:[#allocation92_spill] sm:$0xff]  ;;  %v10056_v14 = vld [vmem:[#allocation77_spill] sm:$0xff] }
  0xa6   :  { %10046 = vst [vmem:[#allocation137_spill] sm:$0xff] %v5115_v2  ;;  %10047 = vst [vmem:[#allocation138_spill] sm:$0xff] %v5117_v26  ;;  %v987_v26 = vrot.slane %v10053_v44, 1  ;;  %v10054_v2 = vld [vmem:[#allocation60_spill] sm:$0xff]  ;;  %v990_v48 = vrot.slane %v10055_v17, 1  ;;  %v992_v59 = vrot.slane %v10056_v14, 1  ;;  %v984_v5 = vsel %vm556_vm1, %v982_v25, %v983_v21 }
  0xa7   :  { %10049 = vst [vmem:[#allocation139_spill] sm:$0xff] %v5124_v35  ;;  %v988_v49 = vrot.slane %v10054_v2, 1  ;;  %v10057_v12 = vld [vmem:[#allocation61_spill] sm:$0xff]  ;;  %v10059_v29 = vld [vmem:[#allocation78_spill] sm:$0xff]  ;;  %v10062_v1 = vld [vmem:[#allocation79_spill] sm:$0xff]  ;;  %v986_v24 = vsel %vm556_vm1, %v983_v21, %v985_v46 }
  0xa8   :  { %v993_v37 = vrot.slane %v10057_v12, 1  ;;  %v10058_v30 = vld [vmem:[#allocation93_spill] sm:$0xff]  ;;  %v997_v13 = vrot.slane %v10059_v29, 1  ;;  %v10060_v53 = vld [vmem:[#allocation62_spill] sm:$0xff]  ;;  %v1002_v23 = vrot.slane %v10062_v1, 1  ;;  %v10063_v42 = vld [vmem:[#allocation63_spill] sm:$0xff] }
  0xa9   :  { %v995_v58 = vrot.slane %v10058_v30, 1  ;;  %v998_v15 = vrot.slane %v10060_v53, 1  ;;  %v10061_v47 = vld [vmem:[#allocation94_spill] sm:$0xff]  ;;  %v1003_v11 = vrot.slane %v10063_v42, 1  ;;  %v10064_v61 = vld [vmem:[#allocation95_spill] sm:$0xff]  ;;  %v10065_v62 = vld [vmem:[#allocation80_spill] sm:$0xff]  ;;  %v989_v51 = vsel %vm556_vm1, %v987_v26, %v988_v49 }
  0xaa   :  { %v1000_v31 = vrot.slane %v10061_v47, 1  ;;  %v1005_v52 = vrot.slane %v10064_v61, 1  ;;  %v1007_v41 = vrot.slane %v10065_v62, 1  ;;  %v10066_v8 = vld [vmem:[#allocation64_spill] sm:$0xff]  ;;  %v10068_v40 = vld [vmem:[#allocation81_spill] sm:$0xff]  ;;  %v991_v19 = vsel %vm556_vm1, %v988_v49, %v990_v48  ;;  %v10071_v46 = vld [vmem:[#allocation82_spill] sm:$0xff] }
  0xab   :  { %v1008_v16 = vrot.slane %v10066_v8, 1  ;;  %v10067_v50 = vld [vmem:[#allocation96_spill] sm:$0xff]  ;;  %v1012_v4 = vrot.slane %v10068_v40, 1  ;;  %v10069_v27 = vld [vmem:[#allocation65_spill] sm:$0xff]  ;;  %v994_v56 = vsel %vm556_vm1, %v992_v59, %v993_v37  ;;  %v996_v55 = vsel %vm556_vm1, %v993_v37, %v995_v58  ;;  %v10072_v38 = vld [vmem:[#allocation66_spill] sm:$0xff] }
  0xac   :  { %v1010_v45 = vrot.slane %v10067_v50, 1  ;;  %v1013_v63 = vrot.slane %v10069_v27, 1  ;;  %v10070_v35 = vld [vmem:[#allocation97_spill] sm:$0xff]  ;;  %v999_v25 = vsel %vm556_vm1, %v997_v13, %v998_v15  ;;  %v1001_v34 = vsel %vm556_vm1, %v998_v15, %v1000_v31  ;;  %v10073_v28 = vld [vmem:[#allocation51_spill] sm:$0xff]  ;;  %v10079_v61 = vld [vmem:[#allocation54_spill] sm:$0xff] }
  0xad   :  { %v1015_v9 = vrot.slane %v10070_v35, 1  ;;  %v1004_v36 = vsel %vm556_vm1, %v1002_v23, %v1003_v11  ;;  %v1006_v43 = vsel %vm556_vm1, %v1003_v11, %v1005_v52  ;;  %v1009_v21 = vsel %vm556_vm1, %v1007_v41, %v1008_v16  ;;  %v10074_v37 = vld [vmem:[#allocation83_spill] sm:$0xff]  ;;  %v10076_v10 = vld [vmem:[#allocation53_spill] sm:$0xff]  ;;  %v10077_v11 = vld [vmem:[#allocation84_spill] sm:$0xff] }
  0xae   :  { %v1017_v26 = vrot.slane %v10071_v46, 1  ;;  %v1011_v49 = vsel %vm556_vm1, %v1008_v16, %v1010_v45  ;;  %v1014_v48 = vsel %vm556_vm1, %v1012_v4, %v1013_v63  ;;  %v1018_v59 = vrot.slane %v10072_v38, 1  ;;  %v10075_v15 = vld [vmem:[#allocation67_spill] sm:$0xff]  ;;  %v10078_v35 = vld [vmem:[#allocation68_spill] sm:$0xff]  ;;  %v10080_v16 = vld [vmem:[#allocation85_spill] sm:$0xff] }
  0xaf   :  { %v1020_v58 = vrot.slane %v10073_v28, 1  ;;  %v1016_v13 = vsel %vm556_vm1, %v1013_v63, %v1015_v9  ;;  %v1022_v31 = vrot.slane %v10074_v37, 1  ;;  %v1023_v23 = vrot.slane %v10075_v15, 1  ;;  %v10081_v47 = vld [vmem:[#allocation69_spill] sm:$0xff]  ;;  %v10082_v17 = vld [vmem:[#allocation56_spill] sm:$0xff]  ;;  %v10083_v0 = vld [vmem:[#allocation86_spill] sm:$0xff] }
  0xb0   :  { %v1025_v52 = vrot.slane %v10076_v10, 1  ;;  %v1027_v41 = vrot.slane %v10077_v11, 1  ;;  %v1028_v50 = vrot.slane %v10078_v35, 1  ;;  %v1030_v45 = vrot.slane %v10079_v61, 1  ;;  %v10084_v9 = vld [vmem:[#allocation70_spill] sm:$0xff]  ;;  %v10085_v3 = vld [vmem:[#allocation57_spill] sm:$0xff] }
  0xb1   :  { %v1032_v4 = vrot.slane %v10080_v16, 1  ;;  %v1033_v30 = vrot.slane %v10081_v47, 1  ;;  %v1035_v28 = vrot.slane %v10082_v17, 1  ;;  %v1037_v63 = vrot.slane %v10083_v0, 1  ;;  %v10086_v37 = vld [vmem:[#allocation87_spill] sm:$0xff]  ;;  %v10088_v46 = vld [vmem:[#allocation58_spill] sm:$0xff] }
  0xb2   :  { %v1038_v18 = vrot.slane %v10084_v9, 1  ;;  %v1040_v15 = vrot.slane %v10085_v3, 1  ;;  %v1042_v10 = vrot.slane %v10086_v37, 1  ;;  %v10087_v38 = vld [vmem:[#allocation71_spill] sm:$0xff]  ;;  %v1045_v35 = vrot.slane %v10088_v46, 1  ;;  %v10089_v27 = vld [vmem:[#allocation88_spill] sm:$0xff] }
  0xb3   :  { %v1043_v11 = vrot.slane %v10087_v38, 1  ;;  %v1019_v61 = vsel %vm556_vm1, %v1017_v26, %v1018_v59  ;;  %v1021_v16 = vsel %vm556_vm1, %v1018_v59, %v1020_v58  ;;  %v1047_v47 = vrot.slane %v10089_v27, 1  ;;  %v10090_v40 = vld [vmem:[#allocation72_spill] sm:$0xff]  ;;  %v10091_v8 = vld [vmem:[#allocation59_spill] sm:$0xff] }
  0xb4   :  { %v1048_v17 = vrot.slane %v10090_v40, 1  ;;  %v1024_v0 = vsel %vm556_vm1, %v1022_v31, %v1023_v23  ;;  %v1026_v9 = vsel %vm556_vm1, %v1023_v23, %v1025_v52  ;;  %v1029_v3 = vsel %vm556_vm1, %v1027_v41, %v1028_v50 }
  0xb5   :  { %v1050_v37 = vrot.slane %v10091_v8, 1  ;;  %v1031_v38 = vsel %vm556_vm1, %v1028_v50, %v1030_v45  ;;  %v1034_v46 = vsel %vm556_vm1, %v1032_v4, %v1033_v30  ;;  %v1036_v26 = vsel %vm556_vm1, %v1033_v30, %v1035_v28  ;;  %v10105_v4 = vld [vmem:[#allocation67_spill] sm:$0xff] }
  0xb6   :  { %v1039_v59 = vsel %vm556_vm1, %v1037_v63, %v1038_v18  ;;  %v1041_v58 = vsel %vm556_vm1, %v1038_v18, %v1040_v15  ;;  %v1044_v40 = vsel %vm556_vm1, %v1042_v10, %v1043_v11  ;;  %v1046_v31 = vsel %vm556_vm1, %v1043_v11, %v1045_v35 }
  0xb7   :  { %v5205_v23 = vadd.f32 %v5120_v57, %v10030_v39  ;;  %v1049_v52 = vsel %vm556_vm1, %v1047_v47, %v1048_v17  ;;  %v5210_v50 = vadd.f32 %v5127_v54, %v10031_v7  ;;  %v5214_v28 = vadd.f32 %v5133_v32, %v10038_v60 }
  0xb8   :  { %v5218_v30 = vadd.f32 %v5136_v6, %v10039_v22  ;;  %v1051_v10 = vsel %vm556_vm1, %v1048_v17, %v1050_v37  ;;  %v5222_v35 = vadd.f32 %v984_v5, %v10050_v20  ;;  %v5225_v57 = vadd.f32 %v986_v24, %v10051_v33 }
  0xb9   :  { %v5228_v47 = vadd.f32 %v989_v51, %v10053_v44  ;;  %v5231_v18 = vadd.f32 %v991_v19, %v10054_v2  ;;  %v5234_v54 = vadd.f32 %v994_v56, %v10056_v14  ;;  %v5237_v32 = vadd.f32 %v996_v55, %v10057_v12  ;;  %v10093_v56 = vld [vmem:[#allocation64_spill] sm:$0xff]  ;;  %v10095_v55 = vld [vmem:[#allocation81_spill] sm:$0xff] }
  0xba   :  { %v5240_v17 = vadd.f32 %v999_v25, %v10059_v29  ;;  %v5243_v5 = vadd.f32 %v1001_v34, %v10060_v53  ;;  %v5246_v24 = vadd.f32 %v1004_v36, %v10062_v1  ;;  %v5249_v51 = vadd.f32 %v1006_v43, %v10063_v42  ;;  %v10097_v25 = vld [vmem:[#allocation65_spill] sm:$0xff]  ;;  %v10099_v34 = vld [vmem:[#allocation82_spill] sm:$0xff]  ;;  %v10103_v43 = vld [vmem:[#allocation83_spill] sm:$0xff] }
  0xbb   :  { %v5252_v19 = vadd.f32 %v1009_v21, %v10065_v62  ;;  %v5255_v6 = vadd.f32 %v1011_v49, %v10093_v56  ;;  %v5258_v37 = vadd.f32 %v1014_v48, %v10095_v55  ;;  %v5261_v15 = vadd.f32 %v1016_v13, %v10097_v25  ;;  %v10101_v36 = vld [vmem:[#allocation66_spill] sm:$0xff]  ;;  %v10107_v48 = vld [vmem:[#allocation84_spill] sm:$0xff] }
  0xbc   :  { %v5264_v11 = vadd.f32 %v1019_v61, %v10099_v34  ;;  %v5267_v41 = vadd.f32 %v1021_v16, %v10101_v36  ;;  %v5270_v45 = vadd.f32 %v1024_v0, %v10103_v43  ;;  %v1116_v21 = vrot.slane %v10030_v39, 2  ;;  %v10109_v13 = vld [vmem:[#allocation68_spill] sm:$0xff]  ;;  %v10111_v61 = vld [vmem:[#allocation89_spill] sm:$0xff] }
  0xbd   :  { %10092 = vst [vmem:[#allocation140_spill] sm:$0xff] %v5252_v19  ;;  %10094 = vst [vmem:[#allocation141_spill] sm:$0xff] %v5255_v6  ;;  %v1117_v49 = vrot.slane %v10031_v7, 2  ;;  %v5275_v63 = vadd.f32 %v1026_v9, %v10105_v4  ;;  %v10112_v16 = vld [vmem:[#allocation85_spill] sm:$0xff]  ;;  %v1121_v0 = vrot.slane %v10038_v60, 2  ;;  %v1122_v39 = vrot.slane %v10039_v22, 2 }
  0xbe   :  { %10096 = vst [vmem:[#allocation142_spill] sm:$0xff] %v5258_v37  ;;  %10098 = vst [vmem:[#allocation143_spill] sm:$0xff] %v5261_v15  ;;  %v5278_v37 = vadd.f32 %v1029_v3, %v10107_v48  ;;  %v5281_v15 = vadd.f32 %v1031_v38, %v10109_v13  ;;  %v10115_v6 = vld [vmem:[#allocation69_spill] sm:$0xff]  ;;  %v5306_v60 = vadd.f32 %v1049_v52, %v10089_v27  ;;  %v10126_v22 = vld [vmem:[#allocation72_spill] sm:$0xff] }
  0xbf   :  { %10100 = vst [vmem:[#allocation144_spill] sm:$0xff] %v5264_v11  ;;  %10102 = vst [vmem:[#allocation145_spill] sm:$0xff] %v5267_v41  ;;  %v1119_v11 = vrot.slane %v10111_v61, 2  ;;  %v5285_v41 = vadd.f32 %v1034_v46, %v10112_v16  ;;  %v5291_v9 = vadd.f32 %v1036_v26, %v10115_v6  ;;  %v10123_v46 = vld [vmem:[#allocation71_spill] sm:$0xff]  ;;  %v5312_v26 = vsel %vm701_vm2, %v1116_v21, %v1117_v49  ;;  %v10134_v19 = vld [vmem:[#allocation97_spill] sm:$0xff] }
  0xc0   :  { %10104 = vst [vmem:[#allocation146_spill] sm:$0xff] %v5270_v45  ;;  %10106 = vst [vmem:[#allocation147_spill] sm:$0xff] %v5275_v63  ;;  %v10114_v45 = vld [vmem:[#allocation90_spill] sm:$0xff]  ;;  %v1132_v21 = vrot.slane %v10054_v2, 2 }
  0xc1   :  { %10108 = vst [vmem:[#allocation148_spill] sm:$0xff] %v5278_v37  ;;  %10110 = vst [vmem:[#allocation149_spill] sm:$0xff] %v5281_v15  ;;  %v1124_v7 = vrot.slane %v10114_v45, 2  ;;  %v10117_v63 = vld [vmem:[#allocation86_spill] sm:$0xff]  ;;  %v10121_v15 = vld [vmem:[#allocation87_spill] sm:$0xff]  ;;  %v5309_v45 = vadd.f32 %v1051_v10, %v10126_v22  ;;  %v1131_v10 = vrot.slane %v10053_v44, 2 }
  0xc2   :  { %10113 = vst [vmem:[#allocation150_spill] sm:$0xff] %v5285_v41  ;;  %10116 = vst [vmem:[#allocation151_spill] sm:$0xff] %v5291_v9  ;;  %v5294_v3 = vadd.f32 %v1039_v59, %v10117_v63  ;;  %v10119_v37 = vld [vmem:[#allocation70_spill] sm:$0xff]  ;;  %v5300_v61 = vadd.f32 %v1044_v40, %v10121_v15  ;;  %v5303_v41 = vadd.f32 %v1046_v31, %v10123_v46  ;;  %v1127_v40 = vrot.slane %v10051_v33, 2  ;;  %v10132_v44 = vld [vmem:[#allocation95_spill] sm:$0xff] }
  0xc3   :  { %v5297_v38 = vadd.f32 %v1041_v58, %v10119_v37  ;;  %10125 = vst [vmem:[#allocation156_spill] sm:$0xff] %v5306_v60  ;;  %10127 = vst [vmem:[#allocation157_spill] sm:$0xff] %v5309_v45  ;;  %v5315_v59 = vsel %vm701_vm2, %v1117_v49, %v1119_v11  ;;  %v1126_v58 = vrot.slane %v10050_v20, 2  ;;  %v5321_v31 = vsel %vm701_vm2, %v1121_v0, %v1122_v39  ;;  %v10129_v45 = vld [vmem:[#allocation92_spill] sm:$0xff]  ;;  %v10130_v20 = vld [vmem:[#allocation93_spill] sm:$0xff] }
  0xc4   :  { %10118 = vst [vmem:[#allocation152_spill] sm:$0xff] %v5294_v3  ;;  %10122 = vst [vmem:[#allocation154_spill] sm:$0xff] %v5300_v61  ;;  %v10128_v61 = vld [vmem:[#allocation91_spill] sm:$0xff]  ;;  %v5324_v52 = vsel %vm701_vm2, %v1122_v39, %v1124_v7  ;;  %v1134_v60 = vrot.slane %v10129_v45, 2  ;;  %v1136_v11 = vrot.slane %v10056_v14, 2  ;;  %v1137_v49 = vrot.slane %v10057_v12, 2 }
  0xc5   :  { %10120 = vst [vmem:[#allocation153_spill] sm:$0xff] %v5297_v38  ;;  %10124 = vst [vmem:[#allocation155_spill] sm:$0xff] %v5303_v41  ;;  %v1129_v38 = vrot.slane %v10128_v61, 2  ;;  %v1139_v33 = vrot.slane %v10130_v20, 2  ;;  %v1141_v61 = vrot.slane %v10059_v29, 2  ;;  %v1142_v0 = vrot.slane %v10060_v53, 2 }
  0xc6   :  { %v10131_v41 = vld [vmem:[#allocation94_spill] sm:$0xff]  ;;  %v1146_v39 = vrot.slane %v10062_v1, 2  ;;  %v1147_v7 = vrot.slane %v10063_v42, 2  ;;  %v1149_v2 = vrot.slane %v10132_v44, 2  ;;  %v1151_v45 = vrot.slane %v10065_v62, 2  ;;  %v10133_v9 = vld [vmem:[#allocation96_spill] sm:$0xff] }
  0xc7   :  { %v1144_v3 = vrot.slane %v10131_v41, 2  ;;  %v1152_v14 = vrot.slane %v10093_v56, 2  ;;  %v1128_v12 = vsel %vm701_vm2, %v1126_v58, %v1127_v40  ;;  %v1154_v20 = vrot.slane %v10133_v9, 2 }
  0xc8   :  { %v1156_v29 = vrot.slane %v10095_v55, 2  ;;  %v1157_v53 = vrot.slane %v10097_v25, 2  ;;  %v1130_v41 = vsel %vm701_vm2, %v1127_v40, %v1129_v38  ;;  %v1133_v1 = vsel %vm701_vm2, %v1131_v10, %v1132_v21 }
  0xc9   :  { %v1135_v42 = vsel %vm701_vm2, %v1132_v21, %v1134_v60  ;;  %v1159_v44 = vrot.slane %v10134_v19, 2  ;;  %v1138_v62 = vsel %vm701_vm2, %v1136_v11, %v1137_v49  ;;  %v1140_v56 = vsel %vm701_vm2, %v1137_v49, %v1139_v33  ;;  %v10135_v11 = vld [vmem:[#allocation51_spill] sm:$0xff] }
  0xca   :  { %v1143_v58 = vsel %vm701_vm2, %v1141_v61, %v1142_v0  ;;  %v1145_v9 = vsel %vm701_vm2, %v1142_v0, %v1144_v3  ;;  %v1148_v55 = vsel %vm701_vm2, %v1146_v39, %v1147_v7  ;;  %v1150_v25 = vsel %vm701_vm2, %v1147_v7, %v1149_v2  ;;  %v10136_v0 = vld [vmem:[#allocation53_spill] sm:$0xff]  ;;  %v10137_v7 = vld [vmem:[#allocation54_spill] sm:$0xff] }
  0xcb   :  { %v1153_v38 = vsel %vm701_vm2, %v1151_v45, %v1152_v14  ;;  %v1161_v40 = vrot.slane %v10099_v34, 2  ;;  %v1155_v60 = vsel %vm701_vm2, %v1152_v14, %v1154_v20  ;;  %v1158_v10 = vsel %vm701_vm2, %v1156_v29, %v1157_v53  ;;  %v10140_v34 = vld [vmem:[#allocation58_spill] sm:$0xff] }
  0xcc   :  { %v1162_v21 = vrot.slane %v10101_v36, 2  ;;  %v1164_v33 = vrot.slane %v10135_v11, 2  ;;  %v1160_v61 = vsel %vm701_vm2, %v1157_v53, %v1159_v44  ;;  %v1166_v3 = vrot.slane %v10103_v43, 2  ;;  %v10138_v36 = vld [vmem:[#allocation56_spill] sm:$0xff]  ;;  %v10139_v43 = vld [vmem:[#allocation57_spill] sm:$0xff] }
  0xcd   :  { %v1167_v49 = vrot.slane %v10105_v4, 2  ;;  %v1169_v2 = vrot.slane %v10136_v0, 2  ;;  %v1171_v45 = vrot.slane %v10107_v48, 2  ;;  %v1172_v39 = vrot.slane %v10109_v13, 2 }
  0xce   :  { %v1174_v20 = vrot.slane %v10137_v7, 2  ;;  %v1176_v29 = vrot.slane %v10112_v16, 2  ;;  %v1177_v14 = vrot.slane %v10115_v6, 2  ;;  %v1179_v11 = vrot.slane %v10138_v36, 2 }
  0xcf   :  { %v1181_v53 = vrot.slane %v10117_v63, 2  ;;  %v1182_v44 = vrot.slane %v10119_v37, 2  ;;  %v1184_v4 = vrot.slane %v10139_v43, 2  ;;  %v1186_v0 = vrot.slane %v10121_v15, 2 }
  0xd0   :  { %v1187_v48 = vrot.slane %v10123_v46, 2  ;;  %v1189_v13 = vrot.slane %v10140_v34, 2  ;;  %v1163_v7 = vsel %vm701_vm2, %v1161_v40, %v1162_v21  ;;  %v1165_v16 = vsel %vm701_vm2, %v1162_v21, %v1164_v33 }
  0xd1   :  { %v1191_v6 = vrot.slane %v10089_v27, 2  ;;  %v1192_v36 = vrot.slane %v10126_v22, 2  ;;  %v1168_v63 = vsel %vm701_vm2, %v1166_v3, %v1167_v49  ;;  %v1170_v37 = vsel %vm701_vm2, %v1167_v49, %v1169_v2 }
  0xd2   :  { %v1173_v43 = vsel %vm701_vm2, %v1171_v45, %v1172_v39  ;;  %v1194_v15 = vrot.slane %v10091_v8, 2  ;;  %v1175_v46 = vsel %vm701_vm2, %v1172_v39, %v1174_v20  ;;  %v1178_v34 = vsel %vm701_vm2, %v1176_v29, %v1177_v14  ;;  %v10154_v39 = vld [vmem:[#allocation153_spill] sm:$0xff]  ;;  %v10155_v20 = vld [vmem:[#allocation154_spill] sm:$0xff] }
  0xd3   :  { %v1180_v40 = vsel %vm701_vm2, %v1177_v14, %v1179_v11  ;;  %v1183_v21 = vsel %vm701_vm2, %v1181_v53, %v1182_v44  ;;  %v1185_v33 = vsel %vm701_vm2, %v1182_v44, %v1184_v4  ;;  %v1188_v22 = vsel %vm701_vm2, %v1186_v0, %v1187_v48  ;;  %v10160_v14 = vld [vmem:[#allocation157_spill] sm:$0xff] }
  0xd4   :  { %v1190_v3 = vsel %vm701_vm2, %v1187_v48, %v1189_v13  ;;  %v5393_v49 = vadd.f32 %v5312_v26, %v5205_v23  ;;  %v1193_v2 = vsel %vm701_vm2, %v1191_v6, %v1192_v36  ;;  %v5398_v45 = vadd.f32 %v5315_v59, %v5210_v50 }
  0xd5   :  { %v1230_v11 = vadd.f32 %v5321_v31, %v5214_v28  ;;  %v1231_v4 = vadd.f32 %v5324_v52, %v5218_v30  ;;  %v1195_v0 = vsel %vm701_vm2, %v1192_v36, %v1194_v15  ;;  %v1232_v48 = vadd.f32 %v1128_v12, %v5222_v35  ;;  %v10141_v36 = vld [vmem:[#allocation140_spill] sm:$0xff]  ;;  %v10142_v35 = vld [vmem:[#allocation141_spill] sm:$0xff]  ;;  %v10148_v31 = vld [vmem:[#allocation147_spill] sm:$0xff] }
  0xd6   :  { %v1233_v13 = vadd.f32 %v1130_v41, %v5225_v57  ;;  %v1234_v23 = vadd.f32 %v1133_v1, %v5228_v47  ;;  %v1235_v6 = vadd.f32 %v1135_v42, %v5231_v18  ;;  %v1236_v26 = vadd.f32 %v1138_v62, %v5234_v54  ;;  %v10143_v41 = vld [vmem:[#allocation142_spill] sm:$0xff]  ;;  %v10144_v47 = vld [vmem:[#allocation143_spill] sm:$0xff]  ;;  %v10145_v18 = vld [vmem:[#allocation144_spill] sm:$0xff] }
  0xd7   :  { %v1237_v50 = vadd.f32 %v1140_v56, %v5237_v32  ;;  %v1238_v59 = vadd.f32 %v1143_v58, %v5240_v17  ;;  %v1239_v28 = vadd.f32 %v1145_v9, %v5243_v5  ;;  %v1240_v30 = vadd.f32 %v1148_v55, %v5246_v24  ;;  %v10146_v54 = vld [vmem:[#allocation145_spill] sm:$0xff]  ;;  %v10147_v56 = vld [vmem:[#allocation146_spill] sm:$0xff]  ;;  %v10149_v9 = vld [vmem:[#allocation148_spill] sm:$0xff] }
  0xd8   :  { %v1241_v15 = vadd.f32 %v1150_v25, %v5249_v51  ;;  %v1242_v12 = vadd.f32 %v1153_v38, %v10141_v36  ;;  %v1243_v57 = vadd.f32 %v1155_v60, %v10142_v35  ;;  %v1244_v1 = vadd.f32 %v1158_v10, %v10143_v41  ;;  %v10150_v55 = vld [vmem:[#allocation149_spill] sm:$0xff]  ;;  %v10151_v25 = vld [vmem:[#allocation150_spill] sm:$0xff]  ;;  %v10152_v58 = vld [vmem:[#allocation151_spill] sm:$0xff] }
  0xd9   :  { %v1245_v42 = vadd.f32 %v1160_v61, %v10144_v47  ;;  %v1246_v62 = vadd.f32 %v1163_v7, %v10145_v18  ;;  %v1247_v32 = vadd.f32 %v1165_v16, %v10146_v54  ;;  %v1248_v17 = vadd.f32 %v1168_v63, %v10147_v56  ;;  %v10153_v60 = vld [vmem:[#allocation152_spill] sm:$0xff]  ;;  %v10157_v16 = vld [vmem:[#allocation155_spill] sm:$0xff] }
  0xda   :  { %v1249_v5 = vadd.f32 %v1170_v37, %v10148_v31  ;;  %v1250_v24 = vadd.f32 %v1173_v43, %v10149_v9  ;;  %v1251_v51 = vadd.f32 %v1175_v46, %v10150_v55  ;;  %v1252_v52 = vadd.f32 %v1178_v34, %v10151_v25  ;;  %v10159_v63 = vld [vmem:[#allocation156_spill] sm:$0xff] }
  0xdb   :  { %v1253_v38 = vadd.f32 %v1180_v40, %v10152_v58  ;;  %v1254_v10 = vadd.f32 %v1183_v21, %v10153_v60  ;;  %v1255_v61 = vadd.f32 %v1185_v33, %v10154_v39  ;;  %v5430_v7 = vadd.f32 %v1188_v22, %v10155_v20 }
  0xdc   :  { %v5433_v29 = vadd.f32 %v1190_v3, %v10157_v16  ;;  %v1258_v37 = vadd.f32 %v1193_v2, %v10159_v63  ;;  %v1259_v43 = vadd.f32 %v1195_v0, %v10160_v14  ;;  %v1260_v46 = vadd.f32 %v1230_v11, %v5393_v49 }
  0xdd   :  { %10156 = vst [vmem:[#allocation140_spill] sm:$0xff] %v5430_v7  ;;  %v1261_v34 = vadd.f32 %v1231_v4, %v5398_v45  ;;  %v1262_v53 = vadd.f32 %v1232_v48, %v5393_v49  ;;  %v1263_v44 = vadd.f32 %v1233_v13, %v5398_v45  ;;  %v1264_v40 = vadd.f32 %v1234_v23, %v1232_v48 }
  0xde   :  { %10158 = vst [vmem:[#allocation141_spill] sm:$0xff] %v5433_v29  ;;  %v1265_v21 = vadd.f32 %v1235_v6, %v1233_v13  ;;  %v1266_v33 = vadd.f32 %v1236_v26, %v1234_v23  ;;  %v1267_v22 = vadd.f32 %v1237_v50, %v1235_v6  ;;  %v1268_v36 = vadd.f32 %v1238_v59, %v1236_v26 }
  0xdf   :  { %v1269_v35 = vadd.f32 %v1239_v28, %v1237_v50  ;;  %v1270_v3 = vadd.f32 %v1240_v30, %v1238_v59  ;;  %v1271_v41 = vadd.f32 %v1241_v15, %v1239_v28  ;;  %v1272_v47 = vadd.f32 %v1242_v12, %v1240_v30 }
  0xe0   :  { %v1273_v2 = vadd.f32 %v1243_v57, %v1241_v15  ;;  %v1274_v18 = vadd.f32 %v1244_v1, %v1242_v12  ;;  %v1275_v0 = vadd.f32 %v1245_v42, %v1243_v57  ;;  %v1276_v54 = vadd.f32 %v1246_v62, %v1244_v1 }
  0xe1   :  { %v1277_v11 = vadd.f32 %v1247_v32, %v1245_v42  ;;  %v1278_v56 = vadd.f32 %v1248_v17, %v1246_v62  ;;  %v1279_v4 = vadd.f32 %v1249_v5, %v1247_v32  ;;  %v1280_v31 = vadd.f32 %v1250_v24, %v1248_v17 }
  0xe2   :  { %v1281_v9 = vadd.f32 %v1251_v51, %v1249_v5  ;;  %v1282_v55 = vadd.f32 %v1252_v52, %v1250_v24  ;;  %v1283_v25 = vadd.f32 %v1253_v38, %v1251_v51  ;;  %v1284_v58 = vadd.f32 %v1254_v10, %v1252_v52 }
  0xe3   :  { %v1285_v60 = vadd.f32 %v1255_v61, %v1253_v38  ;;  %v1286_v39 = vadd.f32 %v5430_v7, %v1254_v10  ;;  %v1287_v20 = vadd.f32 %v5433_v29, %v1255_v61  ;;  %v1288_v16 = vadd.f32 %v1258_v37, %v5430_v7 }
  0xe4   :  { %v1289_v63 = vadd.f32 %v1259_v43, %v5433_v29  ;;  %v1290_v14 = vadd.f32 %v1260_v46, %v5393_v49  ;;  %v1291_v8 = vadd.f32 %v1261_v34, %v5398_v45  ;;  %v1292_v27 = vadd.f32 %v1260_v46, %v1232_v48 }
  0xe5   :  { %v1293_v19 = vadd.f32 %v1261_v34, %v1233_v13  ;;  %v1294_v7 = vadd.f32 %v1262_v53, %v1234_v23  ;;  %v1295_v29 = vadd.f32 %v1263_v44, %v1235_v6  ;;  %v1296_v49 = vadd.f32 %v1264_v40, %v1236_v26 }
  0xe6   :  { %v1297_v45 = vadd.f32 %v1265_v21, %v1237_v50  ;;  %v1298_v46 = vadd.f32 %v1266_v33, %v1238_v59  ;;  %v1299_v48 = vadd.f32 %v1267_v22, %v1239_v28  ;;  %v1300_v13 = vadd.f32 %v1268_v36, %v1240_v30 }
  0xe7   :  { %v1301_v34 = vadd.f32 %v1269_v35, %v1241_v15  ;;  %v1302_v23 = vadd.f32 %v1270_v3, %v1242_v12  ;;  %v1303_v53 = vadd.f32 %v1271_v41, %v1243_v57  ;;  %v1304_v6 = vadd.f32 %v1272_v47, %v1244_v1  ;;  %v10161_v15 = vld [vmem:[#allocation140_spill] sm:$0xff]  ;;  %v10162_v3 = vld [vmem:[#allocation141_spill] sm:$0xff] }
  0xe8   :  { %v1305_v44 = vadd.f32 %v1273_v2, %v1245_v42  ;;  %v1306_v26 = vadd.f32 %v1274_v18, %v1246_v62  ;;  %v1307_v40 = vadd.f32 %v1275_v0, %v1247_v32  ;;  %v1308_v21 = vadd.f32 %v1276_v54, %v1248_v17  ;;  %v10181_v18 = vld [vmem:[#allocation8_spill] sm:$0xff] }
  0xe9   :  { %v1309_v50 = vadd.f32 %v1277_v11, %v1249_v5  ;;  %v1310_v33 = vadd.f32 %v1278_v56, %v1250_v24  ;;  %v1311_v59 = vadd.f32 %v1279_v4, %v1251_v51  ;;  %v1312_v22 = vadd.f32 %v1280_v31, %v1252_v52  ;;  %v10167_v24 = vld [vmem:[#allocation7_spill] sm:$0xff]  ;;  %v10186_v4 = vld [vmem:[#allocation38_spill] sm:$0xff] }
  0xea   :  { %v1313_v28 = vadd.f32 %v1281_v9, %v1253_v38  ;;  %v1314_v30 = vadd.f32 %v1282_v55, %v1254_v10  ;;  %v1315_v36 = vadd.f32 %v1283_v25, %v1255_v61  ;;  %v1316_v35 = vadd.f32 %v1284_v58, %v10161_v15  ;;  %v10171_v61 = vld [vmem:[#allocation37_spill] sm:$0xff]  ;;  %v10191_v58 = vld [vmem:[#allocation23_spill] sm:$0xff] }
  0xeb   :  { %v1317_v12 = vadd.f32 %v1285_v60, %v10162_v3  ;;  %v1318_v41 = vadd.f32 %v1286_v39, %v1258_v37  ;;  %v1319_v57 = vadd.f32 %v1287_v20, %v1259_v43  ;;  %v1320_v1 = vadd.f32 %v1288_v16, %v10161_v15  ;;  %v10176_v43 = vld [vmem:[#allocation22_spill] sm:$0xff]  ;;  %v10218_v15 = vld [vmem:[#allocation11_spill] sm:$0xff] }
  0xec   :  { %v1321_v42 = vadd.f32 %v1289_v63, %v10162_v3  ;;  %v5451_v62 = vmul.f32 0.11111111, %v1290_v14  ;;  %v5453_v32 = vmul.f32 0.11111111, %v1291_v8  ;;  %v5455_v17 = vmul.f32 0.11111111, %v1292_v27 }
  0xed   :  { %v5457_v5 = vmul.f32 0.11111111, %v1293_v19  ;;  %v5461_v51 = vmul.f32 %v10167_v24, %v10167_v24  ;;  %v5463_v52 = vmul.f32 0.11111111, %v1294_v7  ;;  %v5465_v38 = vmul.f32 0.11111111, %v1295_v29 }
  0xee   :  { %10163 = vst [vmem:[#allocation142_spill] sm:$0xff] %v5451_v62  ;;  %10164 = vst [vmem:[#allocation143_spill] sm:$0xff] %v5453_v32  ;;  %v5467_v10 = vmul.f32 0.11111111, %v1296_v49  ;;  %v5471_v37 = vmul.f32 %v10171_v61, %v10171_v61  ;;  %v5473_v8 = vmul.f32 0.11111111, %v1297_v45  ;;  %v5481_v47 = vmul.f32 %v10176_v43, %v10176_v43 }
  0xef   :  { %10165 = vst [vmem:[#allocation144_spill] sm:$0xff] %v5455_v17  ;;  %10166 = vst [vmem:[#allocation145_spill] sm:$0xff] %v5457_v5  ;;  %v5475_v27 = vmul.f32 0.11111111, %v1298_v46  ;;  %v5477_v19 = vmul.f32 0.11111111, %v1299_v48  ;;  %v5491_v0 = vmul.f32 %v10181_v18, %v10181_v18  ;;  %v5501_v31 = vmul.f32 %v10186_v4, %v10186_v4 }
  0xf0   :  { %10168 = vst [vmem:[#allocation146_spill] sm:$0xff] %v5463_v52  ;;  %10169 = vst [vmem:[#allocation147_spill] sm:$0xff] %v5465_v38  ;;  %v5483_v7 = vmul.f32 0.11111111, %v1300_v13  ;;  %v5485_v29 = vmul.f32 0.11111111, %v1301_v34  ;;  %v5511_v60 = vmul.f32 %v10191_v58, %v10191_v58 }
  0xf1   :  { %10170 = vst [vmem:[#allocation148_spill] sm:$0xff] %v5467_v10  ;;  %10172 = vst [vmem:[#allocation149_spill] sm:$0xff] %v5471_v37  ;;  %v5487_v2 = vmul.f32 0.11111111, %v1302_v23  ;;  %v5493_v54 = vmul.f32 0.11111111, %v1303_v53 }
  0xf2   :  { %10173 = vst [vmem:[#allocation150_spill] sm:$0xff] %v5473_v8  ;;  %10174 = vst [vmem:[#allocation151_spill] sm:$0xff] %v5475_v27  ;;  %v5495_v11 = vmul.f32 0.11111111, %v1304_v6  ;;  %v5497_v56 = vmul.f32 0.11111111, %v1305_v44 }
  0xf3   :  { %10175 = vst [vmem:[#allocation152_spill] sm:$0xff] %v5477_v19  ;;  %10177 = vst [vmem:[#allocation153_spill] sm:$0xff] %v5481_v47  ;;  %v5503_v9 = vmul.f32 0.11111111, %v1306_v26  ;;  %v5505_v55 = vmul.f32 0.11111111, %v1307_v40 }
  0xf4   :  { %10178 = vst [vmem:[#allocation154_spill] sm:$0xff] %v5483_v7  ;;  %10179 = vst [vmem:[#allocation155_spill] sm:$0xff] %v5485_v29  ;;  %v5507_v25 = vmul.f32 0.11111111, %v1308_v21  ;;  %v5513_v39 = vmul.f32 0.11111111, %v1309_v50 }
  0xf5   :  { %10180 = vst [vmem:[#allocation156_spill] sm:$0xff] %v5487_v2  ;;  %10182 = vst [vmem:[#allocation157_spill] sm:$0xff] %v5491_v0  ;;  %v5515_v20 = vmul.f32 0.11111111, %v1310_v33  ;;  %v5517_v16 = vmul.f32 0.11111111, %v1311_v59 }
  0xf6   :  { %10183 = vst [vmem:[#allocation140_spill] sm:$0xff] %v5493_v54  ;;  %10184 = vst [vmem:[#allocation141_spill] sm:$0xff] %v5495_v11  ;;  %v10196_v63 = vld [vmem:[#allocation9_spill] sm:$0xff]  ;;  %v5523_v49 = vmul.f32 0.11111111, %v1312_v22  ;;  %v10201_v48 = vld [vmem:[#allocation39_spill] sm:$0xff] }
  0xf7   :  { %10185 = vst [vmem:[#allocation158_spill] sm:$0xff] %v5497_v56  ;;  %10187 = vst [vmem:[#allocation159_spill] sm:$0xff] %v5501_v31  ;;  %v5521_v14 = vmul.f32 %v10196_v63, %v10196_v63  ;;  %v5525_v45 = vmul.f32 0.11111111, %v1313_v28  ;;  %v5527_v46 = vmul.f32 0.11111111, %v1314_v30  ;;  %v5531_v13 = vmul.f32 %v10201_v48, %v10201_v48 }
  0xf8   :  { %10188 = vst [vmem:[#allocation160_spill] sm:$0xff] %v5503_v9  ;;  %10189 = vst [vmem:[#allocation161_spill] sm:$0xff] %v5505_v55  ;;  %v5533_v34 = vmul.f32 0.11111111, %v1315_v36  ;;  %v5535_v23 = vmul.f32 0.11111111, %v1316_v35  ;;  %v5565_v35 = vmul.f32 %v10218_v15, %v10218_v15 }
  0xf9   :  { %10190 = vst [vmem:[#allocation162_spill] sm:$0xff] %v5507_v25  ;;  %10192 = vst [vmem:[#allocation163_spill] sm:$0xff] %v5511_v60  ;;  %v5537_v53 = vmul.f32 0.11111111, %v1317_v12  ;;  %v10206_v6 = vld [vmem:[#allocation24_spill] sm:$0xff]  ;;  %v10211_v50 = vld [vmem:[#allocation10_spill] sm:$0xff] }
  0xfa   :  { %10193 = vst [vmem:[#allocation164_spill] sm:$0xff] %v5513_v39  ;;  %10194 = vst [vmem:[#allocation165_spill] sm:$0xff] %v5515_v20  ;;  %v5541_v44 = vmul.f32 %v10206_v6, %v10206_v6  ;;  %v5543_v26 = vmul.f32 0.11111111, %v1318_v41  ;;  %v5545_v40 = vmul.f32 0.11111111, %v1319_v57  ;;  %v5551_v33 = vmul.f32 %v10211_v50, %v10211_v50 }
  0xfb   :  { %10195 = vst [vmem:[#allocation166_spill] sm:$0xff] %v5517_v16  ;;  %10197 = vst [vmem:[#allocation167_spill] sm:$0xff] %v5521_v14  ;;  %v5547_v21 = vmul.f32 0.11111111, %v1320_v1  ;;  %v5553_v59 = vmul.f32 0.11111111, %v1321_v42 }
  0xfc   :  { %10198 = vst [vmem:[#allocation168_spill] sm:$0xff] %v5523_v49  ;;  %10199 = vst [vmem:[#allocation169_spill] sm:$0xff] %v5525_v45  ;;  %v10214_v22 = vld [vmem:[#allocation40_spill] sm:$0xff]  ;;  %v10216_v30 = vld [vmem:[#allocation25_spill] sm:$0xff]  ;;  %v1468_v32 = vrot.slane %v5471_v37, 1  ;;  %v1473_v62 = vrot.slane %v5501_v31, 1 }
  0xfd   :  { %10200 = vst [vmem:[#allocation170_spill] sm:$0xff] %v5527_v46  ;;  %10202 = vst [vmem:[#allocation171_spill] sm:$0xff] %v5531_v13  ;;  %v5557_v28 = vmul.f32 %v10214_v22, %v10214_v22  ;;  %v5561_v36 = vmul.f32 %v10216_v30, %v10216_v30  ;;  %v10220_v3 = vld [vmem:[#allocation41_spill] sm:$0xff]  ;;  %v10222_v41 = vld [vmem:[#allocation26_spill] sm:$0xff] }
  0xfe   :  { %10203 = vst [vmem:[#allocation172_spill] sm:$0xff] %v5533_v34  ;;  %10204 = vst [vmem:[#allocation173_spill] sm:$0xff] %v5535_v23  ;;  %v5569_v12 = vmul.f32 %v10220_v3, %v10220_v3  ;;  %v5573_v57 = vmul.f32 %v10222_v41, %v10222_v41  ;;  %v10224_v1 = vld [vmem:[#allocation13_spill] sm:$0xff]  ;;  %v10226_v22 = vld [vmem:[#allocation42_spill] sm:$0xff] }
  0xff   :  { %10205 = vst [vmem:[#allocation174_spill] sm:$0xff] %v5537_v53  ;;  %10207 = vst [vmem:[#allocation175_spill] sm:$0xff] %v5541_v44  ;;  %v5577_v42 = vmul.f32 %v10224_v1, %v10224_v1  ;;  %v5581_v30 = vmul.f32 %v10226_v22, %v10226_v22  ;;  %v10228_v50 = vld [vmem:[#allocation27_spill] sm:$0xff]  ;;  %v10229_v6 = vld [vmem:[#allocation14_spill] sm:$0xff]  ;;  %v1485_v37 = vrot.slane %v5561_v36, 1 }
 0x100   :  { %10208 = vst [vmem:[#allocation176_spill] sm:$0xff] %v5543_v26  ;;  %10209 = vst [vmem:[#allocation177_spill] sm:$0xff] %v5545_v40  ;;  %v5585_v15 = vmul.f32 %v10228_v50, %v10228_v50  ;;  %v5589_v3 = vmul.f32 %v10229_v6, %v10229_v6  ;;  %v10230_v48 = vld [vmem:[#allocation43_spill] sm:$0xff]  ;;  %v10232_v63 = vld [vmem:[#allocation28_spill] sm:$0xff]  ;;  %v1488_v31 = vrot.slane %v5569_v12, 1 }
 0x101   :  { %10210 = vst [vmem:[#allocation178_spill] sm:$0xff] %v5547_v21  ;;  %10212 = vst [vmem:[#allocation179_spill] sm:$0xff] %v5551_v33  ;;  %v5593_v41 = vmul.f32 %v10230_v48, %v10230_v48  ;;  %v5597_v1 = vmul.f32 %v10232_v63, %v10232_v63  ;;  %v10233_v58 = vld [vmem:[#allocation15_spill] sm:$0xff]  ;;  %v10234_v4 = vld [vmem:[#allocation44_spill] sm:$0xff] }
 0x102   :  { %10213 = vst [vmem:[#allocation180_spill] sm:$0xff] %v5553_v59  ;;  %10215 = vst [vmem:[#allocation181_spill] sm:$0xff] %v5557_v28  ;;  %v5601_v22 = vmul.f32 %v10233_v58, %v10233_v58  ;;  %v5605_v50 = vmul.f32 %v10234_v4, %v10234_v4  ;;  %v10236_v18 = vld [vmem:[#allocation29_spill] sm:$0xff]  ;;  %v10237_v43 = vld [vmem:[#allocation16_spill] sm:$0xff] }
 0x103   :  { %10217 = vst [vmem:[#allocation182_spill] sm:$0xff] %v5561_v36  ;;  %10219 = vst [vmem:[#allocation183_spill] sm:$0xff] %v5565_v35  ;;  %v5609_v6 = vmul.f32 %v10236_v18, %v10236_v18  ;;  %v5613_v48 = vmul.f32 %v10237_v43, %v10237_v43  ;;  %v10238_v61 = vld [vmem:[#allocation45_spill] sm:$0xff]  ;;  %v10240_v24 = vld [vmem:[#allocation30_spill] sm:$0xff] }
 0x104   :  { %10221 = vst [vmem:[#allocation184_spill] sm:$0xff] %v5569_v12  ;;  %10223 = vst [vmem:[#allocation185_spill] sm:$0xff] %v5573_v57  ;;  %v5617_v63 = vmul.f32 %v10238_v61, %v10238_v61  ;;  %v5621_v58 = vmul.f32 %v10240_v24, %v10240_v24  ;;  %v10241_v59 = vld [vmem:[#allocation104_spill] sm:$0xff]  ;;  %v10243_v26 = vld [vmem:[#allocation17_spill] sm:$0xff] }
 0x105   :  { %10225 = vst [vmem:[#allocation186_spill] sm:$0xff] %v5577_v42  ;;  %10227 = vst [vmem:[#allocation187_spill] sm:$0xff] %v5581_v30  ;;  %v1450_v21 = vrot.slane %v10241_v59, 1  ;;  %v10242_v4 = vld [vmem:[#allocation108_spill] sm:$0xff]  ;;  %v5627_v18 = vmul.f32 %v10243_v26, %v10243_v26  ;;  %v10245_v53 = vld [vmem:[#allocation46_spill] sm:$0xff] }
 0x106   :  { %10231 = vst [vmem:[#allocation188_spill] sm:$0xff] %v5593_v41  ;;  %10235 = vst [vmem:[#allocation189_spill] sm:$0xff] %v5605_v50  ;;  %v1451_v40 = vrot.slane %v10242_v4, 1  ;;  %v5631_v43 = vmul.f32 %v10245_v53, %v10245_v53  ;;  %v10247_v23 = vld [vmem:[#allocation31_spill] sm:$0xff]  ;;  %v10249_v34 = vld [vmem:[#allocation112_spill] sm:$0xff] }
 0x107   :  { %10239 = vst [vmem:[#allocation190_spill] sm:$0xff] %v5617_v63  ;;  %10244 = vst [vmem:[#allocation104_spill] sm:$0xff] %v5627_v18  ;;  %v5635_v61 = vmul.f32 %v10247_v23, %v10247_v23  ;;  %v1453_v46 = vrot.slane %v10249_v34, 1  ;;  %v10250_v24 = vld [vmem:[#allocation18_spill] sm:$0xff]  ;;  %v10255_v55 = vld [vmem:[#allocation47_spill] sm:$0xff]  ;;  %v1483_v34 = vrot.slane %v5557_v28, 1 }
 0x108   :  { %10246 = vst [vmem:[#allocation108_spill] sm:$0xff] %v5631_v43  ;;  %v5640_v45 = vmul.f32 %v10250_v24, %v10250_v24  ;;  %v10252_v49 = vld [vmem:[#allocation98_spill] sm:$0xff]  ;;  %v5647_v53 = vmul.f32 %v10255_v55, %v10255_v55  ;;  %v10257_v9 = vld [vmem:[#allocation32_spill] sm:$0xff]  ;;  %v10259_v56 = vld [vmem:[#allocation19_spill] sm:$0xff]  ;;  %v5674_v27 = vsel %vm556_vm1, %v1450_v21, %v1451_v40  ;;  %v1466_v21 = vrot.slane %v5461_v51, 1 }
 0x109   :  { %10248 = vst [vmem:[#allocation191_spill] sm:$0xff] %v5635_v61  ;;  %v1455_v16 = vrot.slane %v10252_v49, 1  ;;  %v10253_v20 = vld [vmem:[#allocation118_spill] sm:$0xff]  ;;  %v5651_v23 = vmul.f32 %v10257_v9, %v10257_v9  ;;  %v5655_v11 = vmul.f32 %v10259_v56, %v10259_v56  ;;  %v10261_v24 = vld [vmem:[#allocation48_spill] sm:$0xff]  ;;  %v10263_v2 = vld [vmem:[#allocation33_spill] sm:$0xff]  ;;  %v5677_v56 = vsel %vm556_vm1, %v1451_v40, %v1453_v46 }
 0x10a   :  { %10251 = vst [vmem:[#allocation192_spill] sm:$0xff] %v5640_v45  ;;  %v1456_v39 = vrot.slane %v10253_v20, 1  ;;  %v10254_v26 = vld [vmem:[#allocation122_spill] sm:$0xff]  ;;  %10256 = vst [vmem:[#allocation98_spill] sm:$0xff] %v5647_v53  ;;  %v5659_v54 = vmul.f32 %v10261_v24, %v10261_v24  ;;  %v5663_v29 = vmul.f32 %v10263_v2, %v10263_v2  ;;  %v10264_v7 = vld [vmem:[#allocation20_spill] sm:$0xff]  ;;  %v1470_v46 = vrot.slane %v5481_v47, 1 }
 0x10b   :  { %v1458_v25 = vrot.slane %v10254_v26, 1  ;;  %10258 = vst [vmem:[#allocation118_spill] sm:$0xff] %v5651_v23  ;;  %10260 = vst [vmem:[#allocation193_spill] sm:$0xff] %v5655_v11  ;;  %v5667_v55 = vmul.f32 %v10264_v7, %v10264_v7  ;;  %v10266_v19 = vld [vmem:[#allocation49_spill] sm:$0xff]  ;;  %v10267_v24 = vld [vmem:[#allocation126_spill] sm:$0xff]  ;;  %v1471_v40 = vrot.slane %v5491_v0, 1 }
 0x10c   :  { %10262 = vst [vmem:[#allocation194_spill] sm:$0xff] %v5659_v54  ;;  %v5671_v9 = vmul.f32 %v10266_v19, %v10266_v19  ;;  %v1460_v8 = vrot.slane %v10267_v24, 1  ;;  %v10268_v10 = vld [vmem:[#allocation131_spill] sm:$0xff]  ;;  %v10269_v2 = vld [vmem:[#allocation136_spill] sm:$0xff]  ;;  %v5683_v5 = vsel %vm556_vm1, %v1455_v16, %v1456_v39  ;;  %v1476_v16 = vrot.slane %v5521_v14, 1 }
 0x10d   :  { %10265 = vst [vmem:[#allocation195_spill] sm:$0xff] %v5667_v55  ;;  %v1461_v38 = vrot.slane %v10268_v10, 1  ;;  %v1463_v52 = vrot.slane %v10269_v2, 1  ;;  %v5686_v7 = vsel %vm556_vm1, %v1456_v39, %v1458_v25  ;;  %v10270_v19 = vld [vmem:[#allocation139_spill] sm:$0xff]  ;;  %v1475_v2 = vrot.slane %v5511_v60, 1 }
 0x10e   :  { %v1465_v17 = vrot.slane %v10270_v19, 1  ;;  %v1478_v26 = vrot.slane %v5531_v13, 1  ;;  %v1480_v25 = vrot.slane %v5541_v44, 1  ;;  %v1481_v39 = vrot.slane %v5551_v33, 1 }
 0x10f   :  { %v1486_v47 = vrot.slane %v5565_v35, 1  ;;  %v1462_v0 = vsel %vm556_vm1, %v1460_v8, %v1461_v38  ;;  %v1490_v60 = vrot.slane %v5573_v57, 1  ;;  %v1491_v14 = vrot.slane %v5577_v42, 1 }
 0x110   :  { %v1464_v13 = vsel %vm556_vm1, %v1461_v38, %v1463_v52  ;;  %v1467_v44 = vsel %vm556_vm1, %v1465_v17, %v1466_v21  ;;  %v1469_v33 = vsel %vm556_vm1, %v1466_v21, %v1468_v32  ;;  %v1493_v28 = vrot.slane %v5581_v30, 1 }
 0x111   :  { %v1472_v36 = vsel %vm556_vm1, %v1470_v46, %v1471_v40  ;;  %v1474_v35 = vsel %vm556_vm1, %v1471_v40, %v1473_v62  ;;  %v1477_v8 = vsel %vm556_vm1, %v1475_v2, %v1476_v16  ;;  %v1479_v12 = vsel %vm556_vm1, %v1476_v16, %v1478_v26 }
 0x112   :  { %v1482_v57 = vsel %vm556_vm1, %v1480_v25, %v1481_v39  ;;  %v1484_v42 = vsel %vm556_vm1, %v1481_v39, %v1483_v34  ;;  %v1487_v52 = vsel %vm556_vm1, %v1485_v37, %v1486_v47  ;;  %v1495_v17 = vrot.slane %v5585_v15, 1 }
 0x113   :  { %v1489_v32 = vsel %vm556_vm1, %v1486_v47, %v1488_v31  ;;  %v1492_v38 = vsel %vm556_vm1, %v1490_v60, %v1491_v14  ;;  %v1496_v21 = vrot.slane %v5589_v3, 1  ;;  %v1498_v62 = vrot.slane %v5593_v41, 1 }
 0x114   :  { %v1494_v2 = vsel %vm556_vm1, %v1491_v14, %v1493_v28  ;;  %v1500_v26 = vrot.slane %v5597_v1, 1  ;;  %v1501_v46 = vrot.slane %v5601_v22, 1  ;;  %v1503_v34 = vrot.slane %v5605_v50, 1 }
 0x115   :  { %v1505_v37 = vrot.slane %v5609_v6, 1  ;;  %v1506_v40 = vrot.slane %v5613_v48, 1  ;;  %v1508_v47 = vrot.slane %v5617_v63, 1  ;;  %v1510_v31 = vrot.slane %v5621_v58, 1 }
 0x116   :  { %v1511_v60 = vrot.slane %v5627_v18, 1  ;;  %v1513_v16 = vrot.slane %v5631_v43, 1  ;;  %v1515_v14 = vrot.slane %v5635_v61, 1  ;;  %v1516_v28 = vrot.slane %v5640_v45, 1 }
 0x117   :  { %v1518_v25 = vrot.slane %v5647_v53, 1  ;;  %v1520_v39 = vrot.slane %v5651_v23, 1  ;;  %v1521_v50 = vrot.slane %v5655_v11, 1  ;;  %v1523_v41 = vrot.slane %v5659_v54, 1 }
 0x118   :  { %v1497_v63 = vsel %vm556_vm1, %v1495_v17, %v1496_v21  ;;  %v1499_v30 = vsel %vm556_vm1, %v1496_v21, %v1498_v62  ;;  %v1525_v18 = vrot.slane %v5663_v29, 1  ;;  %v1526_v43 = vrot.slane %v5667_v55, 1 }
 0x119   :  { %v1502_v61 = vsel %vm556_vm1, %v1500_v26, %v1501_v46  ;;  %v1504_v45 = vsel %vm556_vm1, %v1501_v46, %v1503_v34  ;;  %v1507_v53 = vsel %vm556_vm1, %v1505_v37, %v1506_v40  ;;  %v1528_v23 = vrot.slane %v5671_v9, 1 }
 0x11a   :  { %v1509_v11 = vsel %vm556_vm1, %v1506_v40, %v1508_v47  ;;  %v1512_v54 = vsel %vm556_vm1, %v1510_v31, %v1511_v60  ;;  %v1514_v17 = vsel %vm556_vm1, %v1511_v60, %v1513_v16  ;;  %v1517_v21 = vsel %vm556_vm1, %v1515_v14, %v1516_v28  ;;  %v10272_v60 = vld [vmem:[#allocation157_spill] sm:$0xff]  ;;  %v10274_v16 = vld [vmem:[#allocation163_spill] sm:$0xff] }
 0x11b   :  { %v1519_v62 = vsel %vm556_vm1, %v1516_v28, %v1518_v25  ;;  %v1522_v55 = vsel %vm556_vm1, %v1520_v39, %v1521_v50  ;;  %v1524_v26 = vsel %vm556_vm1, %v1521_v50, %v1523_v41  ;;  %v5755_v46 = vadd.f32 %v5674_v27, %v10241_v59 }
 0x11c   :  { %v1527_v34 = vsel %vm556_vm1, %v1525_v18, %v1526_v43  ;;  %v5760_v37 = vadd.f32 %v5677_v56, %v10242_v4  ;;  %v5764_v40 = vadd.f32 %v5683_v5, %v10252_v49  ;;  %v5768_v47 = vadd.f32 %v5686_v7, %v10253_v20  ;;  %v10271_v5 = vld [vmem:[#allocation153_spill] sm:$0xff] }
 0x11d   :  { %v1529_v50 = vsel %vm556_vm1, %v1526_v43, %v1528_v23  ;;  %v5772_v41 = vadd.f32 %v1462_v0, %v10267_v24  ;;  %v5775_v27 = vadd.f32 %v1464_v13, %v10268_v10  ;;  %v5778_v18 = vadd.f32 %v1467_v44, %v10270_v19  ;;  %v10276_v0 = vld [vmem:[#allocation167_spill] sm:$0xff] }
 0x11e   :  { %v5781_v56 = vadd.f32 %v1469_v33, %v5461_v51  ;;  %v5784_v31 = vadd.f32 %v1472_v36, %v10271_v5  ;;  %v5787_v7 = vadd.f32 %v1474_v35, %v10272_v60  ;;  %v5790_v43 = vadd.f32 %v1477_v8, %v10274_v16  ;;  %v10277_v13 = vld [vmem:[#allocation175_spill] sm:$0xff]  ;;  %v10279_v33 = vld [vmem:[#allocation182_spill] sm:$0xff]  ;;  %v10282_v35 = vld [vmem:[#allocation185_spill] sm:$0xff] }
 0x11f   :  { %v5793_v23 = vadd.f32 %v1479_v12, %v10276_v0  ;;  %v5796_v14 = vadd.f32 %v1482_v57, %v10277_v13  ;;  %v10278_v44 = vld [vmem:[#allocation179_spill] sm:$0xff]  ;;  %v5802_v25 = vadd.f32 %v1487_v52, %v10279_v33  ;;  %v10283_v8 = vld [vmem:[#allocation186_spill] sm:$0xff]  ;;  %v5814_v12 = vadd.f32 %v1497_v63, %v5585_v15  ;;  %v10291_v63 = vld [vmem:[#allocation112_spill] sm:$0xff] }
 0x120   :  { %10273 = vst [vmem:[#allocation126_spill] sm:$0xff] %v5787_v7  ;;  %10275 = vst [vmem:[#allocation131_spill] sm:$0xff] %v5790_v43  ;;  %v5799_v28 = vadd.f32 %v1484_v42, %v10278_v44  ;;  %v10280_v36 = vld [vmem:[#allocation183_spill] sm:$0xff]  ;;  %v5808_v7 = vadd.f32 %v1492_v38, %v10282_v35  ;;  %v5811_v43 = vadd.f32 %v1494_v2, %v10283_v8  ;;  %v1594_v52 = vrot.slane %v10241_v59, 2 }
 0x121   :  { %v5805_v39 = vadd.f32 %v1489_v32, %v10280_v36  ;;  %10285 = vst [vmem:[#allocation157_spill] sm:$0xff] %v5814_v12  ;;  %v5817_v57 = vadd.f32 %v1499_v30, %v5589_v3  ;;  %v5820_v42 = vadd.f32 %v1502_v61, %v5597_v1  ;;  %v1595_v32 = vrot.slane %v10242_v4, 2 }
 0x122   :  { %10284 = vst [vmem:[#allocation153_spill] sm:$0xff] %v5811_v43  ;;  %v5828_v38 = vadd.f32 %v1507_v53, %v5609_v6  ;;  %v5831_v2 = vadd.f32 %v1509_v11, %v5613_v48  ;;  %v1597_v12 = vrot.slane %v10291_v63, 2  ;;  %v5835_v30 = vadd.f32 %v1512_v54, %v5621_v58  ;;  %v10302_v54 = vld [vmem:[#allocation193_spill] sm:$0xff]  ;;  %v10313_v43 = vld [vmem:[#allocation187_spill] sm:$0xff] }
 0x123   :  { %10281 = vst [vmem:[#allocation139_spill] sm:$0xff] %v5805_v39  ;;  %10286 = vst [vmem:[#allocation163_spill] sm:$0xff] %v5817_v57  ;;  %v5825_v39 = vadd.f32 %v1504_v45, %v5601_v22  ;;  %v1599_v61 = vrot.slane %v10252_v49, 2  ;;  %v1600_v59 = vrot.slane %v10253_v20, 2  ;;  %v10294_v57 = vld [vmem:[#allocation104_spill] sm:$0xff]  ;;  %v5856_v49 = vadd.f32 %v1527_v34, %v5663_v29  ;;  %v10305_v20 = vld [vmem:[#allocation195_spill] sm:$0xff] }
 0x124   :  { %10287 = vst [vmem:[#allocation167_spill] sm:$0xff] %v5820_v42  ;;  %10289 = vst [vmem:[#allocation179_spill] sm:$0xff] %v5828_v38  ;;  %v10293_v42 = vld [vmem:[#allocation122_spill] sm:$0xff]  ;;  %v5841_v45 = vadd.f32 %v1514_v17, %v10294_v57  ;;  %v10298_v38 = vld [vmem:[#allocation192_spill] sm:$0xff]  ;;  %v5862_v17 = vsel %vm701_vm2, %v1594_v52, %v1595_v32  ;;  %v1610_v52 = vrot.slane %v5461_v51, 2 }
 0x125   :  { %10288 = vst [vmem:[#allocation175_spill] sm:$0xff] %v5825_v39  ;;  %10290 = vst [vmem:[#allocation182_spill] sm:$0xff] %v5831_v2  ;;  %v1602_v4 = vrot.slane %v10293_v42, 2  ;;  %v10296_v39 = vld [vmem:[#allocation191_spill] sm:$0xff]  ;;  %v5847_v11 = vadd.f32 %v1519_v62, %v10298_v38  ;;  %v10300_v2 = vld [vmem:[#allocation118_spill] sm:$0xff]  ;;  %v5859_v42 = vadd.f32 %v1529_v50, %v10305_v20  ;;  %v1604_v62 = vrot.slane %v10267_v24, 2 }
 0x126   :  { %10292 = vst [vmem:[#allocation183_spill] sm:$0xff] %v5835_v30  ;;  %10295 = vst [vmem:[#allocation185_spill] sm:$0xff] %v5841_v45  ;;  %v5844_v53 = vadd.f32 %v1517_v21, %v10296_v39  ;;  %v5850_v63 = vadd.f32 %v1522_v55, %v10300_v2  ;;  %v5853_v30 = vadd.f32 %v1524_v26, %v10302_v54  ;;  %v1605_v55 = vrot.slane %v10268_v10, 2  ;;  %v10312_v45 = vld [vmem:[#allocation184_spill] sm:$0xff] }
 0x127   :  { %10299 = vst [vmem:[#allocation112_spill] sm:$0xff] %v5847_v11  ;;  %10304 = vst [vmem:[#allocation191_spill] sm:$0xff] %v5856_v49  ;;  %v5865_v21 = vsel %vm701_vm2, %v1595_v32, %v1597_v12  ;;  %v5871_v26 = vsel %vm701_vm2, %v1599_v61, %v1600_v59  ;;  %v5874_v34 = vsel %vm701_vm2, %v1600_v59, %v1602_v4  ;;  %v1609_v50 = vrot.slane %v10270_v19, 2  ;;  %v10309_v32 = vld [vmem:[#allocation159_spill] sm:$0xff]  ;;  %v10311_v4 = vld [vmem:[#allocation181_spill] sm:$0xff] }
 0x128   :  { %10297 = vst [vmem:[#allocation186_spill] sm:$0xff] %v5844_v53  ;;  %10301 = vst [vmem:[#allocation122_spill] sm:$0xff] %v5850_v63  ;;  %v10307_v63 = vld [vmem:[#allocation136_spill] sm:$0xff]  ;;  %v1614_v12 = vrot.slane %v10271_v5, 2  ;;  %v1615_v24 = vrot.slane %v10272_v60, 2  ;;  %v1617_v10 = vrot.slane %v10309_v32, 2  ;;  %v1606_v60 = vsel %vm701_vm2, %v1604_v62, %v1605_v55 }
 0x129   :  { %10303 = vst [vmem:[#allocation104_spill] sm:$0xff] %v5853_v30  ;;  %10306 = vst [vmem:[#allocation192_spill] sm:$0xff] %v5859_v42  ;;  %v1607_v11 = vrot.slane %v10307_v63, 2  ;;  %v10308_v42 = vld [vmem:[#allocation149_spill] sm:$0xff]  ;;  %v1619_v63 = vrot.slane %v10274_v16, 2  ;;  %v1620_v61 = vrot.slane %v10276_v0, 2 }
 0x12a   :  { %v1612_v49 = vrot.slane %v10308_v42, 2  ;;  %v10310_v30 = vld [vmem:[#allocation171_spill] sm:$0xff]  ;;  %v1624_v59 = vrot.slane %v10277_v13, 2  ;;  %v1625_v19 = vrot.slane %v10278_v44, 2  ;;  %v1627_v51 = vrot.slane %v10311_v4, 2 }
 0x12b   :  { %v1622_v53 = vrot.slane %v10310_v30, 2  ;;  %v1629_v42 = vrot.slane %v10279_v33, 2  ;;  %v1630_v5 = vrot.slane %v10280_v36, 2  ;;  %v1632_v32 = vrot.slane %v10312_v45, 2 }
 0x12c   :  { %v1634_v16 = vrot.slane %v10282_v35, 2  ;;  %v1635_v0 = vrot.slane %v10283_v8, 2  ;;  %v1608_v30 = vsel %vm701_vm2, %v1605_v55, %v1607_v11  ;;  %v1611_v13 = vsel %vm701_vm2, %v1609_v50, %v1610_v52 }
 0x12d   :  { %v1613_v44 = vsel %vm701_vm2, %v1610_v52, %v1612_v49  ;;  %v1637_v4 = vrot.slane %v10313_v43, 2  ;;  %v1616_v33 = vsel %vm701_vm2, %v1614_v12, %v1615_v24  ;;  %v1618_v36 = vsel %vm701_vm2, %v1615_v24, %v1617_v10  ;;  %v10314_v52 = vld [vmem:[#allocation188_spill] sm:$0xff] }
 0x12e   :  { %v1621_v62 = vsel %vm701_vm2, %v1619_v63, %v1620_v61  ;;  %v1623_v45 = vsel %vm701_vm2, %v1620_v61, %v1622_v53  ;;  %v1626_v35 = vsel %vm701_vm2, %v1624_v59, %v1625_v19  ;;  %v1628_v8 = vsel %vm701_vm2, %v1625_v19, %v1627_v51  ;;  %v10315_v63 = vld [vmem:[#allocation189_spill] sm:$0xff]  ;;  %v10316_v19 = vld [vmem:[#allocation190_spill] sm:$0xff] }
 0x12f   :  { %v1631_v11 = vsel %vm701_vm2, %v1629_v42, %v1630_v5  ;;  %v1639_v55 = vrot.slane %v5585_v15, 2  ;;  %v1633_v49 = vsel %vm701_vm2, %v1630_v5, %v1632_v32  ;;  %v1636_v43 = vsel %vm701_vm2, %v1634_v16, %v1635_v0  ;;  %v10317_v5 = vld [vmem:[#allocation108_spill] sm:$0xff] }
 0x130   :  { %v1640_v50 = vrot.slane %v5589_v3, 2  ;;  %v1642_v12 = vrot.slane %v10314_v52, 2  ;;  %v1638_v24 = vsel %vm701_vm2, %v1635_v0, %v1637_v4  ;;  %v1644_v53 = vrot.slane %v5597_v1, 2  ;;  %v10318_v0 = vld [vmem:[#allocation98_spill] sm:$0xff] }
 0x131   :  { %v1645_v10 = vrot.slane %v5601_v22, 2  ;;  %v1647_v61 = vrot.slane %v10315_v63, 2  ;;  %v1649_v59 = vrot.slane %v5609_v6, 2  ;;  %v1650_v15 = vrot.slane %v5613_v48, 2  ;;  %v10319_v52 = vld [vmem:[#allocation194_spill] sm:$0xff] }
 0x132   :  { %v1652_v51 = vrot.slane %v10316_v19, 2  ;;  %v1654_v42 = vrot.slane %v5621_v58, 2  ;;  %v1655_v3 = vrot.slane %v10294_v57, 2  ;;  %v1657_v32 = vrot.slane %v10317_v5, 2 }
 0x133   :  { %v1659_v16 = vrot.slane %v10296_v39, 2  ;;  %v1660_v1 = vrot.slane %v10298_v38, 2  ;;  %v1662_v22 = vrot.slane %v10318_v0, 2  ;;  %v1664_v4 = vrot.slane %v10300_v2, 2 }
 0x134   :  { %v1665_v6 = vrot.slane %v10302_v54, 2  ;;  %v1667_v48 = vrot.slane %v10319_v52, 2  ;;  %v1641_v63 = vsel %vm701_vm2, %v1639_v55, %v1640_v50  ;;  %v1643_v58 = vsel %vm701_vm2, %v1640_v50, %v1642_v12 }
 0x135   :  { %v1669_v57 = vrot.slane %v5663_v29, 2  ;;  %v1670_v19 = vrot.slane %v10305_v20, 2  ;;  %v1646_v39 = vsel %vm701_vm2, %v1644_v53, %v1645_v10  ;;  %v1648_v38 = vsel %vm701_vm2, %v1645_v10, %v1647_v61 }
 0x136   :  { %v1651_v5 = vsel %vm701_vm2, %v1649_v59, %v1650_v15  ;;  %v1672_v2 = vrot.slane %v5671_v9, 2  ;;  %v1653_v54 = vsel %vm701_vm2, %v1650_v15, %v1652_v51  ;;  %v1656_v0 = vsel %vm701_vm2, %v1654_v42, %v1655_v3 }
 0x137   :  { %v1658_v55 = vsel %vm701_vm2, %v1655_v3, %v1657_v32  ;;  %v1661_v50 = vsel %vm701_vm2, %v1659_v16, %v1660_v1  ;;  %v1663_v29 = vsel %vm701_vm2, %v1660_v1, %v1662_v22  ;;  %v1666_v20 = vsel %vm701_vm2, %v1664_v4, %v1665_v6  ;;  %v10321_v32 = vld [vmem:[#allocation131_spill] sm:$0xff]  ;;  %v10332_v1 = vld [vmem:[#allocation186_spill] sm:$0xff] }
 0x138   :  { %v1668_v12 = vsel %vm701_vm2, %v1665_v6, %v1667_v48  ;;  %v5943_v53 = vadd.f32 %v5862_v17, %v5755_v46  ;;  %v1671_v9 = vsel %vm701_vm2, %v1669_v57, %v1670_v19  ;;  %v5948_v10 = vadd.f32 %v5865_v21, %v5760_v37  ;;  %v10320_v37 = vld [vmem:[#allocation126_spill] sm:$0xff]  ;;  %v10336_v6 = vld [vmem:[#allocation104_spill] sm:$0xff]  ;;  %v10338_v48 = vld [vmem:[#allocation191_spill] sm:$0xff] }
 0x139   :  { %v1708_v61 = vadd.f32 %v5871_v26, %v5764_v40  ;;  %v1709_v59 = vadd.f32 %v5874_v34, %v5768_v47  ;;  %v1673_v15 = vsel %vm701_vm2, %v1670_v19, %v1672_v2  ;;  %v1710_v51 = vadd.f32 %v1606_v60, %v5772_v41  ;;  %v10322_v34 = vld [vmem:[#allocation139_spill] sm:$0xff]  ;;  %v10323_v60 = vld [vmem:[#allocation153_spill] sm:$0xff]  ;;  %v10334_v22 = vld [vmem:[#allocation122_spill] sm:$0xff] }
 0x13a   :  { %v1711_v42 = vadd.f32 %v1608_v30, %v5775_v27  ;;  %v1712_v46 = vadd.f32 %v1611_v13, %v5778_v18  ;;  %v1713_v17 = vadd.f32 %v1613_v44, %v5781_v56  ;;  %v1714_v3 = vadd.f32 %v1616_v33, %v5784_v31  ;;  %v10324_v30 = vld [vmem:[#allocation157_spill] sm:$0xff]  ;;  %v10325_v13 = vld [vmem:[#allocation163_spill] sm:$0xff] }
 0x13b   :  { %v1715_v21 = vadd.f32 %v1618_v36, %v10320_v37  ;;  %v1716_v16 = vadd.f32 %v1621_v62, %v10321_v32  ;;  %v1717_v40 = vadd.f32 %v1623_v45, %v5793_v23  ;;  %v1718_v47 = vadd.f32 %v1626_v35, %v5796_v14  ;;  %v10326_v33 = vld [vmem:[#allocation167_spill] sm:$0xff]  ;;  %v10329_v35 = vld [vmem:[#allocation182_spill] sm:$0xff] }
 0x13c   :  { %v1719_v26 = vadd.f32 %v1628_v8, %v5799_v28  ;;  %v1720_v41 = vadd.f32 %v1631_v11, %v5802_v25  ;;  %v1721_v27 = vadd.f32 %v1633_v49, %v10322_v34  ;;  %v1722_v18 = vadd.f32 %v1636_v43, %v5808_v7  ;;  %v10327_v62 = vld [vmem:[#allocation175_spill] sm:$0xff]  ;;  %v10331_v11 = vld [vmem:[#allocation185_spill] sm:$0xff]  ;;  %v10333_v43 = vld [vmem:[#allocation112_spill] sm:$0xff] }
 0x13d   :  { %v1723_v56 = vadd.f32 %v1638_v24, %v10323_v60  ;;  %v1724_v31 = vadd.f32 %v1641_v63, %v10324_v30  ;;  %v1725_v44 = vadd.f32 %v1643_v58, %v10325_v13  ;;  %v1726_v36 = vadd.f32 %v1646_v39, %v10326_v33  ;;  %v10328_v45 = vld [vmem:[#allocation179_spill] sm:$0xff]  ;;  %v10339_v58 = vld [vmem:[#allocation192_spill] sm:$0xff] }
 0x13e   :  { %v1727_v23 = vadd.f32 %v1648_v38, %v10327_v62  ;;  %v1728_v14 = vadd.f32 %v1651_v5, %v10328_v45  ;;  %v1729_v28 = vadd.f32 %v1653_v54, %v10329_v35  ;;  %v10330_v8 = vld [vmem:[#allocation183_spill] sm:$0xff]  ;;  %v1731_v49 = vadd.f32 %v1658_v55, %v10331_v11 }
 0x13f   :  { %v1730_v25 = vadd.f32 %v1656_v0, %v10330_v8  ;;  %v1732_v7 = vadd.f32 %v1661_v50, %v10332_v1  ;;  %v1733_v24 = vadd.f32 %v1663_v29, %v10333_v43  ;;  %v5980_v4 = vadd.f32 %v1666_v20, %v10334_v22 }
 0x140   :  { %v5983_v52 = vadd.f32 %v1668_v12, %v10336_v6  ;;  %v1736_v63 = vadd.f32 %v1671_v9, %v10338_v48  ;;  %v1737_v57 = vadd.f32 %v1673_v15, %v10339_v58  ;;  %v1738_v19 = vadd.f32 %v1708_v61, %v5943_v53 }
 0x141   :  { %10335 = vst [vmem:[#allocation118_spill] sm:$0xff] %v5980_v4  ;;  %v1739_v39 = vadd.f32 %v1709_v59, %v5948_v10  ;;  %v1740_v38 = vadd.f32 %v1710_v51, %v5943_v53  ;;  %v1741_v5 = vadd.f32 %v1711_v42, %v5948_v10  ;;  %v1742_v2 = vadd.f32 %v1712_v46, %v1710_v51 }
 0x142   :  { %10337 = vst [vmem:[#allocation193_spill] sm:$0xff] %v5983_v52  ;;  %v1743_v54 = vadd.f32 %v1713_v17, %v1711_v42  ;;  %v1744_v0 = vadd.f32 %v1714_v3, %v1712_v46  ;;  %v1745_v55 = vadd.f32 %v1715_v21, %v1713_v17  ;;  %v1746_v50 = vadd.f32 %v1716_v16, %v1714_v3 }
 0x143   :  { %v1747_v29 = vadd.f32 %v1717_v40, %v1715_v21  ;;  %v1748_v20 = vadd.f32 %v1718_v47, %v1716_v16  ;;  %v1749_v12 = vadd.f32 %v1719_v26, %v1717_v40  ;;  %v1750_v37 = vadd.f32 %v1720_v41, %v1718_v47 }
 0x144   :  { %v1751_v9 = vadd.f32 %v1721_v27, %v1719_v26  ;;  %v1752_v32 = vadd.f32 %v1722_v18, %v1720_v41  ;;  %v1753_v15 = vadd.f32 %v1723_v56, %v1721_v27  ;;  %v1754_v34 = vadd.f32 %v1724_v31, %v1722_v18 }
 0x145   :  { %v1755_v61 = vadd.f32 %v1725_v44, %v1723_v56  ;;  %v1756_v60 = vadd.f32 %v1726_v36, %v1724_v31  ;;  %v1757_v59 = vadd.f32 %v1727_v23, %v1725_v44  ;;  %v1758_v30 = vadd.f32 %v1728_v14, %v1726_v36 }
 0x146   :  { %v1759_v13 = vadd.f32 %v1729_v28, %v1727_v23  ;;  %v1760_v33 = vadd.f32 %v1730_v25, %v1728_v14  ;;  %v1761_v62 = vadd.f32 %v1731_v49, %v1729_v28  ;;  %v1762_v45 = vadd.f32 %v1732_v7, %v1730_v25 }
 0x147   :  { %v1763_v35 = vadd.f32 %v1733_v24, %v1731_v49  ;;  %v1764_v8 = vadd.f32 %v5980_v4, %v1732_v7  ;;  %v1765_v11 = vadd.f32 %v5983_v52, %v1733_v24  ;;  %v1766_v1 = vadd.f32 %v1736_v63, %v5980_v4 }
 0x148   :  { %v1767_v43 = vadd.f32 %v1737_v57, %v5983_v52  ;;  %v1768_v22 = vadd.f32 %v1738_v19, %v5943_v53  ;;  %v1769_v6 = vadd.f32 %v1739_v39, %v5948_v10  ;;  %v1770_v48 = vadd.f32 %v1738_v19, %v1710_v51 }
 0x149   :  { %v1771_v58 = vadd.f32 %v1739_v39, %v1711_v42  ;;  %v1772_v4 = vadd.f32 %v1740_v38, %v1712_v46  ;;  %v1773_v52 = vadd.f32 %v1741_v5, %v1713_v17  ;;  %v1774_v53 = vadd.f32 %v1742_v2, %v1714_v3 }
 0x14a   :  { %v1775_v10 = vadd.f32 %v1743_v54, %v1715_v21  ;;  %v1776_v19 = vadd.f32 %v1744_v0, %v1716_v16  ;;  %v1777_v51 = vadd.f32 %v1745_v55, %v1717_v40  ;;  %v1778_v39 = vadd.f32 %v1746_v50, %v1718_v47 }
 0x14b   :  { %v1779_v42 = vadd.f32 %v1747_v29, %v1719_v26  ;;  %v1780_v38 = vadd.f32 %v1748_v20, %v1720_v41  ;;  %v1781_v46 = vadd.f32 %v1749_v12, %v1721_v27  ;;  %v1782_v5 = vadd.f32 %v1750_v37, %v1722_v18  ;;  %v10340_v26 = vld [vmem:[#allocation118_spill] sm:$0xff]  ;;  %v10341_v20 = vld [vmem:[#allocation193_spill] sm:$0xff] }
 0x14c   :  { %v1783_v17 = vadd.f32 %v1751_v9, %v1723_v56  ;;  %v1784_v2 = vadd.f32 %v1752_v32, %v1724_v31  ;;  %v1785_v3 = vadd.f32 %v1753_v15, %v1725_v44  ;;  %v1786_v21 = vadd.f32 %v1754_v34, %v1726_v36  ;;  %v10356_v32 = vld [vmem:[#allocation102_spill] sm:$0xff] }
 0x14d   :  { %v1787_v54 = vadd.f32 %v1755_v61, %v1727_v23  ;;  %v1788_v0 = vadd.f32 %v1756_v60, %v1728_v14  ;;  %v1789_v16 = vadd.f32 %v1757_v59, %v1729_v28  ;;  %v1790_v40 = vadd.f32 %v1758_v30, %v1730_v25  ;;  %v10346_v14 = vld [vmem:[#allocation100_spill] sm:$0xff]  ;;  %v10361_v61 = vld [vmem:[#allocation103_spill] sm:$0xff] }
 0x14e   :  { %v1791_v55 = vadd.f32 %v1759_v13, %v1731_v49  ;;  %v1792_v47 = vadd.f32 %v1760_v33, %v1732_v7  ;;  %v1793_v50 = vadd.f32 %v1761_v62, %v1733_v24  ;;  %v1794_v29 = vadd.f32 %v1762_v45, %v10340_v26  ;;  %v10351_v24 = vld [vmem:[#allocation101_spill] sm:$0xff] }
 0x14f   :  { %v1795_v41 = vadd.f32 %v1763_v35, %v10341_v20  ;;  %v1796_v12 = vadd.f32 %v1764_v8, %v1736_v63  ;;  %v1797_v27 = vadd.f32 %v1765_v11, %v1737_v57  ;;  %v1798_v18 = vadd.f32 %v1766_v1, %v10340_v26  ;;  %v10366_v33 = vld [vmem:[#allocation105_spill] sm:$0xff]  ;;  %v10371_v11 = vld [vmem:[#allocation106_spill] sm:$0xff]  ;;  %v10398_v26 = vld [vmem:[#allocation115_spill] sm:$0xff] }
 0x150   :  { %v1799_v56 = vadd.f32 %v1767_v43, %v10341_v20  ;;  %v6001_v31 = vmul.f32 0.11111111, %v1768_v22  ;;  %v6003_v44 = vmul.f32 0.11111111, %v1769_v6  ;;  %v6005_v36 = vmul.f32 0.11111111, %v1770_v48 }
 0x151   :  { %v6007_v23 = vmul.f32 0.11111111, %v1771_v58  ;;  %v6011_v28 = vmul.f32 %v10346_v14, %v10346_v14  ;;  %v6013_v25 = vmul.f32 0.11111111, %v1772_v4  ;;  %v6015_v49 = vmul.f32 0.11111111, %v1773_v52 }
 0x152   :  { %10342 = vst [vmem:[#allocation195_spill] sm:$0xff] %v6001_v31  ;;  %10343 = vst [vmem:[#allocation136_spill] sm:$0xff] %v6003_v44  ;;  %v6017_v7 = vmul.f32 0.11111111, %v1774_v53  ;;  %v6021_v63 = vmul.f32 %v10351_v24, %v10351_v24  ;;  %v6023_v57 = vmul.f32 0.11111111, %v1775_v10  ;;  %v6031_v15 = vmul.f32 %v10356_v32, %v10356_v32 }
 0x153   :  { %10344 = vst [vmem:[#allocation149_spill] sm:$0xff] %v6005_v36  ;;  %10345 = vst [vmem:[#allocation159_spill] sm:$0xff] %v6007_v23  ;;  %v6025_v37 = vmul.f32 0.11111111, %v1776_v19  ;;  %v6027_v9 = vmul.f32 0.11111111, %v1777_v51  ;;  %v6041_v60 = vmul.f32 %v10361_v61, %v10361_v61  ;;  %v6051_v62 = vmul.f32 %v10366_v33, %v10366_v33 }
 0x154   :  { %10347 = vst [vmem:[#allocation171_spill] sm:$0xff] %v6011_v28  ;;  %10348 = vst [vmem:[#allocation181_spill] sm:$0xff] %v6013_v25  ;;  %v6033_v4 = vmul.f32 0.11111111, %v1778_v39  ;;  %v6035_v52 = vmul.f32 0.11111111, %v1779_v42  ;;  %v6061_v1 = vmul.f32 %v10371_v11, %v10371_v11 }
 0x155   :  { %10349 = vst [vmem:[#allocation184_spill] sm:$0xff] %v6015_v49  ;;  %10350 = vst [vmem:[#allocation187_spill] sm:$0xff] %v6017_v7  ;;  %v6037_v34 = vmul.f32 0.11111111, %v1780_v38  ;;  %v6043_v59 = vmul.f32 0.11111111, %v1781_v46 }
 0x156   :  { %10352 = vst [vmem:[#allocation188_spill] sm:$0xff] %v6021_v63  ;;  %10353 = vst [vmem:[#allocation189_spill] sm:$0xff] %v6023_v57  ;;  %v6045_v30 = vmul.f32 0.11111111, %v1782_v5  ;;  %v6047_v13 = vmul.f32 0.11111111, %v1783_v17 }
 0x157   :  { %10354 = vst [vmem:[#allocation190_spill] sm:$0xff] %v6025_v37  ;;  %10355 = vst [vmem:[#allocation108_spill] sm:$0xff] %v6027_v9  ;;  %v6053_v45 = vmul.f32 0.11111111, %v1784_v2  ;;  %v6055_v35 = vmul.f32 0.11111111, %v1785_v3 }
 0x158   :  { %10357 = vst [vmem:[#allocation98_spill] sm:$0xff] %v6031_v15  ;;  %10358 = vst [vmem:[#allocation194_spill] sm:$0xff] %v6033_v4  ;;  %v6057_v8 = vmul.f32 0.11111111, %v1786_v21  ;;  %v6063_v43 = vmul.f32 0.11111111, %v1787_v54 }
 0x159   :  { %10359 = vst [vmem:[#allocation126_spill] sm:$0xff] %v6035_v52  ;;  %10360 = vst [vmem:[#allocation131_spill] sm:$0xff] %v6037_v34  ;;  %v6065_v22 = vmul.f32 0.11111111, %v1788_v0  ;;  %v6067_v6 = vmul.f32 0.11111111, %v1789_v16 }
 0x15a   :  { %10362 = vst [vmem:[#allocation139_spill] sm:$0xff] %v6041_v60  ;;  %10363 = vst [vmem:[#allocation153_spill] sm:$0xff] %v6043_v59  ;;  %v10376_v48 = vld [vmem:[#allocation107_spill] sm:$0xff]  ;;  %v6073_v53 = vmul.f32 0.11111111, %v1790_v40  ;;  %v10381_v51 = vld [vmem:[#allocation109_spill] sm:$0xff] }
 0x15b   :  { %10364 = vst [vmem:[#allocation157_spill] sm:$0xff] %v6045_v30  ;;  %10365 = vst [vmem:[#allocation163_spill] sm:$0xff] %v6047_v13  ;;  %v6071_v58 = vmul.f32 %v10376_v48, %v10376_v48  ;;  %v6075_v10 = vmul.f32 0.11111111, %v1791_v55  ;;  %v6077_v19 = vmul.f32 0.11111111, %v1792_v47  ;;  %v6081_v39 = vmul.f32 %v10381_v51, %v10381_v51 }
 0x15c   :  { %10367 = vst [vmem:[#allocation167_spill] sm:$0xff] %v6051_v62  ;;  %10368 = vst [vmem:[#allocation175_spill] sm:$0xff] %v6053_v45  ;;  %v6083_v42 = vmul.f32 0.11111111, %v1793_v50  ;;  %v6085_v38 = vmul.f32 0.11111111, %v1794_v29  ;;  %v6115_v29 = vmul.f32 %v10398_v26, %v10398_v26 }
 0x15d   :  { %10369 = vst [vmem:[#allocation179_spill] sm:$0xff] %v6055_v35  ;;  %10370 = vst [vmem:[#allocation182_spill] sm:$0xff] %v6057_v8  ;;  %v6087_v46 = vmul.f32 0.11111111, %v1795_v41  ;;  %v10386_v5 = vld [vmem:[#allocation110_spill] sm:$0xff]  ;;  %v10391_v54 = vld [vmem:[#allocation111_spill] sm:$0xff] }
 0x15e   :  { %10372 = vst [vmem:[#allocation183_spill] sm:$0xff] %v6061_v1  ;;  %10373 = vst [vmem:[#allocation185_spill] sm:$0xff] %v6063_v43  ;;  %v6091_v17 = vmul.f32 %v10386_v5, %v10386_v5  ;;  %v6093_v2 = vmul.f32 0.11111111, %v1796_v12  ;;  %v6095_v3 = vmul.f32 0.11111111, %v1797_v27  ;;  %v6101_v0 = vmul.f32 %v10391_v54, %v10391_v54 }
 0x15f   :  { %10374 = vst [vmem:[#allocation186_spill] sm:$0xff] %v6065_v22  ;;  %10375 = vst [vmem:[#allocation112_spill] sm:$0xff] %v6067_v6  ;;  %v6097_v21 = vmul.f32 0.11111111, %v1798_v18  ;;  %v6103_v16 = vmul.f32 0.11111111, %v1799_v56 }
 0x160   :  { %10377 = vst [vmem:[#allocation122_spill] sm:$0xff] %v6071_v58  ;;  %10378 = vst [vmem:[#allocation104_spill] sm:$0xff] %v6073_v53  ;;  %v10394_v40 = vld [vmem:[#allocation113_spill] sm:$0xff]  ;;  %v10396_v47 = vld [vmem:[#allocation114_spill] sm:$0xff] }
 0x161   :  { %10379 = vst [vmem:[#allocation191_spill] sm:$0xff] %v6075_v10  ;;  %10380 = vst [vmem:[#allocation192_spill] sm:$0xff] %v6077_v19  ;;  %v6107_v55 = vmul.f32 %v10394_v40, %v10394_v40  ;;  %v6111_v50 = vmul.f32 %v10396_v47, %v10396_v47  ;;  %v10400_v20 = vld [vmem:[#allocation99_spill] sm:$0xff]  ;;  %v10402_v12 = vld [vmem:[#allocation116_spill] sm:$0xff] }
 0x162   :  { %10382 = vst [vmem:[#allocation118_spill] sm:$0xff] %v6081_v39  ;;  %10383 = vst [vmem:[#allocation193_spill] sm:$0xff] %v6083_v42  ;;  %v6119_v41 = vmul.f32 %v10400_v20, %v10400_v20  ;;  %v6123_v27 = vmul.f32 %v10402_v12, %v10402_v12  ;;  %v10404_v18 = vld [vmem:[#allocation117_spill] sm:$0xff]  ;;  %v10406_v40 = vld [vmem:[#allocation119_spill] sm:$0xff] }
 0x163   :  { %10384 = vst [vmem:[#allocation196_spill] sm:$0xff] %v6085_v38  ;;  %10385 = vst [vmem:[#allocation197_spill] sm:$0xff] %v6087_v46  ;;  %v6127_v56 = vmul.f32 %v10404_v18, %v10404_v18  ;;  %v6131_v47 = vmul.f32 %v10406_v40, %v10406_v40  ;;  %v10408_v54 = vld [vmem:[#allocation120_spill] sm:$0xff]  ;;  %v10410_v5 = vld [vmem:[#allocation121_spill] sm:$0xff] }
 0x164   :  { %10387 = vst [vmem:[#allocation198_spill] sm:$0xff] %v6091_v17  ;;  %10388 = vst [vmem:[#allocation199_spill] sm:$0xff] %v6093_v2  ;;  %v6135_v26 = vmul.f32 %v10408_v54, %v10408_v54  ;;  %v6139_v20 = vmul.f32 %v10410_v5, %v10410_v5  ;;  %v10412_v51 = vld [vmem:[#allocation123_spill] sm:$0xff]  ;;  %v10414_v48 = vld [vmem:[#allocation124_spill] sm:$0xff] }
 0x165   :  { %10389 = vst [vmem:[#allocation200_spill] sm:$0xff] %v6095_v3  ;;  %10390 = vst [vmem:[#allocation201_spill] sm:$0xff] %v6097_v21  ;;  %v6143_v12 = vmul.f32 %v10412_v51, %v10412_v51  ;;  %v6147_v18 = vmul.f32 %v10414_v48, %v10414_v48  ;;  %v10416_v11 = vld [vmem:[#allocation125_spill] sm:$0xff]  ;;  %v10418_v33 = vld [vmem:[#allocation127_spill] sm:$0xff] }
 0x166   :  { %10392 = vst [vmem:[#allocation202_spill] sm:$0xff] %v6101_v0  ;;  %10393 = vst [vmem:[#allocation203_spill] sm:$0xff] %v6103_v16  ;;  %v6151_v40 = vmul.f32 %v10416_v11, %v10416_v11  ;;  %v6155_v54 = vmul.f32 %v10418_v33, %v10418_v33  ;;  %v10420_v61 = vld [vmem:[#allocation128_spill] sm:$0xff]  ;;  %v10422_v32 = vld [vmem:[#allocation129_spill] sm:$0xff] }
 0x167   :  { %10395 = vst [vmem:[#allocation204_spill] sm:$0xff] %v6107_v55  ;;  %10397 = vst [vmem:[#allocation205_spill] sm:$0xff] %v6111_v50  ;;  %v6159_v5 = vmul.f32 %v10420_v61, %v10420_v61  ;;  %v6163_v51 = vmul.f32 %v10422_v32, %v10422_v32  ;;  %v10424_v24 = vld [vmem:[#allocation130_spill] sm:$0xff]  ;;  %v10426_v14 = vld [vmem:[#allocation132_spill] sm:$0xff] }
 0x168   :  { %10399 = vst [vmem:[#allocation206_spill] sm:$0xff] %v6115_v29  ;;  %10401 = vst [vmem:[#allocation207_spill] sm:$0xff] %v6119_v41  ;;  %v6167_v48 = vmul.f32 %v10424_v24, %v10424_v24  ;;  %v6171_v11 = vmul.f32 %v10426_v14, %v10426_v14  ;;  %v10428_v16 = vld [vmem:[#allocation133_spill] sm:$0xff]  ;;  %v10430_v21 = vld [vmem:[#allocation134_spill] sm:$0xff] }
 0x169   :  { %10403 = vst [vmem:[#allocation208_spill] sm:$0xff] %v6123_v27  ;;  %10405 = vst [vmem:[#allocation209_spill] sm:$0xff] %v6127_v56  ;;  %v6175_v33 = vmul.f32 %v10428_v16, %v10428_v16  ;;  %v6179_v61 = vmul.f32 %v10430_v21, %v10430_v21  ;;  %v10432_v3 = vld [vmem:[#allocation135_spill] sm:$0xff]  ;;  %v10434_v2 = vld [vmem:[#allocation137_spill] sm:$0xff] }
 0x16a   :  { %10407 = vst [vmem:[#allocation210_spill] sm:$0xff] %v6131_v47  ;;  %10409 = vst [vmem:[#allocation211_spill] sm:$0xff] %v6135_v26  ;;  %v6183_v32 = vmul.f32 %v10432_v3, %v10432_v3  ;;  %v6187_v24 = vmul.f32 %v10434_v2, %v10434_v2  ;;  %v10436_v46 = vld [vmem:[#allocation138_spill] sm:$0xff]  ;;  %v10445_v35 = vld [vmem:[#allocation73_spill] sm:$0xff] }
 0x16b   :  { %10411 = vst [vmem:[#allocation212_spill] sm:$0xff] %v6139_v20  ;;  %10413 = vst [vmem:[#allocation213_spill] sm:$0xff] %v6143_v12  ;;  %v6191_v14 = vmul.f32 %v10436_v46, %v10436_v46  ;;  %v6259_v2 = vmul.f32 %v10445_v35, %v10445_v35  ;;  %v10447_v22 = vld [vmem:[#allocation89_spill] sm:$0xff]  ;;  %v10449_v16 = vld [vmem:[#allocation74_spill] sm:$0xff] }
 0x16c   :  { %10415 = vst [vmem:[#allocation214_spill] sm:$0xff] %v6147_v18  ;;  %10417 = vst [vmem:[#allocation215_spill] sm:$0xff] %v6151_v40  ;;  %v6267_v6 = vmul.f32 %v10447_v22, %v10447_v22  ;;  %v6271_v53 = vmul.f32 %v10449_v16, %v10449_v16  ;;  %v10450_v10 = vld [vmem:[#allocation52_spill] sm:$0xff]  ;;  %v10451_v19 = vld [vmem:[#allocation90_spill] sm:$0xff] }
 0x16d   :  { %10419 = vst [vmem:[#allocation216_spill] sm:$0xff] %v6155_v54  ;;  %10421 = vst [vmem:[#allocation217_spill] sm:$0xff] %v6159_v5  ;;  %v6275_v21 = vmul.f32 %v10450_v10, %v10450_v10  ;;  %v6279_v3 = vmul.f32 %v10451_v19, %v10451_v19  ;;  %v10454_v42 = vld [vmem:[#allocation55_spill] sm:$0xff]  ;;  %v10457_v59 = vld [vmem:[#allocation76_spill] sm:$0xff] }
 0x16e   :  { %10423 = vst [vmem:[#allocation218_spill] sm:$0xff] %v6163_v51  ;;  %10425 = vst [vmem:[#allocation219_spill] sm:$0xff] %v6167_v48  ;;  %v6287_v45 = vmul.f32 %v10454_v42, %v10454_v42  ;;  %v10455_v13 = vld [vmem:[#allocation91_spill] sm:$0xff]  ;;  %v6295_v34 = vmul.f32 %v10457_v59, %v10457_v59  ;;  %v10458_v52 = vld [vmem:[#allocation60_spill] sm:$0xff]  ;;  %v1997_v42 = vrot.slane %v6271_v53, 1 }
 0x16f   :  { %10427 = vst [vmem:[#allocation220_spill] sm:$0xff] %v6171_v11  ;;  %10429 = vst [vmem:[#allocation221_spill] sm:$0xff] %v6175_v33  ;;  %v10453_v33 = vld [vmem:[#allocation75_spill] sm:$0xff]  ;;  %v6291_v30 = vmul.f32 %v10455_v13, %v10455_v13  ;;  %v6299_v4 = vmul.f32 %v10458_v52, %v10458_v52  ;;  %v10460_v9 = vld [vmem:[#allocation92_spill] sm:$0xff] }
 0x170   :  { %10431 = vst [vmem:[#allocation222_spill] sm:$0xff] %v6179_v61  ;;  %10433 = vst [vmem:[#allocation223_spill] sm:$0xff] %v6183_v32  ;;  %v6283_v46 = vmul.f32 %v10453_v33, %v10453_v33  ;;  %v6303_v37 = vmul.f32 %v10460_v9, %v10460_v9  ;;  %v10462_v57 = vld [vmem:[#allocation77_spill] sm:$0xff]  ;;  %v10468_v44 = vld [vmem:[#allocation78_spill] sm:$0xff]  ;;  %v2003_v19 = vrot.slane %v6287_v45, 1 }
 0x171   :  { %10435 = vst [vmem:[#allocation224_spill] sm:$0xff] %v6187_v24  ;;  %10437 = vst [vmem:[#allocation225_spill] sm:$0xff] %v6191_v14  ;;  %v10446_v24 = vld [vmem:[#allocation50_spill] sm:$0xff]  ;;  %v6307_v7 = vmul.f32 %v10462_v57, %v10462_v57  ;;  %v10464_v49 = vld [vmem:[#allocation61_spill] sm:$0xff]  ;;  %v6319_v31 = vmul.f32 %v10468_v44, %v10468_v44  ;;  %v1995_v44 = vrot.slane %v6267_v6, 1  ;;  %v2005_v10 = vrot.slane %v6291_v30, 1 }
 0x172   :  { %v6263_v38 = vmul.f32 %v10446_v24, %v10446_v24  ;;  %10448 = vst [vmem:[#allocation226_spill] sm:$0xff] %v6267_v6  ;;  %10452 = vst [vmem:[#allocation227_spill] sm:$0xff] %v6279_v3  ;;  %v6311_v25 = vmul.f32 %v10464_v49, %v10464_v49  ;;  %v10466_v23 = vld [vmem:[#allocation93_spill] sm:$0xff]  ;;  %v10470_v14 = vld [vmem:[#allocation62_spill] sm:$0xff]  ;;  %v2008_v16 = vrot.slane %v6299_v4, 1  ;;  %v2010_v22 = vrot.slane %v6303_v37, 1 }
 0x173   :  { %10456 = vst [vmem:[#allocation228_spill] sm:$0xff] %v6291_v30  ;;  %10459 = vst [vmem:[#allocation229_spill] sm:$0xff] %v6299_v4  ;;  %v6315_v36 = vmul.f32 %v10466_v23, %v10466_v23  ;;  %v6323_v8 = vmul.f32 %v10470_v14, %v10470_v14  ;;  %v10472_v32 = vld [vmem:[#allocation94_spill] sm:$0xff]  ;;  %v10474_v43 = vld [vmem:[#allocation79_spill] sm:$0xff] }
 0x174   :  { %10461 = vst [vmem:[#allocation230_spill] sm:$0xff] %v6303_v37  ;;  %10463 = vst [vmem:[#allocation231_spill] sm:$0xff] %v6307_v7  ;;  %v6327_v61 = vmul.f32 %v10472_v32, %v10472_v32  ;;  %v6331_v11 = vmul.f32 %v10474_v43, %v10474_v43  ;;  %v10476_v48 = vld [vmem:[#allocation63_spill] sm:$0xff]  ;;  %v10480_v40 = vld [vmem:[#allocation80_spill] sm:$0xff]  ;;  %v2013_v24 = vrot.slane %v6311_v25, 1 }
 0x175   :  { %10465 = vst [vmem:[#allocation232_spill] sm:$0xff] %v6311_v25  ;;  %10467 = vst [vmem:[#allocation233_spill] sm:$0xff] %v6315_v36  ;;  %v6335_v51 = vmul.f32 %v10476_v48, %v10476_v48  ;;  %v10478_v5 = vld [vmem:[#allocation95_spill] sm:$0xff]  ;;  %v6343_v18 = vmul.f32 %v10480_v40, %v10480_v40  ;;  %v10482_v12 = vld [vmem:[#allocation64_spill] sm:$0xff]  ;;  %v1992_v48 = vrot.slane %v6259_v2, 1  ;;  %v2015_v35 = vrot.slane %v6315_v36, 1 }
 0x176   :  { %10469 = vst [vmem:[#allocation234_spill] sm:$0xff] %v6319_v31  ;;  %10471 = vst [vmem:[#allocation235_spill] sm:$0xff] %v6323_v8  ;;  %v6339_v54 = vmul.f32 %v10478_v5, %v10478_v5  ;;  %v6347_v20 = vmul.f32 %v10482_v12, %v10482_v12  ;;  %v10484_v26 = vld [vmem:[#allocation96_spill] sm:$0xff]  ;;  %v10486_v56 = vld [vmem:[#allocation81_spill] sm:$0xff]  ;;  %v2018_v6 = vrot.slane %v6323_v8, 1 }
 0x177   :  { %10473 = vst [vmem:[#allocation236_spill] sm:$0xff] %v6327_v61  ;;  %10475 = vst [vmem:[#allocation237_spill] sm:$0xff] %v6331_v11  ;;  %v6351_v47 = vmul.f32 %v10484_v26, %v10484_v26  ;;  %v6355_v27 = vmul.f32 %v10486_v56, %v10486_v56  ;;  %v10488_v41 = vld [vmem:[#allocation65_spill] sm:$0xff]  ;;  %v10492_v0 = vld [vmem:[#allocation82_spill] sm:$0xff]  ;;  %v2023_v30 = vrot.slane %v6335_v51, 1  ;;  %v2027_v37 = vrot.slane %v6343_v18, 1 }
 0x178   :  { %10477 = vst [vmem:[#allocation238_spill] sm:$0xff] %v6335_v51  ;;  %10479 = vst [vmem:[#allocation239_spill] sm:$0xff] %v6339_v54  ;;  %v6359_v29 = vmul.f32 %v10488_v41, %v10488_v41  ;;  %v10490_v50 = vld [vmem:[#allocation97_spill] sm:$0xff]  ;;  %v6367_v17 = vmul.f32 %v10492_v0, %v10492_v0  ;;  %v10493_v39 = vld [vmem:[#allocation66_spill] sm:$0xff]  ;;  %v2025_v4 = vrot.slane %v6339_v54, 1  ;;  %v2006_v51 = vsel %vm556_vm1, %v2003_v19, %v2005_v10 }
 0x179   :  { %10481 = vst [vmem:[#allocation240_spill] sm:$0xff] %v6343_v18  ;;  %10483 = vst [vmem:[#allocation241_spill] sm:$0xff] %v6347_v20  ;;  %v6363_v55 = vmul.f32 %v10490_v50, %v10490_v50  ;;  %v6371_v58 = vmul.f32 %v10493_v39, %v10493_v39  ;;  %v10494_v1 = vld [vmem:[#allocation51_spill] sm:$0xff]  ;;  %v10498_v50 = vld [vmem:[#allocation53_spill] sm:$0xff]  ;;  %v2030_v36 = vrot.slane %v6351_v47, 1  ;;  %v2011_v18 = vsel %vm556_vm1, %v2008_v16, %v2010_v22 }
 0x17a   :  { %10485 = vst [vmem:[#allocation242_spill] sm:$0xff] %v6351_v47  ;;  %10487 = vst [vmem:[#allocation243_spill] sm:$0xff] %v6355_v27  ;;  %v6375_v62 = vmul.f32 %v10494_v1, %v10494_v1  ;;  %v10496_v60 = vld [vmem:[#allocation83_spill] sm:$0xff]  ;;  %v6387_v0 = vmul.f32 %v10498_v50, %v10498_v50  ;;  %v10500_v41 = vld [vmem:[#allocation84_spill] sm:$0xff]  ;;  %v2033_v8 = vrot.slane %v6359_v29, 1  ;;  %v2037_v10 = vrot.slane %v6367_v17, 1 }
 0x17b   :  { %10489 = vst [vmem:[#allocation244_spill] sm:$0xff] %v6359_v29  ;;  %10491 = vst [vmem:[#allocation245_spill] sm:$0xff] %v6363_v55  ;;  %v6379_v15 = vmul.f32 %v10496_v60, %v10496_v60  ;;  %v10497_v63 = vld [vmem:[#allocation67_spill] sm:$0xff]  ;;  %v6391_v39 = vmul.f32 %v10500_v41, %v10500_v41  ;;  %v10501_v56 = vld [vmem:[#allocation68_spill] sm:$0xff]  ;;  %v2035_v22 = vrot.slane %v6363_v55, 1 }
 0x17c   :  { %10495 = vst [vmem:[#allocation246_spill] sm:$0xff] %v6375_v62  ;;  %v6383_v28 = vmul.f32 %v10497_v63, %v10497_v63  ;;  %10499 = vst [vmem:[#allocation247_spill] sm:$0xff] %v6387_v0  ;;  %v6395_v1 = vmul.f32 %v10501_v56, %v10501_v56  ;;  %v10502_v26 = vld [vmem:[#allocation54_spill] sm:$0xff]  ;;  %v10504_v12 = vld [vmem:[#allocation85_spill] sm:$0xff]  ;;  %v1993_v56 = vrot.slane %v6263_v38, 1 }
 0x17d   :  { %v6399_v60 = vmul.f32 %v10502_v26, %v10502_v26  ;;  %v6403_v63 = vmul.f32 %v10504_v12, %v10504_v12  ;;  %v10505_v40 = vld [vmem:[#allocation69_spill] sm:$0xff]  ;;  %v10507_v5 = vld [vmem:[#allocation56_spill] sm:$0xff]  ;;  %v10509_v43 = vld [vmem:[#allocation86_spill] sm:$0xff] }
 0x17e   :  { %v6407_v50 = vmul.f32 %v10505_v40, %v10505_v40  ;;  %v6411_v41 = vmul.f32 %v10507_v5, %v10507_v5  ;;  %v6417_v26 = vmul.f32 %v10509_v43, %v10509_v43  ;;  %v10511_v32 = vld [vmem:[#allocation70_spill] sm:$0xff]  ;;  %v10513_v14 = vld [vmem:[#allocation57_spill] sm:$0xff]  ;;  %v10515_v5 = vld [vmem:[#allocation87_spill] sm:$0xff]  ;;  %v6455_v33 = vsel %vm556_vm1, %v1992_v48, %v1993_v56 }
 0x17f   :  { %10503 = vst [vmem:[#allocation248_spill] sm:$0xff] %v6399_v60  ;;  %v6421_v12 = vmul.f32 %v10511_v32, %v10511_v32  ;;  %v6425_v40 = vmul.f32 %v10513_v14, %v10513_v14  ;;  %v6430_v23 = vmul.f32 %v10515_v5, %v10515_v5  ;;  %v10517_v49 = vld [vmem:[#allocation71_spill] sm:$0xff]  ;;  %v10519_v43 = vld [vmem:[#allocation58_spill] sm:$0xff]  ;;  %v10521_v32 = vld [vmem:[#allocation88_spill] sm:$0xff]  ;;  %v2012_v48 = vrot.slane %v6307_v7, 1 }
 0x180   :  { %10506 = vst [vmem:[#allocation249_spill] sm:$0xff] %v6407_v50  ;;  %10508 = vst [vmem:[#allocation250_spill] sm:$0xff] %v6411_v41  ;;  %v6434_v57 = vmul.f32 %v10517_v49, %v10517_v49  ;;  %v6438_v9 = vmul.f32 %v10519_v43, %v10519_v43  ;;  %v6442_v52 = vmul.f32 %v10521_v32, %v10521_v32  ;;  %v10522_v14 = vld [vmem:[#allocation72_spill] sm:$0xff]  ;;  %v10524_v13 = vld [vmem:[#allocation59_spill] sm:$0xff]  ;;  %v1998_v49 = vrot.slane %v6275_v21, 1 }
 0x181   :  { %10510 = vst [vmem:[#allocation251_spill] sm:$0xff] %v6417_v26  ;;  %10512 = vst [vmem:[#allocation252_spill] sm:$0xff] %v6421_v12  ;;  %v6446_v59 = vmul.f32 %v10522_v14, %v10522_v14  ;;  %v6450_v5 = vmul.f32 %v10524_v13, %v10524_v13  ;;  %v2000_v43 = vrot.slane %v6279_v3, 1  ;;  %v2002_v32 = vrot.slane %v6283_v46, 1 }
 0x182   :  { %10514 = vst [vmem:[#allocation253_spill] sm:$0xff] %v6425_v40  ;;  %10516 = vst [vmem:[#allocation254_spill] sm:$0xff] %v6430_v23  ;;  %v6461_v14 = vsel %vm556_vm1, %v1993_v56, %v1995_v44  ;;  %v2007_v13 = vrot.slane %v6295_v34, 1  ;;  %v2017_v3 = vrot.slane %v6319_v31, 1  ;;  %v2020_v44 = vrot.slane %v6327_v61, 1 }
 0x183   :  { %10518 = vst [vmem:[#allocation255_spill] sm:$0xff] %v6434_v57  ;;  %10520 = vst [vmem:[#allocation256_spill] sm:$0xff] %v6438_v9  ;;  %v2022_v56 = vrot.slane %v6331_v11, 1  ;;  %v2028_v7 = vrot.slane %v6347_v20, 1  ;;  %v1999_v25 = vsel %vm556_vm1, %v1997_v42, %v1998_v49  ;;  %v2032_v31 = vrot.slane %v6355_v27, 1 }
 0x184   :  { %10523 = vst [vmem:[#allocation257_spill] sm:$0xff] %v6446_v59  ;;  %v2001_v61 = vsel %vm556_vm1, %v1998_v49, %v2000_v43  ;;  %v2004_v11 = vsel %vm556_vm1, %v2002_v32, %v2003_v19  ;;  %v2009_v54 = vsel %vm556_vm1, %v2007_v13, %v2008_v16  ;;  %v2014_v20 = vsel %vm556_vm1, %v2012_v48, %v2013_v24 }
 0x185   :  { %v2016_v42 = vsel %vm556_vm1, %v2013_v24, %v2015_v35  ;;  %v2019_v47 = vsel %vm556_vm1, %v2017_v3, %v2018_v6  ;;  %v2021_v27 = vsel %vm556_vm1, %v2018_v6, %v2020_v44  ;;  %v2024_v29 = vsel %vm556_vm1, %v2022_v56, %v2023_v30 }
 0x186   :  { %v2026_v49 = vsel %vm556_vm1, %v2023_v30, %v2025_v4  ;;  %v2029_v32 = vsel %vm556_vm1, %v2027_v37, %v2028_v7  ;;  %v2031_v43 = vsel %vm556_vm1, %v2028_v7, %v2030_v36  ;;  %v2034_v13 = vsel %vm556_vm1, %v2032_v31, %v2033_v8 }
 0x187   :  { %v2038_v24 = vrot.slane %v6371_v58, 1  ;;  %v2040_v35 = vrot.slane %v6375_v62, 1  ;;  %v2042_v6 = vrot.slane %v6379_v15, 1  ;;  %v2043_v19 = vrot.slane %v6383_v28, 1 }
 0x188   :  { %v2045_v4 = vrot.slane %v6387_v0, 1  ;;  %v2047_v37 = vrot.slane %v6391_v39, 1  ;;  %v2048_v36 = vrot.slane %v6395_v1, 1  ;;  %v2050_v31 = vrot.slane %v6399_v60, 1 }
 0x189   :  { %v2052_v7 = vrot.slane %v6403_v63, 1  ;;  %v2053_v30 = vrot.slane %v6407_v50, 1  ;;  %v2055_v3 = vrot.slane %v6411_v41, 1  ;;  %v2057_v16 = vrot.slane %v6417_v26, 1 }
 0x18a   :  { %v2058_v48 = vrot.slane %v6421_v12, 1  ;;  %v2060_v44 = vrot.slane %v6425_v40, 1  ;;  %v2062_v56 = vrot.slane %v6430_v23, 1  ;;  %v2063_v0 = vrot.slane %v6434_v57, 1 }
 0x18b   :  { %v2036_v62 = vsel %vm556_vm1, %v2033_v8, %v2035_v22  ;;  %v2065_v60 = vrot.slane %v6438_v9, 1  ;;  %v2067_v55 = vrot.slane %v6442_v52, 1  ;;  %v2068_v50 = vrot.slane %v6446_v59, 1 }
 0x18c   :  { %v2039_v41 = vsel %vm556_vm1, %v2037_v10, %v2038_v24  ;;  %v2041_v26 = vsel %vm556_vm1, %v2038_v24, %v2040_v35  ;;  %v2044_v12 = vsel %vm556_vm1, %v2042_v6, %v2043_v19  ;;  %v2070_v40 = vrot.slane %v6450_v5, 1 }
 0x18d   :  { %v2046_v23 = vsel %vm556_vm1, %v2043_v19, %v2045_v4  ;;  %v2049_v57 = vsel %vm556_vm1, %v2047_v37, %v2048_v36  ;;  %v2051_v8 = vsel %vm556_vm1, %v2048_v36, %v2050_v31  ;;  %v2054_v22 = vsel %vm556_vm1, %v2052_v7, %v2053_v30  ;;  %v10526_v7 = vld [vmem:[#allocation231_spill] sm:$0xff] }
 0x18e   :  { %v2056_v9 = vsel %vm556_vm1, %v2053_v30, %v2055_v3  ;;  %v2059_v59 = vsel %vm556_vm1, %v2057_v16, %v2058_v48  ;;  %v2061_v10 = vsel %vm556_vm1, %v2058_v48, %v2060_v44  ;;  %v2064_v24 = vsel %vm556_vm1, %v2062_v56, %v2063_v0 }
 0x18f   :  { %v2066_v35 = vsel %vm556_vm1, %v2063_v0, %v2065_v60  ;;  %v2069_v6 = vsel %vm556_vm1, %v2067_v55, %v2068_v50  ;;  %v6534_v19 = vadd.f32 %v6455_v33, %v6259_v2  ;;  %v6538_v4 = vadd.f32 %v6461_v14, %v6263_v38  ;;  %v10525_v55 = vld [vmem:[#allocation229_spill] sm:$0xff] }
 0x190   :  { %v2071_v37 = vsel %vm556_vm1, %v2068_v50, %v2070_v40  ;;  %v6542_v36 = vadd.f32 %v1999_v25, %v6271_v53  ;;  %v6545_v31 = vadd.f32 %v2001_v61, %v6275_v21  ;;  %v6548_v60 = vadd.f32 %v2004_v11, %v6283_v46  ;;  %v10527_v25 = vld [vmem:[#allocation232_spill] sm:$0xff]  ;;  %v10529_v61 = vld [vmem:[#allocation234_spill] sm:$0xff]  ;;  %v10531_v11 = vld [vmem:[#allocation235_spill] sm:$0xff] }
 0x191   :  { %v6551_v0 = vadd.f32 %v2006_v51, %v6287_v45  ;;  %v6554_v33 = vadd.f32 %v2009_v54, %v6295_v34  ;;  %v6557_v14 = vadd.f32 %v2011_v18, %v10525_v55  ;;  %v6560_v40 = vadd.f32 %v2014_v20, %v10526_v7  ;;  %v10532_v51 = vld [vmem:[#allocation237_spill] sm:$0xff]  ;;  %v10533_v54 = vld [vmem:[#allocation238_spill] sm:$0xff]  ;;  %v10534_v18 = vld [vmem:[#allocation240_spill] sm:$0xff] }
 0x192   :  { %v6563_v50 = vadd.f32 %v2016_v42, %v10527_v25  ;;  %v6566_v30 = vadd.f32 %v2019_v47, %v10529_v61  ;;  %v6569_v3 = vadd.f32 %v2021_v27, %v10531_v11  ;;  %v6572_v16 = vadd.f32 %v2024_v29, %v10532_v51  ;;  %v10535_v20 = vld [vmem:[#allocation241_spill] sm:$0xff]  ;;  %v10536_v42 = vld [vmem:[#allocation243_spill] sm:$0xff]  ;;  %v10538_v47 = vld [vmem:[#allocation244_spill] sm:$0xff] }
 0x193   :  { %v6575_v48 = vadd.f32 %v2026_v49, %v10533_v54  ;;  %v6578_v44 = vadd.f32 %v2029_v32, %v10534_v18  ;;  %v6581_v56 = vadd.f32 %v2031_v43, %v10535_v20  ;;  %v6590_v27 = vadd.f32 %v2039_v41, %v6367_v17 }
 0x194   :  { %10528 = vst [vmem:[#allocation229_spill] sm:$0xff] %v6563_v50  ;;  %10530 = vst [vmem:[#allocation231_spill] sm:$0xff] %v6566_v30  ;;  %v6584_v50 = vadd.f32 %v2034_v13, %v10536_v42  ;;  %v6587_v30 = vadd.f32 %v2036_v62, %v10538_v47  ;;  %v6593_v29 = vadd.f32 %v2041_v26, %v6371_v58  ;;  %v2136_v13 = vrot.slane %v6259_v2, 2  ;;  %v10547_v26 = vld [vmem:[#allocation249_spill] sm:$0xff]  ;;  %v10554_v2 = vld [vmem:[#allocation254_spill] sm:$0xff] }
 0x195   :  { %10540 = vst [vmem:[#allocation235_spill] sm:$0xff] %v6590_v27  ;;  %v6596_v49 = vadd.f32 %v2044_v12, %v6379_v15  ;;  %v6599_v32 = vadd.f32 %v2046_v23, %v6383_v28  ;;  %v6602_v43 = vadd.f32 %v2049_v57, %v6391_v39  ;;  %v2137_v62 = vrot.slane %v6263_v38, 2  ;;  %v10549_v12 = vld [vmem:[#allocation226_spill] sm:$0xff]  ;;  %v10550_v23 = vld [vmem:[#allocation251_spill] sm:$0xff]  ;;  %v10552_v57 = vld [vmem:[#allocation252_spill] sm:$0xff] }
 0x196   :  { %10537 = vst [vmem:[#allocation232_spill] sm:$0xff] %v6584_v50  ;;  %10539 = vst [vmem:[#allocation234_spill] sm:$0xff] %v6587_v30  ;;  %v6607_v30 = vadd.f32 %v2051_v8, %v6395_v1  ;;  %v6610_v41 = vadd.f32 %v2054_v22, %v6403_v63  ;;  %v6623_v27 = vadd.f32 %v2064_v24, %v10554_v2  ;;  %v10556_v38 = vld [vmem:[#allocation255_spill] sm:$0xff]  ;;  %v2146_v24 = vrot.slane %v6283_v46, 2  ;;  %v10567_v50 = vld [vmem:[#allocation242_spill] sm:$0xff] }
 0x197   :  { %10541 = vst [vmem:[#allocation237_spill] sm:$0xff] %v6593_v29  ;;  %10542 = vst [vmem:[#allocation238_spill] sm:$0xff] %v6596_v49  ;;  %v6613_v29 = vadd.f32 %v2056_v9, %v10547_v26  ;;  %v2139_v49 = vrot.slane %v10549_v12, 2  ;;  %v6626_v8 = vadd.f32 %v2066_v35, %v10556_v38  ;;  %v6629_v22 = vadd.f32 %v2069_v6, %v6442_v52  ;;  %v10562_v6 = vld [vmem:[#allocation228_spill] sm:$0xff] }
 0x198   :  { %10543 = vst [vmem:[#allocation240_spill] sm:$0xff] %v6599_v32  ;;  %10544 = vst [vmem:[#allocation241_spill] sm:$0xff] %v6602_v43  ;;  %v6617_v32 = vadd.f32 %v2059_v59, %v10550_v23  ;;  %v6620_v43 = vadd.f32 %v2061_v10, %v10552_v57  ;;  %v2141_v12 = vrot.slane %v6271_v53, 2  ;;  %v2142_v59 = vrot.slane %v6275_v21, 2  ;;  %v10561_v10 = vld [vmem:[#allocation227_spill] sm:$0xff] }
 0x199   :  { %10545 = vst [vmem:[#allocation243_spill] sm:$0xff] %v6607_v30  ;;  %10546 = vst [vmem:[#allocation244_spill] sm:$0xff] %v6610_v41  ;;  %v10559_v41 = vld [vmem:[#allocation257_spill] sm:$0xff]  ;;  %v2147_v35 = vrot.slane %v6287_v45, 2  ;;  %v2152_v53 = vrot.slane %v10525_v55, 2  ;;  %v2161_v46 = vrot.slane %v10529_v61, 2 }
 0x19a   :  { %10548 = vst [vmem:[#allocation249_spill] sm:$0xff] %v6613_v29  ;;  %10551 = vst [vmem:[#allocation226_spill] sm:$0xff] %v6617_v32  ;;  %v6632_v9 = vadd.f32 %v2071_v37, %v10559_v41  ;;  %v6637_v32 = vsel %vm701_vm2, %v2136_v13, %v2137_v62  ;;  %v2151_v37 = vrot.slane %v6295_v34, 2  ;;  %v2156_v13 = vrot.slane %v10526_v7, 2  ;;  %v10566_v30 = vld [vmem:[#allocation239_spill] sm:$0xff] }
 0x19b   :  { %10553 = vst [vmem:[#allocation251_spill] sm:$0xff] %v6620_v43  ;;  %10555 = vst [vmem:[#allocation252_spill] sm:$0xff] %v6623_v27  ;;  %v2144_v43 = vrot.slane %v10561_v10, 2  ;;  %v2157_v27 = vrot.slane %v10527_v25, 2  ;;  %v10564_v10 = vld [vmem:[#allocation233_spill] sm:$0xff]  ;;  %v2162_v45 = vrot.slane %v10531_v11, 2  ;;  %v2143_v25 = vsel %vm701_vm2, %v2141_v12, %v2142_v59 }
 0x19c   :  { %10557 = vst [vmem:[#allocation254_spill] sm:$0xff] %v6626_v8  ;;  %10558 = vst [vmem:[#allocation255_spill] sm:$0xff] %v6629_v22  ;;  %v6643_v8 = vsel %vm701_vm2, %v2137_v62, %v2139_v49  ;;  %v2149_v22 = vrot.slane %v10562_v6, 2  ;;  %v2159_v29 = vrot.slane %v10564_v10, 2  ;;  %v10565_v49 = vld [vmem:[#allocation236_spill] sm:$0xff]  ;;  %v2166_v6 = vrot.slane %v10532_v51, 2 }
 0x19d   :  { %10560 = vst [vmem:[#allocation257_spill] sm:$0xff] %v6632_v9  ;;  %v10563_v9 = vld [vmem:[#allocation230_spill] sm:$0xff]  ;;  %v2164_v62 = vrot.slane %v10565_v49, 2  ;;  %v2167_v34 = vrot.slane %v10533_v54, 2  ;;  %v2169_v55 = vrot.slane %v10566_v30, 2  ;;  %v2172_v7 = vrot.slane %v10535_v20, 2 }
 0x19e   :  { %v2154_v21 = vrot.slane %v10563_v9, 2  ;;  %v2171_v9 = vrot.slane %v10534_v18, 2  ;;  %v2174_v10 = vrot.slane %v10567_v50, 2  ;;  %v2176_v61 = vrot.slane %v10536_v42, 2 }
 0x19f   :  { %v2177_v11 = vrot.slane %v10538_v47, 2  ;;  %v2145_v49 = vsel %vm701_vm2, %v2142_v59, %v2144_v43  ;;  %v2148_v51 = vsel %vm701_vm2, %v2146_v24, %v2147_v35  ;;  %v2150_v54 = vsel %vm701_vm2, %v2147_v35, %v2149_v22  ;;  %v10568_v35 = vld [vmem:[#allocation245_spill] sm:$0xff] }
 0x1a0   :  { %v2153_v30 = vsel %vm701_vm2, %v2151_v37, %v2152_v53  ;;  %v2155_v18 = vsel %vm701_vm2, %v2152_v53, %v2154_v21  ;;  %v2158_v20 = vsel %vm701_vm2, %v2156_v13, %v2157_v27  ;;  %v2160_v12 = vsel %vm701_vm2, %v2157_v27, %v2159_v29  ;;  %v10569_v29 = vld [vmem:[#allocation246_spill] sm:$0xff] }
 0x1a1   :  { %v2163_v50 = vsel %vm701_vm2, %v2161_v46, %v2162_v45  ;;  %v2165_v42 = vsel %vm701_vm2, %v2162_v45, %v2164_v62  ;;  %v2168_v47 = vsel %vm701_vm2, %v2166_v6, %v2167_v34  ;;  %v2170_v43 = vsel %vm701_vm2, %v2167_v34, %v2169_v55  ;;  %v10570_v45 = vld [vmem:[#allocation247_spill] sm:$0xff]  ;;  %v10571_v55 = vld [vmem:[#allocation248_spill] sm:$0xff] }
 0x1a2   :  { %v2173_v59 = vsel %vm701_vm2, %v2171_v9, %v2172_v7  ;;  %v2175_v22 = vsel %vm701_vm2, %v2172_v7, %v2174_v10  ;;  %v2178_v24 = vsel %vm701_vm2, %v2176_v61, %v2177_v11  ;;  %v2179_v37 = vrot.slane %v10568_v35, 2  ;;  %v10572_v10 = vld [vmem:[#allocation250_spill] sm:$0xff]  ;;  %v10573_v35 = vld [vmem:[#allocation253_spill] sm:$0xff] }
 0x1a3   :  { %v2181_v53 = vrot.slane %v6367_v17, 2  ;;  %v2182_v27 = vrot.slane %v6371_v58, 2  ;;  %v2184_v21 = vrot.slane %v10569_v29, 2  ;;  %v2186_v13 = vrot.slane %v6379_v15, 2 }
 0x1a4   :  { %v2187_v46 = vrot.slane %v6383_v28, 2  ;;  %v2189_v62 = vrot.slane %v10570_v45, 2  ;;  %v2191_v6 = vrot.slane %v6391_v39, 2  ;;  %v2192_v34 = vrot.slane %v6395_v1, 2  ;;  %v10574_v45 = vld [vmem:[#allocation256_spill] sm:$0xff] }
 0x1a5   :  { %v2194_v9 = vrot.slane %v10571_v55, 2  ;;  %v2196_v7 = vrot.slane %v6403_v63, 2  ;;  %v2197_v17 = vrot.slane %v10547_v26, 2  ;;  %v2199_v58 = vrot.slane %v10572_v10, 2 }
 0x1a6   :  { %v2201_v61 = vrot.slane %v10550_v23, 2  ;;  %v2202_v15 = vrot.slane %v10552_v57, 2  ;;  %v2204_v28 = vrot.slane %v10573_v35, 2  ;;  %v2206_v29 = vrot.slane %v10554_v2, 2 }
 0x1a7   :  { %v2207_v39 = vrot.slane %v10556_v38, 2  ;;  %v2180_v1 = vsel %vm701_vm2, %v2177_v11, %v2179_v37  ;;  %v2209_v55 = vrot.slane %v10574_v45, 2  ;;  %v2211_v63 = vrot.slane %v6442_v52, 2 }
 0x1a8   :  { %v2212_v26 = vrot.slane %v10559_v41, 2  ;;  %v2183_v10 = vsel %vm701_vm2, %v2181_v53, %v2182_v27  ;;  %v2185_v23 = vsel %vm701_vm2, %v2182_v27, %v2184_v21  ;;  %v2188_v57 = vsel %vm701_vm2, %v2186_v13, %v2187_v46 }
 0x1a9   :  { %v2214_v35 = vrot.slane %v6450_v5, 2  ;;  %v2190_v2 = vsel %vm701_vm2, %v2187_v46, %v2189_v62  ;;  %v2193_v38 = vsel %vm701_vm2, %v2191_v6, %v2192_v34  ;;  %v2195_v11 = vsel %vm701_vm2, %v2192_v34, %v2194_v9 }
 0x1aa   :  { %v2198_v37 = vsel %vm701_vm2, %v2196_v7, %v2197_v17  ;;  %v2200_v52 = vsel %vm701_vm2, %v2197_v17, %v2199_v58  ;;  %v2203_v41 = vsel %vm701_vm2, %v2201_v61, %v2202_v15  ;;  %v2205_v53 = vsel %vm701_vm2, %v2202_v15, %v2204_v28 }
 0x1ab   :  { %v2208_v27 = vsel %vm701_vm2, %v2206_v29, %v2207_v39  ;;  %v2210_v21 = vsel %vm701_vm2, %v2207_v39, %v2209_v55  ;;  %v2213_v5 = vsel %vm701_vm2, %v2211_v63, %v2212_v26  ;;  %v6716_v13 = vadd.f32 %v6637_v32, %v6534_v19  ;;  %v10575_v32 = vld [vmem:[#allocation229_spill] sm:$0xff]  ;;  %v10589_v29 = vld [vmem:[#allocation252_spill] sm:$0xff]  ;;  %v10593_v55 = vld [vmem:[#allocation255_spill] sm:$0xff] }
 0x1ac   :  { %v6720_v46 = vadd.f32 %v6643_v8, %v6538_v4  ;;  %v2215_v62 = vsel %vm701_vm2, %v2212_v26, %v2214_v35  ;;  %v2250_v6 = vadd.f32 %v2143_v25, %v6542_v36  ;;  %v2251_v34 = vadd.f32 %v2145_v49, %v6545_v31  ;;  %v10576_v4 = vld [vmem:[#allocation231_spill] sm:$0xff]  ;;  %v10577_v25 = vld [vmem:[#allocation232_spill] sm:$0xff]  ;;  %v10578_v49 = vld [vmem:[#allocation234_spill] sm:$0xff] }
 0x1ad   :  { %v2252_v9 = vadd.f32 %v2148_v51, %v6548_v60  ;;  %v2253_v7 = vadd.f32 %v2150_v54, %v6551_v0  ;;  %v2254_v17 = vadd.f32 %v2153_v30, %v6554_v33  ;;  %v2255_v58 = vadd.f32 %v2155_v18, %v6557_v14  ;;  %v10579_v51 = vld [vmem:[#allocation235_spill] sm:$0xff]  ;;  %v10580_v54 = vld [vmem:[#allocation237_spill] sm:$0xff]  ;;  %v10581_v18 = vld [vmem:[#allocation238_spill] sm:$0xff] }
 0x1ae   :  { %v2256_v19 = vadd.f32 %v2158_v20, %v6560_v40  ;;  %v2257_v61 = vadd.f32 %v2160_v12, %v10575_v32  ;;  %v2258_v8 = vadd.f32 %v2163_v50, %v10576_v4  ;;  %v2259_v15 = vadd.f32 %v2165_v42, %v6569_v3  ;;  %v10582_v12 = vld [vmem:[#allocation240_spill] sm:$0xff]  ;;  %v10583_v50 = vld [vmem:[#allocation241_spill] sm:$0xff]  ;;  %v10584_v42 = vld [vmem:[#allocation243_spill] sm:$0xff] }
 0x1af   :  { %v2260_v36 = vadd.f32 %v2168_v47, %v6572_v16  ;;  %v2261_v31 = vadd.f32 %v2170_v43, %v6575_v48  ;;  %v2262_v60 = vadd.f32 %v2173_v59, %v6578_v44  ;;  %v2263_v0 = vadd.f32 %v2175_v22, %v6581_v56  ;;  %v10585_v47 = vld [vmem:[#allocation244_spill] sm:$0xff]  ;;  %v10586_v43 = vld [vmem:[#allocation249_spill] sm:$0xff]  ;;  %v10587_v59 = vld [vmem:[#allocation226_spill] sm:$0xff] }
 0x1b0   :  { %v2264_v33 = vadd.f32 %v2178_v24, %v10577_v25  ;;  %v2265_v14 = vadd.f32 %v2180_v1, %v10578_v49  ;;  %v2266_v40 = vadd.f32 %v2183_v10, %v10579_v51  ;;  %v2267_v30 = vadd.f32 %v2185_v23, %v10580_v54  ;;  %v10588_v24 = vld [vmem:[#allocation251_spill] sm:$0xff]  ;;  %v10591_v1 = vld [vmem:[#allocation254_spill] sm:$0xff]  ;;  %v10594_v26 = vld [vmem:[#allocation257_spill] sm:$0xff] }
 0x1b1   :  { %v2268_v20 = vadd.f32 %v2188_v57, %v10581_v18  ;;  %v2269_v3 = vadd.f32 %v2190_v2, %v10582_v12  ;;  %v2270_v16 = vadd.f32 %v2193_v38, %v10583_v50  ;;  %v2271_v48 = vadd.f32 %v2195_v11, %v10584_v42 }
 0x1b2   :  { %v2272_v44 = vadd.f32 %v2198_v37, %v10585_v47  ;;  %v2273_v56 = vadd.f32 %v2200_v52, %v10586_v43  ;;  %v2274_v22 = vadd.f32 %v2203_v41, %v10587_v59  ;;  %v2275_v28 = vadd.f32 %v2205_v53, %v10588_v24 }
 0x1b3   :  { %v6750_v39 = vadd.f32 %v2208_v27, %v10589_v29  ;;  %v6753_v45 = vadd.f32 %v2210_v21, %v10591_v1  ;;  %v2278_v63 = vadd.f32 %v2213_v5, %v10593_v55  ;;  %v2279_v10 = vadd.f32 %v2215_v62, %v10594_v26 }
 0x1b4   :  { %v2280_v23 = vadd.f32 %v2250_v6, %v6716_v13  ;;  %v2281_v57 = vadd.f32 %v2251_v34, %v6720_v46  ;;  %v2282_v35 = vadd.f32 %v2252_v9, %v6716_v13  ;;  %v2283_v2 = vadd.f32 %v2253_v7, %v6720_v46 }
 0x1b5   :  { %10590 = vst [vmem:[#allocation227_spill] sm:$0xff] %v6750_v39  ;;  %10592 = vst [vmem:[#allocation228_spill] sm:$0xff] %v6753_v45  ;;  %v2284_v38 = vadd.f32 %v2254_v17, %v2252_v9  ;;  %v2285_v11 = vadd.f32 %v2255_v58, %v2253_v7  ;;  %v2286_v37 = vadd.f32 %v2256_v19, %v2254_v17 }
 0x1b6   :  { %v2287_v52 = vadd.f32 %v2257_v61, %v2255_v58  ;;  %v2288_v41 = vadd.f32 %v2258_v8, %v2256_v19  ;;  %v2289_v53 = vadd.f32 %v2259_v15, %v2257_v61  ;;  %v2290_v27 = vadd.f32 %v2260_v36, %v2258_v8 }
 0x1b7   :  { %v2291_v21 = vadd.f32 %v2261_v31, %v2259_v15  ;;  %v2292_v32 = vadd.f32 %v2262_v60, %v2260_v36  ;;  %v2293_v5 = vadd.f32 %v2263_v0, %v2261_v31  ;;  %v2294_v4 = vadd.f32 %v2264_v33, %v2262_v60 }
 0x1b8   :  { %v2295_v62 = vadd.f32 %v2265_v14, %v2263_v0  ;;  %v2296_v25 = vadd.f32 %v2266_v40, %v2264_v33  ;;  %v2297_v6 = vadd.f32 %v2267_v30, %v2265_v14  ;;  %v2298_v49 = vadd.f32 %v2268_v20, %v2266_v40 }
 0x1b9   :  { %v2299_v34 = vadd.f32 %v2269_v3, %v2267_v30  ;;  %v2300_v51 = vadd.f32 %v2270_v16, %v2268_v20  ;;  %v2301_v54 = vadd.f32 %v2271_v48, %v2269_v3  ;;  %v2302_v18 = vadd.f32 %v2272_v44, %v2270_v16 }
 0x1ba   :  { %v2303_v12 = vadd.f32 %v2273_v56, %v2271_v48  ;;  %v2304_v50 = vadd.f32 %v2274_v22, %v2272_v44  ;;  %v2305_v42 = vadd.f32 %v2275_v28, %v2273_v56  ;;  %v2306_v47 = vadd.f32 %v6750_v39, %v2274_v22 }
 0x1bb   :  { %v2307_v43 = vadd.f32 %v6753_v45, %v2275_v28  ;;  %v2308_v59 = vadd.f32 %v2278_v63, %v6750_v39  ;;  %v2309_v24 = vadd.f32 %v2279_v10, %v6753_v45  ;;  %v2310_v29 = vadd.f32 %v2280_v23, %v6716_v13 }
 0x1bc   :  { %v2311_v1 = vadd.f32 %v2281_v57, %v6720_v46  ;;  %v2312_v55 = vadd.f32 %v2280_v23, %v2252_v9  ;;  %v2313_v26 = vadd.f32 %v2281_v57, %v2253_v7  ;;  %v2314_v39 = vadd.f32 %v2282_v35, %v2254_v17 }
 0x1bd   :  { %v2315_v45 = vadd.f32 %v2283_v2, %v2255_v58  ;;  %v2316_v13 = vadd.f32 %v2284_v38, %v2256_v19  ;;  %v2317_v46 = vadd.f32 %v2285_v11, %v2257_v61  ;;  %v2318_v9 = vadd.f32 %v2286_v37, %v2258_v8 }
 0x1be   :  { %v2319_v23 = vadd.f32 %v2287_v52, %v2259_v15  ;;  %v2320_v7 = vadd.f32 %v2288_v41, %v2260_v36  ;;  %v2321_v57 = vadd.f32 %v2289_v53, %v2261_v31  ;;  %v2322_v17 = vadd.f32 %v2290_v27, %v2262_v60  ;;  %v10595_v31 = vld [vmem:[#allocation227_spill] sm:$0xff]  ;;  %v10596_v27 = vld [vmem:[#allocation228_spill] sm:$0xff] }
 0x1bf   :  { %v2323_v35 = vadd.f32 %v2291_v21, %v2263_v0  ;;  %v2324_v2 = vadd.f32 %v2292_v32, %v2264_v33  ;;  %v2325_v58 = vadd.f32 %v2293_v5, %v2265_v14  ;;  %v2326_v19 = vadd.f32 %v2294_v4, %v2266_v40  ;;  %v10613_v4 = vld [vmem:[#allocation144_spill] sm:$0xff] }
 0x1c0   :  { %v2327_v38 = vadd.f32 %v2295_v62, %v2267_v30  ;;  %v2328_v11 = vadd.f32 %v2296_v25, %v2268_v20  ;;  %v2329_v61 = vadd.f32 %v2297_v6, %v2269_v3  ;;  %v2330_v8 = vadd.f32 %v2298_v49, %v2270_v16 }
 0x1c1   :  { %v2331_v37 = vadd.f32 %v2299_v34, %v2271_v48  ;;  %v2332_v15 = vadd.f32 %v2300_v51, %v2272_v44  ;;  %v2333_v52 = vadd.f32 %v2301_v54, %v2273_v56  ;;  %v2334_v36 = vadd.f32 %v2302_v18, %v2274_v22  ;;  %v10603_v48 = vld [vmem:[#allocation142_spill] sm:$0xff]  ;;  %v10618_v34 = vld [vmem:[#allocation145_spill] sm:$0xff] }
 0x1c2   :  { %v2335_v41 = vadd.f32 %v2303_v12, %v2275_v28  ;;  %v2336_v53 = vadd.f32 %v2304_v50, %v10595_v31  ;;  %v2337_v60 = vadd.f32 %v2305_v42, %v10596_v27  ;;  %v2338_v0 = vadd.f32 %v2306_v47, %v2278_v63  ;;  %v10608_v63 = vld [vmem:[#allocation143_spill] sm:$0xff]  ;;  %v10623_v50 = vld [vmem:[#allocation146_spill] sm:$0xff] }
 0x1c3   :  { %v2339_v21 = vadd.f32 %v2307_v43, %v2279_v10  ;;  %v2340_v32 = vadd.f32 %v2308_v59, %v10595_v31  ;;  %v2341_v33 = vadd.f32 %v2309_v24, %v10596_v27  ;;  %v6771_v14 = vmul.f32 0.11111111, %v2310_v29  ;;  %v10628_v24 = vld [vmem:[#allocation147_spill] sm:$0xff]  ;;  %v10653_v31 = vld [vmem:[#allocation156_spill] sm:$0xff] }
 0x1c4   :  { %v6773_v40 = vmul.f32 0.11111111, %v2311_v1  ;;  %v6775_v30 = vmul.f32 0.11111111, %v2312_v55  ;;  %v6777_v20 = vmul.f32 0.11111111, %v2313_v26  ;;  %v6785_v44 = vmul.f32 %v10603_v48, %v10603_v48 }
 0x1c5   :  { %10597 = vst [vmem:[#allocation230_spill] sm:$0xff] %v6771_v14  ;;  %v6779_v3 = vmul.f32 0.11111111, %v2314_v39  ;;  %v6781_v16 = vmul.f32 0.11111111, %v2315_v45  ;;  %v6795_v10 = vmul.f32 %v10608_v63, %v10608_v63  ;;  %v6805_v62 = vmul.f32 %v10613_v4, %v10613_v4  ;;  %v10655_v27 = vld [vmem:[#allocation140_spill] sm:$0xff] }
 0x1c6   :  { %10598 = vst [vmem:[#allocation233_spill] sm:$0xff] %v6773_v40  ;;  %10599 = vst [vmem:[#allocation236_spill] sm:$0xff] %v6775_v30  ;;  %v6787_v56 = vmul.f32 0.11111111, %v2316_v13  ;;  %v6789_v22 = vmul.f32 0.11111111, %v2317_v46  ;;  %v6815_v51 = vmul.f32 %v10618_v34, %v10618_v34  ;;  %v6825_v42 = vmul.f32 %v10623_v50, %v10623_v50 }
 0x1c7   :  { %10600 = vst [vmem:[#allocation239_spill] sm:$0xff] %v6777_v20  ;;  %10601 = vst [vmem:[#allocation242_spill] sm:$0xff] %v6779_v3  ;;  %v6791_v28 = vmul.f32 0.11111111, %v2318_v9  ;;  %v6797_v5 = vmul.f32 0.11111111, %v2319_v23  ;;  %v6835_v29 = vmul.f32 %v10628_v24, %v10628_v24 }
 0x1c8   :  { %10602 = vst [vmem:[#allocation245_spill] sm:$0xff] %v6781_v16  ;;  %10604 = vst [vmem:[#allocation246_spill] sm:$0xff] %v6785_v44  ;;  %v6799_v39 = vmul.f32 0.11111111, %v2320_v7  ;;  %v6801_v45 = vmul.f32 0.11111111, %v2321_v57 }
 0x1c9   :  { %10605 = vst [vmem:[#allocation247_spill] sm:$0xff] %v6787_v56  ;;  %10606 = vst [vmem:[#allocation248_spill] sm:$0xff] %v6789_v22  ;;  %v6807_v25 = vmul.f32 0.11111111, %v2322_v17  ;;  %v6809_v6 = vmul.f32 0.11111111, %v2323_v35 }
 0x1ca   :  { %10607 = vst [vmem:[#allocation250_spill] sm:$0xff] %v6791_v28  ;;  %10609 = vst [vmem:[#allocation253_spill] sm:$0xff] %v6795_v10  ;;  %v6811_v49 = vmul.f32 0.11111111, %v2324_v2  ;;  %v6817_v54 = vmul.f32 0.11111111, %v2325_v58 }
 0x1cb   :  { %10610 = vst [vmem:[#allocation256_spill] sm:$0xff] %v6797_v5  ;;  %10611 = vst [vmem:[#allocation229_spill] sm:$0xff] %v6799_v39  ;;  %v6819_v18 = vmul.f32 0.11111111, %v2326_v19  ;;  %v6821_v12 = vmul.f32 0.11111111, %v2327_v38 }
 0x1cc   :  { %10612 = vst [vmem:[#allocation231_spill] sm:$0xff] %v6801_v45  ;;  %10614 = vst [vmem:[#allocation232_spill] sm:$0xff] %v6805_v62  ;;  %v6827_v47 = vmul.f32 0.11111111, %v2328_v11  ;;  %v6829_v43 = vmul.f32 0.11111111, %v2329_v61 }
 0x1cd   :  { %10615 = vst [vmem:[#allocation234_spill] sm:$0xff] %v6807_v25  ;;  %10616 = vst [vmem:[#allocation235_spill] sm:$0xff] %v6809_v6  ;;  %v6831_v59 = vmul.f32 0.11111111, %v2330_v8  ;;  %v6837_v1 = vmul.f32 0.11111111, %v2331_v37 }
 0x1ce   :  { %10617 = vst [vmem:[#allocation237_spill] sm:$0xff] %v6811_v49  ;;  %10619 = vst [vmem:[#allocation238_spill] sm:$0xff] %v6815_v51  ;;  %v6839_v55 = vmul.f32 0.11111111, %v2332_v15  ;;  %v6841_v26 = vmul.f32 0.11111111, %v2333_v52 }
 0x1cf   :  { %10620 = vst [vmem:[#allocation240_spill] sm:$0xff] %v6817_v54  ;;  %10621 = vst [vmem:[#allocation241_spill] sm:$0xff] %v6819_v18  ;;  %v10633_v13 = vld [vmem:[#allocation148_spill] sm:$0xff]  ;;  %v6847_v9 = vmul.f32 0.11111111, %v2334_v36  ;;  %v10638_v57 = vld [vmem:[#allocation150_spill] sm:$0xff] }
 0x1d0   :  { %10622 = vst [vmem:[#allocation243_spill] sm:$0xff] %v6821_v12  ;;  %10624 = vst [vmem:[#allocation244_spill] sm:$0xff] %v6825_v42  ;;  %v6845_v46 = vmul.f32 %v10633_v13, %v10633_v13  ;;  %v6849_v23 = vmul.f32 0.11111111, %v2335_v41  ;;  %v6851_v7 = vmul.f32 0.11111111, %v2336_v53  ;;  %v6855_v17 = vmul.f32 %v10638_v57, %v10638_v57 }
 0x1d1   :  { %10625 = vst [vmem:[#allocation249_spill] sm:$0xff] %v6827_v47  ;;  %10626 = vst [vmem:[#allocation226_spill] sm:$0xff] %v6829_v43  ;;  %v6857_v35 = vmul.f32 0.11111111, %v2337_v60  ;;  %v6859_v2 = vmul.f32 0.11111111, %v2338_v0  ;;  %v6885_v53 = vmul.f32 %v10653_v31, %v10653_v31  ;;  %v6889_v60 = vmul.f32 %v10655_v27, %v10655_v27 }
 0x1d2   :  { %10627 = vst [vmem:[#allocation251_spill] sm:$0xff] %v6831_v59  ;;  %10629 = vst [vmem:[#allocation252_spill] sm:$0xff] %v6835_v29  ;;  %v6861_v58 = vmul.f32 0.11111111, %v2339_v21  ;;  %v10643_v19 = vld [vmem:[#allocation151_spill] sm:$0xff]  ;;  %v10647_v8 = vld [vmem:[#allocation152_spill] sm:$0xff] }
 0x1d3   :  { %10630 = vst [vmem:[#allocation254_spill] sm:$0xff] %v6837_v1  ;;  %10631 = vst [vmem:[#allocation255_spill] sm:$0xff] %v6839_v55  ;;  %v6865_v38 = vmul.f32 %v10643_v19, %v10643_v19  ;;  %v6867_v11 = vmul.f32 0.11111111, %v2340_v32  ;;  %v6869_v61 = vmul.f32 0.11111111, %v2341_v33  ;;  %v6873_v37 = vmul.f32 %v10647_v8, %v10647_v8 }
 0x1d4   :  { %10632 = vst [vmem:[#allocation257_spill] sm:$0xff] %v6841_v26  ;;  %10634 = vst [vmem:[#allocation227_spill] sm:$0xff] %v6845_v46  ;;  %v10649_v15 = vld [vmem:[#allocation154_spill] sm:$0xff]  ;;  %v10651_v36 = vld [vmem:[#allocation155_spill] sm:$0xff] }
 0x1d5   :  { %10635 = vst [vmem:[#allocation228_spill] sm:$0xff] %v6847_v9  ;;  %10636 = vst [vmem:[#allocation258_spill] sm:$0xff] %v6849_v23  ;;  %v6877_v52 = vmul.f32 %v10649_v15, %v10649_v15  ;;  %v6881_v41 = vmul.f32 %v10651_v36, %v10651_v36  ;;  %v10657_v0 = vld [vmem:[#allocation141_spill] sm:$0xff]  ;;  %v10659_v32 = vld [vmem:[#allocation158_spill] sm:$0xff] }
 0x1d6   :  { %10637 = vst [vmem:[#allocation259_spill] sm:$0xff] %v6851_v7  ;;  %10639 = vst [vmem:[#allocation260_spill] sm:$0xff] %v6855_v17  ;;  %v6893_v21 = vmul.f32 %v10657_v0, %v10657_v0  ;;  %v6897_v33 = vmul.f32 %v10659_v32, %v10659_v32  ;;  %v10661_v15 = vld [vmem:[#allocation160_spill] sm:$0xff]  ;;  %v10663_v8 = vld [vmem:[#allocation161_spill] sm:$0xff] }
 0x1d7   :  { %10640 = vst [vmem:[#allocation261_spill] sm:$0xff] %v6857_v35  ;;  %10641 = vst [vmem:[#allocation262_spill] sm:$0xff] %v6859_v2  ;;  %v6901_v36 = vmul.f32 %v10661_v15, %v10661_v15  ;;  %v6905_v31 = vmul.f32 %v10663_v8, %v10663_v8  ;;  %v10665_v19 = vld [vmem:[#allocation162_spill] sm:$0xff]  ;;  %v10667_v57 = vld [vmem:[#allocation164_spill] sm:$0xff] }
 0x1d8   :  { %10642 = vst [vmem:[#allocation263_spill] sm:$0xff] %v6861_v58  ;;  %10644 = vst [vmem:[#allocation264_spill] sm:$0xff] %v6865_v38  ;;  %v6909_v27 = vmul.f32 %v10665_v19, %v10665_v19  ;;  %v6913_v0 = vmul.f32 %v10667_v57, %v10667_v57  ;;  %v10669_v13 = vld [vmem:[#allocation165_spill] sm:$0xff]  ;;  %v10671_v24 = vld [vmem:[#allocation166_spill] sm:$0xff] }
 0x1d9   :  { %10645 = vst [vmem:[#allocation265_spill] sm:$0xff] %v6867_v11  ;;  %10646 = vst [vmem:[#allocation266_spill] sm:$0xff] %v6869_v61  ;;  %v6917_v32 = vmul.f32 %v10669_v13, %v10669_v13  ;;  %v6921_v15 = vmul.f32 %v10671_v24, %v10671_v24  ;;  %v10673_v50 = vld [vmem:[#allocation168_spill] sm:$0xff]  ;;  %v10675_v34 = vld [vmem:[#allocation169_spill] sm:$0xff] }
 0x1da   :  { %10648 = vst [vmem:[#allocation267_spill] sm:$0xff] %v6873_v37  ;;  %10650 = vst [vmem:[#allocation268_spill] sm:$0xff] %v6877_v52  ;;  %v6925_v8 = vmul.f32 %v10673_v50, %v10673_v50  ;;  %v6929_v19 = vmul.f32 %v10675_v34, %v10675_v34  ;;  %v10677_v4 = vld [vmem:[#allocation170_spill] sm:$0xff]  ;;  %v10679_v63 = vld [vmem:[#allocation172_spill] sm:$0xff] }
 0x1db   :  { %10652 = vst [vmem:[#allocation269_spill] sm:$0xff] %v6881_v41  ;;  %10654 = vst [vmem:[#allocation270_spill] sm:$0xff] %v6885_v53  ;;  %v6933_v57 = vmul.f32 %v10677_v4, %v10677_v4  ;;  %v6937_v13 = vmul.f32 %v10679_v63, %v10679_v63  ;;  %v10681_v48 = vld [vmem:[#allocation173_spill] sm:$0xff]  ;;  %v10683_v61 = vld [vmem:[#allocation174_spill] sm:$0xff] }
 0x1dc   :  { %10656 = vst [vmem:[#allocation271_spill] sm:$0xff] %v6889_v60  ;;  %10658 = vst [vmem:[#allocation272_spill] sm:$0xff] %v6893_v21  ;;  %v6941_v24 = vmul.f32 %v10681_v48, %v10681_v48  ;;  %v6945_v50 = vmul.f32 %v10683_v61, %v10683_v61  ;;  %v10685_v11 = vld [vmem:[#allocation176_spill] sm:$0xff]  ;;  %v10687_v58 = vld [vmem:[#allocation177_spill] sm:$0xff] }
 0x1dd   :  { %10660 = vst [vmem:[#allocation273_spill] sm:$0xff] %v6897_v33  ;;  %10662 = vst [vmem:[#allocation274_spill] sm:$0xff] %v6901_v36  ;;  %v6949_v34 = vmul.f32 %v10685_v11, %v10685_v11  ;;  %v6953_v4 = vmul.f32 %v10687_v58, %v10687_v58  ;;  %v10689_v2 = vld [vmem:[#allocation178_spill] sm:$0xff]  ;;  %v10691_v35 = vld [vmem:[#allocation180_spill] sm:$0xff] }
 0x1de   :  { %10664 = vst [vmem:[#allocation275_spill] sm:$0xff] %v6905_v31  ;;  %10666 = vst [vmem:[#allocation276_spill] sm:$0xff] %v6909_v27  ;;  %v6957_v63 = vmul.f32 %v10689_v2, %v10689_v2  ;;  %v6961_v48 = vmul.f32 %v10691_v35, %v10691_v35  ;;  %v10700_v12 = vld [vmem:[#allocation2_spill] sm:$0xff]  ;;  %v10701_v2 = vld [vmem:[#allocation73_spill] sm:$0xff] }
 0x1df   :  { %10668 = vst [vmem:[#allocation277_spill] sm:$0xff] %v6913_v0  ;;  %10670 = vst [vmem:[#allocation278_spill] sm:$0xff] %v6917_v32  ;;  %v7029_v23 = vmul.f32 %v10701_v2, %v10700_v12  ;;  %v10703_v7 = vld [vmem:[#allocation50_spill] sm:$0xff]  ;;  %v10705_v35 = vld [vmem:[#allocation89_spill] sm:$0xff] }
 0x1e0   :  { %10672 = vst [vmem:[#allocation279_spill] sm:$0xff] %v6921_v15  ;;  %10674 = vst [vmem:[#allocation280_spill] sm:$0xff] %v6925_v8  ;;  %v10704_v59 = vld [vmem:[#allocation34_spill] sm:$0xff]  ;;  %v10709_v26 = vld [vmem:[#allocation4_spill] sm:$0xff] }
 0x1e1   :  { %10676 = vst [vmem:[#allocation281_spill] sm:$0xff] %v6929_v19  ;;  %10678 = vst [vmem:[#allocation282_spill] sm:$0xff] %v6933_v57  ;;  %v7037_v1 = vmul.f32 %v10705_v35, %v10704_v59  ;;  %v10707_v61 = vld [vmem:[#allocation6_spill] sm:$0xff]  ;;  %v10710_v11 = vld [vmem:[#allocation52_spill] sm:$0xff] }
 0x1e2   :  { %10680 = vst [vmem:[#allocation283_spill] sm:$0xff] %v6937_v13  ;;  %10682 = vst [vmem:[#allocation284_spill] sm:$0xff] %v6941_v24  ;;  %v10708_v55 = vld [vmem:[#allocation74_spill] sm:$0xff]  ;;  %v7045_v54 = vmul.f32 %v10710_v11, %v10709_v26  ;;  %v10711_v9 = vld [vmem:[#allocation35_spill] sm:$0xff] }
 0x1e3   :  { %10684 = vst [vmem:[#allocation285_spill] sm:$0xff] %v6945_v50  ;;  %10686 = vst [vmem:[#allocation286_spill] sm:$0xff] %v6949_v34  ;;  %v7041_v50 = vmul.f32 %v10708_v55, %v10707_v61  ;;  %v10712_v58 = vld [vmem:[#allocation90_spill] sm:$0xff]  ;;  %v10714_v2 = vld [vmem:[#allocation12_spill] sm:$0xff] }
 0x1e4   :  { %10688 = vst [vmem:[#allocation287_spill] sm:$0xff] %v6953_v4  ;;  %10690 = vst [vmem:[#allocation288_spill] sm:$0xff] %v6957_v63  ;;  %v10702_v63 = vld [vmem:[#allocation3_spill] sm:$0xff]  ;;  %v7049_v12 = vmul.f32 %v10712_v58, %v10711_v9  ;;  %v10718_v35 = vld [vmem:[#allocation36_spill] sm:$0xff]  ;;  %v2540_v52 = vrot.slane %v7045_v54, 1 }
 0x1e5   :  { %10692 = vst [vmem:[#allocation289_spill] sm:$0xff] %v6961_v48  ;;  %v7033_v18 = vmul.f32 %v10703_v7, %v10702_v63  ;;  %10706 = vst [vmem:[#allocation2_spill] sm:$0xff] %v7037_v1  ;;  %v10715_v49 = vld [vmem:[#allocation75_spill] sm:$0xff]  ;;  %v10716_v7 = vld [vmem:[#allocation5_spill] sm:$0xff]  ;;  %v2539_v41 = vrot.slane %v7041_v50, 1 }
 0x1e6   :  { %10713 = vst [vmem:[#allocation73_spill] sm:$0xff] %v7049_v12  ;;  %v7053_v63 = vmul.f32 %v10715_v49, %v10714_v2  ;;  %v10717_v6 = vld [vmem:[#allocation55_spill] sm:$0xff]  ;;  %v10721_v61 = vld [vmem:[#allocation21_spill] sm:$0xff]  ;;  %v10722_v45 = vld [vmem:[#allocation76_spill] sm:$0xff] }
 0x1e7   :  { %v7057_v59 = vmul.f32 %v10717_v6, %v10716_v7  ;;  %v10719_v25 = vld [vmem:[#allocation91_spill] sm:$0xff]  ;;  %v7065_v26 = vmul.f32 %v10722_v45, %v10721_v61  ;;  %v10724_v39 = vld [vmem:[#allocation60_spill] sm:$0xff]  ;;  %v10725_v58 = vld [vmem:[#allocation37_spill] sm:$0xff] }
 0x1e8   :  { %v7061_v55 = vmul.f32 %v10719_v25, %v10718_v35  ;;  %v10723_v11 = vld [vmem:[#allocation7_spill] sm:$0xff]  ;;  %v10726_v5 = vld [vmem:[#allocation92_spill] sm:$0xff]  ;;  %v10728_v2 = vld [vmem:[#allocation22_spill] sm:$0xff] }
 0x1e9   :  { %v7069_v9 = vmul.f32 %v10724_v39, %v10723_v11  ;;  %v7073_v49 = vmul.f32 %v10726_v5, %v10725_v58  ;;  %v10729_v28 = vld [vmem:[#allocation77_spill] sm:$0xff]  ;;  %v10731_v7 = vld [vmem:[#allocation8_spill] sm:$0xff]  ;;  %v10734_v35 = vld [vmem:[#allocation38_spill] sm:$0xff] }
 0x1ea   :  { %10720 = vst [vmem:[#allocation3_spill] sm:$0xff] %v7061_v55  ;;  %v7077_v6 = vmul.f32 %v10729_v28, %v10728_v2  ;;  %v10732_v22 = vld [vmem:[#allocation61_spill] sm:$0xff]  ;;  %v10737_v61 = vld [vmem:[#allocation23_spill] sm:$0xff]  ;;  %v10738_v16 = vld [vmem:[#allocation78_spill] sm:$0xff] }
 0x1eb   :  { %10727 = vst [vmem:[#allocation50_spill] sm:$0xff] %v7073_v49  ;;  %v7081_v25 = vmul.f32 %v10732_v22, %v10731_v7  ;;  %v10735_v56 = vld [vmem:[#allocation93_spill] sm:$0xff]  ;;  %v7089_v39 = vmul.f32 %v10738_v16, %v10737_v61  ;;  %v10741_v3 = vld [vmem:[#allocation62_spill] sm:$0xff]  ;;  %v10743_v58 = vld [vmem:[#allocation39_spill] sm:$0xff] }
 0x1ec   :  { %10730 = vst [vmem:[#allocation34_spill] sm:$0xff] %v7077_v6  ;;  %v7085_v45 = vmul.f32 %v10735_v56, %v10734_v35  ;;  %v10740_v11 = vld [vmem:[#allocation9_spill] sm:$0xff]  ;;  %v10744_v20 = vld [vmem:[#allocation94_spill] sm:$0xff]  ;;  %v10746_v2 = vld [vmem:[#allocation24_spill] sm:$0xff] }
 0x1ed   :  { %10733 = vst [vmem:[#allocation89_spill] sm:$0xff] %v7081_v25  ;;  %10739 = vst [vmem:[#allocation74_spill] sm:$0xff] %v7089_v39  ;;  %v7093_v5 = vmul.f32 %v10741_v3, %v10740_v11  ;;  %v7097_v28 = vmul.f32 %v10744_v20, %v10743_v58  ;;  %v10747_v30 = vld [vmem:[#allocation79_spill] sm:$0xff]  ;;  %v10749_v7 = vld [vmem:[#allocation10_spill] sm:$0xff] }
 0x1ee   :  { %10736 = vst [vmem:[#allocation6_spill] sm:$0xff] %v7085_v45  ;;  %v7101_v22 = vmul.f32 %v10747_v30, %v10746_v2  ;;  %v10750_v40 = vld [vmem:[#allocation63_spill] sm:$0xff]  ;;  %v10752_v35 = vld [vmem:[#allocation40_spill] sm:$0xff]  ;;  %v10755_v61 = vld [vmem:[#allocation25_spill] sm:$0xff] }
 0x1ef   :  { %10742 = vst [vmem:[#allocation4_spill] sm:$0xff] %v7093_v5  ;;  %10745 = vst [vmem:[#allocation52_spill] sm:$0xff] %v7097_v28  ;;  %v7105_v56 = vmul.f32 %v10750_v40, %v10749_v7  ;;  %v10753_v14 = vld [vmem:[#allocation95_spill] sm:$0xff]  ;;  %v10756_v48 = vld [vmem:[#allocation80_spill] sm:$0xff] }
 0x1f0   :  { %10748 = vst [vmem:[#allocation35_spill] sm:$0xff] %v7101_v22  ;;  %v7109_v16 = vmul.f32 %v10753_v14, %v10752_v35  ;;  %v7113_v3 = vmul.f32 %v10756_v48, %v10755_v61  ;;  %v10758_v11 = vld [vmem:[#allocation11_spill] sm:$0xff]  ;;  %v10759_v47 = vld [vmem:[#allocation64_spill] sm:$0xff]  ;;  %v10761_v58 = vld [vmem:[#allocation41_spill] sm:$0xff] }
 0x1f1   :  { %10751 = vst [vmem:[#allocation90_spill] sm:$0xff] %v7105_v56  ;;  %v7117_v20 = vmul.f32 %v10759_v47, %v10758_v11  ;;  %v10762_v4 = vld [vmem:[#allocation96_spill] sm:$0xff]  ;;  %v10764_v2 = vld [vmem:[#allocation26_spill] sm:$0xff]  ;;  %v10765_v34 = vld [vmem:[#allocation81_spill] sm:$0xff] }
 0x1f2   :  { %10754 = vst [vmem:[#allocation12_spill] sm:$0xff] %v7109_v16  ;;  %10757 = vst [vmem:[#allocation75_spill] sm:$0xff] %v7113_v3  ;;  %v7121_v30 = vmul.f32 %v10762_v4, %v10761_v58  ;;  %v7125_v40 = vmul.f32 %v10765_v34, %v10764_v2  ;;  %v10767_v7 = vld [vmem:[#allocation13_spill] sm:$0xff]  ;;  %v10770_v35 = vld [vmem:[#allocation42_spill] sm:$0xff] }
 0x1f3   :  { %10760 = vst [vmem:[#allocation5_spill] sm:$0xff] %v7117_v20  ;;  %v10768_v43 = vld [vmem:[#allocation65_spill] sm:$0xff]  ;;  %v10773_v61 = vld [vmem:[#allocation27_spill] sm:$0xff]  ;;  %v10774_v13 = vld [vmem:[#allocation82_spill] sm:$0xff] }
 0x1f4   :  { %10763 = vst [vmem:[#allocation55_spill] sm:$0xff] %v7121_v30  ;;  %10766 = vst [vmem:[#allocation36_spill] sm:$0xff] %v7125_v40  ;;  %v7129_v14 = vmul.f32 %v10768_v43, %v10767_v7  ;;  %v10771_v24 = vld [vmem:[#allocation97_spill] sm:$0xff]  ;;  %v7137_v47 = vmul.f32 %v10774_v13, %v10773_v61  ;;  %v10775_v11 = vld [vmem:[#allocation14_spill] sm:$0xff] }
 0x1f5   :  { %v7133_v48 = vmul.f32 %v10771_v24, %v10770_v35  ;;  %v10776_v57 = vld [vmem:[#allocation66_spill] sm:$0xff]  ;;  %v10777_v58 = vld [vmem:[#allocation43_spill] sm:$0xff]  ;;  %v10780_v2 = vld [vmem:[#allocation28_spill] sm:$0xff] }
 0x1f6   :  { %10769 = vst [vmem:[#allocation91_spill] sm:$0xff] %v7129_v14  ;;  %v7141_v4 = vmul.f32 %v10776_v57, %v10775_v11  ;;  %v10778_v19 = vld [vmem:[#allocation51_spill] sm:$0xff]  ;;  %v10784_v35 = vld [vmem:[#allocation44_spill] sm:$0xff]  ;;  %v10785_v32 = vld [vmem:[#allocation53_spill] sm:$0xff] }
 0x1f7   :  { %10772 = vst [vmem:[#allocation21_spill] sm:$0xff] %v7133_v48  ;;  %v7145_v34 = vmul.f32 %v10778_v19, %v10777_v58  ;;  %v10781_v8 = vld [vmem:[#allocation83_spill] sm:$0xff]  ;;  %v7157_v13 = vmul.f32 %v10785_v32, %v10784_v35  ;;  %v10787_v61 = vld [vmem:[#allocation29_spill] sm:$0xff]  ;;  %v10788_v0 = vld [vmem:[#allocation84_spill] sm:$0xff]  ;;  %v2535_v32 = vrot.slane %v7033_v18, 1 }
 0x1f8   :  { %v7149_v43 = vmul.f32 %v10781_v8, %v10780_v2  ;;  %v10782_v7 = vld [vmem:[#allocation15_spill] sm:$0xff]  ;;  %v7161_v57 = vmul.f32 %v10788_v0, %v10787_v61  ;;  %v10789_v11 = vld [vmem:[#allocation16_spill] sm:$0xff]  ;;  %v10791_v58 = vld [vmem:[#allocation45_spill] sm:$0xff] }
 0x1f9   :  { %10779 = vst [vmem:[#allocation76_spill] sm:$0xff] %v7145_v34  ;;  %v10783_v15 = vld [vmem:[#allocation67_spill] sm:$0xff]  ;;  %10786 = vst [vmem:[#allocation7_spill] sm:$0xff] %v7157_v13  ;;  %v10790_v27 = vld [vmem:[#allocation68_spill] sm:$0xff] }
 0x1fa   :  { %v7153_v24 = vmul.f32 %v10783_v15, %v10782_v7  ;;  %v7165_v19 = vmul.f32 %v10790_v27, %v10789_v11  ;;  %v10792_v31 = vld [vmem:[#allocation54_spill] sm:$0xff]  ;;  %v10795_v36 = vld [vmem:[#allocation85_spill] sm:$0xff]  ;;  %v2534_v7 = vrot.slane %v7029_v23, 1  ;;  %v10800_v21 = vld [vmem:[#allocation56_spill] sm:$0xff] }
 0x1fb   :  { %v7169_v8 = vmul.f32 %v10792_v31, %v10791_v58  ;;  %v10794_v2 = vld [vmem:[#allocation30_spill] sm:$0xff]  ;;  %v10796_v35 = vld [vmem:[#allocation17_spill] sm:$0xff]  ;;  %v10802_v11 = vld [vmem:[#allocation31_spill] sm:$0xff]  ;;  %v2537_v58 = vrot.slane %v7037_v1, 1  ;;  %v2567_v1 = vrot.slane %v7109_v16, 1  ;;  %v2577_v16 = vrot.slane %v7133_v48, 1 }
 0x1fc   :  { %v7173_v15 = vmul.f32 %v10795_v36, %v10794_v2  ;;  %v10797_v33 = vld [vmem:[#allocation69_spill] sm:$0xff]  ;;  %v10799_v61 = vld [vmem:[#allocation46_spill] sm:$0xff]  ;;  %v10812_v38 = vld [vmem:[#allocation87_spill] sm:$0xff] }
 0x1fd   :  { %10793 = vst [vmem:[#allocation60_spill] sm:$0xff] %v7169_v8  ;;  %v7179_v0 = vmul.f32 %v10797_v33, %v10796_v35  ;;  %v7183_v27 = vmul.f32 %v10800_v21, %v10799_v61  ;;  %v10803_v60 = vld [vmem:[#allocation86_spill] sm:$0xff]  ;;  %v2542_v33 = vrot.slane %v7049_v12, 1  ;;  %v10808_v35 = vld [vmem:[#allocation47_spill] sm:$0xff]  ;;  %v10809_v37 = vld [vmem:[#allocation57_spill] sm:$0xff] }
 0x1fe   :  { %v7187_v31 = vmul.f32 %v10803_v60, %v10802_v11  ;;  %v10805_v36 = vld [vmem:[#allocation18_spill] sm:$0xff]  ;;  %v7199_v21 = vmul.f32 %v10809_v37, %v10808_v35  ;;  %v10811_v61 = vld [vmem:[#allocation32_spill] sm:$0xff]  ;;  %v10814_v11 = vld [vmem:[#allocation19_spill] sm:$0xff] }
 0x1ff   :  { %10798 = vst [vmem:[#allocation37_spill] sm:$0xff] %v7179_v0  ;;  %10801 = vst [vmem:[#allocation92_spill] sm:$0xff] %v7183_v27  ;;  %v10806_v2 = vld [vmem:[#allocation70_spill] sm:$0xff]  ;;  %v7203_v60 = vmul.f32 %v10812_v38, %v10811_v61  ;;  %v10815_v17 = vld [vmem:[#allocation71_spill] sm:$0xff]  ;;  %v7226_v61 = vsel %vm556_vm1, %v2534_v7, %v2535_v32  ;;  %v2552_v7 = vrot.slane %v7073_v49, 1  ;;  %v2569_v49 = vrot.slane %v7113_v3, 1 }
 0x200   :  { %10804 = vst [vmem:[#allocation22_spill] sm:$0xff] %v7187_v31  ;;  %v7192_v53 = vmul.f32 %v10806_v2, %v10805_v36  ;;  %10810 = vst [vmem:[#allocation8_spill] sm:$0xff] %v7199_v21  ;;  %v7207_v46 = vmul.f32 %v10815_v17, %v10814_v11  ;;  %v10817_v36 = vld [vmem:[#allocation48_spill] sm:$0xff]  ;;  %v10818_v2 = vld [vmem:[#allocation58_spill] sm:$0xff]  ;;  %v7229_v17 = vsel %vm556_vm1, %v2535_v32, %v2537_v58  ;;  %v2544_v11 = vrot.slane %v7053_v63, 1 }
 0x201   :  { %10813 = vst [vmem:[#allocation61_spill] sm:$0xff] %v7203_v60  ;;  %v7211_v29 = vmul.f32 %v10818_v2, %v10817_v36  ;;  %v10820_v42 = vld [vmem:[#allocation33_spill] sm:$0xff]  ;;  %v10821_v51 = vld [vmem:[#allocation88_spill] sm:$0xff]  ;;  %v10826_v12 = vld [vmem:[#allocation59_spill] sm:$0xff]  ;;  %v2545_v36 = vrot.slane %v7057_v59, 1  ;;  %v2554_v32 = vrot.slane %v7077_v6, 1 }
 0x202   :  { %10807 = vst [vmem:[#allocation77_spill] sm:$0xff] %v7192_v53  ;;  %10816 = vst [vmem:[#allocation38_spill] sm:$0xff] %v7207_v46  ;;  %v7215_v62 = vmul.f32 %v10821_v51, %v10820_v42  ;;  %v10822_v10 = vld [vmem:[#allocation20_spill] sm:$0xff]  ;;  %v10825_v35 = vld [vmem:[#allocation49_spill] sm:$0xff]  ;;  %v2547_v51 = vrot.slane %v7061_v55, 1  ;;  %v7235_v42 = vsel %vm556_vm1, %v2539_v41, %v2540_v52  ;;  %v2555_v58 = vrot.slane %v7081_v25, 1 }
 0x203   :  { %10819 = vst [vmem:[#allocation93_spill] sm:$0xff] %v7211_v29  ;;  %v10823_v44 = vld [vmem:[#allocation72_spill] sm:$0xff]  ;;  %v7223_v38 = vmul.f32 %v10826_v12, %v10825_v35  ;;  %v2550_v12 = vrot.slane %v7069_v9, 1  ;;  %v2557_v2 = vrot.slane %v7085_v45, 1  ;;  %v2559_v35 = vrot.slane %v7089_v39, 1 }
 0x204   :  { %v7219_v37 = vmul.f32 %v10823_v44, %v10822_v10  ;;  %v7238_v44 = vsel %vm556_vm1, %v2540_v52, %v2542_v33  ;;  %v2549_v10 = vrot.slane %v7065_v26, 1  ;;  %v2560_v41 = vrot.slane %v7093_v5, 1 }
 0x205   :  { %v2562_v55 = vrot.slane %v7097_v28, 1  ;;  %v2564_v52 = vrot.slane %v7101_v22, 1  ;;  %v2565_v33 = vrot.slane %v7105_v56, 1  ;;  %v2570_v6 = vrot.slane %v7117_v20, 1 }
 0x206   :  { %10824 = vst [vmem:[#allocation23_spill] sm:$0xff] %v7219_v37  ;;  %v2546_v25 = vsel %vm556_vm1, %v2544_v11, %v2545_v36  ;;  %v2572_v45 = vrot.slane %v7121_v30, 1  ;;  %v2574_v39 = vrot.slane %v7125_v40, 1  ;;  %v2575_v5 = vrot.slane %v7129_v14, 1 }
 0x207   :  { %v2548_v28 = vsel %vm556_vm1, %v2545_v36, %v2547_v51  ;;  %v2551_v22 = vsel %vm556_vm1, %v2549_v10, %v2550_v12  ;;  %v2553_v56 = vsel %vm556_vm1, %v2550_v12, %v2552_v7  ;;  %v2556_v3 = vsel %vm556_vm1, %v2554_v32, %v2555_v58 }
 0x208   :  { %v2558_v20 = vsel %vm556_vm1, %v2555_v58, %v2557_v2  ;;  %v2561_v11 = vsel %vm556_vm1, %v2559_v35, %v2560_v41  ;;  %v2563_v30 = vsel %vm556_vm1, %v2560_v41, %v2562_v55  ;;  %v2566_v40 = vsel %vm556_vm1, %v2564_v52, %v2565_v33 }
 0x209   :  { %v2568_v14 = vsel %vm556_vm1, %v2565_v33, %v2567_v1  ;;  %v2571_v36 = vsel %vm556_vm1, %v2569_v49, %v2570_v6  ;;  %v2579_v51 = vrot.slane %v7137_v47, 1  ;;  %v2573_v10 = vsel %vm556_vm1, %v2570_v6, %v2572_v45 }
 0x20a   :  { %v2576_v12 = vsel %vm556_vm1, %v2574_v39, %v2575_v5  ;;  %v2580_v7 = vrot.slane %v7141_v4, 1  ;;  %v2582_v32 = vrot.slane %v7145_v34, 1  ;;  %v2578_v58 = vsel %vm556_vm1, %v2575_v5, %v2577_v16 }
 0x20b   :  { %v2584_v55 = vrot.slane %v7149_v43, 1  ;;  %v2585_v2 = vrot.slane %v7153_v24, 1  ;;  %v2587_v1 = vrot.slane %v7157_v13, 1  ;;  %v2589_v49 = vrot.slane %v7161_v57, 1 }
 0x20c   :  { %v2590_v35 = vrot.slane %v7165_v19, 1  ;;  %v2592_v6 = vrot.slane %v7169_v8, 1  ;;  %v2594_v45 = vrot.slane %v7173_v15, 1  ;;  %v2595_v39 = vrot.slane %v7179_v0, 1 }
 0x20d   :  { %v2597_v41 = vrot.slane %v7183_v27, 1  ;;  %v2599_v5 = vrot.slane %v7187_v31, 1  ;;  %v2600_v16 = vrot.slane %v7192_v53, 1  ;;  %v2602_v52 = vrot.slane %v7199_v21, 1 }
 0x20e   :  { %v2604_v33 = vrot.slane %v7203_v60, 1  ;;  %v2605_v13 = vrot.slane %v7207_v46, 1  ;;  %v2607_v34 = vrot.slane %v7211_v29, 1  ;;  %v2581_v8 = vsel %vm556_vm1, %v2579_v51, %v2580_v7 }
 0x20f   :  { %v2583_v48 = vsel %vm556_vm1, %v2580_v7, %v2582_v32  ;;  %v2609_v0 = vrot.slane %v7215_v62, 1  ;;  %v2610_v27 = vrot.slane %v7219_v37, 1  ;;  %v2586_v31 = vsel %vm556_vm1, %v2584_v55, %v2585_v2 }
 0x210   :  { %v2588_v53 = vsel %vm556_vm1, %v2585_v2, %v2587_v1  ;;  %v2591_v21 = vsel %vm556_vm1, %v2589_v49, %v2590_v35  ;;  %v2612_v60 = vrot.slane %v7223_v38, 1  ;;  %v2593_v46 = vsel %vm556_vm1, %v2590_v35, %v2592_v6 }
 0x211   :  { %v2596_v29 = vsel %vm556_vm1, %v2594_v45, %v2595_v39  ;;  %v2598_v51 = vsel %vm556_vm1, %v2595_v39, %v2597_v41  ;;  %v2601_v7 = vsel %vm556_vm1, %v2599_v5, %v2600_v16  ;;  %v2603_v32 = vsel %vm556_vm1, %v2600_v16, %v2602_v52  ;;  %v10828_v39 = vld [vmem:[#allocation89_spill] sm:$0xff]  ;;  %v10830_v41 = vld [vmem:[#allocation74_spill] sm:$0xff] }
 0x212   :  { %v2606_v37 = vsel %vm556_vm1, %v2604_v33, %v2605_v13  ;;  %v2608_v55 = vsel %vm556_vm1, %v2605_v13, %v2607_v34  ;;  %v7307_v2 = vadd.f32 %v7226_v61, %v7029_v23  ;;  %v2611_v1 = vsel %vm556_vm1, %v2609_v0, %v2610_v27 }
 0x213   :  { %v7312_v49 = vadd.f32 %v7229_v17, %v7033_v18  ;;  %v7316_v35 = vadd.f32 %v7235_v42, %v7041_v50  ;;  %v7320_v6 = vadd.f32 %v7238_v44, %v7045_v54  ;;  %v2613_v34 = vsel %vm556_vm1, %v2610_v27, %v2612_v60  ;;  %v10827_v42 = vld [vmem:[#allocation34_spill] sm:$0xff] }
 0x214   :  { %v7324_v13 = vadd.f32 %v2546_v25, %v7053_v63  ;;  %v7327_v61 = vadd.f32 %v2548_v28, %v7057_v59  ;;  %v7330_v0 = vadd.f32 %v2551_v22, %v7065_v26  ;;  %v7333_v17 = vadd.f32 %v2553_v56, %v7069_v9  ;;  %v10832_v25 = vld [vmem:[#allocation4_spill] sm:$0xff]  ;;  %v10833_v28 = vld [vmem:[#allocation35_spill] sm:$0xff]  ;;  %v10834_v22 = vld [vmem:[#allocation90_spill] sm:$0xff] }
 0x215   :  { %v7336_v45 = vadd.f32 %v2556_v3, %v10827_v42  ;;  %v7339_v44 = vadd.f32 %v2558_v20, %v10828_v39  ;;  %v7342_v27 = vadd.f32 %v2561_v11, %v10830_v41  ;;  %v7345_v60 = vadd.f32 %v2563_v30, %v10832_v25  ;;  %v10835_v56 = vld [vmem:[#allocation75_spill] sm:$0xff]  ;;  %v10836_v3 = vld [vmem:[#allocation5_spill] sm:$0xff]  ;;  %v10838_v20 = vld [vmem:[#allocation36_spill] sm:$0xff] }
 0x216   :  { %v7348_v5 = vadd.f32 %v2566_v40, %v10833_v28  ;;  %v7351_v16 = vadd.f32 %v2568_v14, %v10834_v22  ;;  %v7354_v52 = vadd.f32 %v2571_v36, %v10835_v56  ;;  %v7357_v33 = vadd.f32 %v2573_v10, %v10836_v3  ;;  %v10839_v11 = vld [vmem:[#allocation91_spill] sm:$0xff] }
 0x217   :  { %10829 = vst [vmem:[#allocation78_spill] sm:$0xff] %v7339_v44  ;;  %10831 = vst [vmem:[#allocation9_spill] sm:$0xff] %v7342_v27  ;;  %v7360_v44 = vadd.f32 %v2576_v12, %v10838_v20  ;;  %v7363_v27 = vadd.f32 %v2578_v58, %v10839_v11  ;;  %v7366_v30 = vadd.f32 %v2581_v8, %v7137_v47  ;;  %v2678_v36 = vrot.slane %v7029_v23, 2  ;;  %v10847_v8 = vld [vmem:[#allocation2_spill] sm:$0xff] }
 0x218   :  { %10837 = vst [vmem:[#allocation62_spill] sm:$0xff] %v7357_v33  ;;  %v7369_v40 = vadd.f32 %v2583_v48, %v7141_v4  ;;  %v7372_v14 = vadd.f32 %v2586_v31, %v7149_v43  ;;  %v2679_v10 = vrot.slane %v7033_v18, 2  ;;  %v7377_v33 = vadd.f32 %v2588_v53, %v7153_v24 }
 0x219   :  { %10840 = vst [vmem:[#allocation39_spill] sm:$0xff] %v7363_v27  ;;  %10841 = vst [vmem:[#allocation94_spill] sm:$0xff] %v7366_v30  ;;  %v7380_v12 = vadd.f32 %v2591_v21, %v7161_v57  ;;  %v7383_v58 = vadd.f32 %v2593_v46, %v7165_v19  ;;  %v2681_v30 = vrot.slane %v10847_v8, 2  ;;  %v7387_v48 = vadd.f32 %v2596_v29, %v7173_v15  ;;  %v10858_v29 = vld [vmem:[#allocation38_spill] sm:$0xff]  ;;  %v10869_v27 = vld [vmem:[#allocation21_spill] sm:$0xff] }
 0x21a   :  { %10842 = vst [vmem:[#allocation24_spill] sm:$0xff] %v7369_v40  ;;  %10843 = vst [vmem:[#allocation79_spill] sm:$0xff] %v7372_v14  ;;  %v2683_v31 = vrot.slane %v7041_v50, 2  ;;  %v2684_v23 = vrot.slane %v7045_v54, 2  ;;  %v10849_v14 = vld [vmem:[#allocation73_spill] sm:$0xff]  ;;  %v7408_v50 = vadd.f32 %v2611_v1, %v7215_v62  ;;  %v10861_v54 = vld [vmem:[#allocation23_spill] sm:$0xff] }
 0x21b   :  { %10844 = vst [vmem:[#allocation10_spill] sm:$0xff] %v7377_v33  ;;  %10845 = vst [vmem:[#allocation63_spill] sm:$0xff] %v7380_v12  ;;  %v2686_v18 = vrot.slane %v10849_v14, 2  ;;  %v10850_v40 = vld [vmem:[#allocation37_spill] sm:$0xff]  ;;  %v10852_v33 = vld [vmem:[#allocation22_spill] sm:$0xff]  ;;  %v7411_v14 = vadd.f32 %v2613_v34, %v10861_v54  ;;  %v2693_v34 = vrot.slane %v7065_v26, 2 }
 0x21c   :  { %10846 = vst [vmem:[#allocation40_spill] sm:$0xff] %v7383_v58  ;;  %10848 = vst [vmem:[#allocation95_spill] sm:$0xff] %v7387_v48  ;;  %v7393_v53 = vadd.f32 %v2598_v51, %v10850_v40  ;;  %v7396_v21 = vadd.f32 %v2601_v7, %v10852_v33  ;;  %v10854_v12 = vld [vmem:[#allocation77_spill] sm:$0xff]  ;;  %v7405_v48 = vadd.f32 %v2608_v55, %v10858_v29  ;;  %v2709_v26 = vrot.slane %v10834_v22, 2 }
 0x21d   :  { %v7399_v46 = vadd.f32 %v2603_v32, %v10854_v12  ;;  %v10856_v58 = vld [vmem:[#allocation61_spill] sm:$0xff]  ;;  %10860 = vst [vmem:[#allocation96_spill] sm:$0xff] %v7408_v50  ;;  %10862 = vst [vmem:[#allocation26_spill] sm:$0xff] %v7411_v14  ;;  %v7414_v51 = vsel %vm701_vm2, %v2678_v36, %v2679_v10  ;;  %v7417_v7 = vsel %vm701_vm2, %v2679_v10, %v2681_v30  ;;  %v2688_v32 = vrot.slane %v7053_v63, 2  ;;  %v10864_v14 = vld [vmem:[#allocation50_spill] sm:$0xff] }
 0x21e   :  { %10851 = vst [vmem:[#allocation25_spill] sm:$0xff] %v7393_v53  ;;  %10853 = vst [vmem:[#allocation80_spill] sm:$0xff] %v7396_v21  ;;  %v7402_v8 = vadd.f32 %v2606_v37, %v10856_v58  ;;  %v2689_v37 = vrot.slane %v7057_v59, 2  ;;  %v7423_v55 = vsel %vm701_vm2, %v2683_v31, %v2684_v23  ;;  %v7426_v1 = vsel %vm701_vm2, %v2684_v23, %v2686_v18  ;;  %v10865_v10 = vld [vmem:[#allocation6_spill] sm:$0xff]  ;;  %v10867_v18 = vld [vmem:[#allocation12_spill] sm:$0xff] }
 0x21f   :  { %10855 = vst [vmem:[#allocation11_spill] sm:$0xff] %v7399_v46  ;;  %10859 = vst [vmem:[#allocation41_spill] sm:$0xff] %v7405_v48  ;;  %v2694_v36 = vrot.slane %v7069_v9, 2  ;;  %v2696_v50 = vrot.slane %v10864_v14, 2  ;;  %v2698_v30 = vrot.slane %v10827_v42, 2  ;;  %v2699_v63 = vrot.slane %v10828_v39, 2 }
 0x220   :  { %10857 = vst [vmem:[#allocation64_spill] sm:$0xff] %v7402_v8  ;;  %v10863_v8 = vld [vmem:[#allocation3_spill] sm:$0xff]  ;;  %v2701_v59 = vrot.slane %v10865_v10, 2  ;;  %v2704_v31 = vrot.slane %v10832_v25, 2  ;;  %v10866_v48 = vld [vmem:[#allocation52_spill] sm:$0xff]  ;;  %v2708_v23 = vrot.slane %v10833_v28, 2  ;;  %v2690_v39 = vsel %vm701_vm2, %v2688_v32, %v2689_v37 }
 0x221   :  { %v2691_v46 = vrot.slane %v10863_v8, 2  ;;  %v2703_v8 = vrot.slane %v10830_v41, 2  ;;  %v2706_v21 = vrot.slane %v10866_v48, 2  ;;  %v2711_v9 = vrot.slane %v10867_v18, 2  ;;  %v10868_v53 = vld [vmem:[#allocation55_spill] sm:$0xff] }
 0x222   :  { %v2713_v14 = vrot.slane %v10835_v56, 2  ;;  %v2714_v42 = vrot.slane %v10836_v3, 2  ;;  %v2716_v10 = vrot.slane %v10868_v53, 2  ;;  %v2718_v41 = vrot.slane %v10838_v20, 2 }
 0x223   :  { %v2719_v25 = vrot.slane %v10839_v11, 2  ;;  %v2692_v48 = vsel %vm701_vm2, %v2689_v37, %v2691_v46  ;;  %v2695_v28 = vsel %vm701_vm2, %v2693_v34, %v2694_v36  ;;  %v2697_v22 = vsel %vm701_vm2, %v2694_v36, %v2696_v50  ;;  %v10870_v36 = vld [vmem:[#allocation76_spill] sm:$0xff] }
 0x224   :  { %v2721_v18 = vrot.slane %v10869_v27, 2  ;;  %v2700_v56 = vsel %vm701_vm2, %v2698_v30, %v2699_v63  ;;  %v2702_v3 = vsel %vm701_vm2, %v2699_v63, %v2701_v59  ;;  %v2705_v32 = vsel %vm701_vm2, %v2703_v8, %v2704_v31  ;;  %v10871_v8 = vld [vmem:[#allocation7_spill] sm:$0xff] }
 0x225   :  { %v2707_v53 = vsel %vm701_vm2, %v2704_v31, %v2706_v21  ;;  %v2710_v20 = vsel %vm701_vm2, %v2708_v23, %v2709_v26  ;;  %v2712_v11 = vsel %vm701_vm2, %v2709_v26, %v2711_v9  ;;  %v2715_v46 = vsel %vm701_vm2, %v2713_v14, %v2714_v42  ;;  %v10872_v26 = vld [vmem:[#allocation60_spill] sm:$0xff] }
 0x226   :  { %v2723_v37 = vrot.slane %v7137_v47, 2  ;;  %v2717_v50 = vsel %vm701_vm2, %v2714_v42, %v2716_v10  ;;  %v2720_v27 = vsel %vm701_vm2, %v2718_v41, %v2719_v25  ;;  %v2724_v34 = vrot.slane %v7141_v4, 2  ;;  %v10873_v42 = vld [vmem:[#allocation92_spill] sm:$0xff] }
 0x227   :  { %v2726_v30 = vrot.slane %v10870_v36, 2  ;;  %v2722_v63 = vsel %vm701_vm2, %v2719_v25, %v2721_v18  ;;  %v2728_v21 = vrot.slane %v7149_v43, 2  ;;  %v2729_v59 = vrot.slane %v7153_v24, 2  ;;  %v10874_v25 = vld [vmem:[#allocation8_spill] sm:$0xff]  ;;  %v10875_v36 = vld [vmem:[#allocation93_spill] sm:$0xff] }
 0x228   :  { %v2731_v31 = vrot.slane %v10871_v8, 2  ;;  %v2733_v23 = vrot.slane %v7161_v57, 2  ;;  %v2734_v47 = vrot.slane %v7165_v19, 2  ;;  %v2736_v9 = vrot.slane %v10872_v26, 2 }
 0x229   :  { %v2738_v14 = vrot.slane %v7173_v15, 2  ;;  %v2739_v4 = vrot.slane %v10850_v40, 2  ;;  %v2741_v10 = vrot.slane %v10873_v42, 2  ;;  %v2743_v41 = vrot.slane %v10852_v33, 2 }
 0x22a   :  { %v2744_v43 = vrot.slane %v10854_v12, 2  ;;  %v2746_v24 = vrot.slane %v10874_v25, 2  ;;  %v2748_v18 = vrot.slane %v10856_v58, 2  ;;  %v2749_v57 = vrot.slane %v10858_v29, 2 }
 0x22b   :  { %v2751_v19 = vrot.slane %v10875_v36, 2  ;;  %v2725_v8 = vsel %vm701_vm2, %v2723_v37, %v2724_v34  ;;  %v2727_v15 = vsel %vm701_vm2, %v2724_v34, %v2726_v30  ;;  %v2753_v40 = vrot.slane %v7215_v62, 2 }
 0x22c   :  { %v2754_v26 = vrot.slane %v10861_v54, 2  ;;  %v2730_v33 = vsel %vm701_vm2, %v2728_v21, %v2729_v59  ;;  %v2732_v12 = vsel %vm701_vm2, %v2729_v59, %v2731_v31  ;;  %v2735_v42 = vsel %vm701_vm2, %v2733_v23, %v2734_v47 }
 0x22d   :  { %v2756_v58 = vrot.slane %v7223_v38, 2  ;;  %v2737_v29 = vsel %vm701_vm2, %v2734_v47, %v2736_v9  ;;  %v2740_v25 = vsel %vm701_vm2, %v2738_v14, %v2739_v4  ;;  %v2742_v37 = vsel %vm701_vm2, %v2739_v4, %v2741_v10  ;;  %v10877_v10 = vld [vmem:[#allocation9_spill] sm:$0xff] }
 0x22e   :  { %v2745_v34 = vsel %vm701_vm2, %v2743_v41, %v2744_v43  ;;  %v2747_v62 = vsel %vm701_vm2, %v2744_v43, %v2746_v24  ;;  %v2750_v54 = vsel %vm701_vm2, %v2748_v18, %v2749_v57  ;;  %v2752_v30 = vsel %vm701_vm2, %v2749_v57, %v2751_v19  ;;  %v10888_v43 = vld [vmem:[#allocation80_spill] sm:$0xff]  ;;  %v10892_v57 = vld [vmem:[#allocation41_spill] sm:$0xff] }
 0x22f   :  { %v7495_v21 = vadd.f32 %v7414_v51, %v7307_v2  ;;  %v2755_v38 = vsel %vm701_vm2, %v2753_v40, %v2754_v26  ;;  %v7500_v59 = vadd.f32 %v7417_v7, %v7312_v49  ;;  %v2792_v31 = vadd.f32 %v7423_v55, %v7316_v35  ;;  %v10876_v49 = vld [vmem:[#allocation78_spill] sm:$0xff]  ;;  %v10890_v24 = vld [vmem:[#allocation64_spill] sm:$0xff] }
 0x230   :  { %v2793_v23 = vadd.f32 %v7426_v1, %v7320_v6  ;;  %v2757_v47 = vsel %vm701_vm2, %v2754_v26, %v2756_v58  ;;  %v2794_v9 = vadd.f32 %v2690_v39, %v7324_v13  ;;  %v2795_v14 = vadd.f32 %v2692_v48, %v7327_v61  ;;  %v10878_v1 = vld [vmem:[#allocation62_spill] sm:$0xff]  ;;  %v10879_v39 = vld [vmem:[#allocation39_spill] sm:$0xff]  ;;  %v10894_v19 = vld [vmem:[#allocation96_spill] sm:$0xff] }
 0x231   :  { %v2796_v2 = vadd.f32 %v2695_v28, %v7330_v0  ;;  %v2797_v51 = vadd.f32 %v2697_v22, %v7333_v17  ;;  %v2798_v4 = vadd.f32 %v2700_v56, %v7336_v45  ;;  %v2799_v7 = vadd.f32 %v2702_v3, %v10876_v49  ;;  %v10880_v48 = vld [vmem:[#allocation94_spill] sm:$0xff]  ;;  %v10881_v28 = vld [vmem:[#allocation24_spill] sm:$0xff]  ;;  %v10882_v56 = vld [vmem:[#allocation79_spill] sm:$0xff] }
 0x232   :  { %v2800_v41 = vadd.f32 %v2705_v32, %v10877_v10  ;;  %v2801_v35 = vadd.f32 %v2707_v53, %v7345_v60  ;;  %v2802_v6 = vadd.f32 %v2710_v20, %v7348_v5  ;;  %v2803_v55 = vadd.f32 %v2712_v11, %v7351_v16  ;;  %v10883_v32 = vld [vmem:[#allocation10_spill] sm:$0xff]  ;;  %v10884_v53 = vld [vmem:[#allocation63_spill] sm:$0xff]  ;;  %v10885_v20 = vld [vmem:[#allocation40_spill] sm:$0xff] }
 0x233   :  { %v2804_v13 = vadd.f32 %v2715_v46, %v7354_v52  ;;  %v2805_v61 = vadd.f32 %v2717_v50, %v10878_v1  ;;  %v2806_v0 = vadd.f32 %v2720_v27, %v7360_v44  ;;  %v2807_v17 = vadd.f32 %v2722_v63, %v10879_v39  ;;  %v10886_v11 = vld [vmem:[#allocation95_spill] sm:$0xff]  ;;  %v10887_v46 = vld [vmem:[#allocation25_spill] sm:$0xff] }
 0x234   :  { %v2808_v45 = vadd.f32 %v2725_v8, %v10880_v48  ;;  %v2809_v22 = vadd.f32 %v2727_v15, %v10881_v28  ;;  %v2810_v3 = vadd.f32 %v2730_v33, %v10882_v56  ;;  %v2811_v60 = vadd.f32 %v2732_v12, %v10883_v32  ;;  %v10889_v27 = vld [vmem:[#allocation11_spill] sm:$0xff]  ;;  %v10895_v15 = vld [vmem:[#allocation26_spill] sm:$0xff] }
 0x235   :  { %v2812_v5 = vadd.f32 %v2735_v42, %v10884_v53  ;;  %v2813_v16 = vadd.f32 %v2737_v29, %v10885_v20  ;;  %v2814_v52 = vadd.f32 %v2740_v25, %v10886_v11  ;;  %v2815_v50 = vadd.f32 %v2742_v37, %v10887_v46 }
 0x236   :  { %v2816_v44 = vadd.f32 %v2745_v34, %v10888_v43  ;;  %v2817_v63 = vadd.f32 %v2747_v62, %v10889_v27  ;;  %v7532_v18 = vadd.f32 %v2750_v54, %v10890_v24  ;;  %v7535_v36 = vadd.f32 %v2752_v30, %v10892_v57 }
 0x237   :  { %v2820_v8 = vadd.f32 %v2755_v38, %v10894_v19  ;;  %v2821_v40 = vadd.f32 %v2757_v47, %v10895_v15  ;;  %v2822_v26 = vadd.f32 %v2792_v31, %v7495_v21  ;;  %v2823_v33 = vadd.f32 %v2793_v23, %v7500_v59 }
 0x238   :  { %10891 = vst [vmem:[#allocation81_spill] sm:$0xff] %v7532_v18  ;;  %10893 = vst [vmem:[#allocation13_spill] sm:$0xff] %v7535_v36  ;;  %v2824_v12 = vadd.f32 %v2794_v9, %v7495_v21  ;;  %v2825_v42 = vadd.f32 %v2795_v14, %v7500_v59  ;;  %v2826_v58 = vadd.f32 %v2796_v2, %v2794_v9 }
 0x239   :  { %v2827_v29 = vadd.f32 %v2797_v51, %v2795_v14  ;;  %v2828_v25 = vadd.f32 %v2798_v4, %v2796_v2  ;;  %v2829_v37 = vadd.f32 %v2799_v7, %v2797_v51  ;;  %v2830_v34 = vadd.f32 %v2800_v41, %v2798_v4 }
 0x23a   :  { %v2831_v62 = vadd.f32 %v2801_v35, %v2799_v7  ;;  %v2832_v54 = vadd.f32 %v2802_v6, %v2800_v41  ;;  %v2833_v30 = vadd.f32 %v2803_v55, %v2801_v35  ;;  %v2834_v49 = vadd.f32 %v2804_v13, %v2802_v6 }
 0x23b   :  { %v2835_v38 = vadd.f32 %v2805_v61, %v2803_v55  ;;  %v2836_v10 = vadd.f32 %v2806_v0, %v2804_v13  ;;  %v2837_v47 = vadd.f32 %v2807_v17, %v2805_v61  ;;  %v2838_v1 = vadd.f32 %v2808_v45, %v2806_v0 }
 0x23c   :  { %v2839_v31 = vadd.f32 %v2809_v22, %v2807_v17  ;;  %v2840_v39 = vadd.f32 %v2810_v3, %v2808_v45  ;;  %v2841_v23 = vadd.f32 %v2811_v60, %v2809_v22  ;;  %v2842_v48 = vadd.f32 %v2812_v5, %v2810_v3 }
 0x23d   :  { %v2843_v28 = vadd.f32 %v2813_v16, %v2811_v60  ;;  %v2844_v56 = vadd.f32 %v2814_v52, %v2812_v5  ;;  %v2845_v32 = vadd.f32 %v2815_v50, %v2813_v16  ;;  %v2846_v53 = vadd.f32 %v2816_v44, %v2814_v52 }
 0x23e   :  { %v2847_v20 = vadd.f32 %v2817_v63, %v2815_v50  ;;  %v2848_v11 = vadd.f32 %v7532_v18, %v2816_v44  ;;  %v2849_v46 = vadd.f32 %v7535_v36, %v2817_v63  ;;  %v2850_v43 = vadd.f32 %v2820_v8, %v7532_v18 }
 0x23f   :  { %v2851_v27 = vadd.f32 %v2821_v40, %v7535_v36  ;;  %v2852_v24 = vadd.f32 %v2822_v26, %v7495_v21  ;;  %v2853_v57 = vadd.f32 %v2823_v33, %v7500_v59  ;;  %v2854_v19 = vadd.f32 %v2822_v26, %v2794_v9 }
 0x240   :  { %v2855_v15 = vadd.f32 %v2823_v33, %v2795_v14  ;;  %v2856_v18 = vadd.f32 %v2824_v12, %v2796_v2  ;;  %v2857_v36 = vadd.f32 %v2825_v42, %v2797_v51  ;;  %v2858_v21 = vadd.f32 %v2826_v58, %v2798_v4 }
 0x241   :  { %v2859_v59 = vadd.f32 %v2827_v29, %v2799_v7  ;;  %v2860_v9 = vadd.f32 %v2828_v25, %v2800_v41  ;;  %v2861_v26 = vadd.f32 %v2829_v37, %v2801_v35  ;;  %v2862_v14 = vadd.f32 %v2830_v34, %v2802_v6 }
 0x242   :  { %v2863_v33 = vadd.f32 %v2831_v62, %v2803_v55  ;;  %v2864_v2 = vadd.f32 %v2832_v54, %v2804_v13  ;;  %v2865_v12 = vadd.f32 %v2833_v30, %v2805_v61  ;;  %v2866_v42 = vadd.f32 %v2834_v49, %v2806_v0  ;;  %v10896_v55 = vld [vmem:[#allocation81_spill] sm:$0xff] }
 0x243   :  { %v2867_v51 = vadd.f32 %v2835_v38, %v2807_v17  ;;  %v2868_v4 = vadd.f32 %v2836_v10, %v2808_v45  ;;  %v2869_v58 = vadd.f32 %v2837_v47, %v2809_v22  ;;  %v2870_v7 = vadd.f32 %v2838_v1, %v2810_v3  ;;  %v10897_v13 = vld [vmem:[#allocation13_spill] sm:$0xff]  ;;  %v10906_v1 = vld [vmem:[#allocation102_spill] sm:$0xff] }
 0x244   :  { %v2871_v29 = vadd.f32 %v2839_v31, %v2811_v60  ;;  %v2872_v25 = vadd.f32 %v2840_v39, %v2812_v5  ;;  %v2873_v41 = vadd.f32 %v2841_v23, %v2813_v16  ;;  %v2874_v35 = vadd.f32 %v2842_v48, %v2814_v52  ;;  %v10898_v5 = vld [vmem:[#allocation100_spill] sm:$0xff]  ;;  %v10899_v16 = vld [vmem:[#allocation142_spill] sm:$0xff]  ;;  %v10911_v48 = vld [vmem:[#allocation103_spill] sm:$0xff] }
 0x245   :  { %v2875_v37 = vadd.f32 %v2843_v28, %v2815_v50  ;;  %v2876_v6 = vadd.f32 %v2844_v56, %v2816_v44  ;;  %v2877_v34 = vadd.f32 %v2845_v32, %v2817_v63  ;;  %v2878_v62 = vadd.f32 %v2846_v53, %v10896_v55  ;;  %v10907_v31 = vld [vmem:[#allocation144_spill] sm:$0xff]  ;;  %v10912_v28 = vld [vmem:[#allocation145_spill] sm:$0xff] }
 0x246   :  { %v2879_v54 = vadd.f32 %v2847_v20, %v10897_v13  ;;  %v2880_v30 = vadd.f32 %v2848_v11, %v2820_v8  ;;  %v2881_v61 = vadd.f32 %v2849_v46, %v2821_v40  ;;  %v2882_v0 = vadd.f32 %v2850_v43, %v10896_v55  ;;  %v10901_v8 = vld [vmem:[#allocation101_spill] sm:$0xff]  ;;  %v10902_v40 = vld [vmem:[#allocation143_spill] sm:$0xff]  ;;  %v10917_v46 = vld [vmem:[#allocation146_spill] sm:$0xff] }
 0x247   :  { %v2883_v17 = vadd.f32 %v2851_v27, %v10897_v13  ;;  %v7553_v45 = vmul.f32 0.11111111, %v2852_v24  ;;  %v7555_v22 = vmul.f32 0.11111111, %v2853_v57  ;;  %v7557_v3 = vmul.f32 0.11111111, %v2854_v19 }
 0x248   :  { %v7559_v60 = vmul.f32 0.11111111, %v2855_v15  ;;  %v7563_v52 = vmul.f32 %v10899_v16, %v10898_v5  ;;  %v7565_v50 = vmul.f32 0.11111111, %v2856_v18  ;;  %v7567_v44 = vmul.f32 0.11111111, %v2857_v36 }
 0x249   :  { %v7569_v63 = vmul.f32 0.11111111, %v2858_v21  ;;  %v7573_v49 = vmul.f32 %v10902_v40, %v10901_v8  ;;  %v7575_v38 = vmul.f32 0.11111111, %v2859_v59  ;;  %v7577_v10 = vmul.f32 0.11111111, %v2860_v9 }
 0x24a   :  { %v7579_v47 = vmul.f32 0.11111111, %v2861_v26  ;;  %v7583_v39 = vmul.f32 %v10907_v31, %v10906_v1  ;;  %v7585_v18 = vmul.f32 0.11111111, %v2862_v14  ;;  %v7587_v36 = vmul.f32 0.11111111, %v2863_v33 }
 0x24b   :  { %10900 = vst [vmem:[#allocation65_spill] sm:$0xff] %v7569_v63  ;;  %10903 = vst [vmem:[#allocation42_spill] sm:$0xff] %v7575_v38  ;;  %v7589_v23 = vmul.f32 0.11111111, %v2864_v2  ;;  %v7593_v56 = vmul.f32 %v10912_v28, %v10911_v48  ;;  %v7595_v32 = vmul.f32 0.11111111, %v2865_v12 }
 0x24c   :  { %10904 = vst [vmem:[#allocation97_spill] sm:$0xff] %v7577_v10  ;;  %10905 = vst [vmem:[#allocation27_spill] sm:$0xff] %v7579_v47  ;;  %v7597_v53 = vmul.f32 0.11111111, %v2866_v42  ;;  %v7599_v20 = vmul.f32 0.11111111, %v2867_v51 }
 0x24d   :  { %10908 = vst [vmem:[#allocation82_spill] sm:$0xff] %v7585_v18  ;;  %10909 = vst [vmem:[#allocation14_spill] sm:$0xff] %v7587_v36  ;;  %v10916_v11 = vld [vmem:[#allocation105_spill] sm:$0xff]  ;;  %v7605_v27 = vmul.f32 0.11111111, %v2868_v4  ;;  %v10921_v19 = vld [vmem:[#allocation106_spill] sm:$0xff] }
 0x24e   :  { %10910 = vst [vmem:[#allocation66_spill] sm:$0xff] %v7589_v23  ;;  %10913 = vst [vmem:[#allocation43_spill] sm:$0xff] %v7595_v32  ;;  %v7603_v43 = vmul.f32 %v10917_v46, %v10916_v11  ;;  %v7607_v24 = vmul.f32 0.11111111, %v2869_v58  ;;  %v7609_v57 = vmul.f32 0.11111111, %v2870_v7 }
 0x24f   :  { %10914 = vst [vmem:[#allocation51_spill] sm:$0xff] %v7597_v53  ;;  %10915 = vst [vmem:[#allocation28_spill] sm:$0xff] %v7599_v20  ;;  %v10922_v15 = vld [vmem:[#allocation147_spill] sm:$0xff]  ;;  %v7615_v59 = vmul.f32 0.11111111, %v2871_v29  ;;  %v10928_v33 = vld [vmem:[#allocation148_spill] sm:$0xff] }
 0x250   :  { %10918 = vst [vmem:[#allocation83_spill] sm:$0xff] %v7605_v27  ;;  %10919 = vst [vmem:[#allocation15_spill] sm:$0xff] %v7607_v24  ;;  %v7613_v21 = vmul.f32 %v10922_v15, %v10921_v19  ;;  %v7617_v9 = vmul.f32 0.11111111, %v2872_v25  ;;  %v7619_v26 = vmul.f32 0.11111111, %v2873_v41 }
 0x251   :  { %10920 = vst [vmem:[#allocation67_spill] sm:$0xff] %v7609_v57  ;;  %10924 = vst [vmem:[#allocation53_spill] sm:$0xff] %v7615_v59  ;;  %v10927_v14 = vld [vmem:[#allocation107_spill] sm:$0xff]  ;;  %v7625_v12 = vmul.f32 0.11111111, %v2874_v35  ;;  %v10933_v4 = vld [vmem:[#allocation109_spill] sm:$0xff] }
 0x252   :  { %10923 = vst [vmem:[#allocation44_spill] sm:$0xff] %v7613_v21  ;;  %10925 = vst [vmem:[#allocation29_spill] sm:$0xff] %v7617_v9  ;;  %v7623_v2 = vmul.f32 %v10928_v33, %v10927_v14  ;;  %v7627_v42 = vmul.f32 0.11111111, %v2875_v37  ;;  %v7629_v51 = vmul.f32 0.11111111, %v2876_v6 }
 0x253   :  { %10926 = vst [vmem:[#allocation84_spill] sm:$0xff] %v7619_v26  ;;  %10930 = vst [vmem:[#allocation68_spill] sm:$0xff] %v7625_v12  ;;  %v10934_v58 = vld [vmem:[#allocation150_spill] sm:$0xff]  ;;  %v7635_v29 = vmul.f32 0.11111111, %v2877_v34  ;;  %v10940_v13 = vld [vmem:[#allocation151_spill] sm:$0xff] }
 0x254   :  { %10929 = vst [vmem:[#allocation16_spill] sm:$0xff] %v7623_v2  ;;  %10931 = vst [vmem:[#allocation45_spill] sm:$0xff] %v7627_v42  ;;  %v7633_v7 = vmul.f32 %v10934_v58, %v10933_v4  ;;  %v7637_v25 = vmul.f32 0.11111111, %v2878_v62  ;;  %v7639_v41 = vmul.f32 0.11111111, %v2879_v54 }
 0x255   :  { %10932 = vst [vmem:[#allocation54_spill] sm:$0xff] %v7629_v51  ;;  %10936 = vst [vmem:[#allocation85_spill] sm:$0xff] %v7635_v29  ;;  %v10939_v55 = vld [vmem:[#allocation110_spill] sm:$0xff]  ;;  %v7645_v35 = vmul.f32 0.11111111, %v2880_v30  ;;  %v10945_v15 = vld [vmem:[#allocation111_spill] sm:$0xff] }
 0x256   :  { %10935 = vst [vmem:[#allocation30_spill] sm:$0xff] %v7633_v7  ;;  %10937 = vst [vmem:[#allocation17_spill] sm:$0xff] %v7637_v25  ;;  %v7643_v33 = vmul.f32 %v10940_v13, %v10939_v55  ;;  %v7647_v37 = vmul.f32 0.11111111, %v2881_v61  ;;  %v7649_v6 = vmul.f32 0.11111111, %v2882_v0 }
 0x257   :  { %10938 = vst [vmem:[#allocation69_spill] sm:$0xff] %v7639_v41  ;;  %10942 = vst [vmem:[#allocation56_spill] sm:$0xff] %v7645_v35  ;;  %v10946_v46 = vld [vmem:[#allocation152_spill] sm:$0xff]  ;;  %v7655_v34 = vmul.f32 0.11111111, %v2883_v17  ;;  %v10949_v62 = vld [vmem:[#allocation113_spill] sm:$0xff] }
 0x258   :  { %10941 = vst [vmem:[#allocation46_spill] sm:$0xff] %v7643_v33  ;;  %10943 = vst [vmem:[#allocation31_spill] sm:$0xff] %v7647_v37  ;;  %v7653_v58 = vmul.f32 %v10946_v46, %v10945_v15  ;;  %v10950_v28 = vld [vmem:[#allocation154_spill] sm:$0xff]  ;;  %v10953_v40 = vld [vmem:[#allocation155_spill] sm:$0xff] }
 0x259   :  { %10944 = vst [vmem:[#allocation86_spill] sm:$0xff] %v7649_v6  ;;  %10948 = vst [vmem:[#allocation70_spill] sm:$0xff] %v7655_v34  ;;  %v7659_v54 = vmul.f32 %v10950_v28, %v10949_v62  ;;  %v10952_v31 = vld [vmem:[#allocation114_spill] sm:$0xff]  ;;  %v10955_v30 = vld [vmem:[#allocation115_spill] sm:$0xff] }
 0x25a   :  { %10947 = vst [vmem:[#allocation18_spill] sm:$0xff] %v7653_v58  ;;  %v7663_v13 = vmul.f32 %v10953_v40, %v10952_v31  ;;  %v10956_v16 = vld [vmem:[#allocation156_spill] sm:$0xff]  ;;  %v10958_v0 = vld [vmem:[#allocation99_spill] sm:$0xff]  ;;  %v10962_v15 = vld [vmem:[#allocation141_spill] sm:$0xff] }
 0x25b   :  { %10951 = vst [vmem:[#allocation47_spill] sm:$0xff] %v7659_v54  ;;  %v7667_v61 = vmul.f32 %v10956_v16, %v10955_v30  ;;  %v10959_v55 = vld [vmem:[#allocation140_spill] sm:$0xff]  ;;  %v10964_v14 = vld [vmem:[#allocation117_spill] sm:$0xff]  ;;  %v10965_v19 = vld [vmem:[#allocation158_spill] sm:$0xff] }
 0x25c   :  { %10954 = vst [vmem:[#allocation57_spill] sm:$0xff] %v7663_v13  ;;  %v7671_v4 = vmul.f32 %v10959_v55, %v10958_v0  ;;  %v10961_v46 = vld [vmem:[#allocation116_spill] sm:$0xff]  ;;  %v7679_v28 = vmul.f32 %v10965_v19, %v10964_v14  ;;  %v10967_v62 = vld [vmem:[#allocation119_spill] sm:$0xff]  ;;  %v10971_v48 = vld [vmem:[#allocation161_spill] sm:$0xff] }
 0x25d   :  { %10957 = vst [vmem:[#allocation32_spill] sm:$0xff] %v7667_v61  ;;  %v7675_v17 = vmul.f32 %v10962_v15, %v10961_v46  ;;  %v10968_v11 = vld [vmem:[#allocation160_spill] sm:$0xff]  ;;  %v10973_v30 = vld [vmem:[#allocation121_spill] sm:$0xff]  ;;  %v10974_v1 = vld [vmem:[#allocation162_spill] sm:$0xff] }
 0x25e   :  { %10960 = vst [vmem:[#allocation87_spill] sm:$0xff] %v7671_v4  ;;  %10966 = vst [vmem:[#allocation71_spill] sm:$0xff] %v7679_v28  ;;  %v7683_v40 = vmul.f32 %v10968_v11, %v10967_v62  ;;  %v10970_v31 = vld [vmem:[#allocation120_spill] sm:$0xff]  ;;  %v7691_v55 = vmul.f32 %v10974_v1, %v10973_v30  ;;  %v10976_v0 = vld [vmem:[#allocation123_spill] sm:$0xff] }
 0x25f   :  { %10963 = vst [vmem:[#allocation19_spill] sm:$0xff] %v7675_v17  ;;  %v7687_v16 = vmul.f32 %v10971_v48, %v10970_v31  ;;  %v10977_v8 = vld [vmem:[#allocation164_spill] sm:$0xff]  ;;  %v10980_v5 = vld [vmem:[#allocation165_spill] sm:$0xff]  ;;  %v10983_v34 = vld [vmem:[#allocation166_spill] sm:$0xff] }
 0x260   :  { %10969 = vst [vmem:[#allocation48_spill] sm:$0xff] %v7683_v40  ;;  %10975 = vst [vmem:[#allocation33_spill] sm:$0xff] %v7691_v55  ;;  %v7695_v15 = vmul.f32 %v10977_v8, %v10976_v0  ;;  %v10979_v46 = vld [vmem:[#allocation124_spill] sm:$0xff]  ;;  %v10982_v14 = vld [vmem:[#allocation125_spill] sm:$0xff] }
 0x261   :  { %10972 = vst [vmem:[#allocation58_spill] sm:$0xff] %v7687_v16  ;;  %v7699_v19 = vmul.f32 %v10980_v5, %v10979_v46  ;;  %v7703_v11 = vmul.f32 %v10983_v34, %v10982_v14  ;;  %v10985_v62 = vld [vmem:[#allocation127_spill] sm:$0xff]  ;;  %v10986_v6 = vld [vmem:[#allocation168_spill] sm:$0xff]  ;;  %v10989_v37 = vld [vmem:[#allocation169_spill] sm:$0xff] }
 0x262   :  { %10978 = vst [vmem:[#allocation88_spill] sm:$0xff] %v7695_v15  ;;  %v7707_v48 = vmul.f32 %v10986_v6, %v10985_v62  ;;  %v10988_v31 = vld [vmem:[#allocation128_spill] sm:$0xff]  ;;  %v10991_v30 = vld [vmem:[#allocation129_spill] sm:$0xff]  ;;  %v10992_v35 = vld [vmem:[#allocation170_spill] sm:$0xff] }
 0x263   :  { %10981 = vst [vmem:[#allocation20_spill] sm:$0xff] %v7699_v19  ;;  %10984 = vst [vmem:[#allocation72_spill] sm:$0xff] %v7703_v11  ;;  %v7711_v1 = vmul.f32 %v10989_v37, %v10988_v31  ;;  %v7715_v8 = vmul.f32 %v10992_v35, %v10991_v30  ;;  %v10994_v0 = vld [vmem:[#allocation130_spill] sm:$0xff]  ;;  %v10995_v41 = vld [vmem:[#allocation172_spill] sm:$0xff] }
 0x264   :  { %10987 = vst [vmem:[#allocation49_spill] sm:$0xff] %v7707_v48  ;;  %v7719_v5 = vmul.f32 %v10995_v41, %v10994_v0  ;;  %v10997_v46 = vld [vmem:[#allocation132_spill] sm:$0xff]  ;;  %v10998_v25 = vld [vmem:[#allocation173_spill] sm:$0xff]  ;;  %v11001_v29 = vld [vmem:[#allocation174_spill] sm:$0xff] }
 0x265   :  { %10990 = vst [vmem:[#allocation59_spill] sm:$0xff] %v7711_v1  ;;  %10993 = vst [vmem:[#allocation34_spill] sm:$0xff] %v7715_v8  ;;  %v7723_v34 = vmul.f32 %v10998_v25, %v10997_v46  ;;  %v11000_v14 = vld [vmem:[#allocation133_spill] sm:$0xff]  ;;  %v11003_v62 = vld [vmem:[#allocation134_spill] sm:$0xff] }
 0x266   :  { %10996 = vst [vmem:[#allocation89_spill] sm:$0xff] %v7719_v5  ;;  %v7727_v6 = vmul.f32 %v11001_v29, %v11000_v14  ;;  %v11004_v51 = vld [vmem:[#allocation176_spill] sm:$0xff]  ;;  %v11006_v31 = vld [vmem:[#allocation135_spill] sm:$0xff]  ;;  %v11007_v42 = vld [vmem:[#allocation177_spill] sm:$0xff] }
 0x267   :  { %10999 = vst [vmem:[#allocation74_spill] sm:$0xff] %v7723_v34  ;;  %v7731_v37 = vmul.f32 %v11004_v51, %v11003_v62  ;;  %v7735_v35 = vmul.f32 %v11007_v42, %v11006_v31  ;;  %v11009_v30 = vld [vmem:[#allocation137_spill] sm:$0xff]  ;;  %v11010_v8 = vld [vmem:[#allocation178_spill] sm:$0xff]  ;;  %v11013_v5 = vld [vmem:[#allocation180_spill] sm:$0xff] }
 0x268   :  { %11002 = vst [vmem:[#allocation4_spill] sm:$0xff] %v7727_v6  ;;  %v7739_v41 = vmul.f32 %v11010_v8, %v11009_v30  ;;  %v11012_v0 = vld [vmem:[#allocation138_spill] sm:$0xff]  ;;  %v11026_v42 = vld [vmem:[#allocation100_spill] sm:$0xff]  ;;  %v11027_v24 = vld [vmem:[#allocation101_spill] sm:$0xff] }
 0x269   :  { %11005 = vst [vmem:[#allocation35_spill] sm:$0xff] %v7731_v37  ;;  %11008 = vst [vmem:[#allocation90_spill] sm:$0xff] %v7735_v35  ;;  %v7743_v25 = vmul.f32 %v11013_v5, %v11012_v0  ;;  %v2980_v55 = vmul.f32 2.0, %v11026_v42  ;;  %v2981_v8 = vmul.f32 2.0, %v11027_v24  ;;  %v11028_v15 = vld [vmem:[#allocation102_spill] sm:$0xff]  ;;  %v11029_v30 = vld [vmem:[#allocation103_spill] sm:$0xff] }
 0x26a   :  { %11011 = vst [vmem:[#allocation75_spill] sm:$0xff] %v7739_v41  ;;  %v2982_v34 = vmul.f32 2.0, %v11028_v15  ;;  %v2983_v19 = vmul.f32 2.0, %v11029_v30  ;;  %v11030_v6 = vld [vmem:[#allocation105_spill] sm:$0xff]  ;;  %v11031_v11 = vld [vmem:[#allocation106_spill] sm:$0xff]  ;;  %v11032_v29 = vld [vmem:[#allocation107_spill] sm:$0xff] }
 0x26b   :  { %11014 = vst [vmem:[#allocation5_spill] sm:$0xff] %v7743_v25  ;;  %v2984_v5 = vmul.f32 2.0, %v11030_v6  ;;  %v2985_v37 = vmul.f32 2.0, %v11031_v11  ;;  %v2986_v48 = vmul.f32 2.0, %v11032_v29  ;;  %v11033_v35 = vld [vmem:[#allocation109_spill] sm:$0xff]  ;;  %v11034_v1 = vld [vmem:[#allocation110_spill] sm:$0xff] }
 0x26c   :  { %v2987_v14 = vmul.f32 2.0, %v11033_v35  ;;  %v2988_v41 = vmul.f32 2.0, %v11034_v1  ;;  %v11035_v40 = vld [vmem:[#allocation111_spill] sm:$0xff]  ;;  %v11036_v25 = vld [vmem:[#allocation113_spill] sm:$0xff]  ;;  %v11037_v16 = vld [vmem:[#allocation114_spill] sm:$0xff] }
 0x26d   :  { %v2989_v27 = vmul.f32 2.0, %v11035_v40  ;;  %v2990_v42 = vmul.f32 2.0, %v11036_v25  ;;  %v2991_v24 = vmul.f32 2.0, %v11037_v16  ;;  %v11038_v51 = vld [vmem:[#allocation115_spill] sm:$0xff]  ;;  %v11040_v26 = vld [vmem:[#allocation116_spill] sm:$0xff]  ;;  %v11041_v9 = vld [vmem:[#allocation117_spill] sm:$0xff] }
 0x26e   :  { %v2992_v15 = vmul.f32 2.0, %v11038_v51  ;;  %v11039_v12 = vld [vmem:[#allocation99_spill] sm:$0xff]  ;;  %v2994_v6 = vmul.f32 2.0, %v11040_v26  ;;  %v2995_v11 = vmul.f32 2.0, %v11041_v9  ;;  %v11043_v57 = vld [vmem:[#allocation120_spill] sm:$0xff]  ;;  %v11044_v28 = vld [vmem:[#allocation121_spill] sm:$0xff] }
 0x26f   :  { %v2993_v30 = vmul.f32 2.0, %v11039_v12  ;;  %v11042_v59 = vld [vmem:[#allocation119_spill] sm:$0xff]  ;;  %v2997_v35 = vmul.f32 2.0, %v11043_v57  ;;  %v2998_v1 = vmul.f32 2.0, %v11044_v28  ;;  %v11046_v17 = vld [vmem:[#allocation124_spill] sm:$0xff]  ;;  %v11047_v53 = vld [vmem:[#allocation125_spill] sm:$0xff] }
 0x270   :  { %v2996_v29 = vmul.f32 2.0, %v11042_v59  ;;  %v11045_v20 = vld [vmem:[#allocation123_spill] sm:$0xff]  ;;  %v3000_v25 = vmul.f32 2.0, %v11046_v17  ;;  %v3001_v16 = vmul.f32 2.0, %v11047_v53  ;;  %v11049_v32 = vld [vmem:[#allocation128_spill] sm:$0xff]  ;;  %v11050_v61 = vld [vmem:[#allocation129_spill] sm:$0xff] }
 0x271   :  { %v2999_v40 = vmul.f32 2.0, %v11045_v20  ;;  %v11048_v4 = vld [vmem:[#allocation127_spill] sm:$0xff]  ;;  %v3003_v12 = vmul.f32 2.0, %v11049_v32  ;;  %v3004_v26 = vmul.f32 2.0, %v11050_v61  ;;  %v11051_v23 = vld [vmem:[#allocation130_spill] sm:$0xff]  ;;  %v3006_v59 = vmul.f32 2.0, %v10997_v46 }
 0x272   :  { %v3002_v51 = vmul.f32 2.0, %v11048_v4  ;;  %v3005_v9 = vmul.f32 2.0, %v11051_v23  ;;  %v11052_v13 = vld [vmem:[#allocation133_spill] sm:$0xff]  ;;  %v3008_v28 = vmul.f32 2.0, %v11003_v62  ;;  %v3009_v20 = vmul.f32 2.0, %v11006_v31  ;;  %v11054_v54 = vld [vmem:[#allocation142_spill] sm:$0xff] }
 0x273   :  { %v3007_v57 = vmul.f32 2.0, %v11052_v13  ;;  %v11053_v36 = vld [vmem:[#allocation137_spill] sm:$0xff]  ;;  %v3011_v53 = vmul.f32 2.0, %v11012_v0  ;;  %v3012_v4 = vmul.f32 %v2980_v55, %v11054_v54  ;;  %v11055_v18 = vld [vmem:[#allocation143_spill] sm:$0xff]  ;;  %v11056_v58 = vld [vmem:[#allocation144_spill] sm:$0xff] }
 0x274   :  { %v3010_v17 = vmul.f32 2.0, %v11053_v36  ;;  %v3013_v32 = vmul.f32 %v2981_v8, %v11055_v18  ;;  %v3014_v61 = vmul.f32 %v2982_v34, %v11056_v58  ;;  %v11057_v47 = vld [vmem:[#allocation145_spill] sm:$0xff]  ;;  %v11058_v33 = vld [vmem:[#allocation146_spill] sm:$0xff]  ;;  %v11059_v10 = vld [vmem:[#allocation147_spill] sm:$0xff] }
 0x275   :  { %v3015_v23 = vmul.f32 %v2983_v19, %v11057_v47  ;;  %v3016_v46 = vmul.f32 %v2984_v5, %v11058_v33  ;;  %v3017_v13 = vmul.f32 %v2985_v37, %v11059_v10  ;;  %v11060_v7 = vld [vmem:[#allocation148_spill] sm:$0xff]  ;;  %v11061_v38 = vld [vmem:[#allocation150_spill] sm:$0xff]  ;;  %v11062_v2 = vld [vmem:[#allocation151_spill] sm:$0xff] }
 0x276   :  { %v3018_v62 = vmul.f32 %v2986_v48, %v11060_v7  ;;  %v3019_v31 = vmul.f32 %v2987_v14, %v11061_v38  ;;  %v3020_v36 = vmul.f32 %v2988_v41, %v11062_v2  ;;  %v11063_v63 = vld [vmem:[#allocation152_spill] sm:$0xff]  ;;  %v11064_v21 = vld [vmem:[#allocation154_spill] sm:$0xff]  ;;  %v11065_v54 = vld [vmem:[#allocation155_spill] sm:$0xff] }
 0x277   :  { %v3021_v0 = vmul.f32 %v2989_v27, %v11063_v63  ;;  %v3022_v55 = vmul.f32 %v2990_v42, %v11064_v21  ;;  %v3023_v8 = vmul.f32 %v2991_v24, %v11065_v54  ;;  %v11066_v18 = vld [vmem:[#allocation156_spill] sm:$0xff]  ;;  %v11068_v19 = vld [vmem:[#allocation141_spill] sm:$0xff]  ;;  %v11069_v33 = vld [vmem:[#allocation158_spill] sm:$0xff] }
 0x278   :  { %v3024_v58 = vmul.f32 %v2992_v15, %v11066_v18  ;;  %v11067_v34 = vld [vmem:[#allocation140_spill] sm:$0xff]  ;;  %v3026_v5 = vmul.f32 %v2994_v6, %v11068_v19  ;;  %v3027_v10 = vmul.f32 %v2995_v11, %v11069_v33  ;;  %v11071_v7 = vld [vmem:[#allocation161_spill] sm:$0xff]  ;;  %v11072_v14 = vld [vmem:[#allocation162_spill] sm:$0xff] }
 0x279   :  { %v3025_v47 = vmul.f32 %v2993_v30, %v11067_v34  ;;  %v11070_v37 = vld [vmem:[#allocation160_spill] sm:$0xff]  ;;  %v3029_v38 = vmul.f32 %v2997_v35, %v11071_v7  ;;  %v3030_v2 = vmul.f32 %v2998_v1, %v11072_v14  ;;  %v11074_v27 = vld [vmem:[#allocation165_spill] sm:$0xff]  ;;  %v11075_v42 = vld [vmem:[#allocation166_spill] sm:$0xff] }
 0x27a   :  { %v3028_v48 = vmul.f32 %v2996_v29, %v11070_v37  ;;  %v11073_v41 = vld [vmem:[#allocation164_spill] sm:$0xff]  ;;  %v3032_v21 = vmul.f32 %v3000_v25, %v11074_v27  ;;  %v3033_v24 = vmul.f32 %v3001_v16, %v11075_v42  ;;  %v11077_v18 = vld [vmem:[#allocation169_spill] sm:$0xff]  ;;  %v11078_v34 = vld [vmem:[#allocation170_spill] sm:$0xff]  ;;  %v7873_v42 = vadd.f32 0.0001, %v3012_v4 }
 0x27b   :  { %v3031_v63 = vmul.f32 %v2999_v40, %v11073_v41  ;;  %v11076_v54 = vld [vmem:[#allocation168_spill] sm:$0xff]  ;;  %v3035_v30 = vmul.f32 %v3003_v12, %v11077_v18  ;;  %v3036_v6 = vmul.f32 %v3004_v26, %v11078_v34  ;;  %v11080_v33 = vld [vmem:[#allocation173_spill] sm:$0xff]  ;;  %v11081_v37 = vld [vmem:[#allocation174_spill] sm:$0xff]  ;;  %v7877_v12 = vadd.f32 0.0001, %v3014_v61 }
 0x27c   :  { %v3034_v15 = vmul.f32 %v3002_v51, %v11076_v54  ;;  %v11079_v19 = vld [vmem:[#allocation172_spill] sm:$0xff]  ;;  %v3038_v29 = vmul.f32 %v3006_v59, %v11080_v33  ;;  %v3039_v35 = vmul.f32 %v3007_v57, %v11081_v37  ;;  %v11083_v14 = vld [vmem:[#allocation177_spill] sm:$0xff]  ;;  %v11084_v41 = vld [vmem:[#allocation178_spill] sm:$0xff]  ;;  %v7875_v51 = vadd.f32 0.0001, %v3013_v32 }
 0x27d   :  { %v3037_v11 = vmul.f32 %v3005_v9, %v11079_v19  ;;  %v11082_v7 = vld [vmem:[#allocation176_spill] sm:$0xff]  ;;  %v3041_v40 = vmul.f32 %v3009_v20, %v11083_v14  ;;  %v3042_v25 = vmul.f32 %v3010_v17, %v11084_v41  ;;  %v7879_v26 = vadd.f32 0.0001, %v3015_v23  ;;  %v11086_v9 = vld [vmem:[#allocation171_spill] sm:$0xff]  ;;  %v11087_v59 = vld [vmem:[#allocation246_spill] sm:$0xff] }
 0x27e   :  { %v3040_v1 = vmul.f32 %v3008_v28, %v11082_v7  ;;  %v11085_v27 = vld [vmem:[#allocation180_spill] sm:$0xff]  ;;  %v7883_v54 = vadd.f32 %v11087_v59, %v11086_v9  ;;  %v7885_v57 = vadd.f32 0.0001, %v3016_v46  ;;  %v7887_v28 = vadd.f32 0.0001, %v3017_v13  ;;  %v11092_v18 = vld [vmem:[#allocation98_spill] sm:$0xff] }
 0x27f   :  { %v3043_v16 = vmul.f32 %v3011_v53, %v11085_v27  ;;  %v7889_v20 = vadd.f32 0.0001, %v3018_v62  ;;  %v11089_v17 = vld [vmem:[#allocation188_spill] sm:$0xff]  ;;  %v11090_v53 = vld [vmem:[#allocation253_spill] sm:$0xff]  ;;  %v7895_v32 = vadd.f32 0.0001, %v3019_v31 }
 0x280   :  { %11088 = vst [vmem:[#allocation36_spill] sm:$0xff] %v7883_v54  ;;  %v7893_v4 = vadd.f32 %v11090_v53, %v11089_v17  ;;  %v7897_v61 = vadd.f32 0.0001, %v3020_v36  ;;  %v7899_v23 = vadd.f32 0.0001, %v3021_v0  ;;  %v11093_v34 = vld [vmem:[#allocation232_spill] sm:$0xff] }
 0x281   :  { %v7903_v19 = vadd.f32 %v11093_v34, %v11092_v18  ;;  %v7905_v46 = vadd.f32 0.0001, %v3022_v55  ;;  %v7907_v13 = vadd.f32 0.0001, %v3023_v8  ;;  %v7909_v62 = vadd.f32 0.0001, %v3024_v58 }
 0x282   :  { %11091 = vst [vmem:[#allocation91_spill] sm:$0xff] %v7893_v4  ;;  %v11095_v33 = vld [vmem:[#allocation139_spill] sm:$0xff]  ;;  %v11096_v37 = vld [vmem:[#allocation238_spill] sm:$0xff]  ;;  %v7915_v31 = vadd.f32 0.0001, %v3025_v47  ;;  %v11101_v41 = vld [vmem:[#allocation244_spill] sm:$0xff] }
 0x283   :  { %11094 = vst [vmem:[#allocation2_spill] sm:$0xff] %v7903_v19  ;;  %v7913_v7 = vadd.f32 %v11096_v37, %v11095_v33  ;;  %v7917_v36 = vadd.f32 0.0001, %v3026_v5  ;;  %v7919_v0 = vadd.f32 0.0001, %v3027_v10  ;;  %v11100_v14 = vld [vmem:[#allocation167_spill] sm:$0xff] }
 0x284   :  { %v7923_v27 = vadd.f32 %v11101_v41, %v11100_v14  ;;  %v7925_v55 = vadd.f32 0.0001, %v3028_v48  ;;  %v7927_v8 = vadd.f32 0.0001, %v3029_v38  ;;  %v7929_v58 = vadd.f32 0.0001, %v3030_v2 }
 0x285   :  { %11097 = vst [vmem:[#allocation73_spill] sm:$0xff] %v7913_v7  ;;  %11098 = vst [vmem:[#allocation37_spill] sm:$0xff] %v7917_v36  ;;  %v11106_v34 = vld [vmem:[#allocation183_spill] sm:$0xff]  ;;  %v11107_v18 = vld [vmem:[#allocation252_spill] sm:$0xff]  ;;  %v7935_v47 = vadd.f32 0.0001, %v3031_v63 }
 0x286   :  { %11099 = vst [vmem:[#allocation22_spill] sm:$0xff] %v7919_v0  ;;  %11102 = vst [vmem:[#allocation77_spill] sm:$0xff] %v7923_v27  ;;  %v7933_v37 = vadd.f32 %v11107_v18, %v11106_v34  ;;  %v7937_v5 = vadd.f32 0.0001, %v3032_v21  ;;  %v7939_v10 = vadd.f32 0.0001, %v3033_v24 }
 0x287   :  { %11103 = vst [vmem:[#allocation61_spill] sm:$0xff] %v7925_v55  ;;  %11104 = vst [vmem:[#allocation38_spill] sm:$0xff] %v7927_v8  ;;  %v11112_v33 = vld [vmem:[#allocation122_spill] sm:$0xff]  ;;  %v11113_v53 = vld [vmem:[#allocation227_spill] sm:$0xff]  ;;  %v7945_v48 = vadd.f32 0.0001, %v3034_v15 }
 0x288   :  { %11105 = vst [vmem:[#allocation23_spill] sm:$0xff] %v7929_v58  ;;  %11108 = vst [vmem:[#allocation3_spill] sm:$0xff] %v7933_v37  ;;  %v7943_v41 = vadd.f32 %v11113_v53, %v11112_v33  ;;  %v7947_v38 = vadd.f32 0.0001, %v3035_v30  ;;  %v7949_v2 = vadd.f32 0.0001, %v3036_v6 }
 0x289   :  { %11109 = vst [vmem:[#allocation50_spill] sm:$0xff] %v7935_v47  ;;  %11110 = vst [vmem:[#allocation6_spill] sm:$0xff] %v7937_v5  ;;  %v11118_v14 = vld [vmem:[#allocation118_spill] sm:$0xff]  ;;  %v11119_v17 = vld [vmem:[#allocation260_spill] sm:$0xff]  ;;  %v7955_v63 = vadd.f32 0.0001, %v3037_v11 }
 0x28a   :  { %11111 = vst [vmem:[#allocation52_spill] sm:$0xff] %v7939_v10  ;;  %11114 = vst [vmem:[#allocation12_spill] sm:$0xff] %v7943_v41  ;;  %v7953_v18 = vadd.f32 %v11119_v17, %v11118_v14  ;;  %v7957_v21 = vadd.f32 0.0001, %v3038_v29  ;;  %v7959_v24 = vadd.f32 0.0001, %v3039_v35  ;;  %v11134_v29 = vsub.f32 %v7553_v45, %v7563_v52 }
 0x28b   :  { %11115 = vst [vmem:[#allocation55_spill] sm:$0xff] %v7945_v48  ;;  %11116 = vst [vmem:[#allocation21_spill] sm:$0xff] %v7947_v38  ;;  %v11124_v34 = vld [vmem:[#allocation198_spill] sm:$0xff]  ;;  %v11125_v37 = vld [vmem:[#allocation264_spill] sm:$0xff]  ;;  %v7965_v15 = vadd.f32 0.0001, %v3040_v1  ;;  %v11136_v1 = vsub.f32 %v7557_v3, %v7583_v39 }
 0x28c   :  { %11117 = vst [vmem:[#allocation76_spill] sm:$0xff] %v7949_v2  ;;  %11120 = vst [vmem:[#allocation7_spill] sm:$0xff] %v7953_v18  ;;  %v7963_v53 = vadd.f32 %v11125_v37, %v11124_v34  ;;  %v7967_v30 = vadd.f32 0.0001, %v3041_v40  ;;  %v7969_v6 = vadd.f32 0.0001, %v3042_v25  ;;  %v11135_v37 = vsub.f32 %v7555_v22, %v7573_v49 }
 0x28d   :  { %11121 = vst [vmem:[#allocation60_spill] sm:$0xff] %v7955_v63  ;;  %11122 = vst [vmem:[#allocation92_spill] sm:$0xff] %v7957_v21  ;;  %v11130_v33 = vld [vmem:[#allocation202_spill] sm:$0xff]  ;;  %v11131_v41 = vld [vmem:[#allocation267_spill] sm:$0xff]  ;;  %v7975_v11 = vadd.f32 0.0001, %v3043_v16  ;;  %v11137_v25 = vsub.f32 %v7559_v60, %v7593_v56  ;;  %v11138_v16 = vsub.f32 %v7565_v50, %v7603_v43 }
 0x28e   :  { %11123 = vst [vmem:[#allocation8_spill] sm:$0xff] %v7959_v24  ;;  %11126 = vst [vmem:[#allocation93_spill] sm:$0xff] %v7963_v53  ;;  %v7973_v17 = vadd.f32 %v11131_v41, %v11130_v33  ;;  %v3076_v35 = vmul.f32 2.0, %v11134_v29  ;;  %v3077_v34 = vmul.f32 2.0, %v11135_v37  ;;  %v3078_v40 = vmul.f32 2.0, %v11136_v1  ;;  %v11139_v33 = vld [vmem:[#allocation44_spill] sm:$0xff] }
 0x28f   :  { %11127 = vst [vmem:[#allocation78_spill] sm:$0xff] %v7965_v15  ;;  %11128 = vst [vmem:[#allocation9_spill] sm:$0xff] %v7967_v30  ;;  %v3079_v14 = vmul.f32 2.0, %v11137_v25  ;;  %v3080_v41 = vmul.f32 2.0, %v11138_v16  ;;  %v11140_v45 = vsub.f32 %v7567_v44, %v11139_v33  ;;  %v11141_v29 = vld [vmem:[#allocation65_spill] sm:$0xff]  ;;  %v11144_v37 = vld [vmem:[#allocation42_spill] sm:$0xff] }
 0x290   :  { %11129 = vst [vmem:[#allocation62_spill] sm:$0xff] %v7969_v6  ;;  %11132 = vst [vmem:[#allocation39_spill] sm:$0xff] %v7973_v17  ;;  %v11142_v17 = vld [vmem:[#allocation16_spill] sm:$0xff]  ;;  %v11145_v53 = vld [vmem:[#allocation30_spill] sm:$0xff]  ;;  %v3109_v58 = vadd.f32 0.0009, %v3077_v34 }
 0x291   :  { %11133 = vst [vmem:[#allocation94_spill] sm:$0xff] %v7975_v11  ;;  %v3081_v52 = vmul.f32 2.0, %v11140_v45  ;;  %v11143_v22 = vsub.f32 %v11141_v29, %v11142_v17  ;;  %v11146_v3 = vsub.f32 %v11144_v37, %v11145_v53  ;;  %v11147_v1 = vld [vmem:[#allocation97_spill] sm:$0xff]  ;;  %v11148_v18 = vld [vmem:[#allocation46_spill] sm:$0xff]  ;;  %v11150_v25 = vld [vmem:[#allocation27_spill] sm:$0xff] }
 0x292   :  { %v11149_v60 = vsub.f32 %v11147_v1, %v11148_v18  ;;  %v11151_v27 = vld [vmem:[#allocation18_spill] sm:$0xff]  ;;  %v11154_v59 = vld [vmem:[#allocation47_spill] sm:$0xff]  ;;  %v11157_v9 = vld [vmem:[#allocation57_spill] sm:$0xff]  ;;  %v3110_v0 = vadd.f32 0.0009, %v3078_v40 }
 0x293   :  { %v3082_v49 = vmul.f32 2.0, %v11143_v22  ;;  %v3083_v39 = vmul.f32 2.0, %v11146_v3  ;;  %v11152_v50 = vsub.f32 %v11150_v25, %v11151_v27  ;;  %v11153_v16 = vld [vmem:[#allocation82_spill] sm:$0xff]  ;;  %v11160_v7 = vld [vmem:[#allocation32_spill] sm:$0xff]  ;;  %v11162_v3 = vld [vmem:[#allocation43_spill] sm:$0xff] }
 0x294   :  { %v3084_v56 = vmul.f32 2.0, %v11149_v60  ;;  %v11155_v44 = vsub.f32 %v11153_v16, %v11154_v59  ;;  %v11156_v45 = vld [vmem:[#allocation14_spill] sm:$0xff]  ;;  %v11163_v19 = vld [vmem:[#allocation87_spill] sm:$0xff]  ;;  %v11172_v11 = vld [vmem:[#allocation48_spill] sm:$0xff] }
 0x295   :  { %v3085_v43 = vmul.f32 2.0, %v11152_v50  ;;  %v11158_v17 = vsub.f32 %v11156_v45, %v11157_v9  ;;  %v11159_v22 = vld [vmem:[#allocation66_spill] sm:$0xff]  ;;  %v11164_v18 = vsub.f32 %v11162_v3, %v11163_v19  ;;  %v11165_v60 = vld [vmem:[#allocation51_spill] sm:$0xff]  ;;  %v11168_v50 = vld [vmem:[#allocation28_spill] sm:$0xff]  ;;  %v3114_v34 = vadd.f32 0.0009, %v3082_v49 }
 0x296   :  { %v3086_v33 = vmul.f32 2.0, %v11155_v44  ;;  %v11161_v53 = vsub.f32 %v11159_v22, %v11160_v7  ;;  %v11166_v4 = vld [vmem:[#allocation19_spill] sm:$0xff]  ;;  %v11175_v6 = vld [vmem:[#allocation58_spill] sm:$0xff]  ;;  %v11178_v30 = vld [vmem:[#allocation33_spill] sm:$0xff] }
 0x297   :  { %v3087_v29 = vmul.f32 2.0, %v11158_v17  ;;  %v3089_v1 = vmul.f32 2.0, %v11164_v18  ;;  %v11167_v27 = vsub.f32 %v11165_v60, %v11166_v4  ;;  %v11169_v54 = vld [vmem:[#allocation71_spill] sm:$0xff]  ;;  %v11180_v18 = vld [vmem:[#allocation53_spill] sm:$0xff]  ;;  %v11181_v15 = vld [vmem:[#allocation88_spill] sm:$0xff] }
 0x298   :  { %v3088_v37 = vmul.f32 2.0, %v11161_v53  ;;  %v11170_v59 = vsub.f32 %v11168_v50, %v11169_v54  ;;  %v11171_v44 = vld [vmem:[#allocation83_spill] sm:$0xff]  ;;  %v11182_v4 = vsub.f32 %v11180_v18, %v11181_v15  ;;  %v11184_v24 = vld [vmem:[#allocation20_spill] sm:$0xff]  ;;  %v11190_v63 = vld [vmem:[#allocation49_spill] sm:$0xff] }
 0x299   :  { %v3090_v25 = vmul.f32 2.0, %v11167_v27  ;;  %v11173_v9 = vsub.f32 %v11171_v44, %v11172_v11  ;;  %v11174_v17 = vld [vmem:[#allocation15_spill] sm:$0xff]  ;;  %v11183_v27 = vld [vmem:[#allocation29_spill] sm:$0xff]  ;;  %v11187_v21 = vld [vmem:[#allocation72_spill] sm:$0xff] }
 0x29a   :  { %v3091_v16 = vmul.f32 2.0, %v11170_v59  ;;  %v11176_v7 = vsub.f32 %v11174_v17, %v11175_v6  ;;  %v11177_v53 = vld [vmem:[#allocation67_spill] sm:$0xff]  ;;  %v3095_v60 = vmul.f32 2.0, %v11182_v4  ;;  %v11185_v54 = vsub.f32 %v11183_v27, %v11184_v24  ;;  %v11186_v59 = vld [vmem:[#allocation84_spill] sm:$0xff]  ;;  %v11196_v38 = vld [vmem:[#allocation34_spill] sm:$0xff] }
 0x29b   :  { %v3092_v45 = vmul.f32 2.0, %v11173_v9  ;;  %v11179_v19 = vsub.f32 %v11177_v53, %v11178_v30  ;;  %v11188_v11 = vsub.f32 %v11186_v59, %v11187_v21  ;;  %v11189_v9 = vld [vmem:[#allocation68_spill] sm:$0xff]  ;;  %v11193_v2 = vld [vmem:[#allocation59_spill] sm:$0xff]  ;;  %v11198_v4 = vld [vmem:[#allocation85_spill] sm:$0xff]  ;;  %v3120_v40 = vadd.f32 0.0009, %v3088_v37 }
 0x29c   :  { %v3093_v22 = vmul.f32 2.0, %v11176_v7  ;;  %v3096_v50 = vmul.f32 2.0, %v11185_v54  ;;  %v11191_v6 = vsub.f32 %v11189_v9, %v11190_v63  ;;  %v11192_v7 = vld [vmem:[#allocation45_spill] sm:$0xff]  ;;  %v3108_v54 = vadd.f32 0.0009, %v3076_v35  ;;  %v11202_v21 = vld [vmem:[#allocation74_spill] sm:$0xff] }
 0x29d   :  { %v3094_v3 = vmul.f32 2.0, %v11179_v19  ;;  %v3097_v44 = vmul.f32 2.0, %v11188_v11  ;;  %v11194_v30 = vsub.f32 %v11192_v7, %v11193_v2  ;;  %v11195_v19 = vld [vmem:[#allocation54_spill] sm:$0xff]  ;;  %v11199_v48 = vld [vmem:[#allocation89_spill] sm:$0xff]  ;;  %v11205_v63 = vld [vmem:[#allocation4_spill] sm:$0xff] }
 0x29e   :  { %v3098_v17 = vmul.f32 2.0, %v11191_v6  ;;  %v11197_v15 = vsub.f32 %v11195_v19, %v11196_v38  ;;  %v11200_v24 = vsub.f32 %v11198_v4, %v11199_v48  ;;  %v11201_v10 = vld [vmem:[#allocation17_spill] sm:$0xff]  ;;  %v11207_v47 = vld [vmem:[#allocation56_spill] sm:$0xff]  ;;  %v11208_v2 = vld [vmem:[#allocation35_spill] sm:$0xff]  ;;  %v3125_v49 = vadd.f32 0.0009, %v3093_v22 }
 0x29f   :  { %v3099_v53 = vmul.f32 2.0, %v11194_v30  ;;  %v11203_v59 = vsub.f32 %v11201_v10, %v11202_v21  ;;  %v11204_v5 = vld [vmem:[#allocation69_spill] sm:$0xff]  ;;  %v11209_v7 = vsub.f32 %v11207_v47, %v11208_v2  ;;  %v11210_v38 = vld [vmem:[#allocation31_spill] sm:$0xff]  ;;  %v11211_v19 = vld [vmem:[#allocation90_spill] sm:$0xff] }
 0x2a0   :  { %v3100_v18 = vmul.f32 2.0, %v11197_v15  ;;  %v3101_v27 = vmul.f32 2.0, %v11200_v24  ;;  %v11206_v9 = vsub.f32 %v11204_v5, %v11205_v63  ;;  %v11212_v15 = vsub.f32 %v11210_v38, %v11211_v19  ;;  %v11213_v48 = vld [vmem:[#allocation86_spill] sm:$0xff]  ;;  %v11214_v4 = vld [vmem:[#allocation75_spill] sm:$0xff]  ;;  %v11217_v10 = vld [vmem:[#allocation5_spill] sm:$0xff] }
 0x2a1   :  { %v3102_v11 = vmul.f32 2.0, %v11203_v59  ;;  %v3104_v30 = vmul.f32 2.0, %v11209_v7  ;;  %v11215_v35 = vsub.f32 %v11213_v48, %v11214_v4  ;;  %v11216_v55 = vld [vmem:[#allocation70_spill] sm:$0xff]  ;;  %v3111_v5 = vadd.f32 0.0009, %v3079_v14  ;;  %v11219_v36 = vld [vmem:[#allocation204_spill] sm:$0xff] }
 0x2a2   :  { %v3103_v6 = vmul.f32 2.0, %v11206_v9  ;;  %v3105_v8 = vmul.f32 2.0, %v11212_v15  ;;  %v11218_v21 = vsub.f32 %v11216_v55, %v11217_v10  ;;  %v3112_v63 = vadd.f32 0.0009, %v3080_v41  ;;  %v11220_v47 = vld [vmem:[#allocation268_spill] sm:$0xff] }
 0x2a3   :  { %v3106_v24 = vmul.f32 2.0, %v11215_v35  ;;  %v3113_v9 = vadd.f32 0.0009, %v3081_v52  ;;  %v8075_v2 = vadd.f32 %v11220_v47, %v11219_v36  ;;  %v3115_v7 = vadd.f32 0.0009, %v3083_v39 }
 0x2a4   :  { %v3107_v59 = vmul.f32 2.0, %v11218_v21  ;;  %v3116_v38 = vadd.f32 0.0009, %v3084_v56  ;;  %v8078_v19 = vmul.f32 %v3108_v54, %v7873_v42  ;;  %v3117_v15 = vadd.f32 0.0009, %v3085_v43  ;;  %v11251_v21 = vld [vmem:[#allocation55_spill] sm:$0xff] }
 0x2a5   :  { %v3118_v48 = vadd.f32 0.0009, %v3086_v33  ;;  %v3119_v4 = vadd.f32 0.0009, %v3087_v29  ;;  %v8081_v55 = vmul.f32 %v3109_v58, %v7875_v51  ;;  %v3121_v14 = vadd.f32 0.0009, %v3089_v1 }
 0x2a6   :  { %11221 = vst [vmem:[#allocation24_spill] sm:$0xff] %v8078_v19  ;;  %v3122_v41 = vadd.f32 0.0009, %v3090_v25  ;;  %v8084_v52 = vmul.f32 %v3110_v0, %v7877_v12  ;;  %v3123_v35 = vadd.f32 0.0009, %v3091_v16  ;;  %v8087_v39 = vmul.f32 %v3111_v5, %v7879_v26  ;;  %v11253_v5 = vld [vmem:[#allocation21_spill] sm:$0xff] }
 0x2a7   :  { %11222 = vst [vmem:[#allocation79_spill] sm:$0xff] %v8081_v55  ;;  %v3124_v10 = vadd.f32 0.0009, %v3092_v45  ;;  %v3126_v42 = vadd.f32 0.0009, %v3094_v3  ;;  %v8090_v33 = vmul.f32 %v3112_v63, %v7885_v57  ;;  %v8093_v37 = vmul.f32 %v3113_v9, %v7887_v28  ;;  %v11255_v9 = vld [vmem:[#allocation76_spill] sm:$0xff] }
 0x2a8   :  { %11223 = vst [vmem:[#allocation10_spill] sm:$0xff] %v8084_v52  ;;  %11224 = vst [vmem:[#allocation63_spill] sm:$0xff] %v8087_v39  ;;  %v3127_v56 = vadd.f32 0.0009, %v3095_v60  ;;  %v3128_v43 = vadd.f32 0.0009, %v3096_v50  ;;  %v8096_v25 = vmul.f32 %v3114_v34, %v7889_v20  ;;  %v8099_v22 = vmul.f32 %v3115_v7, %v7895_v32 }
 0x2a9   :  { %11225 = vst [vmem:[#allocation40_spill] sm:$0xff] %v8090_v33  ;;  %v3129_v51 = vadd.f32 0.0009, %v3097_v44  ;;  %v3130_v58 = vadd.f32 0.0009, %v3098_v17  ;;  %11226 = vst [vmem:[#allocation95_spill] sm:$0xff] %v8093_v37  ;;  %v8102_v60 = vmul.f32 %v3116_v38, %v7897_v61  ;;  %v8105_v28 = vmul.f32 %v3117_v15, %v7899_v23 }
 0x2aa   :  { %v3131_v29 = vadd.f32 0.0009, %v3099_v53  ;;  %v3132_v12 = vadd.f32 0.0009, %v3100_v18  ;;  %v3133_v0 = vadd.f32 0.0009, %v3101_v27  ;;  %v8108_v50 = vmul.f32 %v3118_v48, %v7905_v46 }
 0x2ab   :  { %v3134_v1 = vadd.f32 0.0009, %v3102_v11  ;;  %11227 = vst [vmem:[#allocation25_spill] sm:$0xff] %v8096_v25  ;;  %v3135_v26 = vadd.f32 0.0009, %v3103_v6  ;;  %11228 = vst [vmem:[#allocation80_spill] sm:$0xff] %v8099_v22  ;;  %v8111_v20 = vmul.f32 %v3119_v4, %v7907_v13  ;;  %v8114_v44 = vmul.f32 %v3120_v40, %v7909_v62 }
 0x2ac   :  { %v3136_v16 = vadd.f32 0.0009, %v3104_v30  ;;  %v3137_v45 = vadd.f32 0.0009, %v3105_v8  ;;  %v3138_v57 = vadd.f32 0.0009, %v3106_v24  ;;  %v8117_v32 = vmul.f32 %v3121_v14, %v7915_v31 }
 0x2ad   :  { %v3139_v3 = vadd.f32 0.0009, %v3107_v59  ;;  %11229 = vst [vmem:[#allocation11_spill] sm:$0xff] %v8102_v60  ;;  %11230 = vst [vmem:[#allocation64_spill] sm:$0xff] %v8105_v28  ;;  %v11235_v8 = vld [vmem:[#allocation37_spill] sm:$0xff]  ;;  %v11237_v61 = vld [vmem:[#allocation22_spill] sm:$0xff]  ;;  %v8144_v59 = vmul.f32 %v3130_v58, %v11251_v21  ;;  %v8147_v63 = vmul.f32 %v3131_v29, %v11253_v5  ;;  %v8150_v34 = vmul.f32 %v3132_v12, %v11255_v9 }
 0x2ae   :  { %11231 = vst [vmem:[#allocation41_spill] sm:$0xff] %v8108_v50  ;;  %11232 = vst [vmem:[#allocation96_spill] sm:$0xff] %v8111_v20  ;;  %v8120_v17 = vmul.f32 %v3122_v41, %v11235_v8  ;;  %v8123_v53 = vmul.f32 %v3123_v35, %v11237_v61  ;;  %v11239_v23 = vld [vmem:[#allocation61_spill] sm:$0xff]  ;;  %v11241_v46 = vld [vmem:[#allocation38_spill] sm:$0xff] }
 0x2af   :  { %11233 = vst [vmem:[#allocation26_spill] sm:$0xff] %v8114_v44  ;;  %11234 = vst [vmem:[#allocation81_spill] sm:$0xff] %v8117_v32  ;;  %v8126_v18 = vmul.f32 %v3124_v10, %v11239_v23  ;;  %v8129_v27 = vmul.f32 %v3125_v49, %v11241_v46  ;;  %v11243_v13 = vld [vmem:[#allocation23_spill] sm:$0xff]  ;;  %v11245_v62 = vld [vmem:[#allocation50_spill] sm:$0xff] }
 0x2b0   :  { %11236 = vst [vmem:[#allocation13_spill] sm:$0xff] %v8120_v17  ;;  %11238 = vst [vmem:[#allocation132_spill] sm:$0xff] %v8123_v53  ;;  %v8132_v54 = vmul.f32 %v3126_v42, %v11243_v13  ;;  %v8135_v11 = vmul.f32 %v3127_v56, %v11245_v62  ;;  %v11247_v31 = vld [vmem:[#allocation6_spill] sm:$0xff]  ;;  %v11249_v30 = vld [vmem:[#allocation52_spill] sm:$0xff] }
 0x2b1   :  { %11240 = vst [vmem:[#allocation134_spill] sm:$0xff] %v8126_v18  ;;  %11242 = vst [vmem:[#allocation135_spill] sm:$0xff] %v8129_v27  ;;  %v8138_v6 = vmul.f32 %v3128_v43, %v11247_v31  ;;  %v8141_v24 = vmul.f32 %v3129_v51, %v11249_v30  ;;  %v11257_v7 = vld [vmem:[#allocation60_spill] sm:$0xff]  ;;  %v11263_v14 = vld [vmem:[#allocation78_spill] sm:$0xff] }
 0x2b2   :  { %11244 = vst [vmem:[#allocation138_spill] sm:$0xff] %v8132_v54  ;;  %11246 = vst [vmem:[#allocation100_spill] sm:$0xff] %v8135_v11  ;;  %v8153_v38 = vmul.f32 %v3133_v0, %v11257_v7  ;;  %v11259_v15 = vld [vmem:[#allocation92_spill] sm:$0xff]  ;;  %v8162_v41 = vmul.f32 %v3136_v16, %v11263_v14  ;;  %v11265_v35 = vld [vmem:[#allocation9_spill] sm:$0xff] }
 0x2b3   :  { %11248 = vst [vmem:[#allocation101_spill] sm:$0xff] %v8138_v6  ;;  %11250 = vst [vmem:[#allocation102_spill] sm:$0xff] %v8141_v24  ;;  %v8156_v48 = vmul.f32 %v3134_v1, %v11259_v15  ;;  %v11261_v4 = vld [vmem:[#allocation8_spill] sm:$0xff]  ;;  %v8165_v10 = vmul.f32 %v3137_v45, %v11265_v35  ;;  %v11267_v49 = vld [vmem:[#allocation62_spill] sm:$0xff] }
 0x2b4   :  { %11252 = vst [vmem:[#allocation103_spill] sm:$0xff] %v8144_v59  ;;  %11254 = vst [vmem:[#allocation105_spill] sm:$0xff] %v8147_v63  ;;  %v8159_v40 = vmul.f32 %v3135_v26, %v11261_v4  ;;  %v8168_v42 = vmul.f32 %v3138_v57, %v11267_v49  ;;  %v11269_v56 = vld [vmem:[#allocation94_spill] sm:$0xff]  ;;  %v11271_v51 = vld [vmem:[#allocation205_spill] sm:$0xff] }
 0x2b5   :  { %11256 = vst [vmem:[#allocation106_spill] sm:$0xff] %v8150_v34  ;;  %11258 = vst [vmem:[#allocation107_spill] sm:$0xff] %v8153_v38  ;;  %v8171_v43 = vmul.f32 %v3139_v3, %v11269_v56  ;;  %v11272_v58 = vld [vmem:[#allocation269_spill] sm:$0xff]  ;;  %v11273_v12 = vld [vmem:[#allocation206_spill] sm:$0xff] }
 0x2b6   :  { %11260 = vst [vmem:[#allocation109_spill] sm:$0xff] %v8156_v48  ;;  %11262 = vst [vmem:[#allocation110_spill] sm:$0xff] %v8159_v40  ;;  %v3183_v29 = vadd.f32 %v11272_v58, %v11271_v51  ;;  %v11274_v0 = vld [vmem:[#allocation270_spill] sm:$0xff]  ;;  %v11275_v26 = vld [vmem:[#allocation207_spill] sm:$0xff] }
 0x2b7   :  { %11264 = vst [vmem:[#allocation111_spill] sm:$0xff] %v8162_v41  ;;  %11266 = vst [vmem:[#allocation113_spill] sm:$0xff] %v8165_v10  ;;  %v3184_v1 = vadd.f32 %v11274_v0, %v11273_v12  ;;  %v11276_v8 = vld [vmem:[#allocation271_spill] sm:$0xff]  ;;  %v11277_v16 = vld [vmem:[#allocation208_spill] sm:$0xff] }
 0x2b8   :  { %11268 = vst [vmem:[#allocation114_spill] sm:$0xff] %v8168_v42  ;;  %11270 = vst [vmem:[#allocation115_spill] sm:$0xff] %v8171_v43  ;;  %v3185_v61 = vadd.f32 %v11276_v8, %v11275_v26  ;;  %v11278_v23 = vld [vmem:[#allocation272_spill] sm:$0xff]  ;;  %v11279_v45 = vld [vmem:[#allocation209_spill] sm:$0xff] }
 0x2b9   :  { %v3186_v46 = vadd.f32 %v11278_v23, %v11277_v16  ;;  %v11280_v13 = vld [vmem:[#allocation273_spill] sm:$0xff]  ;;  %v11281_v57 = vld [vmem:[#allocation210_spill] sm:$0xff]  ;;  %v11283_v3 = vld [vmem:[#allocation211_spill] sm:$0xff] }
 0x2ba   :  { %v3187_v62 = vadd.f32 %v11280_v13, %v11279_v45  ;;  %v11282_v31 = vld [vmem:[#allocation274_spill] sm:$0xff]  ;;  %v11284_v21 = vld [vmem:[#allocation275_spill] sm:$0xff]  ;;  %v11285_v9 = vld [vmem:[#allocation212_spill] sm:$0xff] }
 0x2bb   :  { %v3188_v30 = vadd.f32 %v11282_v31, %v11281_v57  ;;  %v3189_v5 = vadd.f32 %v11284_v21, %v11283_v3  ;;  %v11286_v7 = vld [vmem:[#allocation276_spill] sm:$0xff]  ;;  %v11287_v4 = vld [vmem:[#allocation213_spill] sm:$0xff]  ;;  %v11289_v49 = vld [vmem:[#allocation214_spill] sm:$0xff] }
 0x2bc   :  { %v3190_v15 = vadd.f32 %v11286_v7, %v11285_v9  ;;  %v11288_v14 = vld [vmem:[#allocation277_spill] sm:$0xff]  ;;  %v11290_v56 = vld [vmem:[#allocation278_spill] sm:$0xff]  ;;  %v11291_v42 = vld [vmem:[#allocation215_spill] sm:$0xff] }
 0x2bd   :  { %v3191_v35 = vadd.f32 %v11288_v14, %v11287_v4  ;;  %v3192_v43 = vadd.f32 %v11290_v56, %v11289_v49  ;;  %v11292_v10 = vld [vmem:[#allocation279_spill] sm:$0xff]  ;;  %v11293_v40 = vld [vmem:[#allocation216_spill] sm:$0xff]  ;;  %v11295_v34 = vld [vmem:[#allocation217_spill] sm:$0xff] }
 0x2be   :  { %v3193_v41 = vadd.f32 %v11292_v10, %v11291_v42  ;;  %v11294_v48 = vld [vmem:[#allocation280_spill] sm:$0xff]  ;;  %v11296_v63 = vld [vmem:[#allocation281_spill] sm:$0xff]  ;;  %v11297_v24 = vld [vmem:[#allocation218_spill] sm:$0xff] }
 0x2bf   :  { %v3194_v38 = vadd.f32 %v11294_v48, %v11293_v40  ;;  %v3195_v59 = vadd.f32 %v11296_v63, %v11295_v34  ;;  %v11298_v6 = vld [vmem:[#allocation282_spill] sm:$0xff]  ;;  %v11299_v54 = vld [vmem:[#allocation219_spill] sm:$0xff]  ;;  %v11301_v53 = vld [vmem:[#allocation220_spill] sm:$0xff] }
 0x2c0   :  { %v3196_v11 = vadd.f32 %v11298_v6, %v11297_v24  ;;  %v11300_v27 = vld [vmem:[#allocation283_spill] sm:$0xff]  ;;  %v11302_v17 = vld [vmem:[#allocation284_spill] sm:$0xff]  ;;  %v11303_v44 = vld [vmem:[#allocation221_spill] sm:$0xff] }
 0x2c1   :  { %v3197_v18 = vadd.f32 %v11300_v27, %v11299_v54  ;;  %v3198_v32 = vadd.f32 %v11302_v17, %v11301_v53  ;;  %v11304_v20 = vld [vmem:[#allocation285_spill] sm:$0xff]  ;;  %v11305_v28 = vld [vmem:[#allocation222_spill] sm:$0xff]  ;;  %v11307_v25 = vld [vmem:[#allocation223_spill] sm:$0xff] }
 0x2c2   :  { %v3199_v50 = vadd.f32 %v11304_v20, %v11303_v44  ;;  %v11306_v60 = vld [vmem:[#allocation286_spill] sm:$0xff]  ;;  %v11308_v37 = vld [vmem:[#allocation287_spill] sm:$0xff]  ;;  %v11309_v39 = vld [vmem:[#allocation224_spill] sm:$0xff] }
 0x2c3   :  { %v3200_v22 = vadd.f32 %v11306_v60, %v11305_v28  ;;  %v3201_v33 = vadd.f32 %v11308_v37, %v11307_v25  ;;  %v11310_v52 = vld [vmem:[#allocation288_spill] sm:$0xff]  ;;  %v11311_v19 = vld [vmem:[#allocation225_spill] sm:$0xff]  ;;  %v11315_v54 = vld [vmem:[#allocation91_spill] sm:$0xff] }
 0x2c4   :  { %v3202_v55 = vadd.f32 %v11310_v52, %v11309_v39  ;;  %v11312_v6 = vld [vmem:[#allocation289_spill] sm:$0xff]  ;;  %v11313_v63 = vld [vmem:[#allocation36_spill] sm:$0xff]  ;;  %v8219_v17 = vadd.f32 0.0001, %v11315_v54  ;;  %v11317_v53 = vld [vmem:[#allocation2_spill] sm:$0xff] }
 0x2c5   :  { %v3203_v24 = vadd.f32 %v11312_v6, %v11311_v19  ;;  %v8216_v27 = vadd.f32 0.0001, %v11313_v63  ;;  %v8222_v20 = vadd.f32 0.0001, %v11317_v53  ;;  %v11319_v44 = vld [vmem:[#allocation73_spill] sm:$0xff]  ;;  %v11321_v28 = vld [vmem:[#allocation195_spill] sm:$0xff] }
 0x2c6   :  { %11316 = vst [vmem:[#allocation116_spill] sm:$0xff] %v8219_v17  ;;  %v8225_v60 = vadd.f32 0.0001, %v11319_v44  ;;  %v11322_v37 = vld [vmem:[#allocation171_spill] sm:$0xff]  ;;  %v11324_v34 = vld [vmem:[#allocation230_spill] sm:$0xff]  ;;  %v11327_v6 = vld [vmem:[#allocation77_spill] sm:$0xff] }
 0x2c7   :  { %11314 = vst [vmem:[#allocation99_spill] sm:$0xff] %v8216_v27  ;;  %11318 = vst [vmem:[#allocation117_spill] sm:$0xff] %v8222_v20  ;;  %v11323_v25 = vsub.f32 %v11321_v28, %v11322_v37  ;;  %v11325_v52 = vld [vmem:[#allocation246_spill] sm:$0xff]  ;;  %v8234_v19 = vadd.f32 0.0001, %v11327_v6  ;;  %v11329_v63 = vld [vmem:[#allocation3_spill] sm:$0xff] }
 0x2c8   :  { %11320 = vst [vmem:[#allocation119_spill] sm:$0xff] %v8225_v60  ;;  %v11326_v39 = vsub.f32 %v11324_v34, %v11325_v52  ;;  %v8237_v27 = vadd.f32 0.0001, %v11329_v63  ;;  %v11331_v54 = vld [vmem:[#allocation12_spill] sm:$0xff]  ;;  %v11336_v60 = vld [vmem:[#allocation233_spill] sm:$0xff]  ;;  %v11339_v28 = vld [vmem:[#allocation7_spill] sm:$0xff] }
 0x2c9   :  { %11328 = vst [vmem:[#allocation120_spill] sm:$0xff] %v8234_v19  ;;  %v8240_v17 = vadd.f32 0.0001, %v11331_v54  ;;  %v11333_v53 = vld [vmem:[#allocation136_spill] sm:$0xff]  ;;  %v11337_v40 = vld [vmem:[#allocation253_spill] sm:$0xff]  ;;  %v11346_v63 = vld [vmem:[#allocation98_spill] sm:$0xff] }
 0x2ca   :  { %v3236_v48 = vadd.f32 %v11326_v39, %v11323_v25  ;;  %11330 = vst [vmem:[#allocation121_spill] sm:$0xff] %v8237_v27  ;;  %v11334_v20 = vld [vmem:[#allocation188_spill] sm:$0xff]  ;;  %v11338_v10 = vsub.f32 %v11336_v60, %v11337_v40  ;;  %v8249_v42 = vadd.f32 0.0001, %v11339_v28  ;;  %v11341_v52 = vld [vmem:[#allocation93_spill] sm:$0xff]  ;;  %v11343_v25 = vld [vmem:[#allocation39_spill] sm:$0xff] }
 0x2cb   :  { %11332 = vst [vmem:[#allocation123_spill] sm:$0xff] %v8240_v17  ;;  %v11335_v44 = vsub.f32 %v11333_v53, %v11334_v20  ;;  %v8252_v39 = vadd.f32 0.0001, %v11341_v52  ;;  %v8255_v6 = vadd.f32 0.0001, %v11343_v25  ;;  %v11345_v34 = vld [vmem:[#allocation149_spill] sm:$0xff] }
 0x2cc   :  { %11340 = vst [vmem:[#allocation124_spill] sm:$0xff] %v8249_v42  ;;  %v11347_v54 = vsub.f32 %v11345_v34, %v11346_v63  ;;  %v11348_v17 = vld [vmem:[#allocation236_spill] sm:$0xff]  ;;  %v8264_v53 = vadd.f32 0.0001, %v8075_v2  ;;  %v8266_v60 = vadd.f32 0.0001, %v3183_v29 }
 0x2cd   :  { %v3237_v37 = vadd.f32 %v11338_v10, %v11335_v44  ;;  %11342 = vst [vmem:[#allocation125_spill] sm:$0xff] %v8252_v39  ;;  %11344 = vst [vmem:[#allocation127_spill] sm:$0xff] %v8255_v6  ;;  %v11349_v27 = vld [vmem:[#allocation232_spill] sm:$0xff]  ;;  %v8268_v40 = vadd.f32 0.0001, %v3184_v1  ;;  %v11352_v10 = vld [vmem:[#allocation159_spill] sm:$0xff] }
 0x2ce   :  { %v11350_v19 = vsub.f32 %v11348_v17, %v11349_v27  ;;  %v11353_v44 = vld [vmem:[#allocation139_spill] sm:$0xff]  ;;  %v11356_v25 = vld [vmem:[#allocation238_spill] sm:$0xff]  ;;  %v8276_v42 = vadd.f32 0.0001, %v3185_v61  ;;  %v8278_v34 = vadd.f32 0.0001, %v3186_v46 }
 0x2cf   :  { %11351 = vst [vmem:[#allocation128_spill] sm:$0xff] %v8268_v40  ;;  %v11354_v28 = vsub.f32 %v11352_v10, %v11353_v44  ;;  %v11355_v52 = vld [vmem:[#allocation239_spill] sm:$0xff]  ;;  %v8280_v17 = vadd.f32 0.0001, %v3187_v62  ;;  %v11362_v29 = vld [vmem:[#allocation242_spill] sm:$0xff]  ;;  %v11363_v63 = vld [vmem:[#allocation244_spill] sm:$0xff] }
 0x2d0   :  { %v3238_v20 = vadd.f32 %v11350_v19, %v11347_v54  ;;  %v11357_v6 = vsub.f32 %v11355_v52, %v11356_v25  ;;  %v11359_v19 = vld [vmem:[#allocation181_spill] sm:$0xff]  ;;  %v11360_v2 = vld [vmem:[#allocation167_spill] sm:$0xff]  ;;  %v11364_v1 = vsub.f32 %v11362_v29, %v11363_v63  ;;  %v8288_v40 = vadd.f32 0.0001, %v3188_v30  ;;  %v11370_v52 = vld [vmem:[#allocation252_spill] sm:$0xff] }
 0x2d1   :  { %11358 = vst [vmem:[#allocation129_spill] sm:$0xff] %v8280_v17  ;;  %v11361_v27 = vsub.f32 %v11359_v19, %v11360_v2  ;;  %v8290_v10 = vadd.f32 0.0001, %v3189_v5  ;;  %v8292_v44 = vadd.f32 0.0001, %v3190_v15  ;;  %v11367_v61 = vld [vmem:[#allocation183_spill] sm:$0xff] }
 0x2d2   :  { %v3239_v39 = vadd.f32 %v11357_v6, %v11354_v28  ;;  %v11366_v6 = vld [vmem:[#allocation184_spill] sm:$0xff]  ;;  %v11369_v46 = vld [vmem:[#allocation245_spill] sm:$0xff]  ;;  %v8300_v17 = vadd.f32 0.0001, %v3191_v35  ;;  %v8302_v19 = vadd.f32 0.0001, %v3192_v43 }
 0x2d3   :  { %v3240_v54 = vadd.f32 %v11364_v1, %v11361_v27  ;;  %11365 = vst [vmem:[#allocation130_spill] sm:$0xff] %v8292_v44  ;;  %v11368_v28 = vsub.f32 %v11366_v6, %v11367_v61  ;;  %v11371_v62 = vsub.f32 %v11369_v46, %v11370_v52  ;;  %v8304_v2 = vadd.f32 0.0001, %v3193_v41  ;;  %v11373_v27 = vld [vmem:[#allocation187_spill] sm:$0xff]  ;;  %v11374_v30 = vld [vmem:[#allocation122_spill] sm:$0xff]  ;;  %v11383_v43 = vld [vmem:[#allocation248_spill] sm:$0xff] }
 0x2d4   :  { %v11375_v29 = vsub.f32 %v11373_v27, %v11374_v30  ;;  %v11376_v5 = vld [vmem:[#allocation247_spill] sm:$0xff]  ;;  %v8312_v44 = vadd.f32 0.0001, %v3194_v38  ;;  %v8314_v6 = vadd.f32 0.0001, %v3195_v59  ;;  %v11381_v35 = vld [vmem:[#allocation118_spill] sm:$0xff] }
 0x2d5   :  { %v3241_v25 = vadd.f32 %v11371_v62, %v11368_v28  ;;  %11372 = vst [vmem:[#allocation133_spill] sm:$0xff] %v8304_v2  ;;  %v11377_v63 = vld [vmem:[#allocation227_spill] sm:$0xff]  ;;  %v8316_v61 = vadd.f32 0.0001, %v3196_v11  ;;  %v11380_v28 = vld [vmem:[#allocation189_spill] sm:$0xff]  ;;  %v11384_v52 = vld [vmem:[#allocation260_spill] sm:$0xff] }
 0x2d6   :  { %v11378_v15 = vsub.f32 %v11376_v5, %v11377_v63  ;;  %v11382_v46 = vsub.f32 %v11380_v28, %v11381_v35  ;;  %v11385_v41 = vsub.f32 %v11383_v43, %v11384_v52  ;;  %v8324_v2 = vadd.f32 0.0001, %v3197_v18  ;;  %v11389_v38 = vld [vmem:[#allocation198_spill] sm:$0xff]  ;;  %v11392_v63 = vld [vmem:[#allocation264_spill] sm:$0xff]  ;;  %v11401_v52 = vld [vmem:[#allocation267_spill] sm:$0xff] }
 0x2d7   :  { %11379 = vst [vmem:[#allocation137_spill] sm:$0xff] %v8316_v61  ;;  %v8326_v27 = vadd.f32 0.0001, %v3198_v32  ;;  %v8328_v30 = vadd.f32 0.0001, %v3199_v50  ;;  %v11391_v59 = vld [vmem:[#allocation250_spill] sm:$0xff] }
 0x2d8   :  { %v3242_v1 = vadd.f32 %v11378_v15, %v11375_v29  ;;  %v3243_v62 = vadd.f32 %v11385_v41, %v11382_v46  ;;  %v11388_v29 = vld [vmem:[#allocation190_spill] sm:$0xff]  ;;  %v11393_v11 = vsub.f32 %v11391_v59, %v11392_v63  ;;  %v8336_v61 = vadd.f32 0.0001, %v3200_v22  ;;  %v11397_v46 = vld [vmem:[#allocation108_spill] sm:$0xff]  ;;  %v11406_v59 = vld [vmem:[#allocation229_spill] sm:$0xff] }
 0x2d9   :  { %11386 = vst [vmem:[#allocation142_spill] sm:$0xff] %v8326_v27  ;;  %11387 = vst [vmem:[#allocation143_spill] sm:$0xff] %v8328_v30  ;;  %v11390_v5 = vsub.f32 %v11388_v29, %v11389_v38  ;;  %v8338_v28 = vadd.f32 0.0001, %v3201_v33  ;;  %v8340_v35 = vadd.f32 0.0001, %v3202_v55  ;;  %v11407_v22 = vsub.f32 %v11406_v59, %v11220_v47 }
 0x2da   :  { %11394 = vst [vmem:[#allocation144_spill] sm:$0xff] %v8336_v61  ;;  %v11398_v18 = vld [vmem:[#allocation202_spill] sm:$0xff]  ;;  %v11400_v32 = vld [vmem:[#allocation256_spill] sm:$0xff]  ;;  %v8348_v30 = vadd.f32 0.0001, %v3203_v24  ;;  %v11410_v63 = vld [vmem:[#allocation231_spill] sm:$0xff] }
 0x2db   :  { %v3244_v15 = vadd.f32 %v11393_v11, %v11390_v5  ;;  %11395 = vst [vmem:[#allocation145_spill] sm:$0xff] %v8338_v28  ;;  %11396 = vst [vmem:[#allocation146_spill] sm:$0xff] %v8340_v35  ;;  %v11399_v43 = vsub.f32 %v11397_v46, %v11398_v18  ;;  %v11402_v50 = vsub.f32 %v11400_v32, %v11401_v52  ;;  %v11404_v29 = vld [vmem:[#allocation194_spill] sm:$0xff]  ;;  %v11412_v18 = vld [vmem:[#allocation131_spill] sm:$0xff]  ;;  %v3272_v28 = vadd.f32 0.0009, %v3240_v54 }
 0x2dc   :  { %11403 = vst [vmem:[#allocation147_spill] sm:$0xff] %v8348_v30  ;;  %v11405_v38 = vsub.f32 %v11404_v29, %v11219_v36  ;;  %v11408_v33 = vld [vmem:[#allocation126_spill] sm:$0xff]  ;;  %v11411_v11 = vsub.f32 %v11410_v63, %v11272_v58  ;;  %v11413_v32 = vsub.f32 %v11412_v18, %v11273_v12  ;;  %v11418_v29 = vld [vmem:[#allocation235_spill] sm:$0xff]  ;;  %v11420_v59 = vld [vmem:[#allocation157_spill] sm:$0xff] }
 0x2dd   :  { %v3245_v41 = vadd.f32 %v11402_v50, %v11399_v43  ;;  %v11409_v55 = vsub.f32 %v11408_v33, %v11271_v51  ;;  %v11414_v43 = vld [vmem:[#allocation234_spill] sm:$0xff]  ;;  %v11416_v50 = vld [vmem:[#allocation153_spill] sm:$0xff]  ;;  %v11419_v47 = vsub.f32 %v11418_v29, %v11276_v8  ;;  %v11421_v51 = vsub.f32 %v11420_v59, %v11277_v16  ;;  %v11426_v63 = vld [vmem:[#allocation240_spill] sm:$0xff] }
 0x2de   :  { %v3246_v5 = vadd.f32 %v11407_v22, %v11405_v38  ;;  %v11415_v24 = vsub.f32 %v11414_v43, %v11274_v0  ;;  %v11417_v36 = vsub.f32 %v11416_v50, %v11275_v26  ;;  %v11422_v22 = vld [vmem:[#allocation237_spill] sm:$0xff]  ;;  %v11427_v0 = vsub.f32 %v11426_v63, %v11280_v13  ;;  %v11428_v18 = vld [vmem:[#allocation175_spill] sm:$0xff]  ;;  %v11436_v29 = vld [vmem:[#allocation182_spill] sm:$0xff] }
 0x2df   :  { %v3247_v46 = vadd.f32 %v11411_v11, %v11409_v55  ;;  %v11423_v58 = vsub.f32 %v11422_v22, %v11278_v23  ;;  %v11424_v55 = vld [vmem:[#allocation163_spill] sm:$0xff]  ;;  %v11429_v26 = vsub.f32 %v11428_v18, %v11281_v57  ;;  %v11442_v22 = vld [vmem:[#allocation226_spill] sm:$0xff]  ;;  %v11502_v35 = vld [vmem:[#allocation201_spill] sm:$0xff] }
 0x2e0   :  { %v3248_v52 = vadd.f32 %v11415_v24, %v11413_v32  ;;  %v3249_v38 = vadd.f32 %v11419_v47, %v11417_v36  ;;  %v11425_v12 = vsub.f32 %v11424_v55, %v11279_v45  ;;  %v11430_v32 = vld [vmem:[#allocation241_spill] sm:$0xff]  ;;  %v11432_v24 = vld [vmem:[#allocation179_spill] sm:$0xff]  ;;  %v11437_v45 = vsub.f32 %v11436_v29, %v11285_v9  ;;  %v11444_v55 = vld [vmem:[#allocation186_spill] sm:$0xff] }
 0x2e1   :  { %v3250_v33 = vadd.f32 %v11423_v58, %v11421_v51  ;;  %v11431_v8 = vsub.f32 %v11430_v32, %v11282_v31  ;;  %v11433_v16 = vsub.f32 %v11432_v24, %v11283_v3  ;;  %v11434_v50 = vld [vmem:[#allocation243_spill] sm:$0xff]  ;;  %v11438_v47 = vld [vmem:[#allocation249_spill] sm:$0xff]  ;;  %v11443_v31 = vsub.f32 %v11442_v22, %v11288_v14  ;;  %v11454_v24 = vld [vmem:[#allocation104_spill] sm:$0xff] }
 0x2e2   :  { %v3251_v11 = vadd.f32 %v11427_v0, %v11425_v12  ;;  %v11435_v23 = vsub.f32 %v11434_v50, %v11284_v21  ;;  %v11439_v13 = vsub.f32 %v11438_v47, %v11286_v7  ;;  %v11440_v51 = vld [vmem:[#allocation185_spill] sm:$0xff]  ;;  %v11445_v3 = vsub.f32 %v11444_v55, %v11289_v49  ;;  %v11446_v12 = vld [vmem:[#allocation251_spill] sm:$0xff]  ;;  %v11448_v0 = vld [vmem:[#allocation112_spill] sm:$0xff] }
 0x2e3   :  { %v3252_v43 = vadd.f32 %v11431_v8, %v11429_v26  ;;  %v11441_v57 = vsub.f32 %v11440_v51, %v11287_v4  ;;  %v11447_v21 = vsub.f32 %v11446_v12, %v11290_v56  ;;  %v11449_v9 = vld [vmem:[#allocation215_spill] sm:$0xff]  ;;  %v11451_v26 = vld [vmem:[#allocation254_spill] sm:$0xff]  ;;  %v11455_v4 = vld [vmem:[#allocation216_spill] sm:$0xff] }
 0x2e4   :  { %v3253_v36 = vadd.f32 %v11435_v23, %v11433_v16  ;;  %v3254_v59 = vadd.f32 %v11439_v13, %v11437_v45  ;;  %v11450_v18 = vsub.f32 %v11448_v0, %v11449_v9  ;;  %v11452_v7 = vld [vmem:[#allocation279_spill] sm:$0xff]  ;;  %v11456_v16 = vsub.f32 %v11454_v24, %v11455_v4  ;;  %v11458_v14 = vld [vmem:[#allocation280_spill] sm:$0xff]  ;;  %v11461_v49 = vld [vmem:[#allocation217_spill] sm:$0xff] }
 0x2e5   :  { %v3255_v58 = vadd.f32 %v11443_v31, %v11441_v57  ;;  %v3256_v63 = vadd.f32 %v11447_v21, %v11445_v3  ;;  %v11453_v32 = vsub.f32 %v11451_v26, %v11452_v7  ;;  %v11457_v50 = vld [vmem:[#allocation255_spill] sm:$0xff]  ;;  %v11463_v13 = vld [vmem:[#allocation257_spill] sm:$0xff]  ;;  %v11466_v22 = vld [vmem:[#allocation192_spill] sm:$0xff] }
 0x2e6   :  { %v11459_v23 = vsub.f32 %v11457_v50, %v11458_v14  ;;  %v11460_v45 = vld [vmem:[#allocation191_spill] sm:$0xff]  ;;  %v11464_v56 = vld [vmem:[#allocation281_spill] sm:$0xff]  ;;  %v11467_v31 = vld [vmem:[#allocation218_spill] sm:$0xff] }
 0x2e7   :  { %v3257_v8 = vadd.f32 %v11453_v32, %v11450_v18  ;;  %v11462_v47 = vsub.f32 %v11460_v45, %v11461_v49  ;;  %v11465_v51 = vsub.f32 %v11463_v13, %v11464_v56  ;;  %v11468_v55 = vsub.f32 %v11466_v22, %v11467_v31  ;;  %v11469_v3 = vld [vmem:[#allocation228_spill] sm:$0xff]  ;;  %v11470_v12 = vld [vmem:[#allocation282_spill] sm:$0xff]  ;;  %v11472_v9 = vld [vmem:[#allocation193_spill] sm:$0xff] }
 0x2e8   :  { %v3258_v29 = vadd.f32 %v11459_v23, %v11456_v16  ;;  %v11471_v21 = vsub.f32 %v11469_v3, %v11470_v12  ;;  %v11473_v18 = vld [vmem:[#allocation219_spill] sm:$0xff]  ;;  %v11475_v7 = vld [vmem:[#allocation258_spill] sm:$0xff]  ;;  %v11478_v16 = vld [vmem:[#allocation196_spill] sm:$0xff]  ;;  %v3268_v12 = vadd.f32 0.0009, %v3236_v48 }
 0x2e9   :  { %v3259_v57 = vadd.f32 %v11465_v51, %v11462_v47  ;;  %v11474_v26 = vsub.f32 %v11472_v9, %v11473_v18  ;;  %v11476_v32 = vld [vmem:[#allocation283_spill] sm:$0xff]  ;;  %v11479_v50 = vld [vmem:[#allocation220_spill] sm:$0xff]  ;;  %v11484_v13 = vld [vmem:[#allocation197_spill] sm:$0xff] }
 0x2ea   :  { %v3260_v0 = vadd.f32 %v11471_v21, %v11468_v55  ;;  %v11477_v24 = vsub.f32 %v11475_v7, %v11476_v32  ;;  %v11480_v14 = vsub.f32 %v11478_v16, %v11479_v50  ;;  %v11481_v23 = vld [vmem:[#allocation259_spill] sm:$0xff]  ;;  %v11482_v45 = vld [vmem:[#allocation284_spill] sm:$0xff]  ;;  %v11485_v56 = vld [vmem:[#allocation221_spill] sm:$0xff] }
 0x2eb   :  { %v11483_v49 = vsub.f32 %v11481_v23, %v11482_v45  ;;  %v11486_v51 = vsub.f32 %v11484_v13, %v11485_v56  ;;  %v11487_v22 = vld [vmem:[#allocation261_spill] sm:$0xff]  ;;  %v11490_v21 = vld [vmem:[#allocation199_spill] sm:$0xff]  ;;  %v11491_v9 = vld [vmem:[#allocation222_spill] sm:$0xff]  ;;  %v3269_v13 = vadd.f32 0.0009, %v3237_v37 }
 0x2ec   :  { %v3261_v4 = vadd.f32 %v11477_v24, %v11474_v26  ;;  %v11488_v31 = vld [vmem:[#allocation285_spill] sm:$0xff]  ;;  %v11492_v18 = vsub.f32 %v11490_v21, %v11491_v9  ;;  %v11493_v7 = vld [vmem:[#allocation262_spill] sm:$0xff]  ;;  %v11496_v16 = vld [vmem:[#allocation200_spill] sm:$0xff]  ;;  %v3270_v56 = vadd.f32 0.0009, %v3238_v20 }
 0x2ed   :  { %v3262_v47 = vadd.f32 %v11483_v49, %v11480_v14  ;;  %v11489_v55 = vsub.f32 %v11487_v22, %v11488_v31  ;;  %v11494_v26 = vld [vmem:[#allocation286_spill] sm:$0xff]  ;;  %v11497_v50 = vld [vmem:[#allocation223_spill] sm:$0xff]  ;;  %v11503_v22 = vld [vmem:[#allocation224_spill] sm:$0xff]  ;;  %v3271_v9 = vadd.f32 0.0009, %v3239_v39 }
 0x2ee   :  { %v11495_v32 = vsub.f32 %v11493_v7, %v11494_v26  ;;  %v11498_v30 = vsub.f32 %v11496_v16, %v11497_v50  ;;  %v11499_v23 = vld [vmem:[#allocation263_spill] sm:$0xff]  ;;  %v11505_v48 = vld [vmem:[#allocation265_spill] sm:$0xff]  ;;  %v11506_v31 = vld [vmem:[#allocation288_spill] sm:$0xff]  ;;  %v3273_v7 = vadd.f32 0.0009, %v3241_v25 }
 0x2ef   :  { %v3263_v3 = vadd.f32 %v11489_v55, %v11486_v51  ;;  %v11500_v14 = vld [vmem:[#allocation287_spill] sm:$0xff]  ;;  %v11504_v51 = vsub.f32 %v11502_v35, %v11503_v22  ;;  %v11507_v55 = vsub.f32 %v11505_v48, %v11506_v31  ;;  %v11509_v26 = vld [vmem:[#allocation225_spill] sm:$0xff]  ;;  %v11511_v16 = vld [vmem:[#allocation266_spill] sm:$0xff]  ;;  %v3275_v37 = vadd.f32 0.0009, %v3243_v62 }
 0x2f0   :  { %v3264_v24 = vadd.f32 %v11495_v32, %v11492_v18  ;;  %v11501_v45 = vsub.f32 %v11499_v23, %v11500_v14  ;;  %v11508_v18 = vld [vmem:[#allocation203_spill] sm:$0xff]  ;;  %v11512_v50 = vld [vmem:[#allocation289_spill] sm:$0xff]  ;;  %v3276_v20 = vadd.f32 0.0009, %v3244_v15  ;;  %v3277_v14 = vadd.f32 0.0009, %v3245_v41 }
 0x2f1   :  { %v3266_v21 = vadd.f32 %v11507_v55, %v11504_v51  ;;  %v11510_v32 = vsub.f32 %v11508_v18, %v11509_v26  ;;  %v11513_v61 = vsub.f32 %v11511_v16, %v11512_v50  ;;  %v3279_v35 = vadd.f32 0.0009, %v3247_v46  ;;  %v11514_v22 = vld [vmem:[#allocation99_spill] sm:$0xff]  ;;  %v11515_v54 = vld [vmem:[#allocation116_spill] sm:$0xff]  ;;  %v11516_v26 = vld [vmem:[#allocation117_spill] sm:$0xff] }
 0x2f2   :  { %v3265_v49 = vadd.f32 %v11501_v45, %v11498_v30  ;;  %v3274_v30 = vadd.f32 0.0009, %v3242_v1  ;;  %v3278_v45 = vadd.f32 0.0009, %v3246_v5  ;;  %v3300_v27 = vmul.f32 %v3268_v12, %v11514_v22  ;;  %v11517_v15 = vld [vmem:[#allocation119_spill] sm:$0xff]  ;;  %v11528_v22 = vld [vmem:[#allocation137_spill] sm:$0xff] }
 0x2f3   :  { %v3267_v23 = vadd.f32 %v11513_v61, %v11510_v32  ;;  %v3280_v48 = vadd.f32 0.0009, %v3248_v52  ;;  %v3281_v51 = vadd.f32 0.0009, %v3249_v38  ;;  %v3282_v39 = vadd.f32 0.0009, %v3250_v33 }
 0x2f4   :  { %v8484_v25 = vmul.f32 %v3269_v13, %v11515_v54  ;;  %v3283_v31 = vadd.f32 0.0009, %v3251_v11  ;;  %v3284_v55 = vadd.f32 0.0009, %v3252_v43  ;;  %v3285_v18 = vadd.f32 0.0009, %v3253_v36 }
 0x2f5   :  { %v8487_v16 = vmul.f32 %v3270_v56, %v11516_v26  ;;  %v3286_v1 = vadd.f32 0.0009, %v3254_v59  ;;  %v3287_v61 = vadd.f32 0.0009, %v3255_v58  ;;  %v3288_v62 = vadd.f32 0.0009, %v3256_v63 }
 0x2f6   :  { %v8490_v41 = vmul.f32 %v3271_v9, %v11517_v15  ;;  %v3289_v5 = vadd.f32 0.0009, %v3257_v8  ;;  %v3290_v46 = vadd.f32 0.0009, %v3258_v29  ;;  %v11518_v52 = vld [vmem:[#allocation120_spill] sm:$0xff]  ;;  %3656 = vrcp.f32 %v3300_v27  ;;  %v11519_v11 = vld [vmem:[#allocation121_spill] sm:$0xff] }
 0x2f7   :  { %v8493_v38 = vmul.f32 %v3272_v28, %v11518_v52  ;;  %v3291_v33 = vadd.f32 0.0009, %v3259_v57  ;;  %v3292_v12 = vadd.f32 0.0009, %v3260_v0  ;;  %v8496_v43 = vmul.f32 %v3273_v7, %v11519_v11  ;;  %v11520_v58 = vld [vmem:[#allocation123_spill] sm:$0xff]  ;;  %v11521_v13 = vld [vmem:[#allocation124_spill] sm:$0xff] }
 0x2f8   :  { %3658 = vrcp.f32 %v8484_v25  ;;  %v3293_v36 = vadd.f32 0.0009, %v3261_v4  ;;  %v3294_v59 = vadd.f32 0.0009, %v3262_v47  ;;  %v8500_v63 = vmul.f32 %v3274_v30, %v11520_v58  ;;  %v11522_v56 = vld [vmem:[#allocation125_spill] sm:$0xff]  ;;  %v11523_v47 = vld [vmem:[#allocation127_spill] sm:$0xff] }
 0x2f9   :  { %3660 = vrcp.f32 %v8487_v16  ;;  %v3295_v8 = vadd.f32 0.0009, %v3263_v3  ;;  %v3296_v29 = vadd.f32 0.0009, %v3264_v24  ;;  %v8504_v28 = vmul.f32 %v3275_v37, %v11521_v13  ;;  %v11524_v24 = vld [vmem:[#allocation128_spill] sm:$0xff]  ;;  %v11526_v37 = vld [vmem:[#allocation130_spill] sm:$0xff] }
 0x2fa   :  { %3662 = vrcp.f32 %v8490_v41  ;;  %v3297_v57 = vadd.f32 0.0009, %v3265_v49  ;;  %v3298_v0 = vadd.f32 0.0009, %v3266_v21  ;;  %v8508_v9 = vmul.f32 %v3276_v20, %v11522_v56  ;;  %v11532_v26 = vld [vmem:[#allocation145_spill] sm:$0xff]  ;;  %v11534_v52 = vld [vmem:[#allocation147_spill] sm:$0xff] }
 0x2fb   :  { %3664 = vrcp.f32 %v8493_v38  ;;  %v3299_v4 = vadd.f32 0.0009, %v3267_v23  ;;  %v8512_v7 = vmul.f32 %v3277_v14, %v11523_v47  ;;  %v8515_v32 = vmul.f32 %v3278_v45, %v8264_v53  ;;  %v11525_v23 = vld [vmem:[#allocation129_spill] sm:$0xff] }
 0x2fc   :  { %3666 = vrcp.f32 %v8496_v43  ;;  %v8519_v3 = vmul.f32 %v3279_v35, %v8266_v60  ;;  %v8522_v49 = vmul.f32 %v3280_v48, %v11524_v24  ;;  %v8525_v21 = vmul.f32 %v3281_v51, %v8276_v42  ;;  %v11527_v14 = vld [vmem:[#allocation133_spill] sm:$0xff]  ;;  %v11529_v51 = vld [vmem:[#allocation142_spill] sm:$0xff] }
 0x2fd   :  { %3668 = vrcp.f32 %v8500_v63  ;;  %v8529_v50 = vmul.f32 %v3282_v39, %v8278_v34  ;;  %v8532_v30 = vmul.f32 %v3283_v31, %v11525_v23  ;;  %v8535_v53 = vmul.f32 %v3284_v55, %v8288_v40  ;;  %v11531_v55 = vld [vmem:[#allocation144_spill] sm:$0xff] }
 0x2fe   :  { %3670 = vrcp.f32 %v8504_v28  ;;  %v8539_v60 = vmul.f32 %v3285_v18, %v8290_v10  ;;  %v8542_v20 = vmul.f32 %v3286_v1, %v11526_v37  ;;  %v8545_v42 = vmul.f32 %v3287_v61, %v8300_v17 }
 0x2ff   :  { %3672 = vrcp.f32 %v8508_v9  ;;  %v8549_v34 = vmul.f32 %v3288_v62, %v8302_v19  ;;  %v8552_v45 = vmul.f32 %v3289_v5, %v11527_v14  ;;  %v8555_v40 = vmul.f32 %v3290_v46, %v8312_v44  ;;  %v11530_v44 = vld [vmem:[#allocation143_spill] sm:$0xff]  ;;  %v11533_v62 = vld [vmem:[#allocation146_spill] sm:$0xff] }
 0x300   :  { %3674 = vrcp.f32 %v8512_v7  ;;  %v3657_v10 = vpop.eup %3656  ;;  %v8559_v35 = vmul.f32 %v3291_v33, %v8314_v6  ;;  %v8562_v17 = vmul.f32 %v3292_v12, %v11528_v22  ;;  %v8565_v48 = vmul.f32 %v3293_v36, %v8324_v2 }
 0x301   :  { %3676 = vrcp.f32 %v8515_v32  ;;  %v8569_v39 = vmul.f32 %v3294_v59, %v11529_v51  ;;  %v8572_v54 = vmul.f32 %v3295_v8, %v11530_v44  ;;  %v3364_v31 = vmul.f32 %v3657_v10, %v3300_v27 }
 0x302   :  { %v3659_v19 = vpop.eup %3658  ;;  %3678 = vrcp.f32 %v8519_v3  ;;  %v8576_v18 = vmul.f32 %v3296_v29, %v11531_v55  ;;  %v8579_v1 = vmul.f32 %v3297_v57, %v11532_v26  ;;  %v8584_v15 = vmul.f32 %v3298_v0, %v11533_v62 }
 0x303   :  { %v3661_v6 = vpop.eup %3660  ;;  %3680 = vrcp.f32 %v8522_v49  ;;  %v3365_v2 = vmul.f32 %v3659_v19, %v8484_v25  ;;  %v3396_v27 = vsub.f32 2.0, %v3364_v31  ;;  %v8589_v33 = vmul.f32 %v3299_v4, %v11534_v52 }
 0x304   :  { %v3663_v61 = vpop.eup %3662  ;;  %3682 = vrcp.f32 %v8525_v21  ;;  %v3366_v5 = vmul.f32 %v3661_v6, %v8487_v16 }
 0x305   :  { %v3665_v46 = vpop.eup %3664  ;;  %3684 = vrcp.f32 %v8529_v50  ;;  %v3367_v12 = vmul.f32 %v3663_v61, %v8490_v41  ;;  %v3397_v11 = vsub.f32 2.0, %v3365_v2  ;;  %v8595_v58 = vmul.f32 %v3657_v10, %v3396_v27 }
 0x306   :  { %v3667_v36 = vpop.eup %3666  ;;  %3686 = vrcp.f32 %v8532_v30  ;;  %v3368_v25 = vmul.f32 %v3665_v46, %v8493_v38  ;;  %v3398_v59 = vsub.f32 2.0, %v3366_v5 }
 0x307   :  { %v3669_v8 = vpop.eup %3668  ;;  %3688 = vrcp.f32 %v8535_v53  ;;  %v3369_v16 = vmul.f32 %v3667_v36, %v8496_v43  ;;  %v3399_v29 = vsub.f32 2.0, %v3367_v12  ;;  %v8599_v13 = vmul.f32 %v3659_v19, %v3397_v11 }
 0x308   :  { %v3671_v57 = vpop.eup %3670  ;;  %3690 = vrcp.f32 %v8539_v60  ;;  %v3370_v41 = vmul.f32 %v3669_v8, %v8500_v63  ;;  %v3400_v0 = vsub.f32 2.0, %v3368_v25  ;;  %v8603_v56 = vmul.f32 %v3661_v6, %v3398_v59 }
 0x309   :  { %v3673_v38 = vpop.eup %3672  ;;  %3692 = vrcp.f32 %v8542_v20  ;;  %v3371_v4 = vmul.f32 %v3671_v57, %v8504_v28  ;;  %v3401_v47 = vsub.f32 2.0, %v3369_v16  ;;  %v8607_v24 = vmul.f32 %v3663_v61, %v3399_v29 }
 0x30a   :  { %v3675_v43 = vpop.eup %3674  ;;  %3694 = vrcp.f32 %v8545_v42  ;;  %v3372_v23 = vmul.f32 %v3673_v38, %v8508_v9  ;;  %v3402_v37 = vsub.f32 2.0, %v3370_v41  ;;  %v8611_v14 = vmul.f32 %v3665_v46, %v3400_v0 }
 0x30b   :  { %v3677_v63 = vpop.eup %3676  ;;  %3696 = vrcp.f32 %v8549_v34  ;;  %v3373_v10 = vmul.f32 %v3675_v43, %v8512_v7  ;;  %v3403_v22 = vsub.f32 2.0, %v3371_v4  ;;  %v8615_v19 = vmul.f32 %v3667_v36, %v3401_v47 }
 0x30c   :  { %v3679_v28 = vpop.eup %3678  ;;  %3698 = vrcp.f32 %v8552_v45  ;;  %v3374_v51 = vmul.f32 %v3677_v63, %v8515_v32  ;;  %v3404_v44 = vsub.f32 2.0, %v3372_v23  ;;  %v8619_v31 = vmul.f32 %v3669_v8, %v3402_v37 }
 0x30d   :  { %v3681_v9 = vpop.eup %3680  ;;  %3700 = vrcp.f32 %v8555_v40  ;;  %v3375_v6 = vmul.f32 %v3679_v28, %v8519_v3  ;;  %v3405_v55 = vsub.f32 2.0, %v3373_v10  ;;  %v8623_v26 = vmul.f32 %v3671_v57, %v3403_v22 }
 0x30e   :  { %v3683_v7 = vpop.eup %3682  ;;  %3702 = vrcp.f32 %v8559_v35  ;;  %v3376_v2 = vmul.f32 %v3681_v9, %v8522_v49  ;;  %v3406_v61 = vsub.f32 2.0, %v3374_v51  ;;  %v8627_v62 = vmul.f32 %v3673_v38, %v3404_v44 }
 0x30f   :  { %v3685_v32 = vpop.eup %3684  ;;  %3704 = vrcp.f32 %v8562_v17  ;;  %v3377_v5 = vmul.f32 %v3683_v7, %v8525_v21  ;;  %v3407_v27 = vsub.f32 2.0, %v3375_v6  ;;  %v8631_v46 = vmul.f32 %v3675_v43, %v3405_v55 }
 0x310   :  { %v3687_v3 = vpop.eup %3686  ;;  %3706 = vrcp.f32 %v8565_v48  ;;  %v3378_v52 = vmul.f32 %v3685_v32, %v8529_v50  ;;  %v3408_v12 = vsub.f32 2.0, %v3376_v2  ;;  %v8635_v11 = vmul.f32 %v3677_v63, %v3406_v61  ;;  %v11536_v61 = vld [vmem:[#allocation79_spill] sm:$0xff] }
 0x311   :  { %v3689_v49 = vpop.eup %3688  ;;  %3708 = vrcp.f32 %v8569_v39  ;;  %v3379_v36 = vmul.f32 %v3687_v3, %v8532_v30  ;;  %v3409_v25 = vsub.f32 2.0, %v3377_v5  ;;  %v8639_v59 = vmul.f32 %v3679_v28, %v3407_v27 }
 0x312   :  { %v3691_v21 = vpop.eup %3690  ;;  %3710 = vrcp.f32 %v8572_v54  ;;  %v3380_v8 = vmul.f32 %v3689_v49, %v8535_v53  ;;  %v3410_v16 = vsub.f32 2.0, %v3378_v52  ;;  %v8643_v29 = vmul.f32 %v3681_v9, %v3408_v12  ;;  %v11535_v9 = vld [vmem:[#allocation24_spill] sm:$0xff] }
 0x313   :  { %v3693_v50 = vpop.eup %3692  ;;  %3712 = vrcp.f32 %v8576_v18  ;;  %v3381_v57 = vmul.f32 %v3691_v21, %v8539_v60  ;;  %v3411_v41 = vsub.f32 2.0, %v3379_v36  ;;  %v8647_v0 = vmul.f32 %v3683_v7, %v3409_v25  ;;  %v11538_v36 = vld [vmem:[#allocation63_spill] sm:$0xff] }
 0x314   :  { %v3695_v30 = vpop.eup %3694  ;;  %3714 = vrcp.f32 %v8579_v1  ;;  %v3382_v38 = vmul.f32 %v3693_v50, %v8542_v20  ;;  %v3412_v4 = vsub.f32 2.0, %v3380_v8  ;;  %v8651_v47 = vmul.f32 %v3685_v32, %v3410_v16  ;;  %v11539_v16 = vld [vmem:[#allocation40_spill] sm:$0xff] }
 0x315   :  { %v3697_v53 = vpop.eup %3696  ;;  %3716 = vrcp.f32 %v8584_v15  ;;  %v3383_v43 = vmul.f32 %v3695_v30, %v8545_v42  ;;  %v3413_v23 = vsub.f32 2.0, %v3381_v57  ;;  %v8655_v37 = vmul.f32 %v3687_v3, %v3411_v41  ;;  %v11537_v3 = vld [vmem:[#allocation10_spill] sm:$0xff] }
 0x316   :  { %v3699_v60 = vpop.eup %3698  ;;  %3718 = vrcp.f32 %v8589_v33  ;;  %v3384_v63 = vmul.f32 %v3697_v53, %v8549_v34  ;;  %v3414_v10 = vsub.f32 2.0, %v3382_v38  ;;  %v8659_v22 = vmul.f32 %v3689_v49, %v3412_v4 }
 0x317   :  { %v3701_v20 = vpop.eup %3700  ;;  %v3385_v28 = vmul.f32 %v3699_v60, %v8552_v45  ;;  %v3415_v51 = vsub.f32 2.0, %v3383_v43  ;;  %v3445_v44 = vmul.f32 %v3691_v21, %v3413_v23  ;;  %v8664_v6 = vmul.f32 %v8595_v58, %v11535_v9  ;;  %v11541_v43 = vld [vmem:[#allocation25_spill] sm:$0xff]  ;;  %v11543_v9 = vld [vmem:[#allocation11_spill] sm:$0xff] }
 0x318   :  { %v3703_v42 = vpop.eup %3702  ;;  %v3386_v55 = vmul.f32 %v3701_v20, %v8555_v40  ;;  %v3416_v7 = vsub.f32 2.0, %v3384_v63  ;;  %v3446_v2 = vmul.f32 %v3693_v50, %v3414_v10  ;;  %v8669_v34 = vmul.f32 %v8599_v13, %v11536_v61  ;;  %v11542_v10 = vld [vmem:[#allocation80_spill] sm:$0xff] }
 0x319   :  { %v3705_v32 = vpop.eup %3704  ;;  %v3387_v5 = vmul.f32 %v3703_v42, %v8559_v35  ;;  %v3417_v27 = vsub.f32 2.0, %v3385_v28  ;;  %v3447_v45 = vmul.f32 %v3695_v30, %v3415_v51  ;;  %v8674_v52 = vmul.f32 %v8603_v56, %v11537_v3  ;;  %v11540_v30 = vld [vmem:[#allocation95_spill] sm:$0xff]  ;;  %v11544_v61 = vld [vmem:[#allocation64_spill] sm:$0xff] }
 0x31a   :  { %v3707_v58 = vpop.eup %3706  ;;  %v3388_v12 = vmul.f32 %v3705_v32, %v8562_v17  ;;  %v3418_v49 = vsub.f32 2.0, %v3386_v55  ;;  %v3448_v40 = vmul.f32 %v3697_v53, %v3416_v7  ;;  %v8679_v25 = vmul.f32 %v8607_v24, %v11538_v36 }
 0x31b   :  { %v3709_v13 = vpop.eup %3708  ;;  %v3389_v21 = vmul.f32 %v3707_v58, %v8565_v48  ;;  %v3419_v8 = vsub.f32 2.0, %v3387_v5  ;;  %v3449_v35 = vmul.f32 %v3699_v60, %v3417_v27  ;;  %v8684_v50 = vmul.f32 %v8611_v14, %v11539_v16 }
 0x31c   :  { %v3711_v56 = vpop.eup %3710  ;;  %v3390_v57 = vmul.f32 %v3709_v13, %v8569_v39  ;;  %v3420_v41 = vsub.f32 2.0, %v3388_v12  ;;  %v3450_v17 = vmul.f32 %v3701_v20, %v3418_v49  ;;  %v8689_v38 = vmul.f32 %v8615_v19, %v11540_v30  ;;  %v11546_v12 = vld [vmem:[#allocation96_spill] sm:$0xff] }
 0x31d   :  { %v3713_v24 = vpop.eup %3712  ;;  %v3391_v4 = vmul.f32 %v3711_v56, %v8572_v54  ;;  %v3421_v53 = vsub.f32 2.0, %v3389_v21  ;;  %v3451_v48 = vmul.f32 %v3703_v42, %v3419_v8  ;;  %v8694_v23 = vmul.f32 %v8619_v31, %v11541_v43  ;;  %v11548_v21 = vld [vmem:[#allocation81_spill] sm:$0xff] }
 0x31e   :  { %v3715_v14 = vpop.eup %3714  ;;  %v3392_v60 = vmul.f32 %v3713_v24, %v8576_v18  ;;  %v3422_v63 = vsub.f32 2.0, %v3390_v57  ;;  %v3452_v39 = vmul.f32 %v3705_v32, %v3420_v41  ;;  %v8699_v20 = vmul.f32 %v8623_v26, %v11542_v10  ;;  %v11549_v8 = vld [vmem:[#allocation13_spill] sm:$0xff] }
 0x31f   :  { %v3717_v19 = vpop.eup %3716  ;;  %v3393_v28 = vmul.f32 %v3715_v14, %v8579_v1  ;;  %v3423_v51 = vsub.f32 2.0, %v3391_v4  ;;  %v3453_v54 = vmul.f32 %v3707_v58, %v3421_v53  ;;  %v8704_v42 = vmul.f32 %v8627_v62, %v11543_v9  ;;  %v11545_v1 = vld [vmem:[#allocation41_spill] sm:$0xff]  ;;  %v11553_v4 = vld [vmem:[#allocation138_spill] sm:$0xff]  ;;  %v11554_v53 = vld [vmem:[#allocation100_spill] sm:$0xff] }
 0x320   :  { %v3719_v31 = vpop.eup %3718  ;;  %v3394_v55 = vmul.f32 %v3717_v19, %v8584_v15  ;;  %v3424_v7 = vsub.f32 2.0, %v3392_v60  ;;  %v3454_v18 = vmul.f32 %v3709_v13, %v3422_v63  ;;  %v8709_v32 = vmul.f32 %v8631_v46, %v11544_v61  ;;  %v11547_v15 = vld [vmem:[#allocation26_spill] sm:$0xff]  ;;  %v11557_v63 = vld [vmem:[#allocation103_spill] sm:$0xff] }
 0x321   :  { %v3395_v26 = vmul.f32 %v3719_v31, %v8589_v33  ;;  %v3425_v5 = vsub.f32 2.0, %v3393_v28  ;;  %v3455_v27 = vmul.f32 %v3711_v56, %v3423_v51  ;;  %v8714_v3 = vmul.f32 %v8635_v11, %v11545_v1  ;;  %v11550_v56 = vld [vmem:[#allocation132_spill] sm:$0xff]  ;;  %v11556_v60 = vld [vmem:[#allocation102_spill] sm:$0xff] }
 0x322   :  { %v3426_v58 = vsub.f32 2.0, %v3394_v55  ;;  %v3456_v62 = vmul.f32 %v3713_v24, %v3424_v7  ;;  %v8718_v49 = vmul.f32 %v8639_v59, %v11546_v12  ;;  %v8722_v36 = vmul.f32 %v8643_v29, %v11547_v15  ;;  %v11551_v59 = vld [vmem:[#allocation134_spill] sm:$0xff]  ;;  %v11552_v29 = vld [vmem:[#allocation135_spill] sm:$0xff] }
 0x323   :  { %v3427_v46 = vsub.f32 2.0, %v3395_v26  ;;  %v3457_v13 = vmul.f32 %v3715_v14, %v3425_v5  ;;  %v8726_v33 = vmul.f32 %v8647_v0, %v11548_v21  ;;  %v8730_v11 = vmul.f32 %v8651_v47, %v11549_v8  ;;  %v11555_v47 = vld [vmem:[#allocation101_spill] sm:$0xff] }
 0x324   :  { %v3458_v16 = vmul.f32 %v3717_v19, %v3426_v58  ;;  %v8734_v57 = vmul.f32 %v8655_v37, %v11550_v56  ;;  %v8738_v41 = vmul.f32 %v8659_v22, %v11551_v59  ;;  %v8741_v30 = vmul.f32 %v3445_v44, %v11552_v29  ;;  %v11558_v22 = vld [vmem:[#allocation105_spill] sm:$0xff]  ;;  %v11559_v44 = vld [vmem:[#allocation106_spill] sm:$0xff] }
 0x325   :  { %v3459_v24 = vmul.f32 %v3719_v31, %v3427_v46  ;;  %v8744_v0 = vmul.f32 %v3446_v2, %v11553_v4  ;;  %v8747_v43 = vmul.f32 %v3447_v45, %v11554_v53  ;;  %v8750_v14 = vmul.f32 %v3448_v40, %v11555_v47  ;;  %v11560_v2 = vld [vmem:[#allocation107_spill] sm:$0xff]  ;;  %v11561_v45 = vld [vmem:[#allocation109_spill] sm:$0xff]  ;;  %v11562_v40 = vld [vmem:[#allocation110_spill] sm:$0xff] }
 0x326   :  { %v8753_v37 = vmul.f32 %v3449_v35, %v11556_v60  ;;  %v8756_v10 = vmul.f32 %v3450_v17, %v11557_v63  ;;  %v8759_v19 = vmul.f32 %v3451_v48, %v11558_v22  ;;  %v8762_v28 = vmul.f32 %v3452_v39, %v11559_v44  ;;  %v11563_v35 = vld [vmem:[#allocation111_spill] sm:$0xff]  ;;  %v11564_v17 = vld [vmem:[#allocation113_spill] sm:$0xff]  ;;  %v11565_v48 = vld [vmem:[#allocation114_spill] sm:$0xff] }
 0x327   :  { %v8765_v51 = vmul.f32 %v3453_v54, %v11560_v2  ;;  %v8768_v9 = vmul.f32 %v3454_v18, %v11561_v45  ;;  %v8771_v31 = vmul.f32 %v3455_v27, %v11562_v40  ;;  %v8774_v55 = vmul.f32 %v3456_v62, %v11563_v35  ;;  %v11566_v39 = vld [vmem:[#allocation115_spill] sm:$0xff] }
 0x328   :  { %v8777_v7 = vmul.f32 %v3457_v13, %v11564_v17  ;;  %v8780_v61 = vmul.f32 %v3458_v16, %v11565_v48  ;;  %v8783_v26 = vmul.f32 %v3459_v24, %v11566_v39  ;;  %v3492_v54 = vsub.f32 1.0, %v8664_v6 }
 0x329   :  { %v3493_v18 = vsub.f32 1.0, %v8669_v34  ;;  %v3494_v5 = vsub.f32 1.0, %v8674_v52  ;;  %v3495_v27 = vsub.f32 1.0, %v8679_v25  ;;  %v3496_v1 = vsub.f32 1.0, %v8684_v50 }
 0x32a   :  { %v3497_v58 = vsub.f32 1.0, %v8689_v38  ;;  %v3498_v62 = vsub.f32 1.0, %v8694_v23  ;;  %v3499_v12 = vsub.f32 1.0, %v8699_v20  ;;  %v3500_v15 = vsub.f32 1.0, %v8704_v42 }
 0x32b   :  { %v3501_v46 = vsub.f32 1.0, %v8709_v32  ;;  %v3502_v6 = vsub.f32 1.0, %v8714_v3  ;;  %v3503_v34 = vsub.f32 1.0, %v8718_v49  ;;  %v3504_v52 = vsub.f32 1.0, %v8722_v36 }
 0x32c   :  { %v3505_v25 = vsub.f32 1.0, %v8726_v33  ;;  %v3506_v50 = vsub.f32 1.0, %v8730_v11  ;;  %v3507_v38 = vsub.f32 1.0, %v8734_v57  ;;  %v3508_v23 = vsub.f32 1.0, %v8738_v41 }
 0x32d   :  { %v3509_v20 = vsub.f32 1.0, %v8741_v30  ;;  %v3510_v42 = vsub.f32 1.0, %v8744_v0  ;;  %v3511_v32 = vsub.f32 1.0, %v8747_v43  ;;  %v3512_v3 = vsub.f32 1.0, %v8750_v14 }
 0x32e   :  { %v3513_v49 = vsub.f32 1.0, %v8753_v37  ;;  %v3514_v36 = vsub.f32 1.0, %v8756_v10  ;;  %v3515_v13 = vsub.f32 1.0, %v8759_v19  ;;  %v3516_v21 = vsub.f32 1.0, %v8762_v28 }
 0x32f   :  { %v3517_v33 = vsub.f32 1.0, %v8765_v51  ;;  %v3518_v8 = vsub.f32 1.0, %v8768_v9  ;;  %v3519_v11 = vsub.f32 1.0, %v8771_v31  ;;  %v3520_v16 = vsub.f32 1.0, %v8774_v55 }
 0x330   :  { %v3521_v56 = vsub.f32 1.0, %v8777_v7  ;;  %v3522_v57 = vsub.f32 1.0, %v8780_v61  ;;  %v3523_v59 = vsub.f32 1.0, %v8783_v26  ;;  %v8817_v41 = vmul.f32 0.5, %v3492_v54 }
 0x331   :  { %v8819_v29 = vmul.f32 0.5, %v3493_v18  ;;  %v8821_v30 = vmul.f32 0.5, %v3494_v5  ;;  %v8823_v24 = vmul.f32 0.5, %v3495_v27  ;;  %v8825_v4 = vmul.f32 0.5, %v3496_v1 }
 0x332   :  { %v8827_v0 = vmul.f32 0.5, %v3497_v58  ;;  %v8829_v53 = vmul.f32 0.5, %v3498_v62  ;;  %v8831_v43 = vmul.f32 0.5, %v3499_v12  ;;  %v8833_v47 = vmul.f32 0.5, %v3500_v15 }
 0x333   :  { %v8835_v14 = vmul.f32 0.5, %v3501_v46  ;;  %v8837_v60 = vmul.f32 0.5, %v3502_v6  ;;  %v8839_v37 = vmul.f32 0.5, %v3503_v34  ;;  %v8841_v63 = vmul.f32 0.5, %v3504_v52 }
 0x334   :  { %v8843_v10 = vmul.f32 0.5, %v3505_v25  ;;  %v8845_v22 = vmul.f32 0.5, %v3506_v50  ;;  %v8847_v19 = vmul.f32 0.5, %v3507_v38  ;;  %v8849_v44 = vmul.f32 0.5, %v3508_v23 }
 0x335   :  { %v8851_v28 = vmul.f32 0.5, %v3509_v20  ;;  %v8853_v2 = vmul.f32 0.5, %v3510_v42  ;;  %v8855_v51 = vmul.f32 0.5, %v3511_v32  ;;  %v8857_v45 = vmul.f32 0.5, %v3512_v3 }
 0x336   :  { %v8859_v9 = vmul.f32 0.5, %v3513_v49  ;;  %v8861_v40 = vmul.f32 0.5, %v3514_v36  ;;  %v8863_v31 = vmul.f32 0.5, %v3515_v13  ;;  %v8865_v35 = vmul.f32 0.5, %v3516_v21 }
 0x337   :  { %v8867_v55 = vmul.f32 0.5, %v3517_v33  ;;  %v8869_v17 = vmul.f32 0.5, %v3518_v8  ;;  %v8871_v7 = vmul.f32 0.5, %v3519_v11  ;;  %v8873_v48 = vmul.f32 0.5, %v3520_v16 }
 0x338   :  { %v8875_v61 = vmul.f32 0.5, %v3521_v56  ;;  %v8877_v39 = vmul.f32 0.5, %v3522_v57  ;;  %v8879_v26 = vmul.f32 0.5, %v3523_v59  ;;  %v3556_v54 = vmax.f32 %v8817_v41, 0.0 }
 0x339   :  { %v3557_v18 = vmax.f32 %v8819_v29, 0.0  ;;  %v3558_v5 = vmax.f32 %v8821_v30, 0.0  ;;  %v3559_v27 = vmax.f32 %v8823_v24, 0.0  ;;  %v3560_v1 = vmax.f32 %v8825_v4, 0.0 }
 0x33a   :  { %v3561_v58 = vmax.f32 %v8827_v0, 0.0  ;;  %v3562_v62 = vmax.f32 %v8829_v53, 0.0  ;;  %v3563_v12 = vmax.f32 %v8831_v43, 0.0  ;;  %v3564_v15 = vmax.f32 %v8833_v47, 0.0 }
 0x33b   :  { %v3565_v46 = vmax.f32 %v8835_v14, 0.0  ;;  %v3566_v6 = vmax.f32 %v8837_v60, 0.0  ;;  %v3567_v34 = vmax.f32 %v8839_v37, 0.0  ;;  %v3568_v52 = vmax.f32 %v8841_v63, 0.0 }
 0x33c   :  { %v3569_v25 = vmax.f32 %v8843_v10, 0.0  ;;  %v3570_v50 = vmax.f32 %v8845_v22, 0.0  ;;  %v3571_v38 = vmax.f32 %v8847_v19, 0.0  ;;  %v3572_v23 = vmax.f32 %v8849_v44, 0.0 }
 0x33d   :  { %v3573_v20 = vmax.f32 %v8851_v28, 0.0  ;;  %v3574_v42 = vmax.f32 %v8853_v2, 0.0  ;;  %v3575_v32 = vmax.f32 %v8855_v51, 0.0  ;;  %v3576_v3 = vmax.f32 %v8857_v45, 0.0 }
 0x33e   :  { %v3577_v49 = vmax.f32 %v8859_v9, 0.0  ;;  %v3578_v36 = vmax.f32 %v8861_v40, 0.0  ;;  %v3579_v13 = vmax.f32 %v8863_v31, 0.0  ;;  %v3580_v21 = vmax.f32 %v8865_v35, 0.0 }
 0x33f   :  { %v3581_v33 = vmax.f32 %v8867_v55, 0.0  ;;  %v3582_v8 = vmax.f32 %v8869_v17, 0.0  ;;  %v3583_v11 = vmax.f32 %v8871_v7, 0.0  ;;  %v3584_v16 = vmax.f32 %v8873_v48, 0.0 }
 0x340   :  { %v3585_v56 = vmax.f32 %v8875_v61, 0.0  ;;  %v3586_v57 = vmax.f32 %v8877_v39, 0.0  ;;  %v3587_v59 = vmax.f32 %v8879_v26, 0.0  ;;  %v3588_v41 = vmin.f32 %v3556_v54, 1.0 }
 0x341   :  { %v3589_v29 = vmin.f32 %v3557_v18, 1.0  ;;  %v3590_v30 = vmin.f32 %v3558_v5, 1.0  ;;  %v3591_v24 = vmin.f32 %v3559_v27, 1.0  ;;  %v3592_v4 = vmin.f32 %v3560_v1, 1.0 }
 0x342   :  { %v3593_v0 = vmin.f32 %v3561_v58, 1.0  ;;  %v3594_v53 = vmin.f32 %v3562_v62, 1.0  ;;  %v3595_v43 = vmin.f32 %v3563_v12, 1.0  ;;  %v3596_v47 = vmin.f32 %v3564_v15, 1.0  ;;  %3620 = vst [vmem:[%s9011_s2] sm:$0xff] %v3588_v41 }
 0x343   :  { %v3597_v14 = vmin.f32 %v3565_v46, 1.0  ;;  %v3598_v60 = vmin.f32 %v3566_v6, 1.0  ;;  %v3599_v37 = vmin.f32 %v3567_v34, 1.0  ;;  %v3600_v63 = vmin.f32 %v3568_v52, 1.0  ;;  %3621 = vst [vmem:[%s9011_s2 + $0x8] sm:$0xff] %v3589_v29  ;;  %3622 = vst [vmem:[%s9011_s2 + $0x10] sm:$0xff] %v3590_v30 }
 0x344   :  { %3623 = vst [vmem:[%s9011_s2 + $0x18] sm:$0xff] %v3591_v24  ;;  %3624 = vst [vmem:[%s9011_s2 + $0x20] sm:$0xff] %v3592_v4  ;;  %v3601_v10 = vmin.f32 %v3569_v25, 1.0  ;;  %v3602_v22 = vmin.f32 %v3570_v50, 1.0  ;;  %v3603_v19 = vmin.f32 %v3571_v38, 1.0  ;;  %v3604_v44 = vmin.f32 %v3572_v23, 1.0 }
 0x345   :  { %3625 = vst [vmem:[%s9011_s2 + $0x28] sm:$0xff] %v3593_v0  ;;  %3626 = vst [vmem:[%s9011_s2 + $0x30] sm:$0xff] %v3594_v53  ;;  %v3605_v28 = vmin.f32 %v3573_v20, 1.0  ;;  %v3606_v2 = vmin.f32 %v3574_v42, 1.0  ;;  %v3607_v51 = vmin.f32 %v3575_v32, 1.0  ;;  %v3608_v45 = vmin.f32 %v3576_v3, 1.0 }
 0x346   :  { %3627 = vst [vmem:[%s9011_s2 + $0x38] sm:$0xff] %v3595_v43  ;;  %3628 = vst [vmem:[%s9011_s2 + $0x40] sm:$0xff] %v3596_v47  ;;  %v3609_v9 = vmin.f32 %v3577_v49, 1.0  ;;  %v3610_v40 = vmin.f32 %v3578_v36, 1.0  ;;  %v3611_v31 = vmin.f32 %v3579_v13, 1.0  ;;  %v3612_v35 = vmin.f32 %v3580_v21, 1.0 }
 0x347   :  { %3629 = vst [vmem:[%s9011_s2 + $0x48] sm:$0xff] %v3597_v14  ;;  %3630 = vst [vmem:[%s9011_s2 + $0x50] sm:$0xff] %v3598_v60  ;;  %v3613_v55 = vmin.f32 %v3581_v33, 1.0  ;;  %v3614_v17 = vmin.f32 %v3582_v8, 1.0  ;;  %v3615_v7 = vmin.f32 %v3583_v11, 1.0  ;;  %v3616_v48 = vmin.f32 %v3584_v16, 1.0 }
 0x348   :  { %3631 = vst [vmem:[%s9011_s2 + $0x58] sm:$0xff] %v3599_v37  ;;  %3632 = vst [vmem:[%s9011_s2 + $0x60] sm:$0xff] %v3600_v63  ;;  %v3617_v61 = vmin.f32 %v3585_v56, 1.0  ;;  %v3618_v39 = vmin.f32 %v3586_v57, 1.0  ;;  %v3619_v26 = vmin.f32 %v3587_v59, 1.0 }
 0x349   :  { %3633 = vst [vmem:[%s9011_s2 + $0x68] sm:$0xff] %v3601_v10  ;;  %3634 = vst [vmem:[%s9011_s2 + $0x70] sm:$0xff] %v3602_v22 }
 0x34a   :  { %3635 = vst [vmem:[%s9011_s2 + $0x78] sm:$0xff] %v3603_v19  ;;  %3636 = vst [vmem:[%s9011_s2 + $0x80] sm:$0xff] %v3604_v44 }
 0x34b   :  { %3637 = vst [vmem:[%s9011_s2 + $0x88] sm:$0xff] %v3605_v28  ;;  %3638 = vst [vmem:[%s9011_s2 + $0x90] sm:$0xff] %v3606_v2 }
 0x34c   :  { %3639 = vst [vmem:[%s9011_s2 + $0x98] sm:$0xff] %v3607_v51  ;;  %3640 = vst [vmem:[%s9011_s2 + $0xa0] sm:$0xff] %v3608_v45 }
 0x34d   :  { %3641 = vst [vmem:[%s9011_s2 + $0xa8] sm:$0xff] %v3609_v9  ;;  %3642 = vst [vmem:[%s9011_s2 + $0xb0] sm:$0xff] %v3610_v40 }
 0x34e   :  { %3643 = vst [vmem:[%s9011_s2 + $0xb8] sm:$0xff] %v3611_v31  ;;  %3644 = vst [vmem:[%s9011_s2 + $0xc0] sm:$0xff] %v3612_v35 }
 0x34f   :  { %3645 = vst [vmem:[%s9011_s2 + $0xc8] sm:$0xff] %v3613_v55  ;;  %3646 = vst [vmem:[%s9011_s2 + $0xd0] sm:$0xff] %v3614_v17 }
 0x350   :  { %3647 = vst [vmem:[%s9011_s2 + $0xd8] sm:$0xff] %v3615_v7  ;;  %3648 = vst [vmem:[%s9011_s2 + $0xe0] sm:$0xff] %v3616_v48 }
 0x351   :  { %3649 = vst [vmem:[%s9011_s2 + $0xe8] sm:$0xff] %v3617_v61  ;;  %3650 = vst [vmem:[%s9011_s2 + $0xf0] sm:$0xff] %v3618_v39 }
 0x352   :  { %3651 = vst [vmem:[%s9011_s2 + $0xf8] sm:$0xff] %v3619_v26 }

</bundles_post_ra>
